<compile_context>
chip_gen: v5e
topology: v5e:2x2
jax: 0.10.0
libtpu: 0.0.40
codegen_flags: <defaults>
</compile_context>

<pallas_src>
import math

import jax
import jax.numpy as jnp
from jax.experimental import pallas as pl
from jax.experimental.pallas import tpu as pltpu

# ---- small hyperparameters consistent with the module's structure ----
N_NODES = 64
IN_CHANNELS = 32
OUT_CHANNELS = 8
D_MODEL = 128
D_K = 16
D_V = 16
NUM_HEADS = 8          # d_k * num_heads == d_model
NUM_EDGES = 256
NUM_ENC_LAYERS = 7     # Encoder stacks 7 EncoderLayers
EDGE_CHUNK = 128       # edges processed per 128-lane chunk


# ------------------------- fused Pallas kernel -------------------------

def _gat_kernel(x_t_ref, oh_dst_ref, oh_src_t_ref, oh_dst_t_ref, w_emb_ref,
                wqkv_ref, wo_ref, bo_ref, wm_ref, bm_ref,
                ln1g_ref, ln1b_ref, ln2g_ref, ln2b_ref,
                w_out_ref, b_out_ref, o_ref, h_ref, msg_ref):
    f32 = jnp.float32
    l = pl.program_id(0)

    # ---- embed (no bias) only on the first grid step: h_t = W_emb @ x^T  [D, N] ----
    @pl.when(l == 0)
    def _():
        h_ref[...] = jnp.dot(w_emb_ref[...], x_t_ref[...], preferred_element_type=f32)

    h_t = h_ref[...]                                                     # [D, N]

    def layer_norm_t(x, g, b):
        # LayerNorm over the feature axis (leading axis in transposed layout).
        mu = jnp.mean(x, axis=0, keepdims=True)
        var = jnp.mean((x - mu) ** 2, axis=0, keepdims=True)
        return (x - mu) * jax.lax.rsqrt(var + 1e-5) * g + b

    # ---- fused Q/K/V projection, transposed: [3D, N]; 1/sqrt(d_k) folded into W_q ----
    qkv_t = jnp.dot(wqkv_ref[...], h_t, preferred_element_type=f32)
    q_t = qkv_t[0:D_MODEL, :]
    kv_t = qkv_t[D_MODEL:3 * D_MODEL, :]

    # ---- edge gathers as one-hot matmuls on the MXU; edges live on lanes ----
    qi_t = jnp.dot(q_t, oh_dst_t_ref[...], preferred_element_type=f32)    # [D, E]   Q_i
    kvj_t = jnp.dot(kv_t, oh_src_t_ref[...], preferred_element_type=f32)  # [2D, E]  K_j|V_j
    kj_t = kvj_t[0:D_MODEL, :]
    vj_t = kvj_t[D_MODEL:2 * D_MODEL, :]

    # ---- per-edge attention: heads contracted on the VPU, edge axis chunked ----
    # Score layout is [b(key feat), a(query feat), E_chunk]: softmax reductions and the
    # message contraction run over the LEADING axis (cross-vreg VALU, not XLU).
    for c in range(NUM_EDGES // EDGE_CHUNK):
        e0, e1 = c * EDGE_CHUNK, (c + 1) * EDGE_CHUNK
        qc = qi_t[:, e0:e1]                                               # [D, EC]
        kc = kj_t[:, e0:e1]
        vc = vj_t[:, e0:e1]
        alpha = None                                                      # [b, a, EC]
        for hh in range(NUM_HEADS):
            qh = qc[hh * D_K:(hh + 1) * D_K, :]                           # [a, EC]
            kh = kc[hh * D_K:(hh + 1) * D_K, :]                           # [b, EC]
            t = kh[:, None, :] * qh[None, :, :]
            alpha = t if alpha is None else alpha + t
        m = jnp.max(alpha, axis=0, keepdims=True)                         # softmax over b
        p = jnp.exp(alpha - m)
        inv = pl.reciprocal(jnp.sum(p, axis=0, keepdims=True), approx=True)
        p = p * inv
        for hh in range(NUM_HEADS):
            vh = vc[hh * D_V:(hh + 1) * D_V, :]                           # [b, EC]
            # row of msg = hh*d_v + a  (== combine_heads column order)
            msg_ref[hh * D_V:(hh + 1) * D_V, e0:e1] = jnp.sum(p * vh[:, None, :], axis=0)

    # ---- scatter-add over destination nodes (aggr='add') on the MXU ----
    agg_t = jnp.dot(msg_ref[...], oh_dst_ref[...], preferred_element_type=f32)  # [D, N]
    # F.dropout(p=0.6) is identity in eval mode.

    # ---- W_o + residual + LN, then mlp + residual + LN (all in [D, N] layout) ----
    h1_t = layer_norm_t(
        h_t + jnp.dot(wo_ref[...], agg_t, preferred_element_type=f32) + bo_ref[...],
        ln1g_ref[...], ln1b_ref[...])
    h2_t = layer_norm_t(
        h1_t + jnp.dot(wm_ref[...], h1_t, preferred_element_type=f32) + bm_ref[...],
        ln2g_ref[...], ln2b_ref[...])
    h_ref[...] = h2_t

    # ---- output head + log_softmax on the last grid step (single transpose) ----
    @pl.when(l == NUM_ENC_LAYERS - 1)
    def _():
        h_out = h2_t.T                                                    # [N, D]
        logits = jnp.dot(h_out, w_out_ref[...], preferred_element_type=f32) + b_out_ref[...]
        s = logits - jnp.max(logits, axis=-1, keepdims=True)
        o_ref[...] = s - jnp.log(jnp.sum(jnp.exp(s), axis=-1, keepdims=True))


def gat_forward(params, edge_index, x):
    src, dst = edge_index[0], edge_index[1]
    node_ids = jnp.arange(N_NODES, dtype=jnp.int32)
    # One-hot gather/scatter matrices built once in plain JAX (cheap preprocessing);
    # all gathers/scatters then run as MXU matmuls inside the fused kernel.
    oh_dst = (dst[:, None] == node_ids[None, :]).astype(jnp.float32)      # [E, N]  scatter by target
    oh_dst_t = (node_ids[:, None] == dst[None, :]).astype(jnp.float32)    # [N, E]  gather Q_i
    oh_src_t = (node_ids[:, None] == src[None, :]).astype(jnp.float32)    # [N, E]  gather K_j / V_j
    x_t = x.T                                                             # [in, N]

    args = (x_t, oh_dst, oh_src_t, oh_dst_t, params['embed'],
            params['wqkv'], params['wo'], params['bo'], params['wm'], params['bm'],
            params['ln1_g'], params['ln1_b'], params['ln2_g'], params['ln2_b'],
            params['lin_w'], params['lin_b'])

    # Indices of arguments that are shared across layers (constant block index).
    const_idx = {0, 1, 2, 3, 4, 14, 15}
    in_specs = []
    for i, a in enumerate(args):
        if i in const_idx:
            in_specs.append(pl.BlockSpec(a.shape, lambda l, _nd=a.ndim: (0,) * _nd))
        else:  # stacked per-layer parameter [L, ...]; squeeze the layer dim
            tail = a.shape[1:]
            in_specs.append(pl.BlockSpec((None,) + tail,
                                         lambda l, _nt=len(tail): (l,) + (0,) * _nt))

    return pl.pallas_call(
        _gat_kernel,
        out_shape=jax.ShapeDtypeStruct((N_NODES, OUT_CHANNELS), jnp.float32),
        grid=(NUM_ENC_LAYERS,),
        in_specs=in_specs,
        out_specs=pl.BlockSpec((N_NODES, OUT_CHANNELS), lambda l: (0, 0)),
        scratch_shapes=[
            pltpu.VMEM((D_MODEL, N_NODES), jnp.float32),    # hidden state h^T, carried across layers
            pltpu.VMEM((D_MODEL, NUM_EDGES), jnp.float32),  # per-edge message slab
        ],
        compiler_params=pltpu.CompilerParams(
            dimension_semantics=("arbitrary",),
            vmem_limit_bytes=32 * 1024 * 1024),
    )(*args)
    # TODO(synk): for batched graphs on v7x add a leading "parallel" batch grid axis so
    # both TensorCores are used; single-graph latency case keeps one TC.


# ------------------------- parameter init (deterministic) -------------------------

def _linear_params(key, din, dout, bias=True):
    kw, kb = jax.random.split(key)
    bound = 1.0 / math.sqrt(din)
    w = jax.random.uniform(kw, (din, dout), jnp.float32, -bound, bound)   # stored as W^T
    b = (jax.random.uniform(kb, (dout,), jnp.float32, -bound, bound)
         if bias else jnp.zeros((dout,), jnp.float32))
    return w, b


def init_params(key):
    pkeys = jax.random.split(key, NUM_ENC_LAYERS + 2)
    embed_w, _ = _linear_params(pkeys[0], IN_CHANNELS, D_MODEL, bias=False)     # [in, D]
    lin_w, lin_b = _linear_params(pkeys[1], D_MODEL, OUT_CHANNELS, bias=True)   # [D, out]

    scale = 1.0 / math.sqrt(D_K)
    wqkv, wo, bo, wm, bm = [], [], [], [], []
    for i in range(NUM_ENC_LAYERS):
        ks = jax.random.split(pkeys[2 + i], 5)
        wq, _ = _linear_params(ks[0], D_MODEL, D_K * NUM_HEADS, bias=False)
        wk, _ = _linear_params(ks[1], D_MODEL, D_K * NUM_HEADS, bias=False)
        wv, _ = _linear_params(ks[2], D_MODEL, D_V * NUM_HEADS, bias=False)
        wo_i, bo_i = _linear_params(ks[3], NUM_HEADS * D_V, D_MODEL, bias=True)
        wm_i, bm_i = _linear_params(ks[4], D_MODEL, D_MODEL, bias=True)
        # PyTorch-orientation ([out, in]) fused QKV slab; 1/sqrt(d_k) folded into W_q rows.
        wqkv.append(jnp.concatenate([wq.T * scale, wk.T, wv.T], axis=0))   # [3D, D]
        wo.append(wo_i.T); bo.append(bo_i)                                 # [D, D] ([out, in])
        wm.append(wm_i.T); bm.append(bm_i)

    L = NUM_ENC_LAYERS
    return dict(
        embed=embed_w.T,                                   # [D, in]  (PyTorch orientation)
        wqkv=jnp.stack(wqkv),                              # [L, 3D, D]
        wo=jnp.stack(wo),                                  # [L, D, D]
        bo=jnp.stack(bo).reshape(L, D_MODEL, 1),           # column biases for [D, N] layout
        wm=jnp.stack(wm),                                  # [L, D, D]
        bm=jnp.stack(bm).reshape(L, D_MODEL, 1),
        ln1_g=jnp.ones((L, D_MODEL, 1), jnp.float32),
        ln1_b=jnp.zeros((L, D_MODEL, 1), jnp.float32),
        ln2_g=jnp.ones((L, D_MODEL, 1), jnp.float32),
        ln2_b=jnp.zeros((L, D_MODEL, 1), jnp.float32),
        lin_w=lin_w,                                       # [D, out]
        lin_b=lin_b.reshape(1, OUT_CHANNELS),
    )


# ------------------------- main -------------------------

if __name__ == "__main__":
    key = jax.random.PRNGKey(0)
    kx, ke, kp = jax.random.split(key, 3)
    x = jax.random.normal(kx, (N_NODES, IN_CHANNELS), jnp.float32)
    edge_index = jax.random.randint(ke, (2, NUM_EDGES), 0, N_NODES, dtype=jnp.int32)
    params = init_params(kp)

    out = jax.jit(gat_forward)(params, edge_index, x)
    out = jax.block_until_ready(out)
    assert out.shape == (N_NODES, OUT_CHANNELS)
    assert bool(jnp.all(jnp.isfinite(out)))
    print("KERNEL_OK")
</pallas_src>

<mosaic_0001>
module attributes {stable_mosaic.version = 11 : i64} {
  func.func @_gat_kernel(%arg0: i32, %arg1: memref<32x64xf32, #tpu.memory_space<vmem>>, %arg2: memref<256x64xf32, #tpu.memory_space<vmem>>, %arg3: memref<64x256xf32, #tpu.memory_space<vmem>>, %arg4: memref<64x256xf32, #tpu.memory_space<vmem>>, %arg5: memref<128x32xf32, #tpu.memory_space<vmem>>, %arg6: memref<1x384x128xf32, #tpu.memory_space<vmem>>, %arg7: memref<1x128x128xf32, #tpu.memory_space<vmem>>, %arg8: memref<1x128x1xf32, #tpu.memory_space<vmem>>, %arg9: memref<1x128x128xf32, #tpu.memory_space<vmem>>, %arg10: memref<1x128x1xf32, #tpu.memory_space<vmem>>, %arg11: memref<1x128x1xf32, #tpu.memory_space<vmem>>, %arg12: memref<1x128x1xf32, #tpu.memory_space<vmem>>, %arg13: memref<1x128x1xf32, #tpu.memory_space<vmem>>, %arg14: memref<1x128x1xf32, #tpu.memory_space<vmem>>, %arg15: memref<128x8xf32, #tpu.memory_space<vmem>>, %arg16: memref<1x8xf32, #tpu.memory_space<vmem>>, %arg17: memref<64x8xf32, #tpu.memory_space<vmem>>, %arg18: memref<128x64xf32, #tpu.memory_space<vmem>>, %arg19: memref<128x256xf32, #tpu.memory_space<vmem>>) attributes {dimension_semantics = [#tpu.dimension_semantics<arbitrary>], iteration_bounds = array<i64: 7>, scalar_prefetch = 0 : i64, scratch_operands = 2 : i64, tpu.core_type = #tpu.core_type<tc>, window_params = [{pipeline_mode = #tpu.pipeline_mode<synchronous>, transform_indices = @transform_0, window_bounds = array<i64: 32, 64>}, {pipeline_mode = #tpu.pipeline_mode<synchronous>, transform_indices = @transform_1, window_bounds = array<i64: 256, 64>}, {pipeline_mode = #tpu.pipeline_mode<synchronous>, transform_indices = @transform_2, window_bounds = array<i64: 64, 256>}, {pipeline_mode = #tpu.pipeline_mode<synchronous>, transform_indices = @transform_3, window_bounds = array<i64: 64, 256>}, {pipeline_mode = #tpu.pipeline_mode<synchronous>, transform_indices = @transform_4, window_bounds = array<i64: 128, 32>}, {transform_indices = @transform_5, window_bounds = array<i64: 1, 384, 128>}, {transform_indices = @transform_6, window_bounds = array<i64: 1, 128, 128>}, {transform_indices = @transform_7, window_bounds = array<i64: 1, 128, 1>}, {transform_indices = @transform_8, window_bounds = array<i64: 1, 128, 128>}, {transform_indices = @transform_9, window_bounds = array<i64: 1, 128, 1>}, {transform_indices = @transform_10, window_bounds = array<i64: 1, 128, 1>}, {transform_indices = @transform_11, window_bounds = array<i64: 1, 128, 1>}, {transform_indices = @transform_12, window_bounds = array<i64: 1, 128, 1>}, {transform_indices = @transform_13, window_bounds = array<i64: 1, 128, 1>}, {pipeline_mode = #tpu.pipeline_mode<synchronous>, transform_indices = @transform_14, window_bounds = array<i64: 128, 8>}, {pipeline_mode = #tpu.pipeline_mode<synchronous>, transform_indices = @transform_15, window_bounds = array<i64: 1, 8>}, {pipeline_mode = #tpu.pipeline_mode<synchronous>, transform_indices = @transform_16, window_bounds = array<i64: 64, 8>}]} {
    %c0_i32 = arith.constant 0 : i32
    %0 = arith.cmpi eq, %arg0, %c0_i32 : i32
    %1 = arith.extui %0 : i1 to i32
    %c0_i32_0 = arith.constant 0 : i32
    %2 = arith.cmpi ne, %1, %c0_i32_0 : i32
    scf.if %2 {
      %c0_99 = arith.constant 0 : index
      %c0_100 = arith.constant 0 : index
      %338 = vector.load %arg5[%c0_99, %c0_100] : memref<128x32xf32, #tpu.memory_space<vmem>>, vector<128x32xf32>
      %c0_101 = arith.constant 0 : index
      %c0_102 = arith.constant 0 : index
      %339 = vector.load %arg1[%c0_101, %c0_102] : memref<32x64xf32, #tpu.memory_space<vmem>>, vector<32x64xf32>
      %cst_103 = arith.constant dense<0.000000e+00> : vector<128x64xf32>
      %340 = tpu.matmul %338, %339, %cst_103 {dimension_numbers = #tpu.dot_dimension_numbers<[1], [0], [0], [1], [0, 0, 1, 1], [], []>} : vector<128x32xf32>, vector<32x64xf32>, vector<128x64xf32> -> vector<128x64xf32>
      %c0_104 = arith.constant 0 : index
      %c0_105 = arith.constant 0 : index
      %341 = vector.load %arg18[%c0_104, %c0_105] : memref<128x64xf32, #tpu.memory_space<vmem>>, vector<128x64xf32>
      tpu.vector_store %arg18[%c0_104, %c0_105], %340 {strides = array<i32>} : memref<128x64xf32, #tpu.memory_space<vmem>>, vector<128x64xf32>,
    } else {
    }
    %c0 = arith.constant 0 : index
    %c0_1 = arith.constant 0 : index
    %3 = vector.load %arg18[%c0, %c0_1] : memref<128x64xf32, #tpu.memory_space<vmem>>, vector<128x64xf32>
    %c0_2 = arith.constant 0 : index
    %c0_3 = arith.constant 0 : index
    %c0_4 = arith.constant 0 : index
    %4 = vector.load %arg6[%c0_2, %c0_3, %c0_4] : memref<1x384x128xf32, #tpu.memory_space<vmem>>, vector<1x384x128xf32>
    %5 = vector.shape_cast %4 : vector<1x384x128xf32> to vector<384x128xf32>
    %cst = arith.constant dense<0.000000e+00> : vector<384x64xf32>
    %6 = tpu.matmul %5, %3, %cst {dimension_numbers = #tpu.dot_dimension_numbers<[1], [0], [0], [1], [0, 0, 1, 1], [], []>} : vector<384x128xf32>, vector<128x64xf32>, vector<384x64xf32> -> vector<384x64xf32>
    %7 = vector.extract_strided_slice %6 {offsets = [0, 0], sizes = [128, 64], strides = [1, 1]} : vector<384x64xf32> to vector<128x64xf32>
    %8 = vector.extract_strided_slice %6 {offsets = [128, 0], sizes = [256, 64], strides = [1, 1]} : vector<384x64xf32> to vector<256x64xf32>
    %c0_5 = arith.constant 0 : index
    %c0_6 = arith.constant 0 : index
    %9 = vector.load %arg4[%c0_5, %c0_6] : memref<64x256xf32, #tpu.memory_space<vmem>>, vector<64x256xf32>
    %cst_7 = arith.constant dense<0.000000e+00> : vector<128x256xf32>
    %10 = tpu.matmul %7, %9, %cst_7 {dimension_numbers = #tpu.dot_dimension_numbers<[1], [0], [0], [1], [0, 0, 1, 1], [], []>} : vector<128x64xf32>, vector<64x256xf32>, vector<128x256xf32> -> vector<128x256xf32>
    %c0_8 = arith.constant 0 : index
    %c0_9 = arith.constant 0 : index
    %11 = vector.load %arg3[%c0_8, %c0_9] : memref<64x256xf32, #tpu.memory_space<vmem>>, vector<64x256xf32>
    %cst_10 = arith.constant dense<0.000000e+00> : vector<256x256xf32>
    %12 = tpu.matmul %8, %11, %cst_10 {dimension_numbers = #tpu.dot_dimension_numbers<[1], [0], [0], [1], [0, 0, 1, 1], [], []>} : vector<256x64xf32>, vector<64x256xf32>, vector<256x256xf32> -> vector<256x256xf32>
    %13 = vector.extract_strided_slice %12 {offsets = [0, 0], sizes = [128, 256], strides = [1, 1]} : vector<256x256xf32> to vector<128x256xf32>
    %14 = vector.extract_strided_slice %12 {offsets = [128, 0], sizes = [128, 256], strides = [1, 1]} : vector<256x256xf32> to vector<128x256xf32>
    %15 = vector.extract_strided_slice %10 {offsets = [0, 0], sizes = [128, 128], strides = [1, 1]} : vector<128x256xf32> to vector<128x128xf32>
    %16 = vector.extract_strided_slice %13 {offsets = [0, 0], sizes = [128, 128], strides = [1, 1]} : vector<128x256xf32> to vector<128x128xf32>
    %17 = vector.extract_strided_slice %14 {offsets = [0, 0], sizes = [128, 128], strides = [1, 1]} : vector<128x256xf32> to vector<128x128xf32>
    %18 = vector.extract_strided_slice %15 {offsets = [0, 0], sizes = [16, 128], strides = [1, 1]} : vector<128x128xf32> to vector<16x128xf32>
    %19 = vector.extract_strided_slice %16 {offsets = [0, 0], sizes = [16, 128], strides = [1, 1]} : vector<128x128xf32> to vector<16x128xf32>
    %20 = vector.shape_cast %19 : vector<16x128xf32> to vector<16x1x128xf32>
    %21 = vector.shape_cast %18 : vector<16x128xf32> to vector<1x16x128xf32>
    %22 = vector.broadcast %20 : vector<16x1x128xf32> to vector<16x16x128xf32>
    %23 = vector.broadcast %21 : vector<1x16x128xf32> to vector<16x16x128xf32>
    %24 = arith.mulf %22, %23 : vector<16x16x128xf32>
    %25 = vector.extract_strided_slice %15 {offsets = [16, 0], sizes = [16, 128], strides = [1, 1]} : vector<128x128xf32> to vector<16x128xf32>
    %26 = vector.extract_strided_slice %16 {offsets = [16, 0], sizes = [16, 128], strides = [1, 1]} : vector<128x128xf32> to vector<16x128xf32>
    %27 = vector.shape_cast %26 : vector<16x128xf32> to vector<16x1x128xf32>
    %28 = vector.shape_cast %25 : vector<16x128xf32> to vector<1x16x128xf32>
    %29 = vector.broadcast %27 : vector<16x1x128xf32> to vector<16x16x128xf32>
    %30 = vector.broadcast %28 : vector<1x16x128xf32> to vector<16x16x128xf32>
    %31 = arith.mulf %29, %30 : vector<16x16x128xf32>
    %32 = arith.addf %24, %31 : vector<16x16x128xf32>
    %33 = vector.extract_strided_slice %15 {offsets = [32, 0], sizes = [16, 128], strides = [1, 1]} : vector<128x128xf32> to vector<16x128xf32>
    %34 = vector.extract_strided_slice %16 {offsets = [32, 0], sizes = [16, 128], strides = [1, 1]} : vector<128x128xf32> to vector<16x128xf32>
    %35 = vector.shape_cast %34 : vector<16x128xf32> to vector<16x1x128xf32>
    %36 = vector.shape_cast %33 : vector<16x128xf32> to vector<1x16x128xf32>
    %37 = vector.broadcast %35 : vector<16x1x128xf32> to vector<16x16x128xf32>
    %38 = vector.broadcast %36 : vector<1x16x128xf32> to vector<16x16x128xf32>
    %39 = arith.mulf %37, %38 : vector<16x16x128xf32>
    %40 = arith.addf %32, %39 : vector<16x16x128xf32>
    %41 = vector.extract_strided_slice %15 {offsets = [48, 0], sizes = [16, 128], strides = [1, 1]} : vector<128x128xf32> to vector<16x128xf32>
    %42 = vector.extract_strided_slice %16 {offsets = [48, 0], sizes = [16, 128], strides = [1, 1]} : vector<128x128xf32> to vector<16x128xf32>
    %43 = vector.shape_cast %42 : vector<16x128xf32> to vector<16x1x128xf32>
    %44 = vector.shape_cast %41 : vector<16x128xf32> to vector<1x16x128xf32>
    %45 = vector.broadcast %43 : vector<16x1x128xf32> to vector<16x16x128xf32>
    %46 = vector.broadcast %44 : vector<1x16x128xf32> to vector<16x16x128xf32>
    %47 = arith.mulf %45, %46 : vector<16x16x128xf32>
    %48 = arith.addf %40, %47 : vector<16x16x128xf32>
    %49 = vector.extract_strided_slice %15 {offsets = [64, 0], sizes = [16, 128], strides = [1, 1]} : vector<128x128xf32> to vector<16x128xf32>
    %50 = vector.extract_strided_slice %16 {offsets = [64, 0], sizes = [16, 128], strides = [1, 1]} : vector<128x128xf32> to vector<16x128xf32>
    %51 = vector.shape_cast %50 : vector<16x128xf32> to vector<16x1x128xf32>
    %52 = vector.shape_cast %49 : vector<16x128xf32> to vector<1x16x128xf32>
    %53 = vector.broadcast %51 : vector<16x1x128xf32> to vector<16x16x128xf32>
    %54 = vector.broadcast %52 : vector<1x16x128xf32> to vector<16x16x128xf32>
    %55 = arith.mulf %53, %54 : vector<16x16x128xf32>
    %56 = arith.addf %48, %55 : vector<16x16x128xf32>
    %57 = vector.extract_strided_slice %15 {offsets = [80, 0], sizes = [16, 128], strides = [1, 1]} : vector<128x128xf32> to vector<16x128xf32>
    %58 = vector.extract_strided_slice %16 {offsets = [80, 0], sizes = [16, 128], strides = [1, 1]} : vector<128x128xf32> to vector<16x128xf32>
    %59 = vector.shape_cast %58 : vector<16x128xf32> to vector<16x1x128xf32>
    %60 = vector.shape_cast %57 : vector<16x128xf32> to vector<1x16x128xf32>
    %61 = vector.broadcast %59 : vector<16x1x128xf32> to vector<16x16x128xf32>
    %62 = vector.broadcast %60 : vector<1x16x128xf32> to vector<16x16x128xf32>
    %63 = arith.mulf %61, %62 : vector<16x16x128xf32>
    %64 = arith.addf %56, %63 : vector<16x16x128xf32>
    %65 = vector.extract_strided_slice %15 {offsets = [96, 0], sizes = [16, 128], strides = [1, 1]} : vector<128x128xf32> to vector<16x128xf32>
    %66 = vector.extract_strided_slice %16 {offsets = [96, 0], sizes = [16, 128], strides = [1, 1]} : vector<128x128xf32> to vector<16x128xf32>
    %67 = vector.shape_cast %66 : vector<16x128xf32> to vector<16x1x128xf32>
    %68 = vector.shape_cast %65 : vector<16x128xf32> to vector<1x16x128xf32>
    %69 = vector.broadcast %67 : vector<16x1x128xf32> to vector<16x16x128xf32>
    %70 = vector.broadcast %68 : vector<1x16x128xf32> to vector<16x16x128xf32>
    %71 = arith.mulf %69, %70 : vector<16x16x128xf32>
    %72 = arith.addf %64, %71 : vector<16x16x128xf32>
    %73 = vector.extract_strided_slice %15 {offsets = [112, 0], sizes = [16, 128], strides = [1, 1]} : vector<128x128xf32> to vector<16x128xf32>
    %74 = vector.extract_strided_slice %16 {offsets = [112, 0], sizes = [16, 128], strides = [1, 1]} : vector<128x128xf32> to vector<16x128xf32>
    %75 = vector.shape_cast %74 : vector<16x128xf32> to vector<16x1x128xf32>
    %76 = vector.shape_cast %73 : vector<16x128xf32> to vector<1x16x128xf32>
    %77 = vector.broadcast %75 : vector<16x1x128xf32> to vector<16x16x128xf32>
    %78 = vector.broadcast %76 : vector<1x16x128xf32> to vector<16x16x128xf32>
    %79 = arith.mulf %77, %78 : vector<16x16x128xf32>
    %80 = arith.addf %72, %79 : vector<16x16x128xf32>
    %cst_11 = arith.constant dense<0xFF800000> : vector<16x128xf32>
    %81 = vector.multi_reduction <maximumf>, %80, %cst_11 [0] : vector<16x16x128xf32> to vector<16x128xf32>
    %82 = vector.shape_cast %81 : vector<16x128xf32> to vector<1x16x128xf32>
    %83 = vector.broadcast %82 : vector<1x16x128xf32> to vector<16x16x128xf32>
    %84 = arith.subf %80, %83 : vector<16x16x128xf32>
    %85 = math.exp %84 : vector<16x16x128xf32>
    %cst_12 = arith.constant dense<0.000000e+00> : vector<16x128xf32>
    %86 = vector.multi_reduction <add>, %85, %cst_12 [0] : vector<16x16x128xf32> to vector<16x128xf32>
    %87 = vector.shape_cast %86 : vector<16x128xf32> to vector<1x16x128xf32>
    %88 = tpu.reciprocal %87 {approx = true} : vector<1x16x128xf32> -> vector<1x16x128xf32>
    %89 = vector.broadcast %88 : vector<1x16x128xf32> to vector<16x16x128xf32>
    %90 = arith.mulf %85, %89 : vector<16x16x128xf32>
    %91 = vector.extract_strided_slice %17 {offsets = [0, 0], sizes = [16, 128], strides = [1, 1]} : vector<128x128xf32> to vector<16x128xf32>
    %92 = vector.shape_cast %91 : vector<16x128xf32> to vector<16x1x128xf32>
    %93 = vector.broadcast %92 : vector<16x1x128xf32> to vector<16x16x128xf32>
    %94 = arith.mulf %90, %93 : vector<16x16x128xf32>
    %cst_13 = arith.constant dense<0.000000e+00> : vector<16x128xf32>
    %95 = vector.multi_reduction <add>, %94, %cst_13 [0] : vector<16x16x128xf32> to vector<16x128xf32>
    %c0_14 = arith.constant 0 : index
    %c0_15 = arith.constant 0 : index
    %96 = vector.load %arg19[%c0_14, %c0_15] : memref<128x256xf32, #tpu.memory_space<vmem>>, vector<16x128xf32>
    tpu.vector_store %arg19[%c0_14, %c0_15], %95 {strides = array<i32>} : memref<128x256xf32, #tpu.memory_space<vmem>>, vector<16x128xf32>,
    %97 = vector.extract_strided_slice %17 {offsets = [16, 0], sizes = [16, 128], strides = [1, 1]} : vector<128x128xf32> to vector<16x128xf32>
    %98 = vector.shape_cast %97 : vector<16x128xf32> to vector<16x1x128xf32>
    %99 = vector.broadcast %98 : vector<16x1x128xf32> to vector<16x16x128xf32>
    %100 = arith.mulf %90, %99 : vector<16x16x128xf32>
    %cst_16 = arith.constant dense<0.000000e+00> : vector<16x128xf32>
    %101 = vector.multi_reduction <add>, %100, %cst_16 [0] : vector<16x16x128xf32> to vector<16x128xf32>
    %c16 = arith.constant 16 : index
    %c0_17 = arith.constant 0 : index
    %102 = vector.load %arg19[%c16, %c0_17] : memref<128x256xf32, #tpu.memory_space<vmem>>, vector<16x128xf32>
    tpu.vector_store %arg19[%c16, %c0_17], %101 {strides = array<i32>} : memref<128x256xf32, #tpu.memory_space<vmem>>, vector<16x128xf32>,
    %103 = vector.extract_strided_slice %17 {offsets = [32, 0], sizes = [16, 128], strides = [1, 1]} : vector<128x128xf32> to vector<16x128xf32>
    %104 = vector.shape_cast %103 : vector<16x128xf32> to vector<16x1x128xf32>
    %105 = vector.broadcast %104 : vector<16x1x128xf32> to vector<16x16x128xf32>
    %106 = arith.mulf %90, %105 : vector<16x16x128xf32>
    %cst_18 = arith.constant dense<0.000000e+00> : vector<16x128xf32>
    %107 = vector.multi_reduction <add>, %106, %cst_18 [0] : vector<16x16x128xf32> to vector<16x128xf32>
    %c32 = arith.constant 32 : index
    %c0_19 = arith.constant 0 : index
    %108 = vector.load %arg19[%c32, %c0_19] : memref<128x256xf32, #tpu.memory_space<vmem>>, vector<16x128xf32>
    tpu.vector_store %arg19[%c32, %c0_19], %107 {strides = array<i32>} : memref<128x256xf32, #tpu.memory_space<vmem>>, vector<16x128xf32>,
    %109 = vector.extract_strided_slice %17 {offsets = [48, 0], sizes = [16, 128], strides = [1, 1]} : vector<128x128xf32> to vector<16x128xf32>
    %110 = vector.shape_cast %109 : vector<16x128xf32> to vector<16x1x128xf32>
    %111 = vector.broadcast %110 : vector<16x1x128xf32> to vector<16x16x128xf32>
    %112 = arith.mulf %90, %111 : vector<16x16x128xf32>
    %cst_20 = arith.constant dense<0.000000e+00> : vector<16x128xf32>
    %113 = vector.multi_reduction <add>, %112, %cst_20 [0] : vector<16x16x128xf32> to vector<16x128xf32>
    %c48 = arith.constant 48 : index
    %c0_21 = arith.constant 0 : index
    %114 = vector.load %arg19[%c48, %c0_21] : memref<128x256xf32, #tpu.memory_space<vmem>>, vector<16x128xf32>
    tpu.vector_store %arg19[%c48, %c0_21], %113 {strides = array<i32>} : memref<128x256xf32, #tpu.memory_space<vmem>>, vector<16x128xf32>,
    %115 = vector.extract_strided_slice %17 {offsets = [64, 0], sizes = [16, 128], strides = [1, 1]} : vector<128x128xf32> to vector<16x128xf32>
    %116 = vector.shape_cast %115 : vector<16x128xf32> to vector<16x1x128xf32>
    %117 = vector.broadcast %116 : vector<16x1x128xf32> to vector<16x16x128xf32>
    %118 = arith.mulf %90, %117 : vector<16x16x128xf32>
    %cst_22 = arith.constant dense<0.000000e+00> : vector<16x128xf32>
    %119 = vector.multi_reduction <add>, %118, %cst_22 [0] : vector<16x16x128xf32> to vector<16x128xf32>
    %c64 = arith.constant 64 : index
    %c0_23 = arith.constant 0 : index
    %120 = vector.load %arg19[%c64, %c0_23] : memref<128x256xf32, #tpu.memory_space<vmem>>, vector<16x128xf32>
    tpu.vector_store %arg19[%c64, %c0_23], %119 {strides = array<i32>} : memref<128x256xf32, #tpu.memory_space<vmem>>, vector<16x128xf32>,
    %121 = vector.extract_strided_slice %17 {offsets = [80, 0], sizes = [16, 128], strides = [1, 1]} : vector<128x128xf32> to vector<16x128xf32>
    %122 = vector.shape_cast %121 : vector<16x128xf32> to vector<16x1x128xf32>
    %123 = vector.broadcast %122 : vector<16x1x128xf32> to vector<16x16x128xf32>
    %124 = arith.mulf %90, %123 : vector<16x16x128xf32>
    %cst_24 = arith.constant dense<0.000000e+00> : vector<16x128xf32>
    %125 = vector.multi_reduction <add>, %124, %cst_24 [0] : vector<16x16x128xf32> to vector<16x128xf32>
    %c80 = arith.constant 80 : index
    %c0_25 = arith.constant 0 : index
    %126 = vector.load %arg19[%c80, %c0_25] : memref<128x256xf32, #tpu.memory_space<vmem>>, vector<16x128xf32>
    tpu.vector_store %arg19[%c80, %c0_25], %125 {strides = array<i32>} : memref<128x256xf32, #tpu.memory_space<vmem>>, vector<16x128xf32>,
    %127 = vector.extract_strided_slice %17 {offsets = [96, 0], sizes = [16, 128], strides = [1, 1]} : vector<128x128xf32> to vector<16x128xf32>
    %128 = vector.shape_cast %127 : vector<16x128xf32> to vector<16x1x128xf32>
    %129 = vector.broadcast %128 : vector<16x1x128xf32> to vector<16x16x128xf32>
    %130 = arith.mulf %90, %129 : vector<16x16x128xf32>
    %cst_26 = arith.constant dense<0.000000e+00> : vector<16x128xf32>
    %131 = vector.multi_reduction <add>, %130, %cst_26 [0] : vector<16x16x128xf32> to vector<16x128xf32>
    %c96 = arith.constant 96 : index
    %c0_27 = arith.constant 0 : index
    %132 = vector.load %arg19[%c96, %c0_27] : memref<128x256xf32, #tpu.memory_space<vmem>>, vector<16x128xf32>
    tpu.vector_store %arg19[%c96, %c0_27], %131 {strides = array<i32>} : memref<128x256xf32, #tpu.memory_space<vmem>>, vector<16x128xf32>,
    %133 = vector.extract_strided_slice %17 {offsets = [112, 0], sizes = [16, 128], strides = [1, 1]} : vector<128x128xf32> to vector<16x128xf32>
    %134 = vector.shape_cast %133 : vector<16x128xf32> to vector<16x1x128xf32>
    %135 = vector.broadcast %134 : vector<16x1x128xf32> to vector<16x16x128xf32>
    %136 = arith.mulf %90, %135 : vector<16x16x128xf32>
    %cst_28 = arith.constant dense<0.000000e+00> : vector<16x128xf32>
    %137 = vector.multi_reduction <add>, %136, %cst_28 [0] : vector<16x16x128xf32> to vector<16x128xf32>
    %c112 = arith.constant 112 : index
    %c0_29 = arith.constant 0 : index
    %138 = vector.load %arg19[%c112, %c0_29] : memref<128x256xf32, #tpu.memory_space<vmem>>, vector<16x128xf32>
    tpu.vector_store %arg19[%c112, %c0_29], %137 {strides = array<i32>} : memref<128x256xf32, #tpu.memory_space<vmem>>, vector<16x128xf32>,
    %139 = vector.extract_strided_slice %10 {offsets = [0, 128], sizes = [128, 128], strides = [1, 1]} : vector<128x256xf32> to vector<128x128xf32>
    %140 = vector.extract_strided_slice %13 {offsets = [0, 128], sizes = [128, 128], strides = [1, 1]} : vector<128x256xf32> to vector<128x128xf32>
    %141 = vector.extract_strided_slice %14 {offsets = [0, 128], sizes = [128, 128], strides = [1, 1]} : vector<128x256xf32> to vector<128x128xf32>
    %142 = vector.extract_strided_slice %139 {offsets = [0, 0], sizes = [16, 128], strides = [1, 1]} : vector<128x128xf32> to vector<16x128xf32>
    %143 = vector.extract_strided_slice %140 {offsets = [0, 0], sizes = [16, 128], strides = [1, 1]} : vector<128x128xf32> to vector<16x128xf32>
    %144 = vector.shape_cast %143 : vector<16x128xf32> to vector<16x1x128xf32>
    %145 = vector.shape_cast %142 : vector<16x128xf32> to vector<1x16x128xf32>
    %146 = vector.broadcast %144 : vector<16x1x128xf32> to vector<16x16x128xf32>
    %147 = vector.broadcast %145 : vector<1x16x128xf32> to vector<16x16x128xf32>
    %148 = arith.mulf %146, %147 : vector<16x16x128xf32>
    %149 = vector.extract_strided_slice %139 {offsets = [16, 0], sizes = [16, 128], strides = [1, 1]} : vector<128x128xf32> to vector<16x128xf32>
    %150 = vector.extract_strided_slice %140 {offsets = [16, 0], sizes = [16, 128], strides = [1, 1]} : vector<128x128xf32> to vector<16x128xf32>
    %151 = vector.shape_cast %150 : vector<16x128xf32> to vector<16x1x128xf32>
    %152 = vector.shape_cast %149 : vector<16x128xf32> to vector<1x16x128xf32>
    %153 = vector.broadcast %151 : vector<16x1x128xf32> to vector<16x16x128xf32>
    %154 = vector.broadcast %152 : vector<1x16x128xf32> to vector<16x16x128xf32>
    %155 = arith.mulf %153, %154 : vector<16x16x128xf32>
    %156 = arith.addf %148, %155 : vector<16x16x128xf32>
    %157 = vector.extract_strided_slice %139 {offsets = [32, 0], sizes = [16, 128], strides = [1, 1]} : vector<128x128xf32> to vector<16x128xf32>
    %158 = vector.extract_strided_slice %140 {offsets = [32, 0], sizes = [16, 128], strides = [1, 1]} : vector<128x128xf32> to vector<16x128xf32>
    %159 = vector.shape_cast %158 : vector<16x128xf32> to vector<16x1x128xf32>
    %160 = vector.shape_cast %157 : vector<16x128xf32> to vector<1x16x128xf32>
    %161 = vector.broadcast %159 : vector<16x1x128xf32> to vector<16x16x128xf32>
    %162 = vector.broadcast %160 : vector<1x16x128xf32> to vector<16x16x128xf32>
    %163 = arith.mulf %161, %162 : vector<16x16x128xf32>
    %164 = arith.addf %156, %163 : vector<16x16x128xf32>
    %165 = vector.extract_strided_slice %139 {offsets = [48, 0], sizes = [16, 128], strides = [1, 1]} : vector<128x128xf32> to vector<16x128xf32>
    %166 = vector.extract_strided_slice %140 {offsets = [48, 0], sizes = [16, 128], strides = [1, 1]} : vector<128x128xf32> to vector<16x128xf32>
    %167 = vector.shape_cast %166 : vector<16x128xf32> to vector<16x1x128xf32>
    %168 = vector.shape_cast %165 : vector<16x128xf32> to vector<1x16x128xf32>
    %169 = vector.broadcast %167 : vector<16x1x128xf32> to vector<16x16x128xf32>
    %170 = vector.broadcast %168 : vector<1x16x128xf32> to vector<16x16x128xf32>
    %171 = arith.mulf %169, %170 : vector<16x16x128xf32>
    %172 = arith.addf %164, %171 : vector<16x16x128xf32>
    %173 = vector.extract_strided_slice %139 {offsets = [64, 0], sizes = [16, 128], strides = [1, 1]} : vector<128x128xf32> to vector<16x128xf32>
    %174 = vector.extract_strided_slice %140 {offsets = [64, 0], sizes = [16, 128], strides = [1, 1]} : vector<128x128xf32> to vector<16x128xf32>
    %175 = vector.shape_cast %174 : vector<16x128xf32> to vector<16x1x128xf32>
    %176 = vector.shape_cast %173 : vector<16x128xf32> to vector<1x16x128xf32>
    %177 = vector.broadcast %175 : vector<16x1x128xf32> to vector<16x16x128xf32>
    %178 = vector.broadcast %176 : vector<1x16x128xf32> to vector<16x16x128xf32>
    %179 = arith.mulf %177, %178 : vector<16x16x128xf32>
    %180 = arith.addf %172, %179 : vector<16x16x128xf32>
    %181 = vector.extract_strided_slice %139 {offsets = [80, 0], sizes = [16, 128], strides = [1, 1]} : vector<128x128xf32> to vector<16x128xf32>
    %182 = vector.extract_strided_slice %140 {offsets = [80, 0], sizes = [16, 128], strides = [1, 1]} : vector<128x128xf32> to vector<16x128xf32>
    %183 = vector.shape_cast %182 : vector<16x128xf32> to vector<16x1x128xf32>
    %184 = vector.shape_cast %181 : vector<16x128xf32> to vector<1x16x128xf32>
    %185 = vector.broadcast %183 : vector<16x1x128xf32> to vector<16x16x128xf32>
    %186 = vector.broadcast %184 : vector<1x16x128xf32> to vector<16x16x128xf32>
    %187 = arith.mulf %185, %186 : vector<16x16x128xf32>
    %188 = arith.addf %180, %187 : vector<16x16x128xf32>
    %189 = vector.extract_strided_slice %139 {offsets = [96, 0], sizes = [16, 128], strides = [1, 1]} : vector<128x128xf32> to vector<16x128xf32>
    %190 = vector.extract_strided_slice %140 {offsets = [96, 0], sizes = [16, 128], strides = [1, 1]} : vector<128x128xf32> to vector<16x128xf32>
    %191 = vector.shape_cast %190 : vector<16x128xf32> to vector<16x1x128xf32>
    %192 = vector.shape_cast %189 : vector<16x128xf32> to vector<1x16x128xf32>
    %193 = vector.broadcast %191 : vector<16x1x128xf32> to vector<16x16x128xf32>
    %194 = vector.broadcast %192 : vector<1x16x128xf32> to vector<16x16x128xf32>
    %195 = arith.mulf %193, %194 : vector<16x16x128xf32>
    %196 = arith.addf %188, %195 : vector<16x16x128xf32>
    %197 = vector.extract_strided_slice %139 {offsets = [112, 0], sizes = [16, 128], strides = [1, 1]} : vector<128x128xf32> to vector<16x128xf32>
    %198 = vector.extract_strided_slice %140 {offsets = [112, 0], sizes = [16, 128], strides = [1, 1]} : vector<128x128xf32> to vector<16x128xf32>
    %199 = vector.shape_cast %198 : vector<16x128xf32> to vector<16x1x128xf32>
    %200 = vector.shape_cast %197 : vector<16x128xf32> to vector<1x16x128xf32>
    %201 = vector.broadcast %199 : vector<16x1x128xf32> to vector<16x16x128xf32>
    %202 = vector.broadcast %200 : vector<1x16x128xf32> to vector<16x16x128xf32>
    %203 = arith.mulf %201, %202 : vector<16x16x128xf32>
    %204 = arith.addf %196, %203 : vector<16x16x128xf32>
    %cst_30 = arith.constant dense<0xFF800000> : vector<16x128xf32>
    %205 = vector.multi_reduction <maximumf>, %204, %cst_30 [0] : vector<16x16x128xf32> to vector<16x128xf32>
    %206 = vector.shape_cast %205 : vector<16x128xf32> to vector<1x16x128xf32>
    %207 = vector.broadcast %206 : vector<1x16x128xf32> to vector<16x16x128xf32>
    %208 = arith.subf %204, %207 : vector<16x16x128xf32>
    %209 = math.exp %208 : vector<16x16x128xf32>
    %cst_31 = arith.constant dense<0.000000e+00> : vector<16x128xf32>
    %210 = vector.multi_reduction <add>, %209, %cst_31 [0] : vector<16x16x128xf32> to vector<16x128xf32>
    %211 = vector.shape_cast %210 : vector<16x128xf32> to vector<1x16x128xf32>
    %212 = tpu.reciprocal %211 {approx = true} : vector<1x16x128xf32> -> vector<1x16x128xf32>
    %213 = vector.broadcast %212 : vector<1x16x128xf32> to vector<16x16x128xf32>
    %214 = arith.mulf %209, %213 : vector<16x16x128xf32>
    %215 = vector.extract_strided_slice %141 {offsets = [0, 0], sizes = [16, 128], strides = [1, 1]} : vector<128x128xf32> to vector<16x128xf32>
    %216 = vector.shape_cast %215 : vector<16x128xf32> to vector<16x1x128xf32>
    %217 = vector.broadcast %216 : vector<16x1x128xf32> to vector<16x16x128xf32>
    %218 = arith.mulf %214, %217 : vector<16x16x128xf32>
    %cst_32 = arith.constant dense<0.000000e+00> : vector<16x128xf32>
    %219 = vector.multi_reduction <add>, %218, %cst_32 [0] : vector<16x16x128xf32> to vector<16x128xf32>
    %c0_33 = arith.constant 0 : index
    %c128 = arith.constant 128 : index
    %220 = vector.load %arg19[%c0_33, %c128] : memref<128x256xf32, #tpu.memory_space<vmem>>, vector<16x128xf32>
    tpu.vector_store %arg19[%c0_33, %c128], %219 {strides = array<i32>} : memref<128x256xf32, #tpu.memory_space<vmem>>, vector<16x128xf32>,
    %221 = vector.extract_strided_slice %141 {offsets = [16, 0], sizes = [16, 128], strides = [1, 1]} : vector<128x128xf32> to vector<16x128xf32>
    %222 = vector.shape_cast %221 : vector<16x128xf32> to vector<16x1x128xf32>
    %223 = vector.broadcast %222 : vector<16x1x128xf32> to vector<16x16x128xf32>
    %224 = arith.mulf %214, %223 : vector<16x16x128xf32>
    %cst_34 = arith.constant dense<0.000000e+00> : vector<16x128xf32>
    %225 = vector.multi_reduction <add>, %224, %cst_34 [0] : vector<16x16x128xf32> to vector<16x128xf32>
    %c16_35 = arith.constant 16 : index
    %c128_36 = arith.constant 128 : index
    %226 = vector.load %arg19[%c16_35, %c128_36] : memref<128x256xf32, #tpu.memory_space<vmem>>, vector<16x128xf32>
    tpu.vector_store %arg19[%c16_35, %c128_36], %225 {strides = array<i32>} : memref<128x256xf32, #tpu.memory_space<vmem>>, vector<16x128xf32>,
    %227 = vector.extract_strided_slice %141 {offsets = [32, 0], sizes = [16, 128], strides = [1, 1]} : vector<128x128xf32> to vector<16x128xf32>
    %228 = vector.shape_cast %227 : vector<16x128xf32> to vector<16x1x128xf32>
    %229 = vector.broadcast %228 : vector<16x1x128xf32> to vector<16x16x128xf32>
    %230 = arith.mulf %214, %229 : vector<16x16x128xf32>
    %cst_37 = arith.constant dense<0.000000e+00> : vector<16x128xf32>
    %231 = vector.multi_reduction <add>, %230, %cst_37 [0] : vector<16x16x128xf32> to vector<16x128xf32>
    %c32_38 = arith.constant 32 : index
    %c128_39 = arith.constant 128 : index
    %232 = vector.load %arg19[%c32_38, %c128_39] : memref<128x256xf32, #tpu.memory_space<vmem>>, vector<16x128xf32>
    tpu.vector_store %arg19[%c32_38, %c128_39], %231 {strides = array<i32>} : memref<128x256xf32, #tpu.memory_space<vmem>>, vector<16x128xf32>,
    %233 = vector.extract_strided_slice %141 {offsets = [48, 0], sizes = [16, 128], strides = [1, 1]} : vector<128x128xf32> to vector<16x128xf32>
    %234 = vector.shape_cast %233 : vector<16x128xf32> to vector<16x1x128xf32>
    %235 = vector.broadcast %234 : vector<16x1x128xf32> to vector<16x16x128xf32>
    %236 = arith.mulf %214, %235 : vector<16x16x128xf32>
    %cst_40 = arith.constant dense<0.000000e+00> : vector<16x128xf32>
    %237 = vector.multi_reduction <add>, %236, %cst_40 [0] : vector<16x16x128xf32> to vector<16x128xf32>
    %c48_41 = arith.constant 48 : index
    %c128_42 = arith.constant 128 : index
    %238 = vector.load %arg19[%c48_41, %c128_42] : memref<128x256xf32, #tpu.memory_space<vmem>>, vector<16x128xf32>
    tpu.vector_store %arg19[%c48_41, %c128_42], %237 {strides = array<i32>} : memref<128x256xf32, #tpu.memory_space<vmem>>, vector<16x128xf32>,
    %239 = vector.extract_strided_slice %141 {offsets = [64, 0], sizes = [16, 128], strides = [1, 1]} : vector<128x128xf32> to vector<16x128xf32>
    %240 = vector.shape_cast %239 : vector<16x128xf32> to vector<16x1x128xf32>
    %241 = vector.broadcast %240 : vector<16x1x128xf32> to vector<16x16x128xf32>
    %242 = arith.mulf %214, %241 : vector<16x16x128xf32>
    %cst_43 = arith.constant dense<0.000000e+00> : vector<16x128xf32>
    %243 = vector.multi_reduction <add>, %242, %cst_43 [0] : vector<16x16x128xf32> to vector<16x128xf32>
    %c64_44 = arith.constant 64 : index
    %c128_45 = arith.constant 128 : index
    %244 = vector.load %arg19[%c64_44, %c128_45] : memref<128x256xf32, #tpu.memory_space<vmem>>, vector<16x128xf32>
    tpu.vector_store %arg19[%c64_44, %c128_45], %243 {strides = array<i32>} : memref<128x256xf32, #tpu.memory_space<vmem>>, vector<16x128xf32>,
    %245 = vector.extract_strided_slice %141 {offsets = [80, 0], sizes = [16, 128], strides = [1, 1]} : vector<128x128xf32> to vector<16x128xf32>
    %246 = vector.shape_cast %245 : vector<16x128xf32> to vector<16x1x128xf32>
    %247 = vector.broadcast %246 : vector<16x1x128xf32> to vector<16x16x128xf32>
    %248 = arith.mulf %214, %247 : vector<16x16x128xf32>
    %cst_46 = arith.constant dense<0.000000e+00> : vector<16x128xf32>
    %249 = vector.multi_reduction <add>, %248, %cst_46 [0] : vector<16x16x128xf32> to vector<16x128xf32>
    %c80_47 = arith.constant 80 : index
    %c128_48 = arith.constant 128 : index
    %250 = vector.load %arg19[%c80_47, %c128_48] : memref<128x256xf32, #tpu.memory_space<vmem>>, vector<16x128xf32>
    tpu.vector_store %arg19[%c80_47, %c128_48], %249 {strides = array<i32>} : memref<128x256xf32, #tpu.memory_space<vmem>>, vector<16x128xf32>,
    %251 = vector.extract_strided_slice %141 {offsets = [96, 0], sizes = [16, 128], strides = [1, 1]} : vector<128x128xf32> to vector<16x128xf32>
    %252 = vector.shape_cast %251 : vector<16x128xf32> to vector<16x1x128xf32>
    %253 = vector.broadcast %252 : vector<16x1x128xf32> to vector<16x16x128xf32>
    %254 = arith.mulf %214, %253 : vector<16x16x128xf32>
    %cst_49 = arith.constant dense<0.000000e+00> : vector<16x128xf32>
    %255 = vector.multi_reduction <add>, %254, %cst_49 [0] : vector<16x16x128xf32> to vector<16x128xf32>
    %c96_50 = arith.constant 96 : index
    %c128_51 = arith.constant 128 : index
    %256 = vector.load %arg19[%c96_50, %c128_51] : memref<128x256xf32, #tpu.memory_space<vmem>>, vector<16x128xf32>
    tpu.vector_store %arg19[%c96_50, %c128_51], %255 {strides = array<i32>} : memref<128x256xf32, #tpu.memory_space<vmem>>, vector<16x128xf32>,
    %257 = vector.extract_strided_slice %141 {offsets = [112, 0], sizes = [16, 128], strides = [1, 1]} : vector<128x128xf32> to vector<16x128xf32>
    %258 = vector.shape_cast %257 : vector<16x128xf32> to vector<16x1x128xf32>
    %259 = vector.broadcast %258 : vector<16x1x128xf32> to vector<16x16x128xf32>
    %260 = arith.mulf %214, %259 : vector<16x16x128xf32>
    %cst_52 = arith.constant dense<0.000000e+00> : vector<16x128xf32>
    %261 = vector.multi_reduction <add>, %260, %cst_52 [0] : vector<16x16x128xf32> to vector<16x128xf32>
    %c112_53 = arith.constant 112 : index
    %c128_54 = arith.constant 128 : index
    %262 = vector.load %arg19[%c112_53, %c128_54] : memref<128x256xf32, #tpu.memory_space<vmem>>, vector<16x128xf32>
    tpu.vector_store %arg19[%c112_53, %c128_54], %261 {strides = array<i32>} : memref<128x256xf32, #tpu.memory_space<vmem>>, vector<16x128xf32>,
    %c0_55 = arith.constant 0 : index
    %c0_56 = arith.constant 0 : index
    %263 = vector.load %arg19[%c0_55, %c0_56] : memref<128x256xf32, #tpu.memory_space<vmem>>, vector<128x256xf32>
    %c0_57 = arith.constant 0 : index
    %c0_58 = arith.constant 0 : index
    %264 = vector.load %arg2[%c0_57, %c0_58] : memref<256x64xf32, #tpu.memory_space<vmem>>, vector<256x64xf32>
    %cst_59 = arith.constant dense<0.000000e+00> : vector<128x64xf32>
    %265 = tpu.matmul %263, %264, %cst_59 {dimension_numbers = #tpu.dot_dimension_numbers<[1], [0], [0], [1], [0, 0, 1, 1], [], []>} : vector<128x256xf32>, vector<256x64xf32>, vector<128x64xf32> -> vector<128x64xf32>
    %c0_60 = arith.constant 0 : index
    %c0_61 = arith.constant 0 : index
    %c0_62 = arith.constant 0 : index
    %266 = vector.load %arg7[%c0_60, %c0_61, %c0_62] : memref<1x128x128xf32, #tpu.memory_space<vmem>>, vector<1x128x128xf32>
    %267 = vector.shape_cast %266 : vector<1x128x128xf32> to vector<128x128xf32>
    %cst_63 = arith.constant dense<0.000000e+00> : vector<128x64xf32>
    %268 = tpu.matmul %267, %265, %cst_63 {dimension_numbers = #tpu.dot_dimension_numbers<[1], [0], [0], [1], [0, 0, 1, 1], [], []>} : vector<128x128xf32>, vector<128x64xf32>, vector<128x64xf32> -> vector<128x64xf32>
    %269 = arith.addf %3, %268 : vector<128x64xf32>
    %c0_64 = arith.constant 0 : index
    %c0_65 = arith.constant 0 : index
    %c0_66 = arith.constant 0 : index
    %270 = vector.load %arg8[%c0_64, %c0_65, %c0_66] : memref<1x128x1xf32, #tpu.memory_space<vmem>>, vector<1x128x1xf32>
    %271 = vector.shape_cast %270 : vector<1x128x1xf32> to vector<128x1xf32>
    %272 = vector.broadcast %271 : vector<128x1xf32> to vector<128x64xf32>
    %273 = arith.addf %269, %272 : vector<128x64xf32>
    %c0_67 = arith.constant 0 : index
    %c0_68 = arith.constant 0 : index
    %c0_69 = arith.constant 0 : index
    %274 = vector.load %arg11[%c0_67, %c0_68, %c0_69] : memref<1x128x1xf32, #tpu.memory_space<vmem>>, vector<1x128x1xf32>
    %275 = vector.shape_cast %274 : vector<1x128x1xf32> to vector<128x1xf32>
    %c0_70 = arith.constant 0 : index
    %c0_71 = arith.constant 0 : index
    %c0_72 = arith.constant 0 : index
    %276 = vector.load %arg12[%c0_70, %c0_71, %c0_72] : memref<1x128x1xf32, #tpu.memory_space<vmem>>, vector<1x128x1xf32>
    %277 = vector.shape_cast %276 : vector<1x128x1xf32> to vector<128x1xf32>
    %cst_73 = arith.constant dense<0.000000e+00> : vector<64xf32>
    %278 = vector.multi_reduction <add>, %273, %cst_73 [0] : vector<128x64xf32> to vector<64xf32>
    %279 = vector.shape_cast %278 : vector<64xf32> to vector<1x64xf32>
    %cst_74 = arith.constant 1.280000e+02 : f32
    %280 = vector.broadcast %cst_74 : f32 to vector<1x64xf32>
    %281 = arith.divf %279, %280 : vector<1x64xf32>
    %282 = vector.broadcast %281 : vector<1x64xf32> to vector<128x64xf32>
    %283 = arith.subf %273, %282 : vector<128x64xf32>
    %284 = arith.mulf %283, %283 : vector<128x64xf32>
    %cst_75 = arith.constant dense<0.000000e+00> : vector<64xf32>
    %285 = vector.multi_reduction <add>, %284, %cst_75 [0] : vector<128x64xf32> to vector<64xf32>
    %286 = vector.shape_cast %285 : vector<64xf32> to vector<1x64xf32>
    %cst_76 = arith.constant 1.280000e+02 : f32
    %287 = vector.broadcast %cst_76 : f32 to vector<1x64xf32>
    %288 = arith.divf %286, %287 : vector<1x64xf32>
    %289 = vector.broadcast %281 : vector<1x64xf32> to vector<128x64xf32>
    %290 = arith.subf %273, %289 : vector<128x64xf32>
    %cst_77 = arith.constant 9.99999974E-6 : f32
    %291 = vector.broadcast %cst_77 : f32 to vector<1x64xf32>
    %292 = arith.addf %288, %291 : vector<1x64xf32>
    %293 = math.rsqrt %292 : vector<1x64xf32>
    %294 = vector.broadcast %293 : vector<1x64xf32> to vector<128x64xf32>
    %295 = arith.mulf %290, %294 : vector<128x64xf32>
    %296 = vector.broadcast %275 : vector<128x1xf32> to vector<128x64xf32>
    %297 = arith.mulf %295, %296 : vector<128x64xf32>
    %298 = vector.broadcast %277 : vector<128x1xf32> to vector<128x64xf32>
    %299 = arith.addf %297, %298 : vector<128x64xf32>
    %c0_78 = arith.constant 0 : index
    %c0_79 = arith.constant 0 : index
    %c0_80 = arith.constant 0 : index
    %300 = vector.load %arg9[%c0_78, %c0_79, %c0_80] : memref<1x128x128xf32, #tpu.memory_space<vmem>>, vector<1x128x128xf32>
    %301 = vector.shape_cast %300 : vector<1x128x128xf32> to vector<128x128xf32>
    %cst_81 = arith.constant dense<0.000000e+00> : vector<128x64xf32>
    %302 = tpu.matmul %301, %299, %cst_81 {dimension_numbers = #tpu.dot_dimension_numbers<[1], [0], [0], [1], [0, 0, 1, 1], [], []>} : vector<128x128xf32>, vector<128x64xf32>, vector<128x64xf32> -> vector<128x64xf32>
    %303 = arith.addf %299, %302 : vector<128x64xf32>
    %c0_82 = arith.constant 0 : index
    %c0_83 = arith.constant 0 : index
    %c0_84 = arith.constant 0 : index
    %304 = vector.load %arg10[%c0_82, %c0_83, %c0_84] : memref<1x128x1xf32, #tpu.memory_space<vmem>>, vector<1x128x1xf32>
    %305 = vector.shape_cast %304 : vector<1x128x1xf32> to vector<128x1xf32>
    %306 = vector.broadcast %305 : vector<128x1xf32> to vector<128x64xf32>
    %307 = arith.addf %303, %306 : vector<128x64xf32>
    %c0_85 = arith.constant 0 : index
    %c0_86 = arith.constant 0 : index
    %c0_87 = arith.constant 0 : index
    %308 = vector.load %arg13[%c0_85, %c0_86, %c0_87] : memref<1x128x1xf32, #tpu.memory_space<vmem>>, vector<1x128x1xf32>
    %309 = vector.shape_cast %308 : vector<1x128x1xf32> to vector<128x1xf32>
    %c0_88 = arith.constant 0 : index
    %c0_89 = arith.constant 0 : index
    %c0_90 = arith.constant 0 : index
    %310 = vector.load %arg14[%c0_88, %c0_89, %c0_90] : memref<1x128x1xf32, #tpu.memory_space<vmem>>, vector<1x128x1xf32>
    %311 = vector.shape_cast %310 : vector<1x128x1xf32> to vector<128x1xf32>
    %cst_91 = arith.constant dense<0.000000e+00> : vector<64xf32>
    %312 = vector.multi_reduction <add>, %307, %cst_91 [0] : vector<128x64xf32> to vector<64xf32>
    %313 = vector.shape_cast %312 : vector<64xf32> to vector<1x64xf32>
    %cst_92 = arith.constant 1.280000e+02 : f32
    %314 = vector.broadcast %cst_92 : f32 to vector<1x64xf32>
    %315 = arith.divf %313, %314 : vector<1x64xf32>
    %316 = vector.broadcast %315 : vector<1x64xf32> to vector<128x64xf32>
    %317 = arith.subf %307, %316 : vector<128x64xf32>
    %318 = arith.mulf %317, %317 : vector<128x64xf32>
    %cst_93 = arith.constant dense<0.000000e+00> : vector<64xf32>
    %319 = vector.multi_reduction <add>, %318, %cst_93 [0] : vector<128x64xf32> to vector<64xf32>
    %320 = vector.shape_cast %319 : vector<64xf32> to vector<1x64xf32>
    %cst_94 = arith.constant 1.280000e+02 : f32
    %321 = vector.broadcast %cst_94 : f32 to vector<1x64xf32>
    %322 = arith.divf %320, %321 : vector<1x64xf32>
    %323 = vector.broadcast %315 : vector<1x64xf32> to vector<128x64xf32>
    %324 = arith.subf %307, %323 : vector<128x64xf32>
    %cst_95 = arith.constant 9.99999974E-6 : f32
    %325 = vector.broadcast %cst_95 : f32 to vector<1x64xf32>
    %326 = arith.addf %322, %325 : vector<1x64xf32>
    %327 = math.rsqrt %326 : vector<1x64xf32>
    %328 = vector.broadcast %327 : vector<1x64xf32> to vector<128x64xf32>
    %329 = arith.mulf %324, %328 : vector<128x64xf32>
    %330 = vector.broadcast %309 : vector<128x1xf32> to vector<128x64xf32>
    %331 = arith.mulf %329, %330 : vector<128x64xf32>
    %332 = vector.broadcast %311 : vector<128x1xf32> to vector<128x64xf32>
    %333 = arith.addf %331, %332 : vector<128x64xf32>
    %c0_96 = arith.constant 0 : index
    %c0_97 = arith.constant 0 : index
    %334 = vector.load %arg18[%c0_96, %c0_97] : memref<128x64xf32, #tpu.memory_space<vmem>>, vector<128x64xf32>
    tpu.vector_store %arg18[%c0_96, %c0_97], %333 {strides = array<i32>} : memref<128x64xf32, #tpu.memory_space<vmem>>, vector<128x64xf32>,
    %c6_i32 = arith.constant 6 : i32
    %335 = arith.cmpi eq, %arg0, %c6_i32 : i32
    %336 = arith.extui %335 : i1 to i32
    %c0_i32_98 = arith.constant 0 : i32
    %337 = arith.cmpi ne, %336, %c0_i32_98 : i32
    scf.if %337 {
      %338 = tpu.transpose %333, [1, 0] : vector<128x64xf32> -> vector<64x128xf32>
      %c0_99 = arith.constant 0 : index
      %c0_100 = arith.constant 0 : index
      %339 = vector.load %arg15[%c0_99, %c0_100] : memref<128x8xf32, #tpu.memory_space<vmem>>, vector<128x8xf32>
      %cst_101 = arith.constant dense<0.000000e+00> : vector<64x8xf32>
      %340 = tpu.matmul %338, %339, %cst_101 {dimension_numbers = #tpu.dot_dimension_numbers<[1], [0], [0], [1], [0, 0, 1, 1], [], []>} : vector<64x128xf32>, vector<128x8xf32>, vector<64x8xf32> -> vector<64x8xf32>
      %c0_102 = arith.constant 0 : index
      %c0_103 = arith.constant 0 : index
      %341 = vector.load %arg16[%c0_102, %c0_103] : memref<1x8xf32, #tpu.memory_space<vmem>>, vector<1x8xf32>
      %342 = vector.broadcast %341 : vector<1x8xf32> to vector<64x8xf32>
      %343 = arith.addf %340, %342 : vector<64x8xf32>
      %cst_104 = arith.constant dense<0xFF800000> : vector<64xf32>
      %344 = vector.multi_reduction <maximumf>, %343, %cst_104 [1] : vector<64x8xf32> to vector<64xf32>
      %345 = vector.shape_cast %344 : vector<64xf32> to vector<64x1xf32>
      %346 = vector.broadcast %345 : vector<64x1xf32> to vector<64x8xf32>
      %347 = arith.subf %343, %346 : vector<64x8xf32>
      %348 = math.exp %347 : vector<64x8xf32>
      %cst_105 = arith.constant dense<0.000000e+00> : vector<64xf32>
      %349 = vector.multi_reduction <add>, %348, %cst_105 [1] : vector<64x8xf32> to vector<64xf32>
      %350 = vector.shape_cast %349 : vector<64xf32> to vector<64x1xf32>
      %351 = math.log %350 : vector<64x1xf32>
      %352 = vector.broadcast %351 : vector<64x1xf32> to vector<64x8xf32>
      %353 = arith.subf %347, %352 : vector<64x8xf32>
      %c0_106 = arith.constant 0 : index
      %c0_107 = arith.constant 0 : index
      %354 = vector.load %arg17[%c0_106, %c0_107] : memref<64x8xf32, #tpu.memory_space<vmem>>, vector<64x8xf32>
      tpu.vector_store %arg17[%c0_106, %c0_107], %353 {strides = array<i32>} : memref<64x8xf32, #tpu.memory_space<vmem>>, vector<64x8xf32>,
    } else {
    }
    return
  }
  func.func @transform_0(%arg0: i32) -> (i32, i32) {
    %c0_i32 = arith.constant 0 : i32
    %c0_i32_0 = arith.constant 0 : i32
    %c0_i32_1 = arith.constant 0 : i32
    return %c0_i32, %c0_i32_0 : i32, i32
  }
  func.func @transform_1(%arg0: i32) -> (i32, i32) {
    %c0_i32 = arith.constant 0 : i32
    %c0_i32_0 = arith.constant 0 : i32
    %c0_i32_1 = arith.constant 0 : i32
    return %c0_i32, %c0_i32_0 : i32, i32
  }
  func.func @transform_2(%arg0: i32) -> (i32, i32) {
    %c0_i32 = arith.constant 0 : i32
    %c0_i32_0 = arith.constant 0 : i32
    %c0_i32_1 = arith.constant 0 : i32
    return %c0_i32, %c0_i32_0 : i32, i32
  }
  func.func @transform_3(%arg0: i32) -> (i32, i32) {
    %c0_i32 = arith.constant 0 : i32
    %c0_i32_0 = arith.constant 0 : i32
    %c0_i32_1 = arith.constant 0 : i32
    return %c0_i32, %c0_i32_0 : i32, i32
  }
  func.func @transform_4(%arg0: i32) -> (i32, i32) {
    %c0_i32 = arith.constant 0 : i32
    %c0_i32_0 = arith.constant 0 : i32
    %c0_i32_1 = arith.constant 0 : i32
    return %c0_i32, %c0_i32_0 : i32, i32
  }
  func.func @transform_5(%arg0: i32) -> (i32, i32, i32) {
    %c0_i32 = arith.constant 0 : i32
    %c0_i32_0 = arith.constant 0 : i32
    %c0_i32_1 = arith.constant 0 : i32
    return %arg0, %c0_i32, %c0_i32_0 : i32, i32, i32
  }
  func.func @transform_6(%arg0: i32) -> (i32, i32, i32) {
    %c0_i32 = arith.constant 0 : i32
    %c0_i32_0 = arith.constant 0 : i32
    %c0_i32_1 = arith.constant 0 : i32
    return %arg0, %c0_i32, %c0_i32_0 : i32, i32, i32
  }
  func.func @transform_7(%arg0: i32) -> (i32, i32, i32) {
    %c0_i32 = arith.constant 0 : i32
    %c0_i32_0 = arith.constant 0 : i32
    %c0_i32_1 = arith.constant 0 : i32
    return %arg0, %c0_i32, %c0_i32_0 : i32, i32, i32
  }
  func.func @transform_8(%arg0: i32) -> (i32, i32, i32) {
    %c0_i32 = arith.constant 0 : i32
    %c0_i32_0 = arith.constant 0 : i32
    %c0_i32_1 = arith.constant 0 : i32
    return %arg0, %c0_i32, %c0_i32_0 : i32, i32, i32
  }
  func.func @transform_9(%arg0: i32) -> (i32, i32, i32) {
    %c0_i32 = arith.constant 0 : i32
    %c0_i32_0 = arith.constant 0 : i32
    %c0_i32_1 = arith.constant 0 : i32
    return %arg0, %c0_i32, %c0_i32_0 : i32, i32, i32
  }
  func.func @transform_10(%arg0: i32) -> (i32, i32, i32) {
    %c0_i32 = arith.constant 0 : i32
    %c0_i32_0 = arith.constant 0 : i32
    %c0_i32_1 = arith.constant 0 : i32
    return %arg0, %c0_i32, %c0_i32_0 : i32, i32, i32
  }
  func.func @transform_11(%arg0: i32) -> (i32, i32, i32) {
    %c0_i32 = arith.constant 0 : i32
    %c0_i32_0 = arith.constant 0 : i32
    %c0_i32_1 = arith.constant 0 : i32
    return %arg0, %c0_i32, %c0_i32_0 : i32, i32, i32
  }
  func.func @transform_12(%arg0: i32) -> (i32, i32, i32) {
    %c0_i32 = arith.constant 0 : i32
    %c0_i32_0 = arith.constant 0 : i32
    %c0_i32_1 = arith.constant 0 : i32
    return %arg0, %c0_i32, %c0_i32_0 : i32, i32, i32
  }
  func.func @transform_13(%arg0: i32) -> (i32, i32, i32) {
    %c0_i32 = arith.constant 0 : i32
    %c0_i32_0 = arith.constant 0 : i32
    %c0_i32_1 = arith.constant 0 : i32
    return %arg0, %c0_i32, %c0_i32_0 : i32, i32, i32
  }
  func.func @transform_14(%arg0: i32) -> (i32, i32) {
    %c0_i32 = arith.constant 0 : i32
    %c0_i32_0 = arith.constant 0 : i32
    %c0_i32_1 = arith.constant 0 : i32
    return %c0_i32, %c0_i32_0 : i32, i32
  }
  func.func @transform_15(%arg0: i32) -> (i32, i32) {
    %c0_i32 = arith.constant 0 : i32
    %c0_i32_0 = arith.constant 0 : i32
    %c0_i32_1 = arith.constant 0 : i32
    return %c0_i32, %c0_i32_0 : i32, i32
  }
  func.func @transform_16(%arg0: i32) -> (i32, i32) {
    %c0_i32 = arith.constant 0 : i32
    %c0_i32_0 = arith.constant 0 : i32
    %c0_i32_1 = arith.constant 0 : i32
    return %c0_i32, %c0_i32_0 : i32, i32
  }
}

</mosaic_0001>

<bundles_post_ra>
// kernel: gat_forward.1
= control target key start
LH: loop header
LB: loop body
LE: loop exit
PB: predicated region body
PF: predicated region fallthrough
CT: control target
= control target key end

     0   :  { %s7688_s21 = smov 0   ;;  %s13651_s0 = inlined_call_operand.vmem [shape: f32[32,64], index: 0, kind: input, shape index: {}]   ;;  %s13652_s1 = inlined_call_operand.vmem [shape: f32[256,64], index: 1, kind: input, shape index: {}]   ;;  %s13653_s2 = inlined_call_operand.vmem [shape: f32[64,256], index: 2, kind: input, shape index: {}]   ;;  %s13654_s3 = inlined_call_operand.vmem [shape: f32[64,256], index: 3, kind: input, shape index: {}]   ;;  %s13655_s4 = inlined_call_operand.vmem [shape: f32[128,32], index: 4, kind: input, shape index: {}]   ;;  %s13656_s5 = inlined_call_operand.vmem [shape: f32[7,384,128], index: 5, kind: input, shape index: {}]   ;;  %s13657_s6 = inlined_call_operand.vmem [shape: f32[7,128,128], index: 6, kind: input, shape index: {}]   ;;  %s13658_s7 = inlined_call_operand.vmem [shape: f32[7,128,1], index: 7, kind: input, shape index: {}]   ;;  %s13659_s8 = inlined_call_operand.vmem [shape: f32[7,128,128], index: 8, kind: input, shape index: {}]   ;;  %s13660_s9 = inlined_call_operand.vmem [shape: f32[7,128,1], index: 9, kind: input, shape index: {}]   ;;  %s13661_s10 = inlined_call_operand.vmem [shape: f32[7,128,1], index: 10, kind: input, shape index: {}]   ;;  %s13662_s11 = inlined_call_operand.vmem [shape: f32[7,128,1], index: 11, kind: input, shape index: {}]   ;;  %s13663_s12 = inlined_call_operand.vmem [shape: f32[7,128,1], index: 12, kind: input, shape index: {}]   ;;  %s13664_s13 = inlined_call_operand.vmem [shape: f32[7,128,1], index: 13, kind: input, shape index: {}]   ;;  %s13665_s14 = inlined_call_operand.vmem [shape: f32[128,8], index: 14, kind: input, shape index: {}]   ;;  %s13666_s15 = inlined_call_operand.vmem [shape: f32[1,8], index: 15, kind: input, shape index: {}]   ;;  %s13667_s16 = inlined_call_operand.vmem [shape: f32[64,8], index: 16, kind: output, shape index: {}]  }
   0x1   :  { %13955 = sst [smem:[#allocation183_spill]] %s13651_s0 }
   0x2   :  { %13956 = sst [smem:[#allocation184_spill]] %s13654_s3 }
   0x3   :  { %13957 = sst [smem:[#allocation185_spill]] %s13656_s5 }
   0x4   :  { %13958 = sst [smem:[#allocation186_spill]] %s13657_s6 }
   0x5   :  { %13959 = sst [smem:[#allocation187_spill]] %s13658_s7 }
   0x6   :  { %13960 = sst [smem:[#allocation188_spill]] %s13666_s15 }
   0x7   :  { %13961 = sst [smem:[#allocation189_spill]] %s13667_s16 }
   0x8 LB: > { %13962 = sst [smem:[#allocation4_spill]] %s7599_s21  ;;  %s7694_s22 = sadd.s32 4294967295, %s7599_s21   ;;  %s7599_s21 = sphi %s7688_s21, %s26_s21  }
   0x9   : > { %p7162_p0 = scmp.ge.s32.totalorder %s7599_s21, 1  ;;  %p537_p1 = scmp.lt.s32.totalorder %s7599_s21, 8 }
   0xb   : > { %p538_p2 = pnand %p7162_p0, %p537_p1 }
   0xd   : > { %541 = sbr.rel (%p538_p2) target bundleno = 3043 (0xbe3), region = 84 }
  0x12   : > { %p622_p3 = scmp.lt.s32.totalorder %s7694_s22, 6  ;;  %s13963_s6 = sld [smem:[#allocation186_spill]] }
  0x13   : > { %s13964_s7 = sld [smem:[#allocation187_spill]]  ;;  %p7180_p4 = scmp.ne.s32.totalorder %s7694_s22, 0 }
  0x14   : > { %s623_s23 = scalar_select %p622_p3, %s7694_s22, 6 }
  0x15   : > { %s13965_s5 = sld [smem:[#allocation185_spill]] }
  0x16   : > { %s7388_s24 = smul.u32 384, %s623_s23  ;;  %s7296_s25 = sshll.u32 %s623_s23, 7 }
  0x17   : > { %s7718_s16 = scalar_lea.vmem %s13659_s8, %s7296_s25  ;;  %s7723_s26 = scalar_lea.vmem %s13660_s9, %s7296_s25 }
  0x18   : > { %s7703_s28 = scalar_lea.vmem %s13963_s6, %s7296_s25  ;;  %s7728_s29 = scalar_lea.vmem %s13661_s10, %s7296_s25 }
  0x19   : > { %s7708_s0 = scalar_lea.vmem %s13964_s7, %s7296_s25  ;;  %s7738_s21 = scalar_lea.vmem %s13663_s12, %s7296_s25 }
  0x1a   : > { %s7743_s15 = scalar_lea.vmem %s13664_s13, %s7296_s25  ;;  %670 = sbr.rel (%p7180_p4) target bundleno = 200 (0xc8), region = 88 }
  0x1b   : > { %s7713_s19 = scalar_lea.vmem %s13965_s5, %s7388_s24  ;;  %s7733_s24 = scalar_lea.vmem %s13662_s11, %s7296_s25 }
  0x1c   : > { %s13966_s27 = sld [smem:[#allocation183_spill]] (!%p7180_p4) }
  0x1f   : > { %v679_v4 = vld [vmem:[%s13655_s4 + $0x40] sm:$0xff]  ;;  %vm691_vm0 = vcmask 261120   ;;  %v680_v8 = vld [vmem:[%s13655_s4 + $0x48] sm:$0xff]  ;;  %v681_v12 = vld [vmem:[%s13655_s4 + $0x50] sm:$0xff]  ;;  %vm805_vm1 = vcmask 523264  }
  0x20   : > { %v683_v5 = vld [vmem:[%s13655_s4 + $0x60] sm:$0xff]  ;;  %v684_v9 = vld [vmem:[%s13655_s4 + $0x68] sm:$0xff]  ;;  %v685_v13 = vld [vmem:[%s13655_s4 + $0x70] sm:$0xff] }
  0x21   : > { %v671_v6 = vld [vmem:[%s13655_s4] sm:$0xff]  ;;  %v672_v10 = vld [vmem:[%s13655_s4 + $0x8] sm:$0xff]  ;;  %v673_v14 = vld [vmem:[%s13655_s4 + $0x10] sm:$0xff] }
  0x22   : > { %v690_v0 = vld [vmem:[%s13966_s27 + $0x18] sm:$0xff]  ;;  %v689_v1 = vld [vmem:[%s13966_s27 + $0x10] sm:$0xff]  ;;  %v688_v2 = vld [vmem:[%s13966_s27 + $0x8] sm:$0xff] }
  0x23   : > { %7305 = vmatpush.msra.mxu2 %v690_v0  ;;  %7306 = vmatpush.msra.mxu3 %v690_v0  ;;  %v687_v3 = vld [vmem:[%s13966_s27] sm:$0xff]  ;;  %v676_v11 = vld [vmem:[%s13655_s4 + $0x28] sm:$0xff]  ;;  %v677_v15 = vld [vmem:[%s13655_s4 + $0x30] sm:$0xff] }
  0x24   : > { %752 = vmatpush.msra.mxu0 %v690_v0  ;;  %7304 = vmatpush.msra.mxu1 %v690_v0  ;;  %v675_v7 = vld [vmem:[%s13655_s4 + $0x20] sm:$0xff]  ;;  %v682_v16 = vld [vmem:[%s13655_s4 + $0x58] sm:$0xff] }
  0x25   : > { %7308 = vmatpush.msra.mxu2 %v689_v1  ;;  %7309 = vmatpush.msra.mxu3 %v689_v1  ;;  %v686_v17 = vld [vmem:[%s13655_s4 + $0x78] sm:$0xff] }
  0x26   : > { %753 = vmatpush.msra.mxu0 %v689_v1  ;;  %7307 = vmatpush.msra.mxu1 %v689_v1  ;;  %v674_v18 = vld [vmem:[%s13655_s4 + $0x18] sm:$0xff] }
  0x27   : > { %7311 = vmatpush.msra.mxu2 %v688_v2  ;;  %7312 = vmatpush.msra.mxu3 %v688_v2  ;;  %v678_v19 = vld [vmem:[%s13655_s4 + $0x38] sm:$0xff] }
  0x28   : > { %754 = vmatpush.msra.mxu0 %v688_v2  ;;  %7310 = vmatpush.msra.mxu1 %v688_v2 }
  0x29   : > { %7314 = vmatpush.msra.mxu2 %v687_v3  ;;  %7315 = vmatpush.msra.mxu3 %v687_v3 }
  0x2a   : > { %7189 = vmatmul.msk.f32.vlgmr.msra.gmra.mxu2 %vm691_vm0, %v679_v4  ;;  %7193 = vmatmul.msk.f32.vlgmr.msra.gmra.mxu3 %vm691_vm0, %v683_v5 }
  0x2b   : > { %755 = vmatpush.msra.mxu0 %v687_v3  ;;  %7313 = vmatpush.msra.mxu1 %v687_v3 }
  0x2c   : > { %7181 = vmatmul.msk.f32.vlgmr.msra.gmra.mxu0 %vm691_vm0, %v671_v6  ;;  %7185 = vmatmul.msk.f32.vlgmr.msra.gmra.mxu1 %vm691_vm0, %v675_v7 }
  0x32   : > { %7190 = vmatmul.msk.f32.gmra.mxu2 %vm691_vm0, %v680_v8  ;;  %7194 = vmatmul.msk.f32.gmra.mxu3 %vm691_vm0, %v684_v9 }
  0x34   : > { %7182 = vmatmul.msk.f32.gmra.mxu0 %vm691_vm0, %v672_v10  ;;  %7186 = vmatmul.msk.f32.gmra.mxu1 %vm691_vm0, %v676_v11 }
  0x3a   : > { %7191 = vmatmul.msk.f32.gmra.mxu2 %vm691_vm0, %v681_v12  ;;  %7195 = vmatmul.msk.f32.gmra.mxu3 %vm691_vm0, %v685_v13 }
  0x3c   : > { %7183 = vmatmul.msk.f32.gmra.mxu0 %vm691_vm0, %v673_v14  ;;  %7187 = vmatmul.msk.f32.gmra.mxu1 %vm691_vm0, %v677_v15 }
  0x42   : > { %7192 = vmatmul.msk.f32.gmra.mxu2 %vm691_vm0, %v682_v16  ;;  %7196 = vmatmul.msk.f32.gmra.mxu3 %vm691_vm0, %v686_v17 }
  0x44   : > { %7184 = vmatmul.msk.f32.gmra.mxu0 %vm691_vm0, %v674_v18  ;;  %7188 = vmatmul.msk.f32.gmra.mxu1 %vm691_vm0, %v678_v19 }
  0xa9   : > { %v757_v20 = vpop.f32.mrf.mxu0  ;;  %v769_v21 = vpop.f32.mrf.mxu1 }
  0xaa   : > { %806 = vst.msk [vmem:[#allocation2] sm:$0xff] %vm805_vm1, %v757_v20 }
  0xab   : > { %810 = vst.msk [vmem:[#allocation2 + $0x20] sm:$0xff] %vm805_vm1, %v769_v21 }
  0xad   : > { %v781_v22 = vpop.f32.mrf.mxu2  ;;  %v793_v23 = vpop.f32.mrf.mxu3 }
  0xae   : > { %814 = vst.msk [vmem:[#allocation2 + $0x40] sm:$0xff] %vm805_vm1, %v781_v22 }
  0xaf   : > { %818 = vst.msk [vmem:[#allocation2 + $0x60] sm:$0xff] %vm805_vm1, %v793_v23 }
  0xb1   : > { %v760_v24 = vpop.f32.mrf.mxu0  ;;  %v772_v25 = vpop.f32.mrf.mxu1 }
  0xb2   : > { %807 = vst.msk [vmem:[#allocation2 + $0x8] sm:$0xff] %vm805_vm1, %v760_v24 }
  0xb3   : > { %811 = vst.msk [vmem:[#allocation2 + $0x28] sm:$0xff] %vm805_vm1, %v772_v25 }
  0xb5   : > { %v784_v26 = vpop.f32.mrf.mxu2  ;;  %v796_v27 = vpop.f32.mrf.mxu3 }
  0xb6   : > { %815 = vst.msk [vmem:[#allocation2 + $0x48] sm:$0xff] %vm805_vm1, %v784_v26 }
  0xb7   : > { %819 = vst.msk [vmem:[#allocation2 + $0x68] sm:$0xff] %vm805_vm1, %v796_v27 }
  0xb9   : > { %v763_v28 = vpop.f32.mrf.mxu0  ;;  %v775_v29 = vpop.f32.mrf.mxu1 }
  0xba   : > { %808 = vst.msk [vmem:[#allocation2 + $0x10] sm:$0xff] %vm805_vm1, %v763_v28 }
  0xbb   : > { %812 = vst.msk [vmem:[#allocation2 + $0x30] sm:$0xff] %vm805_vm1, %v775_v29 }
  0xbd   : > { %v787_v30 = vpop.f32.mrf.mxu2  ;;  %v799_v31 = vpop.f32.mrf.mxu3 }
  0xbe   : > { %816 = vst.msk [vmem:[#allocation2 + $0x50] sm:$0xff] %vm805_vm1, %v787_v30 }
  0xbf   : > { %820 = vst.msk [vmem:[#allocation2 + $0x70] sm:$0xff] %vm805_vm1, %v799_v31 }
  0xc1   : > { %v766_v32 = vpop.f32.mrf.mxu0  ;;  %v778_v33 = vpop.f32.mrf.mxu1 }
  0xc2   : > { %809 = vst.msk [vmem:[#allocation2 + $0x18] sm:$0xff] %vm805_vm1, %v766_v32 }
  0xc3   : > { %813 = vst.msk [vmem:[#allocation2 + $0x38] sm:$0xff] %vm805_vm1, %v778_v33 }
  0xc5   : > { %v790_v34 = vpop.f32.mrf.mxu2  ;;  %v802_v35 = vpop.f32.mrf.mxu3 }
  0xc6   : > { %817 = vst.msk [vmem:[#allocation2 + $0x58] sm:$0xff] %vm805_vm1, %v790_v34 }
  0xc7   : > { %821 = vst.msk [vmem:[#allocation2 + $0x78] sm:$0xff] %vm805_vm1, %v802_v35 }
  0xc8 PF: > { %v836_v37 = vld [vmem:[#allocation2 + $0x70] sm:$0xff]  ;;  %v835_v38 = vld [vmem:[#allocation2 + $0x68] sm:$0xff]  ;;  %v834_v39 = vld [vmem:[#allocation2 + $0x60] sm:$0xff]  ;;  %s13967_s3 = sld [smem:[#allocation184_spill]]  ;;  %vm1063_vm2 = vcmask 523264   ;;  %p7293_p5 = scmp.ne.s32.totalorder %s7694_s22, 6 }
  0xc9   : > { %v832_v41 = vld [vmem:[#allocation2 + $0x50] sm:$0xff]  ;;  %v831_v42 = vld [vmem:[#allocation2 + $0x48] sm:$0xff]  ;;  %v830_v43 = vld [vmem:[#allocation2 + $0x40] sm:$0xff]  ;;  %s15080_s17 = sld [smem:[#allocation188_spill]] (!%p7293_p5) }
  0xca   : > { %v829_v44 = vld [vmem:[#allocation2 + $0x38] sm:$0xff]  ;;  %v828_v45 = vld [vmem:[#allocation2 + $0x30] sm:$0xff]  ;;  %v827_v46 = vld [vmem:[#allocation2 + $0x28] sm:$0xff]  ;;  %s15081_s5 = sld [smem:[#allocation189_spill]] (!%p7293_p5) }
  0xcb   : > { %v826_v47 = vld [vmem:[#allocation2 + $0x20] sm:$0xff]  ;;  %v825_v48 = vld [vmem:[#allocation2 + $0x18] sm:$0xff]  ;;  %v824_v49 = vld [vmem:[#allocation2 + $0x10] sm:$0xff] }
  0xcc   : > { %v823_v50 = vld [vmem:[#allocation2 + $0x8] sm:$0xff]  ;;  %v822_v51 = vld [vmem:[#allocation2] sm:$0xff]  ;;  %v840_v54 = vld [vmem:[%s7713_s19 + $0x10] sm:$0xff] }
  0xcd   : > { %v833_v40 = vld [vmem:[#allocation2 + $0x58] sm:$0xff]  ;;  %v838_v52 = vld [vmem:[%s7713_s19] sm:$0xff]  ;;  %v839_v53 = vld [vmem:[%s7713_s19 + $0x8] sm:$0xff] }
  0xce   : > { %v837_v36 = vld [vmem:[#allocation2 + $0x78] sm:$0xff]  ;;  %v842_v56 = vld [vmem:[%s7713_s19 + $0x20] sm:$0xff]  ;;  %v843_v57 = vld [vmem:[%s7713_s19 + $0x28] sm:$0xff] }
  0xcf   : > { %886 = vmatpush.msra.mxu0 %v837_v36  ;;  %v841_v55 = vld [vmem:[%s7713_s19 + $0x18] sm:$0xff]  ;;  %v844_v58 = vld [vmem:[%s7713_s19 + $0x30] sm:$0xff]  ;;  %v846_v60 = vld [vmem:[%s7713_s19 + $0x40] sm:$0xff] }
  0xd0   : > { %v845_v59 = vld [vmem:[%s7713_s19 + $0x38] sm:$0xff]  ;;  %v847_v61 = vld [vmem:[%s7713_s19 + $0x48] sm:$0xff]  ;;  %v848_v62 = vld [vmem:[%s7713_s19 + $0x50] sm:$0xff] }
  0xd1   : > { %887 = vmatpush.msra.mxu0 %v836_v37  ;;  %v1061_v63 = vld [vmem:[%s13967_s3 + $0x70] sm:$0xff]  ;;  %v849_v0 = vld [vmem:[%s7713_s19 + $0x58] sm:$0xff]  ;;  %v1059_v1 = vld [vmem:[%s13967_s3 + $0x60] sm:$0xff] }
  0xd2   : > { %7316 = vmatpush.msra.mxu1 %v1061_v63  ;;  %7317 = vmatpush.msra.mxu2 %v1061_v63  ;;  %v1057_v2 = vld [vmem:[%s13967_s3 + $0x50] sm:$0xff]  ;;  %v1055_v3 = vld [vmem:[%s13967_s3 + $0x40] sm:$0xff]  ;;  %v851_v9 = vld [vmem:[%s7713_s19 + $0x68] sm:$0xff] }
  0xd3   : > { %888 = vmatpush.msra.mxu0 %v835_v38  ;;  %7318 = vmatpush.msra.mxu3 %v1061_v63  ;;  %v850_v4 = vld [vmem:[%s7713_s19 + $0x60] sm:$0xff]  ;;  %v1053_v5 = vld [vmem:[%s13967_s3 + $0x30] sm:$0xff]  ;;  %v853_v11 = vld [vmem:[%s7713_s19 + $0x78] sm:$0xff] }
  0xd4   : > { %7319 = vmatpush.msra.mxu1 %v1059_v1  ;;  %7320 = vmatpush.msra.mxu2 %v1059_v1  ;;  %v1051_v6 = vld [vmem:[%s13967_s3 + $0x20] sm:$0xff]  ;;  %v1049_v7 = vld [vmem:[%s13967_s3 + $0x10] sm:$0xff]  ;;  %v855_v15 = vld [vmem:[%s7713_s19 + $0x88] sm:$0xff] }
  0xd5   : > { %889 = vmatpush.msra.mxu0 %v834_v39  ;;  %7321 = vmatpush.msra.mxu3 %v1059_v1  ;;  %v1047_v8 = vld [vmem:[%s13967_s3] sm:$0xff]  ;;  %v852_v10 = vld [vmem:[%s7713_s19 + $0x70] sm:$0xff]  ;;  %v857_v19 = vld [vmem:[%s7713_s19 + $0x98] sm:$0xff] }
  0xd6   : > { %7322 = vmatpush.msra.mxu1 %v1057_v2  ;;  %7323 = vmatpush.msra.mxu2 %v1057_v2  ;;  %v854_v13 = vld [vmem:[%s7713_s19 + $0x80] sm:$0xff]  ;;  %v856_v17 = vld [vmem:[%s7713_s19 + $0x90] sm:$0xff]  ;;  %v859_v23 = vld [vmem:[%s7713_s19 + $0xa8] sm:$0xff] }
  0xd7   : > { %890 = vmatpush.msra.mxu0 %v833_v40  ;;  %7324 = vmatpush.msra.mxu3 %v1057_v2  ;;  %v858_v21 = vld [vmem:[%s7713_s19 + $0xa0] sm:$0xff]  ;;  %v1062_v24 = vld [vmem:[%s13967_s3 + $0x78] sm:$0xff]  ;;  %v1060_v25 = vld [vmem:[%s13967_s3 + $0x68] sm:$0xff] }
  0xd8   : > { %7325 = vmatpush.msra.mxu1 %v1055_v3  ;;  %7326 = vmatpush.msra.mxu2 %v1055_v3  ;;  %v1058_v26 = vld [vmem:[%s13967_s3 + $0x58] sm:$0xff]  ;;  %v1056_v27 = vld [vmem:[%s13967_s3 + $0x48] sm:$0xff]  ;;  %v860_v29 = vld [vmem:[%s7713_s19 + $0xb0] sm:$0xff] }
  0xd9   : > { %891 = vmatpush.msra.mxu0 %v832_v41  ;;  %7327 = vmatpush.msra.mxu3 %v1055_v3  ;;  %v1054_v30 = vld [vmem:[%s13967_s3 + $0x38] sm:$0xff]  ;;  %v1052_v31 = vld [vmem:[%s13967_s3 + $0x28] sm:$0xff]  ;;  %v862_v37 = vld [vmem:[%s7713_s19 + $0xc0] sm:$0xff] }
  0xda   : > { %7328 = vmatpush.msra.mxu1 %v1053_v5  ;;  %7329 = vmatpush.msra.mxu2 %v1053_v5  ;;  %v1050_v32 = vld [vmem:[%s13967_s3 + $0x18] sm:$0xff]  ;;  %v1048_v33 = vld [vmem:[%s13967_s3 + $0x8] sm:$0xff]  ;;  %v864_v41 = vld [vmem:[%s7713_s19 + $0xd0] sm:$0xff] }
  0xdb   : > { %892 = vmatpush.msra.mxu0 %v831_v42  ;;  %7330 = vmatpush.msra.mxu3 %v1053_v5  ;;  %v861_v35 = vld [vmem:[%s7713_s19 + $0xb8] sm:$0xff]  ;;  %v863_v39 = vld [vmem:[%s7713_s19 + $0xc8] sm:$0xff]  ;;  %v1256_v42 = vld [vmem:[%s13653_s2 + $0x70] sm:$0xff] }
  0xdc   : > { %7331 = vmatpush.msra.mxu1 %v1051_v6  ;;  %7332 = vmatpush.msra.mxu2 %v1051_v6 }
  0xdd   : > { %893 = vmatpush.msra.mxu0 %v830_v43  ;;  %7333 = vmatpush.msra.mxu3 %v1051_v6  ;;  %v1257_v43 = vld [vmem:[%s13653_s2 + $0x78] sm:$0xff] }
  0xde   : > { %7334 = vmatpush.msra.mxu1 %v1049_v7  ;;  %7335 = vmatpush.msra.mxu2 %v1049_v7 }
  0xdf   : > { %894 = vmatpush.msra.mxu0 %v829_v44  ;;  %7336 = vmatpush.msra.mxu3 %v1049_v7  ;;  %v1254_v44 = vld [vmem:[%s13653_s2 + $0x60] sm:$0xff] }
  0xe0   : > { %7337 = vmatpush.msra.mxu1 %v1047_v8  ;;  %7338 = vmatpush.msra.mxu2 %v1047_v8 }
  0xe1   : > { %895 = vmatpush.msra.mxu0 %v828_v45  ;;  %7339 = vmatpush.msra.mxu3 %v1047_v8  ;;  %v1255_v45 = vld [vmem:[%s13653_s2 + $0x68] sm:$0xff] }
  0xe2   : > { %1185 = vmatpush.msrb.mxu2 %v1062_v24  ;;  %1475 = vmatpush.msrb.mxu1 %v1257_v43  ;;  %v879_v24 = vld [vmem:[%s7713_s19 + $0x148] sm:$0xff] }
  0xe3   : > { %896 = vmatpush.msra.mxu0 %v827_v46  ;;  %1362 = vmatpush.msrb.mxu3 %v1256_v42  ;;  %v1252_v46 = vld [vmem:[%s13653_s2 + $0x50] sm:$0xff] }
  0xe4   : > { %1186 = vmatpush.msrb.mxu2 %v1060_v25  ;;  %1476 = vmatpush.msrb.mxu1 %v1255_v45 }
  0xe5   : > { %897 = vmatpush.msra.mxu0 %v826_v47  ;;  %1363 = vmatpush.msrb.mxu3 %v1254_v44  ;;  %v1253_v47 = vld [vmem:[%s13653_s2 + $0x58] sm:$0xff] }
  0xe6   : > { %1187 = vmatpush.msrb.mxu2 %v1058_v26  ;;  %1477 = vmatpush.msrb.mxu1 %v1253_v47  ;;  %v880_v26 = vld [vmem:[%s7713_s19 + $0x150] sm:$0xff]  ;;  %v885_v44 = vld [vmem:[%s7713_s19 + $0x178] sm:$0xff] }
  0xe7   : > { %898 = vmatpush.msra.mxu0 %v825_v48  ;;  %1364 = vmatpush.msrb.mxu3 %v1252_v46  ;;  %v1250_v48 = vld [vmem:[%s13653_s2 + $0x40] sm:$0xff] }
  0xe8   : > { %1188 = vmatpush.msrb.mxu2 %v1056_v27 }
  0xe9   : > { %899 = vmatpush.msra.mxu0 %v824_v49  ;;  %v1251_v49 = vld [vmem:[%s13653_s2 + $0x48] sm:$0xff]  ;;  %1365 = vmatpush.msrb.mxu3 %v1250_v48 }
  0xea   : > { %1189 = vmatpush.msrb.mxu2 %v1054_v30  ;;  %1478 = vmatpush.msrb.mxu1 %v1251_v49 }
  0xeb   : > { %900 = vmatpush.msra.mxu0 %v823_v50 }
  0xec   : > { %1190 = vmatpush.msrb.mxu2 %v1052_v31  ;;  %v882_v31 = vld [vmem:[%s7713_s19 + $0x160] sm:$0xff] }
  0xed   : > { %901 = vmatpush.msra.mxu0 %v822_v51  ;;  %v865_v51 = vld [vmem:[%s7713_s19 + $0xd8] sm:$0xff] }
  0xee   : > { %902 = vmatmul.f32.vlgmr.msra.gmra.mxu0 %v838_v52  ;;  %1191 = vmatpush.msrb.mxu2 %v1050_v32  ;;  %v1248_v52 = vld [vmem:[%s13653_s2 + $0x30] sm:$0xff] }
  0xef   : > { %1120 = vmatpush.msrb.mxu0 %v1061_v63  ;;  %1366 = vmatpush.msrb.mxu3 %v1248_v52  ;;  %v867_v63 = vld [vmem:[%s7713_s19 + $0xe8] sm:$0xff] }
  0xf0   : > { %1192 = vmatpush.msrb.mxu2 %v1048_v33 }
  0xf1   : > { %1121 = vmatpush.msrb.mxu0 %v1059_v1  ;;  %v868_v1 = vld [vmem:[%s7713_s19 + $0xf0] sm:$0xff] }
  0xf3   : > { %1122 = vmatpush.msrb.mxu0 %v1057_v2 }
  0xf5   : > { %1123 = vmatpush.msrb.mxu0 %v1055_v3  ;;  %v869_v3 = vld [vmem:[%s7713_s19 + $0xf8] sm:$0xff] }
  0xf6   : > { %905 = vmatmul.f32.gmra.mxu0 %v839_v53  ;;  %v1249_v53 = vld [vmem:[%s13653_s2 + $0x38] sm:$0xff] }
  0xf7   : > { %1124 = vmatpush.msrb.mxu0 %v1053_v5  ;;  %1479 = vmatpush.msrb.mxu1 %v1249_v53  ;;  %v870_v5 = vld [vmem:[%s7713_s19 + $0x100] sm:$0xff] }
  0xf9   : > { %1125 = vmatpush.msrb.mxu0 %v1051_v6 }
  0xfb   : > { %1126 = vmatpush.msrb.mxu0 %v1049_v7  ;;  %v871_v7 = vld [vmem:[%s7713_s19 + $0x108] sm:$0xff] }
  0xfd   : > { %1127 = vmatpush.msrb.mxu0 %v1047_v8 }
  0xfe   : > { %908 = vmatmul.f32.gmra.mxu0 %v840_v54  ;;  %v1246_v54 = vld [vmem:[%s13653_s2 + $0x20] sm:$0xff] }
  0xff   : > { %1367 = vmatpush.msrb.mxu3 %v1246_v54 }
 0x106   : > { %911 = vmatmul.f32.gmra.mxu0 %v841_v55  ;;  %v1247_v55 = vld [vmem:[%s13653_s2 + $0x28] sm:$0xff] }
 0x107   : > { %1480 = vmatpush.msrb.mxu1 %v1247_v55 }
 0x10e   : > { %914 = vmatmul.f32.gmra.mxu0 %v842_v56  ;;  %v1244_v56 = vld [vmem:[%s13653_s2 + $0x10] sm:$0xff] }
 0x10f   : > { %1368 = vmatpush.msrb.mxu3 %v1244_v56 }
 0x116   : > { %917 = vmatmul.f32.gmra.mxu0 %v843_v57  ;;  %v1245_v57 = vld [vmem:[%s13653_s2 + $0x18] sm:$0xff] }
 0x117   : > { %1481 = vmatpush.msrb.mxu1 %v1245_v57 }
 0x11e   : > { %920 = vmatmul.f32.gmra.mxu0 %v844_v58  ;;  %v1242_v58 = vld [vmem:[%s13653_s2] sm:$0xff] }
 0x11f   : > { %1369 = vmatpush.msrb.mxu3 %v1242_v58 }
 0x126   : > { %923 = vmatmul.f32.gmra.mxu0 %v845_v59  ;;  %v1243_v59 = vld [vmem:[%s13653_s2 + $0x8] sm:$0xff] }
 0x127   : > { %1482 = vmatpush.msrb.mxu1 %v1243_v59 }
 0x12e   : > { %926 = vmatmul.f32.gmra.mxu0 %v846_v60 }
 0x136   : > { %929 = vmatmul.f32.gmra.mxu0 %v847_v61  ;;  %v866_v61 = vld [vmem:[%s7713_s19 + $0xe0] sm:$0xff] }
 0x13e   : > { %932 = vmatmul.f32.gmra.mxu0 %v848_v62 }
 0x146   : > { %935 = vmatmul.f32.gmra.mxu0 %v849_v0 }
 0x14e   : > { %938 = vmatmul.f32.gmra.mxu0 %v850_v4 }
 0x156   : > { %941 = vmatmul.f32.gmra.mxu0 %v851_v9  ;;  %v872_v9 = vld [vmem:[%s7713_s19 + $0x110] sm:$0xff] }
 0x15e   : > { %944 = vmatmul.f32.gmra.mxu0 %v852_v10 }
 0x166   : > { %947 = vmatmul.f32.gmra.mxu0 %v853_v11  ;;  %v873_v11 = vld [vmem:[%s7713_s19 + $0x118] sm:$0xff] }
 0x16b   : > { %v7878_v12 = vpop.f32.mrf.mxu0 }
 0x16e   : > { %950 = vmatmul.f32.gmra.mxu0 %v854_v13 }
 0x173   : > { %v7881_v14 = vpop.f32.mrf.mxu0 }
 0x174   : > { %7198 = vmatmul.msk.f32.vlgmr.msra.gmra.mxu1 %vm1063_vm2, %v7881_v14 }
 0x176   : > { %953 = vmatmul.f32.gmra.mxu0 %v855_v15 }
 0x17b   : > { %v7886_v16 = vpop.f32.mrf.mxu0 }
 0x17c   : > { %7199 = vmatmul.msk.f32.gmra.mxu1 %vm1063_vm2, %v7886_v16 }
 0x17e   : > { %956 = vmatmul.f32.gmra.mxu0 %v856_v17 }
 0x183   : > { %v7891_v18 = vpop.f32.mrf.mxu0 }
 0x184   : > { %7200 = vmatmul.msk.f32.gmra.mxu1 %vm1063_vm2, %v7891_v18 }
 0x186   : > { %959 = vmatmul.f32.gmra.mxu0 %v857_v19 }
 0x18b   : > { %v7896_v20 = vpop.f32.mrf.mxu0 }
 0x18c   : > { %7201 = vmatmul.msk.f32.gmra.mxu1 %vm1063_vm2, %v7896_v20 }
 0x18e   : > { %962 = vmatmul.f32.gmra.mxu0 %v858_v21 }
 0x193   : > { %v7901_v22 = vpop.f32.mrf.mxu0 }
 0x194   : > { %7202 = vmatmul.msk.f32.gmra.mxu1 %vm1063_vm2, %v7901_v22 }
 0x196   : > { %965 = vmatmul.f32.gmra.mxu0 %v859_v23 }
 0x19b   : > { %v7918_v28 = vpop.f32.mrf.mxu0 }
 0x19c   : > { %7203 = vmatmul.msk.f32.vlgmr.msra.gmra.mxu2 %vm1063_vm2, %v7918_v28 }
 0x19e   : > { %968 = vmatmul.f32.gmra.mxu0 %v860_v29 }
 0x1a3   : > { %v7935_v34 = vpop.f32.mrf.mxu0 }
 0x1a4   : > { %7204 = vmatmul.msk.f32.gmra.mxu2 %vm1063_vm2, %v7935_v34 }
 0x1a6   : > { %971 = vmatmul.f32.gmra.mxu0 %v861_v35 }
 0x1ab   : > { %v7940_v36 = vpop.f32.mrf.mxu0 }
 0x1ac   : > { %7205 = vmatmul.msk.f32.gmra.mxu2 %vm1063_vm2, %v7940_v36 }
 0x1ae   : > { %974 = vmatmul.f32.gmra.mxu0 %v862_v37 }
 0x1b3   : > { %v7945_v38 = vpop.f32.mrf.mxu0 }
 0x1b4   : > { %7206 = vmatmul.msk.f32.gmra.mxu2 %vm1063_vm2, %v7945_v38 }
 0x1b6   : > { %977 = vmatmul.f32.gmra.mxu0 %v863_v39  ;;  %v884_v39 = vld [vmem:[%s7713_s19 + $0x170] sm:$0xff] }
 0x1bb   : > { %v7950_v40 = vpop.f32.mrf.mxu0 }
 0x1bc   : > { %7207 = vmatmul.msk.f32.gmra.mxu2 %vm1063_vm2, %v7950_v40 }
 0x1be   : > { %980 = vmatmul.f32.gmra.mxu0 %v864_v41 }
 0x1c3   : > { %v7979_v50 = vpop.f32.mrf.mxu0 }
 0x1c4   : > { %7208 = vmatmul.msk.f32.vlgmr.msra.gmra.mxu3 %vm1063_vm2, %v7979_v50  ;;  %7213 = vmatmul.msk.f32.vlgmr.msrb.gmra.mxu2 %vm1063_vm2, %v7878_v12 }
 0x1c6   : > { %983 = vmatmul.f32.gmra.mxu0 %v865_v51 }
 0x1cb   : > { %v8010_v60 = vpop.f32.mrf.mxu0 }
 0x1cc   : > { %7209 = vmatmul.msk.f32.gmra.mxu3 %vm1063_vm2, %v8010_v60  ;;  %7214 = vmatmul.msk.f32.gmra.mxu2 %vm1063_vm2, %v7881_v14  ;;  %v874_v14 = vld [vmem:[%s7713_s19 + $0x120] sm:$0xff] }
 0x1ce   : > { %986 = vmatmul.f32.gmra.mxu0 %v866_v61 }
 0x1d3   : > { %v8017_v62 = vpop.f32.mrf.mxu0 }
 0x1d4   : > { %7210 = vmatmul.msk.f32.gmra.mxu3 %vm1063_vm2, %v8017_v62  ;;  %7215 = vmatmul.msk.f32.gmra.mxu2 %vm1063_vm2, %v7886_v16  ;;  %v875_v16 = vld [vmem:[%s7713_s19 + $0x128] sm:$0xff] }
 0x1d6   : > { %989 = vmatmul.f32.gmra.mxu0 %v867_v63 }
 0x1db   : > { %v8024_v0 = vpop.f32.mrf.mxu0 }
 0x1dc   : > { %7211 = vmatmul.msk.f32.gmra.mxu3 %vm1063_vm2, %v8024_v0  ;;  %7216 = vmatmul.msk.f32.gmra.mxu2 %vm1063_vm2, %v7891_v18  ;;  %v876_v18 = vld [vmem:[%s7713_s19 + $0x130] sm:$0xff] }
 0x1de   : > { %992 = vmatmul.f32.gmra.mxu0 %v868_v1 }
 0x1e3   : > { %v8031_v2 = vpop.f32.mrf.mxu0 }
 0x1e4   : > { %7212 = vmatmul.msk.f32.gmra.mxu3 %vm1063_vm2, %v8031_v2  ;;  %7217 = vmatmul.msk.f32.gmra.mxu2 %vm1063_vm2, %v7896_v20  ;;  %v877_v20 = vld [vmem:[%s7713_s19 + $0x138] sm:$0xff] }
 0x1e6   : > { %995 = vmatmul.f32.gmra.mxu0 %v869_v3 }
 0x1eb   : > { %v951_v4 = vpop.f32.mrf.mxu0 }
 0x1ec   : > { %7218 = vmatmul.msk.f32.gmra.mxu2 %vm1063_vm2, %v7901_v22  ;;  %7229 = vmatmul.msk.f32.vlgmr.msrb.gmra.mxu3 %vm1063_vm2, %v951_v4  ;;  %v878_v22 = vld [vmem:[%s7713_s19 + $0x140] sm:$0xff] }
 0x1ed   : > { %7261 = vmatmul.msk.f32.vlgmr.msrb.gmra.mxu1 %vm1063_vm2, %v951_v4 }
 0x1ee   : > { %998 = vmatmul.f32.gmra.mxu0 %v870_v5 }
 0x1f1   : > { %v8100_v32 = vpop.f32.mrf.mxu1 }
 0x1f3   : > { %v954_v6 = vpop.f32.mrf.mxu0 }
 0x1f4   : > { %7219 = vmatmul.msk.f32.gmra.mxu2 %vm1063_vm2, %v7918_v28  ;;  %7230 = vmatmul.msk.f32.gmra.mxu3 %vm1063_vm2, %v954_v6  ;;  %v881_v28 = vld [vmem:[%s7713_s19 + $0x158] sm:$0xff] }
 0x1f5   : > { %7262 = vmatmul.msk.f32.gmra.mxu1 %vm1063_vm2, %v954_v6 }
 0x1f6   : > { %1001 = vmatmul.f32.gmra.mxu0 %v871_v7 }
 0x1f9   : > { %v8110_v37 = vpop.f32.mrf.mxu1 }
 0x1fb   : > { %v957_v8 = vpop.f32.mrf.mxu0 }
 0x1fc   : > { %7220 = vmatmul.msk.f32.gmra.mxu2 %vm1063_vm2, %v7935_v34  ;;  %7231 = vmatmul.msk.f32.gmra.mxu3 %vm1063_vm2, %v957_v8  ;;  %v883_v34 = vld [vmem:[%s7713_s19 + $0x168] sm:$0xff] }
 0x1fd   : > { %7263 = vmatmul.msk.f32.gmra.mxu1 %vm1063_vm2, %v957_v8 }
 0x1fe   : > { %1004 = vmatmul.f32.gmra.mxu0 %v872_v9 }
 0x201   : > { %v8119_v42 = vpop.f32.mrf.mxu1 }
 0x203   : > { %v960_v10 = vpop.f32.mrf.mxu0 }
 0x204   : > { %7221 = vmatmul.msk.f32.gmra.mxu2 %vm1063_vm2, %v7940_v36  ;;  %7232 = vmatmul.msk.f32.gmra.mxu3 %vm1063_vm2, %v960_v10 }
 0x205   : > { %7264 = vmatmul.msk.f32.gmra.mxu1 %vm1063_vm2, %v960_v10 }
 0x206   : > { %1007 = vmatmul.f32.gmra.mxu0 %v873_v11 }
 0x209   : > { %v8128_v47 = vpop.f32.mrf.mxu1 }
 0x20a   : > { %13975 = vst [vmem:[#allocation12_spill] sm:$0xff] %v8128_v47 }
 0x20b   : > { %v963_v13 = vpop.f32.mrf.mxu0 }
 0x20c   : > { %7222 = vmatmul.msk.f32.gmra.mxu2 %vm1063_vm2, %v7945_v38  ;;  %7233 = vmatmul.msk.f32.gmra.mxu3 %vm1063_vm2, %v963_v13 }
 0x20d   : > { %7265 = vmatmul.msk.f32.gmra.mxu1 %vm1063_vm2, %v963_v13 }
 0x20e   : > { %1010 = vmatmul.f32.gmra.mxu0 %v874_v14 }
 0x211   : > { %v8139_v52 = vpop.f32.mrf.mxu1 }
 0x212   : > { %13978 = vst [vmem:[#allocation15_spill] sm:$0xff] %v8139_v52 }
 0x213   : > { %v966_v15 = vpop.f32.mrf.mxu0 }
 0x214   : > { %7223 = vmatmul.msk.f32.gmra.mxu2 %vm1063_vm2, %v7950_v40  ;;  %7234 = vmatmul.msk.f32.gmra.mxu3 %vm1063_vm2, %v966_v15 }
 0x215   : > { %7266 = vmatmul.msk.f32.gmra.mxu1 %vm1063_vm2, %v966_v15 }
 0x216   : > { %1013 = vmatmul.f32.gmra.mxu0 %v875_v16 }
 0x21b   : > { %v969_v17 = vpop.f32.mrf.mxu0 }
 0x21c   : > { %7224 = vmatmul.msk.f32.gmra.mxu2 %vm1063_vm2, %v7979_v50  ;;  %7235 = vmatmul.msk.f32.gmra.mxu3 %vm1063_vm2, %v969_v17 }
 0x21d   : > { %7267 = vmatmul.msk.f32.gmra.mxu1 %vm1063_vm2, %v969_v17 }
 0x21e   : > { %1016 = vmatmul.f32.gmra.mxu0 %v876_v18 }
 0x21f   : > { %v8096_v29 = vpop.f32.mrf.mxu2 }
 0x220   : > { %13968 = vst [vmem:[#allocation5_spill] sm:$0xff] %v8096_v29 }
 0x223   : > { %v972_v19 = vpop.f32.mrf.mxu0 }
 0x224   : > { %7225 = vmatmul.msk.f32.gmra.mxu2 %vm1063_vm2, %v8010_v60  ;;  %7236 = vmatmul.msk.f32.gmra.mxu3 %vm1063_vm2, %v972_v19 }
 0x225   : > { %7268 = vmatmul.msk.f32.gmra.mxu1 %vm1063_vm2, %v972_v19 }
 0x226   : > { %1019 = vmatmul.f32.gmra.mxu0 %v877_v20 }
 0x227   : > { %v8104_v35 = vpop.f32.mrf.mxu2 }
 0x228   : > { %13969 = vst [vmem:[#allocation6_spill] sm:$0xff] %v8104_v35 }
 0x22b   : > { %v975_v21 = vpop.f32.mrf.mxu0 }
 0x22c   : > { %7226 = vmatmul.msk.f32.gmra.mxu2 %vm1063_vm2, %v8017_v62  ;;  %7237 = vmatmul.msk.f32.gmra.mxu3 %vm1063_vm2, %v975_v21 }
 0x22d   : > { %7269 = vmatmul.msk.f32.gmra.mxu1 %vm1063_vm2, %v975_v21 }
 0x22e   : > { %1022 = vmatmul.f32.gmra.mxu0 %v878_v22 }
 0x22f   : > { %v8115_v40 = vpop.f32.mrf.mxu2 }
 0x230   : > { %13971 = vst [vmem:[#allocation8_spill] sm:$0xff] %v8115_v40 }
 0x233   : > { %v978_v23 = vpop.f32.mrf.mxu0 }
 0x234   : > { %7227 = vmatmul.msk.f32.gmra.mxu2 %vm1063_vm2, %v8024_v0  ;;  %7238 = vmatmul.msk.f32.gmra.mxu3 %vm1063_vm2, %v978_v23 }
 0x235   : > { %7270 = vmatmul.msk.f32.gmra.mxu1 %vm1063_vm2, %v978_v23 }
 0x236   : > { %1025 = vmatmul.f32.gmra.mxu0 %v879_v24 }
 0x237   : > { %v8124_v45 = vpop.f32.mrf.mxu2 }
 0x238   : > { %13973 = vst [vmem:[#allocation10_spill] sm:$0xff] %v8124_v45 }
 0x23b   : > { %v981_v25 = vpop.f32.mrf.mxu0 }
 0x23c   : > { %7228 = vmatmul.msk.f32.gmra.mxu2 %vm1063_vm2, %v8031_v2  ;;  %7239 = vmatmul.msk.f32.gmra.mxu3 %vm1063_vm2, %v981_v25 }
 0x23d   : > { %7271 = vmatmul.msk.f32.gmra.mxu1 %vm1063_vm2, %v981_v25 }
 0x23e   : > { %1028 = vmatmul.f32.gmra.mxu0 %v880_v26 }
 0x23f   : > { %v8134_v49 = vpop.f32.mrf.mxu2 }
 0x240   : > { %13976 = vst [vmem:[#allocation13_spill] sm:$0xff] %v8134_v49 }
 0x243   : > { %v984_v27 = vpop.f32.mrf.mxu0 }
 0x244   : > { %7240 = vmatmul.msk.f32.gmra.mxu3 %vm1063_vm2, %v984_v27 }
 0x245   : > { %7272 = vmatmul.msk.f32.gmra.mxu1 %vm1063_vm2, %v984_v27 }
 0x246   : > { %1031 = vmatmul.f32.gmra.mxu0 %v881_v28 }
 0x247   : > { %v8107_v36 = vpop.f32.mrf.mxu3  ;;  %v8142_v54 = vpop.f32.mrf.mxu2 }
 0x248   : > { %13970 = vst [vmem:[#allocation7_spill] sm:$0xff] %v8107_v36 }
 0x24b   : > { %v987_v30 = vpop.f32.mrf.mxu0 }
 0x24c   : > { %7241 = vmatmul.msk.f32.gmra.mxu3 %vm1063_vm2, %v987_v30 }
 0x24d   : > { %7273 = vmatmul.msk.f32.gmra.mxu1 %vm1063_vm2, %v987_v30 }
 0x24e   : > { %1034 = vmatmul.f32.gmra.mxu0 %v882_v31 }
 0x24f   : > { %v8117_v41 = vpop.f32.mrf.mxu3  ;;  %v8150_v5 = vpop.f32.mrf.mxu2 }
 0x250   : > { %13972 = vst [vmem:[#allocation9_spill] sm:$0xff] %v8117_v41 }
 0x253   : > { %v990_v33 = vpop.f32.mrf.mxu0 }
 0x254   : > { %7242 = vmatmul.msk.f32.gmra.mxu3 %vm1063_vm2, %v990_v33 }
 0x255   : > { %7274 = vmatmul.msk.f32.gmra.mxu1 %vm1063_vm2, %v990_v33 }
 0x256   : > { %1037 = vmatmul.f32.gmra.mxu0 %v883_v34 }
 0x257   : > { %v8126_v46 = vpop.f32.mrf.mxu3 }
 0x258   : > { %13974 = vst [vmem:[#allocation11_spill] sm:$0xff] %v8126_v46 }
 0x25b   : > { %v993_v38 = vpop.f32.mrf.mxu0 }
 0x25c   : > { %7243 = vmatmul.msk.f32.gmra.mxu3 %vm1063_vm2, %v993_v38 }
 0x25d   : > { %7275 = vmatmul.msk.f32.gmra.mxu1 %vm1063_vm2, %v993_v38 }
 0x25e   : > { %1040 = vmatmul.f32.gmra.mxu0 %v884_v39 }
 0x25f   : > { %v8136_v50 = vpop.f32.mrf.mxu3 }
 0x260   : > { %13977 = vst [vmem:[#allocation14_spill] sm:$0xff] %v8136_v50 }
 0x263   : > { %v996_v43 = vpop.f32.mrf.mxu0 }
 0x264   : > { %7244 = vmatmul.msk.f32.gmra.mxu3 %vm1063_vm2, %v996_v43 }
 0x265   : > { %7276 = vmatmul.msk.f32.gmra.mxu1 %vm1063_vm2, %v996_v43 }
 0x266   : > { %1043 = vmatmul.f32.gmra.mxu0 %v885_v44 }
 0x267   : > { %v8145_v55 = vpop.f32.mrf.mxu3 }
 0x268   : > { %13979 = vst [vmem:[#allocation16_spill] sm:$0xff] %v8145_v55 }
 0x26a   : > { %v1484_v56 = vpop.f32.mrf.mxu1 }
 0x26b   : > { %v999_v48 = vpop.f32.mrf.mxu0  ;;  %v3533_v57 = vrot.slane %v1484_v56, 2  ;;  %v3534_v58 = vrot.slane %v1484_v56, 3  ;;  %v3535_v59 = vrot.slane %v1484_v56, 4  ;;  %v3536_v60 = vrot.slane %v1484_v56, 5 }
 0x26c   : > { %7245 = vmatmul.msk.f32.gmra.mxu3 %vm1063_vm2, %v999_v48  ;;  %v3537_v61 = vrot.slane %v1484_v56, 6  ;;  %v3538_v62 = vrot.slane %v1484_v56, 7  ;;  %v3546_v0 = vperm.slane %v1484_v56, 0 }
 0x26d   : > { %7277 = vmatmul.msk.f32.gmra.mxu1 %vm1063_vm2, %v999_v48  ;;  %v3548_v2 = vperm.slane %v3533_v57, 0  ;;  %v3549_v3 = vperm.slane %v3534_v58, 0  ;;  %v3550_v4 = vperm.slane %v3535_v59, 0  ;;  %v3551_v6 = vperm.slane %v3536_v60, 0 }
 0x26e   : > { %7197 = vmatmul.msk.f32.vlgmr.msrb.gmra.mxu0 %vm1063_vm2, %v7878_v12  ;;  %v3532_v12 = vrot.slane %v1484_v56, 1  ;;  %v3552_v7 = vperm.slane %v3537_v61, 0  ;;  %v3553_v8 = vperm.slane %v3538_v62, 0  ;;  %v8155_v10 = vmul.f32 %v3546_v0, %v8142_v54 }
 0x26f   : > { %v8152_v9 = vpop.f32.mrf.mxu3  ;;  %v8158_v11 = vmul.f32 %v3546_v0, %v8150_v5  ;;  %v8167_v15 = vmul.f32 %v3548_v2, %v8142_v54  ;;  %v8170_v16 = vmul.f32 %v3548_v2, %v8150_v5  ;;  %v8173_v17 = vmul.f32 %v3549_v3, %v8142_v54 }
 0x270   : > { %v3547_v1 = vperm.slane %v3532_v12, 0  ;;  %13980 = vst [vmem:[#allocation17_spill] sm:$0xff] %v8152_v9  ;;  %v8176_v18 = vmul.f32 %v3549_v3, %v8150_v5  ;;  %v8179_v19 = vmul.f32 %v3550_v4, %v8142_v54  ;;  %v8182_v20 = vmul.f32 %v3550_v4, %v8150_v5 }
 0x271   : > { %v1582_v21 = vrot.slane %v8152_v9, 1  ;;  %v1583_v22 = vrot.slane %v8152_v9, 2  ;;  %v8187_v23 = vmul.f32 %v3551_v6, %v8142_v54  ;;  %v8190_v24 = vmul.f32 %v3551_v6, %v8150_v5 }
 0x272   : > { %v8161_v13 = vmul.f32 %v3547_v1, %v8142_v54  ;;  %v8164_v14 = vmul.f32 %v3547_v1, %v8150_v5  ;;  %v1584_v25 = vrot.slane %v8152_v9, 3  ;;  %v1585_v26 = vrot.slane %v8152_v9, 4  ;;  %v1487_v27 = vpop.f32.mrf.mxu1 }
 0x273   : > { %v1002_v51 = vpop.f32.mrf.mxu0  ;;  %v8195_v28 = vmul.f32 %v3552_v7, %v8142_v54  ;;  %v1586_v30 = vrot.slane %v8152_v9, 5  ;;  %v1587_v31 = vrot.slane %v8152_v9, 6  ;;  %v1588_v33 = vrot.slane %v8152_v9, 7 }
 0x274   : > { %7246 = vmatmul.msk.f32.gmra.mxu3 %vm1063_vm2, %v1002_v51  ;;  %v8201_v34 = vmul.f32 %v3552_v7, %v8150_v5  ;;  %v8204_v38 = vmul.f32 %v3553_v8, %v8142_v54  ;;  %v8207_v39 = vmul.f32 %v3553_v8, %v8150_v5  ;;  %v13671_v43 = vperm.slane %v8152_v9, 0 }
 0x275   : > { %7278 = vmatmul.msk.f32.gmra.mxu1 %vm1063_vm2, %v1002_v51  ;;  %v8210_v44 = vperm.slane %v1582_v21, 0  ;;  %v8212_v48 = vperm.slane %v1583_v22, 0  ;;  %v3539_v51 = vrot.slane %v1487_v27, 1  ;;  %v8214_v56 = vperm.slane %v1584_v25, 0 }
 0x276   : > { %v8216_v12 = vperm.slane %v1585_v26, 0  ;;  %v3541_v57 = vrot.slane %v1487_v27, 3  ;;  %v3542_v58 = vrot.slane %v1487_v27, 4  ;;  %v8218_v59 = vperm.slane %v1586_v30, 0 }
 0x277   : > { %13981 = vst [vmem:[#allocation18_spill] sm:$0xff] %v8210_v44  ;;  %v8220_v60 = vperm.slane %v1587_v31, 0  ;;  %v8222_v61 = vperm.slane %v1588_v33, 0  ;;  %v3543_v62 = vrot.slane %v1487_v27, 5  ;;  %v3544_v0 = vrot.slane %v1487_v27, 6  ;;  %v8257_v33 = vpop.f32.mrf.mxu3 }
 0x278   : > { %13982 = vst [vmem:[#allocation19_spill] sm:$0xff] %v8212_v48  ;;  %v3545_v1 = vrot.slane %v1487_v27, 7  ;;  %v3554_v2 = vperm.slane %v1487_v27, 0  ;;  %v8231_v3 = vmul.f32 %v8210_v44, %v8100_v32  ;;  %v8235_v4 = vmul.f32 %v8212_v48, %v8100_v32 }
 0x279   : > { %13983 = vst [vmem:[#allocation20_spill] sm:$0xff] %v8214_v56  ;;  %v3555_v6 = vperm.slane %v3539_v51, 0  ;;  %v8239_v8 = vmul.f32 %v8214_v56, %v8100_v32  ;;  %v8243_v21 = vmul.f32 %v8216_v12, %v8100_v32  ;;  %v3557_v22 = vperm.slane %v3541_v57, 0 }
 0x27a   : > { %13984 = vst [vmem:[#allocation21_spill] sm:$0xff] %v8216_v12  ;;  %v3558_v25 = vperm.slane %v3542_v58, 0  ;;  %v8247_v26 = vmul.f32 %v8218_v59, %v8100_v32  ;;  %v8255_v30 = vmul.f32 %v8222_v61, %v8100_v32  ;;  %v3559_v31 = vperm.slane %v3543_v62, 0 }
 0x27b   : > { %v1005_v53 = vpop.f32.mrf.mxu0  ;;  %13985 = vst [vmem:[#allocation22_spill] sm:$0xff] %v8218_v59  ;;  %v3560_v51 = vperm.slane %v3544_v0, 0  ;;  %v8260_v57 = vmul.f32 %v3554_v2, %v8142_v54  ;;  %v8263_v58 = vmul.f32 %v3554_v2, %v8150_v5  ;;  %v8278_v0 = vmul.f32 %v3557_v22, %v8142_v54 }
 0x27c   : > { %7247 = vmatmul.msk.f32.gmra.mxu3 %vm1063_vm2, %v1005_v53  ;;  %13986 = vst [vmem:[#allocation23_spill] sm:$0xff] %v8220_v60  ;;  %v8284_v2 = vmul.f32 %v3558_v25, %v8142_v54  ;;  %v1589_v59 = vrot.slane %v8257_v33, 1  ;;  %v8290_v56 = vmul.f32 %v3558_v25, %v8150_v5  ;;  %v1590_v48 = vrot.slane %v8257_v33, 2 }
 0x27d   : > { %7279 = vmatmul.msk.f32.gmra.mxu1 %vm1063_vm2, %v1005_v53  ;;  %v3540_v53 = vrot.slane %v1487_v27, 2  ;;  %13987 = vst [vmem:[#allocation24_spill] sm:$0xff] %v8222_v61  ;;  %v8251_v27 = vmul.f32 %v8220_v60, %v8100_v32  ;;  %v8269_v60 = vmul.f32 %v3555_v6, %v8150_v5  ;;  %v1591_v44 = vrot.slane %v8257_v33, 3 }
 0x27e   : > { %13988 = vst [vmem:[#allocation25_spill] sm:$0xff] %v8257_v33  ;;  %v8299_v9 = vmul.f32 %v3559_v31, %v8150_v5  ;;  %v8302_v50 = vmul.f32 %v3560_v51, %v8142_v54  ;;  %v1592_v41 = vrot.slane %v8257_v33, 4  ;;  %v1593_v25 = vrot.slane %v8257_v33, 5 }
 0x27f   : > { %v3556_v7 = vperm.slane %v3540_v53, 0  ;;  %v3561_v53 = vperm.slane %v3545_v1, 0  ;;  %v8281_v1 = vmul.f32 %v3557_v22, %v8150_v5  ;;  %13989 = vst [vmem:[#allocation26_spill] sm:$0xff] %v8290_v56  ;;  %v1490_v22 = vpop.f32.mrf.mxu1  ;;  %v8308_v49 = vmul.f32 %v3560_v51, %v8150_v5 }
 0x280   : > { %13991 = vst [vmem:[#allocation28_spill] sm:$0xff] %v8299_v9  ;;  %v1594_v46 = vrot.slane %v8257_v33, 6  ;;  %v13692_v45 = vperm.slane %v8257_v33, 0  ;;  %v8319_v40 = vperm.slane %v1589_v59, 0  ;;  %v3612_v35 = vrot.slane %v1490_v22, 1 }
 0x281   : > { %v8272_v61 = vmul.f32 %v3556_v7, %v8142_v54  ;;  %v8275_v62 = vmul.f32 %v3556_v7, %v8150_v5  ;;  %v8293_v7 = vmul.f32 %v3559_v31, %v8142_v54  ;;  %13992 = vst [vmem:[#allocation29_spill] sm:$0xff] %v8302_v50  ;;  %v8311_v55 = vmul.f32 %v3561_v53, %v8142_v54 }
 0x282   : > { %13993 = vst [vmem:[#allocation30_spill] sm:$0xff] %v8308_v49  ;;  %v1595_v31 = vrot.slane %v8257_v33, 7  ;;  %v8316_v36 = vmul.f32 %v3561_v53, %v8150_v5  ;;  %v8321_v29 = vperm.slane %v1590_v48, 0  ;;  %v3613_v51 = vrot.slane %v1490_v22, 2 }
 0x283   : > { %v1008_v63 = vpop.f32.mrf.mxu0  ;;  %13990 = vst [vmem:[#allocation27_spill] sm:$0xff] %v8293_v7  ;;  %v3614_v52 = vrot.slane %v1490_v22, 3  ;;  %v8327_v47 = vperm.slane %v1593_v25, 0  ;;  %v3616_v49 = vrot.slane %v1490_v22, 5  ;;  %v8329_v50 = vperm.slane %v1594_v46, 0 }
 0x284   : > { %7248 = vmatmul.msk.f32.gmra.mxu3 %vm1063_vm2, %v1008_v63  ;;  %13994 = vst [vmem:[#allocation31_spill] sm:$0xff] %v8311_v55  ;;  %v3615_v55 = vrot.slane %v1490_v22, 4  ;;  %v8331_v5 = vperm.slane %v1595_v31, 0  ;;  %v3617_v53 = vrot.slane %v1490_v22, 6  ;;  %v3618_v59 = vrot.slane %v1490_v22, 7 }
 0x285   : > { %7280 = vmatmul.msk.f32.gmra.mxu1 %vm1063_vm2, %v1008_v63  ;;  %v8227_v63 = vmul.f32 %v13671_v43, %v8100_v32  ;;  %v8266_v43 = vmul.f32 %v3555_v6, %v8142_v54  ;;  %v8287_v6 = vpop.f32.mrf.mxu2  ;;  %13995 = vst [vmem:[#allocation32_spill] sm:$0xff] %v8316_v36  ;;  %v8325_v54 = vperm.slane %v1592_v41, 0  ;;  %v8336_v48 = vmul.f32 %v13692_v45, %v8100_v32 }
 0x286   : > { %13996 = vst [vmem:[#allocation33_spill] sm:$0xff] %v8319_v40  ;;  %v3626_v41 = vperm.slane %v1490_v22, 0  ;;  %v3627_v25 = vperm.slane %v3612_v35, 0  ;;  %v8344_v36 = vmul.f32 %v8321_v29, %v8100_v32  ;;  %v3628_v31 = vperm.slane %v3613_v51, 0 }
 0x287   : > { %13997 = vst [vmem:[#allocation34_spill] sm:$0xff] %v8321_v29  ;;  %v3629_v9 = vperm.slane %v3614_v52, 0  ;;  %v8352_v45 = vmul.f32 %v8325_v54, %v8100_v32  ;;  %v3630_v22 = vperm.slane %v3615_v55, 0  ;;  %v3631_v35 = vperm.slane %v3616_v49, 0 }
 0x288   : > { %13999 = vst [vmem:[#allocation36_spill] sm:$0xff] %v8325_v54  ;;  %v8362_v29 = vmul.f32 %v8329_v50, %v8100_v32  ;;  %v8366_v51 = vmul.f32 %v8331_v5, %v8100_v32  ;;  %v3632_v52 = vperm.slane %v3617_v53, 0  ;;  %v3658_v54 = vmul.f32 %v3626_v41, %v8287_v6 }
 0x289   : > { %14000 = vst [vmem:[#allocation37_spill] sm:$0xff] %v8327_v47  ;;  %v3662_v55 = vmul.f32 %v3628_v31, %v8287_v6  ;;  %v3666_v53 = vmul.f32 %v3630_v22, %v8287_v6 }
 0x28a   : > { %14001 = vst [vmem:[#allocation38_spill] sm:$0xff] %v8329_v50  ;;  %v3664_v50 = vmul.f32 %v3629_v9, %v8287_v6 }
 0x28b   : > { %v1011_v12 = vpop.f32.mrf.mxu0  ;;  %14002 = vst [vmem:[#allocation39_spill] sm:$0xff] %v8331_v5  ;;  %v3668_v5 = vmul.f32 %v3631_v35, %v8287_v6  ;;  %v8397_v56 = vadd.f32 %v3662_v55, %v8167_v15 }
 0x28c   : > { %7249 = vmatmul.msk.f32.gmra.mxu3 %vm1063_vm2, %v1011_v12  ;;  %14003 = vst [vmem:[#allocation40_spill] sm:$0xff] %v8336_v48 }
 0x28d   : > { %7281 = vmatmul.msk.f32.gmra.mxu1 %vm1063_vm2, %v1011_v12  ;;  %v8323_v12 = vperm.slane %v1591_v44, 0  ;;  %v8340_v44 = vmul.f32 %v8319_v40, %v8100_v32  ;;  %14005 = vst [vmem:[#allocation42_spill] sm:$0xff] %v8344_v36  ;;  %v8356_v40 = vmul.f32 %v8327_v47, %v8100_v32  ;;  %v8358_v33 = vpop.f32.mrf.mxu2  ;;  %v3660_v47 = vmul.f32 %v3627_v25, %v8287_v6 }
 0x28e   : > { %14007 = vst [vmem:[#allocation44_spill] sm:$0xff] %v8352_v45  ;;  %v3659_v45 = vmul.f32 %v3626_v41, %v8358_v33  ;;  %v3661_v49 = vmul.f32 %v3627_v25, %v8358_v33  ;;  %v3669_v41 = vmul.f32 %v3631_v35, %v8358_v33  ;;  %v3671_v25 = vmul.f32 %v3632_v52, %v8358_v33 }
 0x28f   : > { %13998 = vst [vmem:[#allocation35_spill] sm:$0xff] %v8323_v12  ;;  %v8348_v46 = vmul.f32 %v8323_v12, %v8100_v32  ;;  %v3633_v12 = vperm.slane %v3618_v59, 0  ;;  %v1377_v32 = vpop.f32.mrf.mxu3  ;;  %v3667_v59 = vmul.f32 %v3630_v22, %v8358_v33  ;;  %v8385_v36 = vadd.f32 %v3658_v54, %v8155_v10 }
 0x290   : > { %14004 = vst [vmem:[#allocation41_spill] sm:$0xff] %v8340_v44  ;;  %v1662_v44 = vrot.slane %v1377_v32, 1  ;;  %v1663_v22 = vrot.slane %v1377_v32, 2  ;;  %v8391_v48 = vadd.f32 %v3660_v47, %v8161_v13  ;;  %v8394_v35 = vadd.f32 %v3661_v49, %v8164_v14 }
 0x291   : > { %14006 = vst [vmem:[#allocation43_spill] sm:$0xff] %v8348_v46  ;;  %v3672_v46 = vmul.f32 %v3633_v12, %v8287_v6  ;;  %v1664_v7 = vrot.slane %v1377_v32, 3  ;;  %v8403_v10 = vadd.f32 %v3664_v50, %v8173_v17  ;;  %v1667_v47 = vrot.slane %v1377_v32, 6 }
 0x292   : > { %14008 = vst [vmem:[#allocation45_spill] sm:$0xff] %v8356_v40  ;;  %v3663_v40 = vmul.f32 %v3628_v31, %v8358_v33  ;;  %v3673_v31 = vmul.f32 %v3633_v12, %v8358_v33  ;;  %v1668_v13 = vrot.slane %v1377_v32, 7  ;;  %v1676_v54 = vperm.slane %v1377_v32, 0 }
 0x293   : > { %14009 = vst [vmem:[#allocation46_spill] sm:$0xff] %v8362_v29  ;;  %v3665_v29 = vmul.f32 %v3629_v9, %v8358_v33  ;;  %v8388_v9 = vadd.f32 %v3659_v45, %v8158_v11  ;;  %v1666_v45 = vrot.slane %v1377_v32, 5  ;;  %v8409_v14 = vadd.f32 %v3666_v53, %v8179_v19 }
 0x294   : > { %14010 = vst [vmem:[#allocation47_spill] sm:$0xff] %v8366_v51  ;;  %v3670_v51 = vmul.f32 %v3632_v52, %v8287_v6  ;;  %v1665_v52 = vrot.slane %v1377_v32, 4  ;;  %v8400_v12 = vadd.f32 %v3663_v40, %v8170_v16  ;;  %v8412_v49 = vadd.f32 %v3667_v59, %v8182_v20 }
 0x295   : > { %v8406_v11 = vadd.f32 %v3665_v29, %v8176_v18  ;;  %v1677_v15 = vperm.slane %v1662_v44, 0  ;;  %v1678_v55 = vperm.slane %v1663_v22, 0  ;;  %v8415_v40 = vadd.f32 %v3668_v5, %v8187_v23  ;;  %v1014_v44 = vpop.f32.mrf.mxu0 }
 0x296   : > { %v8418_v50 = vadd.f32 %v3669_v41, %v8190_v24  ;;  %v1679_v16 = vperm.slane %v1664_v7, 0  ;;  %v1680_v29 = vperm.slane %v1665_v52, 0  ;;  %v8421_v17 = vadd.f32 %v3670_v51, %v8195_v28  ;;  %v1493_v7 = vpop.f32.mrf.mxu1  ;;  %7250 = vmatmul.msk.f32.gmra.mxu3 %vm1063_vm2, %v1014_v44  ;;  %7282 = vmatmul.msk.f32.gmra.mxu1 %vm1063_vm2, %v1014_v44 }
 0x297   : > { %v8424_v18 = vadd.f32 %v3671_v25, %v8201_v34  ;;  %v8427_v19 = vadd.f32 %v3672_v46, %v8204_v38  ;;  %v1681_v20 = vperm.slane %v1666_v45, 0  ;;  %v8430_v32 = vadd.f32 %v3673_v31, %v8207_v39 }
 0x298   : > { %v1682_v23 = vperm.slane %v1667_v47, 0  ;;  %v1683_v5 = vperm.slane %v1668_v13, 0  ;;  %v8433_v24 = vmul.f32 %v1676_v54, %v8110_v37  ;;  %v1709_v28 = vmul.f32 %v1676_v54, %v8119_v42 }
 0x299   : > { %v8438_v34 = vmul.f32 %v1677_v15, %v8110_v37  ;;  %v1711_v38 = vmul.f32 %v1677_v15, %v8119_v42  ;;  %v8442_v46 = vmul.f32 %v1678_v55, %v8110_v37  ;;  %v1713_v39 = vmul.f32 %v1678_v55, %v8119_v42 }
 0x29a   : > { %14011 = vst [vmem:[#allocation48_spill] sm:$0xff] %v8433_v24  ;;  %v8447_v51 = vmul.f32 %v1679_v16, %v8110_v37  ;;  %v1715_v53 = vmul.f32 %v1679_v16, %v8119_v42  ;;  %v8451_v59 = vmul.f32 %v1680_v29, %v8110_v37  ;;  %v1717_v41 = vmul.f32 %v1680_v29, %v8119_v42 }
 0x29b   : > { %14012 = vst [vmem:[#allocation49_spill] sm:$0xff] %v8438_v34  ;;  %v8455_v25 = vmul.f32 %v1681_v20, %v8110_v37  ;;  %v3619_v31 = vrot.slane %v1493_v7, 1  ;;  %v3620_v22 = vrot.slane %v1493_v7, 2  ;;  %v1719_v52 = vmul.f32 %v1681_v20, %v8119_v42 }
 0x29c   : > { %14013 = vst [vmem:[#allocation50_spill] sm:$0xff] %v8442_v46  ;;  %v8459_v45 = vmul.f32 %v1682_v23, %v8110_v37  ;;  %v3621_v47 = vrot.slane %v1493_v7, 3  ;;  %v3622_v13 = vrot.slane %v1493_v7, 4  ;;  %v1721_v54 = vmul.f32 %v1682_v23, %v8119_v42 }
 0x29d   : > { %14014 = vst [vmem:[#allocation51_spill] sm:$0xff] %v8447_v51  ;;  %v8463_v15 = vmul.f32 %v1683_v5, %v8110_v37  ;;  %v3623_v55 = vrot.slane %v1493_v7, 5  ;;  %v3624_v16 = vrot.slane %v1493_v7, 6  ;;  %v1723_v29 = vmul.f32 %v1683_v5, %v8119_v42 }
 0x29e   : > { %14015 = vst [vmem:[#allocation52_spill] sm:$0xff] %v8451_v59  ;;  %v8467_v44 = vadd.f32 %v1709_v28, %v8227_v63  ;;  %v3634_v59 = vperm.slane %v1493_v7, 0  ;;  %v8470_v20 = vadd.f32 %v1711_v38, %v8231_v3  ;;  %v3635_v51 = vperm.slane %v3619_v31, 0 }
 0x29f   : > { %14016 = vst [vmem:[#allocation53_spill] sm:$0xff] %v8455_v25  ;;  %v3625_v25 = vrot.slane %v1493_v7, 7  ;;  %v3636_v23 = vperm.slane %v3620_v22, 0  ;;  %v8476_v46 = vadd.f32 %v1715_v53, %v8239_v8  ;;  %v3637_v5 = vperm.slane %v3621_v47, 0 }
 0x2a0   : > { %14017 = vst [vmem:[#allocation54_spill] sm:$0xff] %v8459_v45  ;;  %v8473_v45 = vadd.f32 %v1713_v39, %v8235_v4  ;;  %v3638_v34 = vperm.slane %v3622_v13, 0  ;;  %v8482_v63 = vadd.f32 %v1719_v52, %v8247_v26  ;;  %v8485_v7 = vadd.f32 %v1721_v54, %v8251_v27  ;;  %v1380_v27 = vpop.f32.mrf.mxu3 }
 0x2a1   : > { %14018 = vst [vmem:[#allocation55_spill] sm:$0xff] %v8463_v15  ;;  %v8479_v15 = vadd.f32 %v1717_v41, %v8243_v21  ;;  %v3639_v3 = vperm.slane %v3623_v55, 0  ;;  %v3640_v28 = vperm.slane %v3624_v16, 0  ;;  %v8488_v4 = vadd.f32 %v1723_v29, %v8255_v30 }
 0x2a2   : > { %v3641_v38 = vperm.slane %v3625_v25, 0  ;;  %v3674_v8 = vmul.f32 %v3634_v59, %v8287_v6  ;;  %v3675_v39 = vmul.f32 %v3634_v59, %v8358_v33  ;;  %v3676_v21 = vmul.f32 %v3635_v51, %v8287_v6 }
 0x2a3   : > { %v3677_v53 = vmul.f32 %v3635_v51, %v8358_v33  ;;  %v3678_v26 = vmul.f32 %v3636_v23, %v8287_v6  ;;  %v3679_v41 = vmul.f32 %v3636_v23, %v8358_v33  ;;  %v3680_v31 = vmul.f32 %v3637_v5, %v8287_v6 }
 0x2a4   : > { %v3681_v22 = vmul.f32 %v3637_v5, %v8358_v33  ;;  %v3682_v30 = vmul.f32 %v3638_v34, %v8287_v6  ;;  %v3683_v25 = vmul.f32 %v3638_v34, %v8358_v33  ;;  %v3684_v52 = vmul.f32 %v3639_v3, %v8287_v6 }
 0x2a5   : > { %v3685_v59 = vmul.f32 %v3639_v3, %v8358_v33  ;;  %v3686_v47 = vmul.f32 %v3640_v28, %v8287_v6  ;;  %v3687_v51 = vmul.f32 %v3640_v28, %v8358_v33  ;;  %v3688_v13 = vmul.f32 %v3641_v38, %v8287_v6 }
 0x2a6   : > { %v3689_v54 = vmul.f32 %v3641_v38, %v8358_v33  ;;  %v8507_v55 = vadd.f32 %v3674_v8, %v8260_v57  ;;  %v1669_v16 = vrot.slane %v1380_v27, 1  ;;  %v8510_v29 = vadd.f32 %v3675_v39, %v8263_v58 }
 0x2a7   : > { %v8513_v34 = vadd.f32 %v3676_v21, %v8266_v43  ;;  %v1670_v23 = vrot.slane %v1380_v27, 2  ;;  %v1671_v5 = vrot.slane %v1380_v27, 3  ;;  %v8516_v3 = vadd.f32 %v3677_v53, %v8269_v60 }
 0x2a8   : > { %v8519_v28 = vadd.f32 %v3678_v26, %v8272_v61  ;;  %v8522_v33 = vadd.f32 %v3679_v41, %v8275_v62  ;;  %v1672_v57 = vrot.slane %v1380_v27, 4  ;;  %v8525_v6 = vadd.f32 %v3680_v31, %v8278_v0  ;;  %v14021_v61 = vld [vmem:[#allocation26_spill] sm:$0xff]  ;;  %v14023_v62 = vld [vmem:[#allocation27_spill] sm:$0xff]  ;;  %v14025_v31 = vld [vmem:[#allocation28_spill] sm:$0xff] }
 0x2a9   : > { %v8528_v58 = vadd.f32 %v3681_v22, %v8281_v1  ;;  %v1673_v43 = vrot.slane %v1380_v27, 5  ;;  %v1674_v38 = vrot.slane %v1380_v27, 6  ;;  %v8531_v8 = vadd.f32 %v3682_v30, %v8284_v2  ;;  %v14027_v1 = vld [vmem:[#allocation29_spill] sm:$0xff] }
 0x2aa   : > { %v1675_v60 = vrot.slane %v1380_v27, 7  ;;  %v1684_v39 = vperm.slane %v1380_v27, 0  ;;  %v1685_v21 = vperm.slane %v1669_v16, 0  ;;  %v8534_v53 = vadd.f32 %v3683_v25, %v14021_v61  ;;  %v1017_v27 = vpop.f32.mrf.mxu0  ;;  %v8548_v16 = vpop.f32.mrf.mxu2  ;;  %v14031_v25 = vld [vmem:[#allocation31_spill] sm:$0xff] }
 0x2ab   : > { %14019 = vst [vmem:[#allocation56_spill] sm:$0xff] %v8528_v58  ;;  %v8537_v26 = vadd.f32 %v3684_v52, %v14023_v62  ;;  %v1686_v41 = vperm.slane %v1670_v23, 0  ;;  %v1687_v0 = vperm.slane %v1671_v5, 0  ;;  %v8540_v24 = vadd.f32 %v3685_v59, %v14025_v31  ;;  %v14029_v58 = vld [vmem:[#allocation30_spill] sm:$0xff]  ;;  %v14033_v52 = vld [vmem:[#allocation32_spill] sm:$0xff]  ;;  %v1496_v59 = vpop.f32.mrf.mxu1  ;;  %7251 = vmatmul.msk.f32.gmra.mxu3 %vm1063_vm2, %v1017_v27  ;;  %7283 = vmatmul.msk.f32.gmra.mxu1 %vm1063_vm2, %v1017_v27 }
 0x2ac   : > { %14020 = vst [vmem:[#allocation57_spill] sm:$0xff] %v8531_v8  ;;  %v8543_v22 = vadd.f32 %v3686_v47, %v14027_v1  ;;  %v8546_v2 = vadd.f32 %v3687_v51, %v14029_v58  ;;  %v1688_v30 = vperm.slane %v1672_v57, 0  ;;  %v8551_v61 = vadd.f32 %v3688_v13, %v14031_v25 }
 0x2ad   : > { %14022 = vst [vmem:[#allocation26_spill] sm:$0xff] %v8534_v53  ;;  %v8554_v62 = vadd.f32 %v3689_v54, %v14033_v52  ;;  %v1689_v23 = vperm.slane %v1673_v43, 0  ;;  %v1690_v5 = vperm.slane %v1674_v38, 0  ;;  %v1691_v47 = vperm.slane %v1675_v60, 0  ;;  %v14047_v53 = vld [vmem:[#allocation44_spill] sm:$0xff] }
 0x2ae   : > { %14024 = vst [vmem:[#allocation27_spill] sm:$0xff] %v8537_v26  ;;  %v8558_v31 = vmul.f32 %v1684_v39, %v8110_v37  ;;  %v1725_v51 = vmul.f32 %v1684_v39, %v8119_v42  ;;  %v8562_v57 = vmul.f32 %v1685_v21, %v8110_v37  ;;  %v1727_v13 = vmul.f32 %v1685_v21, %v8119_v42 }
 0x2af   : > { %14026 = vst [vmem:[#allocation28_spill] sm:$0xff] %v8540_v24  ;;  %v8567_v54 = vmul.f32 %v1686_v41, %v8110_v37  ;;  %v1729_v58 = vmul.f32 %v1686_v41, %v8119_v42  ;;  %v8571_v43 = vmul.f32 %v1687_v0, %v8110_v37  ;;  %v1731_v38 = vmul.f32 %v1687_v0, %v8119_v42 }
 0x2b0   : > { %14028 = vst [vmem:[#allocation29_spill] sm:$0xff] %v8543_v22  ;;  %v8575_v60 = vmul.f32 %v1688_v30, %v8110_v37  ;;  %v1733_v39 = vmul.f32 %v1688_v30, %v8119_v42  ;;  %v3724_v1 = vrot.slane %v1496_v59, 1  ;;  %v8579_v27 = vmul.f32 %v1689_v23, %v8110_v37 }
 0x2b1   : > { %14030 = vst [vmem:[#allocation30_spill] sm:$0xff] %v8546_v2  ;;  %v1735_v21 = vmul.f32 %v1689_v23, %v8119_v42  ;;  %v3725_v25 = vrot.slane %v1496_v59, 2  ;;  %v3726_v52 = vrot.slane %v1496_v59, 3  ;;  %v8583_v41 = vmul.f32 %v1690_v5, %v8110_v37  ;;  %v14044_v23 = vld [vmem:[#allocation41_spill] sm:$0xff] }
 0x2b2   : > { %14032 = vst [vmem:[#allocation31_spill] sm:$0xff] %v8551_v61  ;;  %v3728_v0 = vrot.slane %v1496_v59, 5  ;;  %v1739_v30 = vmul.f32 %v1691_v47, %v8119_v42  ;;  %v8594_v61 = vadd.f32 %v1727_v13, %v14044_v23  ;;  %v3738_v2 = vperm.slane %v1496_v59, 0  ;;  %v8608_v13 = vpop.f32.mrf.mxu2 }
 0x2b3   : > { %14034 = vst [vmem:[#allocation32_spill] sm:$0xff] %v8554_v62  ;;  %v14043_v62 = vld [vmem:[#allocation40_spill] sm:$0xff]  ;;  %v3739_v22 = vperm.slane %v3724_v1, 0 }
 0x2b4   : > { %14035 = vst [vmem:[#allocation58_spill] sm:$0xff] %v8558_v31  ;;  %v3730_v31 = vrot.slane %v1496_v59, 7 }
 0x2b5   : > { %14036 = vst [vmem:[#allocation59_spill] sm:$0xff] %v8562_v57  ;;  %v8587_v57 = vmul.f32 %v1691_v47, %v8110_v37  ;;  %v3740_v37 = vperm.slane %v3725_v25, 0  ;;  %v14049_v47 = vld [vmem:[#allocation45_spill] sm:$0xff]  ;;  %v3770_v25 = vmul.f32 %v3738_v2, %v8548_v16 }
 0x2b6   : > { %14037 = vst [vmem:[#allocation60_spill] sm:$0xff] %v8567_v54  ;;  %v3727_v54 = vrot.slane %v1496_v59, 4  ;;  %v8606_v8 = vadd.f32 %v1735_v21, %v14049_v47  ;;  %v3745_v23 = vperm.slane %v3730_v31, 0  ;;  %v3773_v21 = vmul.f32 %v3739_v22, %v8608_v13 }
 0x2b7   : > { %14038 = vst [vmem:[#allocation61_spill] sm:$0xff] %v8571_v43  ;;  %v1737_v43 = vmul.f32 %v1690_v5, %v8119_v42  ;;  %v14046_v5 = vld [vmem:[#allocation43_spill] sm:$0xff]  ;;  %v8603_v42 = vadd.f32 %v1733_v39, %v14047_v53  ;;  %v3771_v53 = vmul.f32 %v3738_v2, %v8608_v13  ;;  %v3772_v39 = vmul.f32 %v3739_v22, %v8548_v16 }
 0x2b8   : > { %14039 = vst [vmem:[#allocation62_spill] sm:$0xff] %v8575_v60  ;;  %v3729_v60 = vrot.slane %v1496_v59, 6  ;;  %v8600_v26 = vadd.f32 %v1731_v38, %v14046_v5  ;;  %v14051_v59 = vld [vmem:[#allocation46_spill] sm:$0xff] }
 0x2b9   : > { %14040 = vst [vmem:[#allocation63_spill] sm:$0xff] %v8579_v27  ;;  %v8591_v27 = vadd.f32 %v1725_v51, %v14043_v62  ;;  %v3742_v62 = vperm.slane %v3727_v54, 0  ;;  %v3743_v51 = vperm.slane %v3728_v0, 0  ;;  %v8611_v1 = vadd.f32 %v1737_v43, %v14051_v59 }
 0x2ba   : > { %14041 = vst [vmem:[#allocation64_spill] sm:$0xff] %v8583_v41  ;;  %v14045_v41 = vld [vmem:[#allocation42_spill] sm:$0xff]  ;;  %v3744_v38 = vperm.slane %v3729_v60, 0  ;;  %v3774_v54 = vmul.f32 %v3740_v37, %v8548_v16  ;;  %v3784_v59 = vmul.f32 %v3745_v23, %v8548_v16 }
 0x2bb   : > { %14042 = vst [vmem:[#allocation65_spill] sm:$0xff] %v8587_v57  ;;  %v8597_v24 = vadd.f32 %v1729_v58, %v14045_v41  ;;  %v3741_v57 = vperm.slane %v3726_v52, 0  ;;  %v14053_v58 = vld [vmem:[#allocation47_spill] sm:$0xff]  ;;  %v3775_v52 = vmul.f32 %v3740_v37, %v8608_v13  ;;  %v3778_v60 = vmul.f32 %v3742_v62, %v8548_v16 }
 0x2bc   : > { %14048 = vst [vmem:[#allocation40_spill] sm:$0xff] %v8603_v42  ;;  %v8614_v41 = vadd.f32 %v1739_v30, %v14053_v58  ;;  %v1383_v30 = vpop.f32.mrf.mxu3  ;;  %v3779_v31 = vmul.f32 %v3742_v62, %v8608_v13  ;;  %v3780_v5 = vmul.f32 %v3743_v51, %v8548_v16  ;;  %v3781_v2 = vmul.f32 %v3743_v51, %v8608_v13 }
 0x2bd   : > { %14050 = vst [vmem:[#allocation41_spill] sm:$0xff] %v8606_v8  ;;  %v3776_v43 = vmul.f32 %v3741_v57, %v8548_v16  ;;  %v3777_v0 = vmul.f32 %v3741_v57, %v8608_v13  ;;  %v3782_v47 = vmul.f32 %v3744_v38, %v8548_v16  ;;  %v3783_v22 = vmul.f32 %v3744_v38, %v8608_v13 }
 0x2be   : > { %14052 = vst [vmem:[#allocation42_spill] sm:$0xff] %v8611_v1  ;;  %v3785_v37 = vmul.f32 %v3745_v23, %v8608_v13  ;;  %v8633_v58 = vadd.f32 %v3770_v25, %v8385_v36  ;;  %v8636_v57 = vadd.f32 %v3771_v53, %v8388_v9  ;;  %v1775_v62 = vrot.slane %v1383_v30, 2 }
 0x2bf   : > { %14054 = vst [vmem:[#allocation43_spill] sm:$0xff] %v8614_v41  ;;  %v1774_v41 = vrot.slane %v1383_v30, 1  ;;  %v8639_v1 = vadd.f32 %v3772_v39, %v8391_v48  ;;  %v8642_v51 = vadd.f32 %v3773_v21, %v8394_v35  ;;  %v1776_v8 = vrot.slane %v1383_v30, 3 }
 0x2c0   : > { %v1777_v38 = vrot.slane %v1383_v30, 4  ;;  %v8645_v42 = vadd.f32 %v3774_v54, %v8397_v56  ;;  %v8648_v23 = vadd.f32 %v3775_v52, %v8400_v12  ;;  %v8651_v36 = vadd.f32 %v3776_v43, %v8403_v10 }
 0x2c1   : > { %v1778_v9 = vrot.slane %v1383_v30, 5  ;;  %v8654_v25 = vadd.f32 %v3777_v0, %v8406_v11  ;;  %v1779_v48 = vrot.slane %v1383_v30, 6  ;;  %v1780_v53 = vrot.slane %v1383_v30, 7 }
 0x2c2   : > { %v1788_v39 = vperm.slane %v1383_v30, 0  ;;  %v8657_v35 = vadd.f32 %v3778_v60, %v8409_v14  ;;  %v8660_v21 = vadd.f32 %v3779_v31, %v8412_v49  ;;  %v1789_v56 = vperm.slane %v1774_v41, 0  ;;  %v1020_v41 = vpop.f32.mrf.mxu0 }
 0x2c3   : > { %v1790_v54 = vperm.slane %v1775_v62, 0  ;;  %v8663_v12 = vadd.f32 %v3780_v5, %v8415_v40  ;;  %v8666_v10 = vadd.f32 %v3781_v2, %v8418_v50  ;;  %v1791_v52 = vperm.slane %v1776_v8, 0  ;;  %v14056_v50 = vld [vmem:[#allocation12_spill] sm:$0xff]  ;;  %v1499_v8 = vpop.f32.mrf.mxu1  ;;  %7252 = vmatmul.msk.f32.gmra.mxu3 %vm1063_vm2, %v1020_v41  ;;  %7284 = vmatmul.msk.f32.gmra.mxu1 %vm1063_vm2, %v1020_v41 }
 0x2c4   : > { %v1792_v11 = vperm.slane %v1777_v38, 0  ;;  %v8669_v43 = vadd.f32 %v3782_v47, %v8421_v17  ;;  %v8672_v0 = vadd.f32 %v3783_v22, %v8424_v18  ;;  %v8675_v14 = vadd.f32 %v3784_v59, %v8427_v19  ;;  %v14058_v17 = vld [vmem:[#allocation15_spill] sm:$0xff] }
 0x2c5   : > { %v1793_v49 = vperm.slane %v1778_v9, 0  ;;  %v8678_v30 = vadd.f32 %v3785_v37, %v8430_v32  ;;  %v1794_v40 = vperm.slane %v1779_v48, 0  ;;  %v1795_v60 = vperm.slane %v1780_v53, 0 }
 0x2c6   : > { %v8681_v31 = vmul.f32 %v1788_v39, %v14056_v50  ;;  %v1821_v5 = vmul.f32 %v1788_v39, %v14058_v17  ;;  %v8686_v18 = vmul.f32 %v1789_v56, %v14056_v50  ;;  %v1823_v19 = vmul.f32 %v1789_v56, %v14058_v17 }
 0x2c7   : > { %14055 = vst [vmem:[#allocation44_spill] sm:$0xff] %v8678_v30  ;;  %v8690_v2 = vmul.f32 %v1790_v54, %v14056_v50  ;;  %v1825_v32 = vmul.f32 %v1790_v54, %v14058_v17  ;;  %v8695_v47 = vmul.f32 %v1791_v52, %v14056_v50  ;;  %v1827_v22 = vmul.f32 %v1791_v52, %v14058_v17 }
 0x2c8   : > { %14057 = vst [vmem:[#allocation45_spill] sm:$0xff] %v8681_v31  ;;  %v8699_v59 = vmul.f32 %v1792_v11, %v14056_v50  ;;  %v1829_v37 = vmul.f32 %v1792_v11, %v14058_v17  ;;  %v8703_v62 = vmul.f32 %v1793_v49, %v14056_v50  ;;  %v3731_v38 = vrot.slane %v1499_v8, 1 }
 0x2c9   : > { %14059 = vst [vmem:[#allocation46_spill] sm:$0xff] %v8686_v18  ;;  %v3732_v9 = vrot.slane %v1499_v8, 2  ;;  %v1831_v48 = vmul.f32 %v1793_v49, %v14058_v17  ;;  %v8707_v53 = vmul.f32 %v1794_v40, %v14056_v50  ;;  %v3733_v39 = vrot.slane %v1499_v8, 3 }
 0x2ca   : > { %14060 = vst [vmem:[#allocation47_spill] sm:$0xff] %v8690_v2  ;;  %v3734_v56 = vrot.slane %v1499_v8, 4  ;;  %v1833_v54 = vmul.f32 %v1794_v40, %v14058_v17  ;;  %v8711_v52 = vmul.f32 %v1795_v60, %v14056_v50  ;;  %v3735_v41 = vrot.slane %v1499_v8, 5 }
 0x2cb   : > { %14061 = vst [vmem:[#allocation12_spill] sm:$0xff] %v8695_v47  ;;  %v1835_v11 = vmul.f32 %v1795_v60, %v14058_v17  ;;  %v3737_v47 = vrot.slane %v1499_v8, 7  ;;  %v3746_v2 = vperm.slane %v1499_v8, 0  ;;  %v8718_v49 = vadd.f32 %v1823_v19, %v8470_v20 }
 0x2cc   : > { %14062 = vst [vmem:[#allocation15_spill] sm:$0xff] %v8699_v59  ;;  %v3736_v59 = vrot.slane %v1499_v8, 6  ;;  %v3747_v18 = vperm.slane %v3731_v38, 0  ;;  %v3748_v40 = vperm.slane %v3732_v9, 0  ;;  %v8724_v31 = vadd.f32 %v1827_v22, %v8476_v46 }
 0x2cd   : > { %14063 = vst [vmem:[#allocation66_spill] sm:$0xff] %v8703_v62  ;;  %v8715_v62 = vadd.f32 %v1821_v5, %v8467_v44  ;;  %v3749_v60 = vperm.slane %v3733_v39, 0  ;;  %v3750_v30 = vperm.slane %v3734_v56, 0  ;;  %v8730_v44 = vadd.f32 %v1831_v48, %v8482_v63 }
 0x2ce   : > { %14064 = vst [vmem:[#allocation67_spill] sm:$0xff] %v8707_v53  ;;  %v8721_v53 = vadd.f32 %v1825_v32, %v8473_v45  ;;  %v8733_v8 = vadd.f32 %v1833_v54, %v8485_v7  ;;  %v3751_v20 = vperm.slane %v3735_v41, 0  ;;  %v3752_v5 = vperm.slane %v3736_v59, 0  ;;  %v1386_v7 = vpop.f32.mrf.mxu3 }
 0x2cf   : > { %14065 = vst [vmem:[#allocation68_spill] sm:$0xff] %v8711_v52  ;;  %v8727_v52 = vadd.f32 %v1829_v37, %v8479_v15  ;;  %v8736_v45 = vadd.f32 %v1835_v11, %v8488_v4  ;;  %v3753_v19 = vperm.slane %v3737_v47, 0  ;;  %v3786_v46 = vmul.f32 %v3746_v2, %v8548_v16 }
 0x2d0   : > { %v3787_v32 = vmul.f32 %v3746_v2, %v8608_v13  ;;  %v3788_v15 = vmul.f32 %v3747_v18, %v8548_v16  ;;  %v3789_v22 = vmul.f32 %v3747_v18, %v8608_v13  ;;  %v3790_v63 = vmul.f32 %v3748_v40, %v8548_v16 }
 0x2d1   : > { %v3791_v37 = vmul.f32 %v3748_v40, %v8608_v13  ;;  %v3792_v38 = vmul.f32 %v3749_v60, %v8548_v16  ;;  %v3793_v59 = vmul.f32 %v3749_v60, %v8608_v13  ;;  %v3794_v4 = vmul.f32 %v3750_v30, %v8548_v16 }
 0x2d2   : > { %v3795_v47 = vmul.f32 %v3750_v30, %v8608_v13  ;;  %v3796_v9 = vmul.f32 %v3751_v20, %v8548_v16  ;;  %v3797_v2 = vmul.f32 %v3751_v20, %v8608_v13  ;;  %v3798_v48 = vmul.f32 %v3752_v5, %v8548_v16 }
 0x2d3   : > { %v3799_v18 = vmul.f32 %v3752_v5, %v8608_v13  ;;  %v3800_v39 = vmul.f32 %v3753_v19, %v8548_v16  ;;  %v3801_v56 = vmul.f32 %v3753_v19, %v8608_v13  ;;  %v8755_v54 = vadd.f32 %v3786_v46, %v8507_v55 }
 0x2d4   : > { %v1781_v41 = vrot.slane %v1386_v7, 1  ;;  %v8758_v11 = vadd.f32 %v3787_v32, %v8510_v29  ;;  %v8761_v30 = vadd.f32 %v3788_v15, %v8513_v34  ;;  %v1782_v40 = vrot.slane %v1386_v7, 2  ;;  %v14069_v29 = vld [vmem:[#allocation56_spill] sm:$0xff]  ;;  %v14071_v32 = vld [vmem:[#allocation57_spill] sm:$0xff] }
 0x2d5   : > { %v1783_v60 = vrot.slane %v1386_v7, 3  ;;  %v8764_v20 = vadd.f32 %v3789_v22, %v8516_v3  ;;  %v8767_v5 = vadd.f32 %v3790_v63, %v8519_v28  ;;  %v8770_v16 = vadd.f32 %v3791_v37, %v8522_v33  ;;  %v14072_v28 = vld [vmem:[#allocation26_spill] sm:$0xff]  ;;  %v14073_v33 = vld [vmem:[#allocation27_spill] sm:$0xff] }
 0x2d6   : > { %v1784_v55 = vrot.slane %v1386_v7, 4  ;;  %v8773_v13 = vadd.f32 %v3792_v38, %v8525_v6  ;;  %v8776_v19 = vadd.f32 %v3793_v59, %v14069_v29  ;;  %v1785_v34 = vrot.slane %v1386_v7, 5  ;;  %v14074_v38 = vld [vmem:[#allocation28_spill] sm:$0xff]  ;;  %v14075_v59 = vld [vmem:[#allocation29_spill] sm:$0xff] }
 0x2d7   : > { %14066 = vst [vmem:[#allocation69_spill] sm:$0xff] %v8764_v20  ;;  %v1786_v46 = vrot.slane %v1386_v7, 6  ;;  %v8779_v15 = vadd.f32 %v3794_v4, %v14071_v32  ;;  %v1787_v3 = vrot.slane %v1386_v7, 7  ;;  %v1796_v22 = vperm.slane %v1386_v7, 0  ;;  %v1023_v7 = vpop.f32.mrf.mxu0 }
 0x2d8   : > { %14067 = vst [vmem:[#allocation70_spill] sm:$0xff] %v8770_v16  ;;  %v1797_v20 = vperm.slane %v1781_v41, 0  ;;  %v8782_v63 = vadd.f32 %v3795_v47, %v14072_v28  ;;  %v8785_v37 = vadd.f32 %v3796_v9, %v14073_v33  ;;  %v1798_v16 = vperm.slane %v1782_v40, 0  ;;  %v8796_v41 = vpop.f32.mrf.mxu2  ;;  %v14079_v47 = vld [vmem:[#allocation31_spill] sm:$0xff]  ;;  %v14081_v9 = vld [vmem:[#allocation32_spill] sm:$0xff]  ;;  %7253 = vmatmul.msk.f32.gmra.mxu3 %vm1063_vm2, %v1023_v7  ;;  %7285 = vmatmul.msk.f32.gmra.mxu1 %vm1063_vm2, %v1023_v7 }
 0x2d9   : > { %14068 = vst [vmem:[#allocation71_spill] sm:$0xff] %v8773_v13  ;;  %v1799_v6 = vperm.slane %v1783_v60, 0  ;;  %v8788_v13 = vadd.f32 %v3797_v2, %v14074_v38  ;;  %v8791_v29 = vadd.f32 %v3798_v48, %v14075_v59  ;;  %v1800_v32 = vperm.slane %v1784_v55, 0  ;;  %v1502_v2 = vpop.f32.mrf.mxu1 }
 0x2da   : > { %14070 = vst [vmem:[#allocation56_spill] sm:$0xff] %v8776_v19  ;;  %v14077_v19 = vld [vmem:[#allocation30_spill] sm:$0xff]  ;;  %v8799_v28 = vadd.f32 %v3800_v39, %v14079_v47  ;;  %v8802_v33 = vadd.f32 %v3801_v56, %v14081_v9  ;;  %v1801_v40 = vperm.slane %v1785_v34, 0  ;;  %v1802_v60 = vperm.slane %v1786_v46, 0 }
 0x2db   : > { %14076 = vst [vmem:[#allocation57_spill] sm:$0xff] %v8791_v29  ;;  %v8794_v4 = vadd.f32 %v3799_v18, %v14077_v19  ;;  %v1803_v48 = vperm.slane %v1787_v3, 0  ;;  %v8806_v38 = vmul.f32 %v1796_v22, %v14056_v50  ;;  %v1837_v18 = vmul.f32 %v1796_v22, %v14058_v17 }
 0x2dc   : > { %14080 = vst [vmem:[#allocation27_spill] sm:$0xff] %v8799_v28  ;;  %v8810_v55 = vmul.f32 %v1797_v20, %v14056_v50  ;;  %v1839_v39 = vmul.f32 %v1797_v20, %v14058_v17  ;;  %v8815_v56 = vmul.f32 %v1798_v16, %v14056_v50  ;;  %v1841_v19 = vmul.f32 %v1798_v16, %v14058_v17 }
 0x2dd   : > { %14078 = vst [vmem:[#allocation26_spill] sm:$0xff] %v8794_v4  ;;  %v8819_v34 = vmul.f32 %v1799_v6, %v14056_v50  ;;  %v1843_v46 = vmul.f32 %v1799_v6, %v14058_v17  ;;  %v8823_v3 = vmul.f32 %v1800_v32, %v14056_v50  ;;  %v1845_v22 = vmul.f32 %v1800_v32, %v14058_v17  ;;  %v14091_v4 = vld [vmem:[#allocation40_spill] sm:$0xff] }
 0x2de   : > { %14082 = vst [vmem:[#allocation28_spill] sm:$0xff] %v8802_v33  ;;  %v3836_v59 = vrot.slane %v1502_v2, 1  ;;  %v8827_v7 = vmul.f32 %v1801_v40, %v14056_v50  ;;  %v1847_v20 = vmul.f32 %v1801_v40, %v14058_v17  ;;  %v3837_v47 = vrot.slane %v1502_v2, 2 }
 0x2df   : > { %14083 = vst [vmem:[#allocation29_spill] sm:$0xff] %v8806_v38  ;;  %v3838_v9 = vrot.slane %v1502_v2, 3  ;;  %v8831_v16 = vmul.f32 %v1802_v60, %v14056_v50  ;;  %v3840_v6 = vrot.slane %v1502_v2, 5  ;;  %v1851_v32 = vmul.f32 %v1803_v48, %v14058_v17 }
 0x2e0   : > { %14084 = vst [vmem:[#allocation30_spill] sm:$0xff] %v8810_v55  ;;  %v8835_v55 = vmul.f32 %v1803_v48, %v14056_v50  ;;  %v3842_v38 = vrot.slane %v1502_v2, 7  ;;  %v8842_v40 = vadd.f32 %v1839_v39, %v8594_v61  ;;  %v3850_v33 = vperm.slane %v1502_v2, 0  ;;  %v14093_v48 = vld [vmem:[#allocation41_spill] sm:$0xff]  ;;  %v8856_v61 = vpop.f32.mrf.mxu2 }
 0x2e1   : > { %14085 = vst [vmem:[#allocation31_spill] sm:$0xff] %v8815_v56  ;;  %v3839_v56 = vrot.slane %v1502_v2, 4  ;;  %v3851_v28 = vperm.slane %v3836_v59, 0  ;;  %v3852_v50 = vperm.slane %v3837_v47, 0  ;;  %v8854_v29 = vadd.f32 %v1847_v20, %v14093_v48 }
 0x2e2   : > { %14086 = vst [vmem:[#allocation32_spill] sm:$0xff] %v8819_v34  ;;  %v1849_v34 = vmul.f32 %v1802_v60, %v14058_v17  ;;  %v8848_v60 = vadd.f32 %v1843_v46, %v8600_v26  ;;  %v8851_v17 = vadd.f32 %v1845_v22, %v14091_v4  ;;  %v3857_v46 = vperm.slane %v3842_v38, 0 }
 0x2e3   : > { %14087 = vst [vmem:[#allocation72_spill] sm:$0xff] %v8823_v3  ;;  %v3841_v3 = vrot.slane %v1502_v2, 6  ;;  %v14095_v2 = vld [vmem:[#allocation42_spill] sm:$0xff]  ;;  %v3882_v59 = vmul.f32 %v3850_v33, %v8796_v41  ;;  %v3883_v4 = vmul.f32 %v3850_v33, %v8856_v61  ;;  %v3884_v22 = vmul.f32 %v3851_v28, %v8796_v41 }
 0x2e4   : > { %14088 = vst [vmem:[#allocation73_spill] sm:$0xff] %v8827_v7  ;;  %v8839_v7 = vadd.f32 %v1837_v18, %v8591_v27  ;;  %v3854_v27 = vperm.slane %v3839_v56, 0  ;;  %v3855_v18 = vperm.slane %v3840_v6, 0  ;;  %v8859_v39 = vadd.f32 %v1849_v34, %v14095_v2  ;;  %v1389_v6 = vpop.f32.mrf.mxu3 }
 0x2e5   : > { %14089 = vst [vmem:[#allocation74_spill] sm:$0xff] %v8831_v16  ;;  %v8845_v16 = vadd.f32 %v1841_v19, %v8597_v24  ;;  %v14097_v24 = vld [vmem:[#allocation43_spill] sm:$0xff]  ;;  %v3856_v26 = vperm.slane %v3841_v3, 0  ;;  %v3885_v20 = vmul.f32 %v3851_v28, %v8856_v61  ;;  %v3886_v56 = vmul.f32 %v3852_v50, %v8796_v41 }
 0x2e6   : > { %14090 = vst [vmem:[#allocation75_spill] sm:$0xff] %v8835_v55  ;;  %v3853_v55 = vperm.slane %v3838_v9, 0  ;;  %v8862_v19 = vadd.f32 %v1851_v32, %v14097_v24  ;;  %v3887_v47 = vmul.f32 %v3852_v50, %v8856_v61  ;;  %v3890_v3 = vmul.f32 %v3854_v27, %v8796_v41 }
 0x2e7   : > { %14092 = vst [vmem:[#allocation40_spill] sm:$0xff] %v8851_v17  ;;  %v3891_v38 = vmul.f32 %v3854_v27, %v8856_v61  ;;  %v3892_v32 = vmul.f32 %v3855_v18, %v8796_v41  ;;  %v3893_v33 = vmul.f32 %v3855_v18, %v8856_v61  ;;  %v3894_v48 = vmul.f32 %v3856_v26, %v8796_v41 }
 0x2e8   : > { %14094 = vst [vmem:[#allocation41_spill] sm:$0xff] %v8854_v29  ;;  %v3888_v34 = vmul.f32 %v3853_v55, %v8796_v41  ;;  %v3889_v9 = vmul.f32 %v3853_v55, %v8856_v61  ;;  %v3895_v28 = vmul.f32 %v3856_v26, %v8856_v61  ;;  %v3896_v2 = vmul.f32 %v3857_v46, %v8796_v41 }
 0x2e9   : > { %14096 = vst [vmem:[#allocation42_spill] sm:$0xff] %v8859_v39  ;;  %v3897_v50 = vmul.f32 %v3857_v46, %v8856_v61  ;;  %v8881_v24 = vadd.f32 %v3882_v59, %v8633_v58  ;;  %v8884_v55 = vadd.f32 %v3883_v4, %v8636_v57  ;;  %v1887_v27 = vrot.slane %v1389_v6, 2 }
 0x2ea   : > { %14098 = vst [vmem:[#allocation43_spill] sm:$0xff] %v8862_v19  ;;  %v1886_v19 = vrot.slane %v1389_v6, 1  ;;  %v8887_v39 = vadd.f32 %v3884_v22, %v8639_v1  ;;  %v8890_v18 = vadd.f32 %v3885_v20, %v8642_v51  ;;  %v1888_v29 = vrot.slane %v1389_v6, 3 }
 0x2eb   : > { %v1889_v26 = vrot.slane %v1389_v6, 4  ;;  %v8893_v17 = vadd.f32 %v3886_v56, %v8645_v42  ;;  %v8896_v46 = vadd.f32 %v3887_v47, %v8648_v23  ;;  %v8899_v58 = vadd.f32 %v3888_v34, %v8651_v36 }
 0x2ec   : > { %v1890_v57 = vrot.slane %v1389_v6, 5  ;;  %v8902_v59 = vadd.f32 %v3889_v9, %v8654_v25  ;;  %v1891_v1 = vrot.slane %v1389_v6, 6  ;;  %v1892_v4 = vrot.slane %v1389_v6, 7 }
 0x2ed   : > { %v1900_v22 = vperm.slane %v1389_v6, 0  ;;  %v8905_v51 = vadd.f32 %v3890_v3, %v8657_v35  ;;  %v8908_v20 = vadd.f32 %v3891_v38, %v8660_v21  ;;  %v1901_v42 = vperm.slane %v1886_v19, 0  ;;  %v1026_v19 = vpop.f32.mrf.mxu0  ;;  %v14100_v6 = vld [vmem:[#allocation44_spill] sm:$0xff] }
 0x2ee   : > { %v1902_v56 = vperm.slane %v1887_v27, 0  ;;  %v8911_v23 = vadd.f32 %v3892_v32, %v8663_v12  ;;  %v8914_v36 = vadd.f32 %v3893_v33, %v8666_v10  ;;  %v1903_v47 = vperm.slane %v1888_v29, 0  ;;  %v14102_v10 = vld [vmem:[#allocation5_spill] sm:$0xff]  ;;  %v1505_v29 = vpop.f32.mrf.mxu1  ;;  %7254 = vmatmul.msk.f32.gmra.mxu3 %vm1063_vm2, %v1026_v19  ;;  %7286 = vmatmul.msk.f32.gmra.mxu1 %vm1063_vm2, %v1026_v19 }
 0x2ef   : > { %v1904_v25 = vperm.slane %v1889_v26, 0  ;;  %v8917_v34 = vadd.f32 %v3894_v48, %v8669_v43  ;;  %v8920_v9 = vadd.f32 %v3895_v28, %v8672_v0  ;;  %v8923_v35 = vadd.f32 %v3896_v2, %v8675_v14  ;;  %v14104_v43 = vld [vmem:[#allocation6_spill] sm:$0xff] }
 0x2f0   : > { %v1905_v21 = vperm.slane %v1890_v57, 0  ;;  %v8926_v3 = vadd.f32 %v3897_v50, %v14100_v6  ;;  %v1906_v12 = vperm.slane %v1891_v1, 0  ;;  %v1907_v38 = vperm.slane %v1892_v4, 0 }
 0x2f1   : > { %14099 = vst [vmem:[#allocation76_spill] sm:$0xff] %v8923_v35  ;;  %v8929_v32 = vmul.f32 %v1900_v22, %v14102_v10  ;;  %v1933_v33 = vmul.f32 %v1900_v22, %v14104_v43  ;;  %v8934_v0 = vmul.f32 %v1901_v42, %v14102_v10  ;;  %v1935_v14 = vmul.f32 %v1901_v42, %v14104_v43 }
 0x2f2   : > { %14101 = vst [vmem:[#allocation44_spill] sm:$0xff] %v8926_v3  ;;  %v8938_v48 = vmul.f32 %v1902_v56, %v14102_v10  ;;  %v1937_v28 = vmul.f32 %v1902_v56, %v14104_v43  ;;  %v8943_v2 = vmul.f32 %v1903_v47, %v14102_v10  ;;  %v1939_v50 = vmul.f32 %v1903_v47, %v14104_v43 }
 0x2f3   : > { %14103 = vst [vmem:[#allocation5_spill] sm:$0xff] %v8929_v32  ;;  %v8947_v27 = vmul.f32 %v1904_v25, %v14102_v10  ;;  %v1941_v26 = vmul.f32 %v1904_v25, %v14104_v43  ;;  %v8951_v57 = vmul.f32 %v1905_v21, %v14102_v10  ;;  %v3843_v1 = vrot.slane %v1505_v29, 1 }
 0x2f4   : > { %14105 = vst [vmem:[#allocation6_spill] sm:$0xff] %v8934_v0  ;;  %v3844_v4 = vrot.slane %v1505_v29, 2  ;;  %v1943_v22 = vmul.f32 %v1905_v21, %v14104_v43  ;;  %v8955_v42 = vmul.f32 %v1906_v12, %v14102_v10  ;;  %v3845_v56 = vrot.slane %v1505_v29, 3 }
 0x2f5   : > { %14106 = vst [vmem:[#allocation77_spill] sm:$0xff] %v8938_v48  ;;  %v3846_v19 = vrot.slane %v1505_v29, 4  ;;  %v1945_v6 = vmul.f32 %v1906_v12, %v14104_v43  ;;  %v8959_v47 = vmul.f32 %v1907_v38, %v14102_v10  ;;  %v1947_v25 = vmul.f32 %v1907_v38, %v14104_v43 }
 0x2f6   : > { %14107 = vst [vmem:[#allocation78_spill] sm:$0xff] %v8943_v2  ;;  %v3848_v2 = vrot.slane %v1505_v29, 6  ;;  %v3849_v48 = vrot.slane %v1505_v29, 7  ;;  %v3858_v0 = vperm.slane %v1505_v29, 0  ;;  %v8966_v21 = vadd.f32 %v1935_v14, %v8718_v49 }
 0x2f7   : > { %14108 = vst [vmem:[#allocation79_spill] sm:$0xff] %v8947_v27  ;;  %v3847_v27 = vrot.slane %v1505_v29, 5  ;;  %v3859_v32 = vperm.slane %v3843_v1, 0  ;;  %v3860_v12 = vperm.slane %v3844_v4, 0  ;;  %v8972_v3 = vadd.f32 %v1939_v50, %v8724_v31 }
 0x2f8   : > { %14109 = vst [vmem:[#allocation80_spill] sm:$0xff] %v8951_v57  ;;  %v8963_v57 = vadd.f32 %v1933_v33, %v8715_v62  ;;  %v3861_v38 = vperm.slane %v3845_v56, 0  ;;  %v3862_v35 = vperm.slane %v3846_v19, 0  ;;  %v8978_v62 = vadd.f32 %v1943_v22, %v8730_v44 }
 0x2f9   : > { %14110 = vst [vmem:[#allocation81_spill] sm:$0xff] %v8955_v42  ;;  %v8969_v42 = vadd.f32 %v1937_v28, %v8721_v53  ;;  %v8981_v29 = vadd.f32 %v1945_v6, %v8733_v8  ;;  %v3863_v49 = vperm.slane %v3847_v27, 0  ;;  %v3864_v33 = vperm.slane %v3848_v2, 0  ;;  %v1392_v8 = vpop.f32.mrf.mxu3 }
 0x2fa   : > { %14111 = vst [vmem:[#allocation82_spill] sm:$0xff] %v8959_v47  ;;  %v8975_v47 = vadd.f32 %v1941_v26, %v8727_v52  ;;  %v8984_v53 = vadd.f32 %v1947_v25, %v8736_v45  ;;  %v3865_v14 = vperm.slane %v3849_v48, 0  ;;  %v3898_v31 = vmul.f32 %v3858_v0, %v8796_v41 }
 0x2fb   : > { %v3899_v28 = vmul.f32 %v3858_v0, %v8856_v61  ;;  %v3900_v52 = vmul.f32 %v3859_v32, %v8796_v41  ;;  %v3901_v50 = vmul.f32 %v3859_v32, %v8856_v61  ;;  %v3902_v44 = vmul.f32 %v3860_v12, %v8796_v41 }
 0x2fc   : > { %14112 = vst [vmem:[#allocation83_spill] sm:$0xff] %v8984_v53  ;;  %v3903_v26 = vmul.f32 %v3860_v12, %v8856_v61  ;;  %v3904_v27 = vmul.f32 %v3861_v38, %v8796_v41  ;;  %v3905_v2 = vmul.f32 %v3861_v38, %v8856_v61  ;;  %v3906_v45 = vmul.f32 %v3862_v35, %v8796_v41 }
 0x2fd   : > { %v3907_v48 = vmul.f32 %v3862_v35, %v8856_v61  ;;  %v3908_v1 = vmul.f32 %v3863_v49, %v8796_v41  ;;  %v3909_v0 = vmul.f32 %v3863_v49, %v8856_v61  ;;  %v3910_v4 = vmul.f32 %v3864_v33, %v8796_v41  ;;  %v14114_v49 = vld [vmem:[#allocation69_spill] sm:$0xff] }
 0x2fe   : > { %v3911_v32 = vmul.f32 %v3864_v33, %v8856_v61  ;;  %v3912_v22 = vmul.f32 %v3865_v14, %v8796_v41  ;;  %v3913_v56 = vmul.f32 %v3865_v14, %v8856_v61  ;;  %v9003_v19 = vadd.f32 %v3898_v31, %v8755_v54  ;;  %v14116_v41 = vld [vmem:[#allocation70_spill] sm:$0xff]  ;;  %v14117_v14 = vld [vmem:[#allocation71_spill] sm:$0xff] }
 0x2ff   : > { %v1893_v6 = vrot.slane %v1392_v8, 1  ;;  %v9006_v25 = vadd.f32 %v3899_v28, %v8758_v11  ;;  %v9009_v35 = vadd.f32 %v3900_v52, %v8761_v30  ;;  %v1894_v12 = vrot.slane %v1392_v8, 2  ;;  %v14118_v11 = vld [vmem:[#allocation56_spill] sm:$0xff] }
 0x300   : > { %v1895_v38 = vrot.slane %v1392_v8, 3  ;;  %v9012_v53 = vadd.f32 %v3901_v50, %v14114_v49  ;;  %v9015_v33 = vadd.f32 %v3902_v44, %v8767_v5  ;;  %v9018_v61 = vadd.f32 %v3903_v26, %v14116_v41 }
 0x301   : > { %14113 = vst [vmem:[#allocation84_spill] sm:$0xff] %v9009_v35  ;;  %v1896_v54 = vrot.slane %v1392_v8, 4  ;;  %v9021_v31 = vadd.f32 %v3904_v27, %v14117_v14  ;;  %v9024_v28 = vadd.f32 %v3905_v2, %v14118_v11  ;;  %v1897_v30 = vrot.slane %v1392_v8, 5  ;;  %v14119_v2 = vld [vmem:[#allocation57_spill] sm:$0xff]  ;;  %v14121_v11 = vld [vmem:[#allocation26_spill] sm:$0xff] }
 0x302   : > { %14115 = vst [vmem:[#allocation69_spill] sm:$0xff] %v9012_v53  ;;  %v1898_v52 = vrot.slane %v1392_v8, 6  ;;  %v9027_v35 = vadd.f32 %v3906_v45, %v8779_v15  ;;  %v1899_v50 = vrot.slane %v1392_v8, 7  ;;  %v1908_v49 = vperm.slane %v1392_v8, 0  ;;  %v1029_v8 = vpop.f32.mrf.mxu0 }
 0x303   : > { %v1909_v53 = vperm.slane %v1893_v6, 0  ;;  %v9030_v5 = vadd.f32 %v3907_v48, %v8782_v63  ;;  %v9033_v44 = vadd.f32 %v3908_v1, %v8785_v37  ;;  %v1910_v26 = vperm.slane %v1894_v12, 0  ;;  %v9044_v6 = vpop.f32.mrf.mxu2  ;;  %v14123_v63 = vld [vmem:[#allocation27_spill] sm:$0xff]  ;;  %v14125_v37 = vld [vmem:[#allocation28_spill] sm:$0xff]  ;;  %7255 = vmatmul.msk.f32.gmra.mxu3 %vm1063_vm2, %v1029_v8  ;;  %7287 = vmatmul.msk.f32.gmra.mxu1 %vm1063_vm2, %v1029_v8 }
 0x304   : > { %v1911_v27 = vperm.slane %v1895_v38, 0  ;;  %v9036_v41 = vadd.f32 %v3909_v0, %v8788_v13  ;;  %v9039_v14 = vadd.f32 %v3910_v4, %v14119_v2  ;;  %v9042_v15 = vadd.f32 %v3911_v32, %v14121_v11  ;;  %v1508_v13 = vpop.f32.mrf.mxu1 }
 0x305   : > { %v1912_v45 = vperm.slane %v1896_v54, 0  ;;  %v9047_v48 = vadd.f32 %v3912_v22, %v14123_v63  ;;  %v9050_v1 = vadd.f32 %v3913_v56, %v14125_v37  ;;  %v1913_v12 = vperm.slane %v1897_v30, 0 }
 0x306   : > { %14120 = vst [vmem:[#allocation70_spill] sm:$0xff] %v9039_v14  ;;  %v1914_v38 = vperm.slane %v1898_v52, 0  ;;  %v1915_v0 = vperm.slane %v1899_v50, 0  ;;  %v9054_v4 = vmul.f32 %v1908_v49, %v14102_v10  ;;  %v1949_v32 = vmul.f32 %v1908_v49, %v14104_v43 }
 0x307   : > { %14122 = vst [vmem:[#allocation71_spill] sm:$0xff] %v9042_v15  ;;  %v9058_v54 = vmul.f32 %v1909_v53, %v14102_v10  ;;  %v1951_v22 = vmul.f32 %v1909_v53, %v14104_v43  ;;  %v9063_v56 = vmul.f32 %v1910_v26, %v14102_v10  ;;  %v1953_v30 = vmul.f32 %v1910_v26, %v14104_v43  ;;  %v14135_v15 = vld [vmem:[#allocation40_spill] sm:$0xff] }
 0x308   : > { %14124 = vst [vmem:[#allocation56_spill] sm:$0xff] %v9047_v48  ;;  %v9067_v52 = vmul.f32 %v1911_v27, %v14102_v10  ;;  %v1955_v50 = vmul.f32 %v1911_v27, %v14104_v43  ;;  %v9071_v2 = vmul.f32 %v1912_v45, %v14102_v10  ;;  %v1957_v49 = vmul.f32 %v1912_v45, %v14104_v43 }
 0x309   : > { %14126 = vst [vmem:[#allocation57_spill] sm:$0xff] %v9050_v1  ;;  %v3948_v11 = vrot.slane %v1508_v13, 1  ;;  %v9075_v8 = vmul.f32 %v1913_v12, %v14102_v10  ;;  %v1959_v53 = vmul.f32 %v1913_v12, %v14104_v43  ;;  %v3949_v63 = vrot.slane %v1508_v13, 2 }
 0x30a   : > { %14127 = vst [vmem:[#allocation26_spill] sm:$0xff] %v9054_v4  ;;  %v3950_v37 = vrot.slane %v1508_v13, 3  ;;  %v9079_v26 = vmul.f32 %v1914_v38, %v14102_v10  ;;  %v3952_v27 = vrot.slane %v1508_v13, 5  ;;  %v1963_v45 = vmul.f32 %v1915_v0, %v14104_v43 }
 0x30b   : > { %14128 = vst [vmem:[#allocation27_spill] sm:$0xff] %v9058_v54  ;;  %v9083_v54 = vmul.f32 %v1915_v0, %v14102_v10  ;;  %v3954_v4 = vrot.slane %v1508_v13, 7  ;;  %v9090_v12 = vadd.f32 %v1951_v22, %v8842_v40  ;;  %v3962_v1 = vperm.slane %v1508_v13, 0  ;;  %v14137_v0 = vld [vmem:[#allocation41_spill] sm:$0xff]  ;;  %v9104_v40 = vpop.f32.mrf.mxu2 }
 0x30c   : > { %14129 = vst [vmem:[#allocation28_spill] sm:$0xff] %v9063_v56  ;;  %v3951_v56 = vrot.slane %v1508_v13, 4  ;;  %v3963_v48 = vperm.slane %v3948_v11, 0  ;;  %v3964_v10 = vperm.slane %v3949_v63, 0  ;;  %v9102_v14 = vadd.f32 %v1959_v53, %v14137_v0 }
 0x30d   : > { %14130 = vst [vmem:[#allocation85_spill] sm:$0xff] %v9067_v52  ;;  %v1961_v52 = vmul.f32 %v1914_v38, %v14104_v43  ;;  %v9096_v38 = vadd.f32 %v1955_v50, %v8848_v60  ;;  %v9099_v43 = vadd.f32 %v1957_v49, %v14135_v15  ;;  %v3969_v50 = vperm.slane %v3954_v4, 0 }
 0x30e   : > { %14131 = vst [vmem:[#allocation86_spill] sm:$0xff] %v9071_v2  ;;  %v3953_v2 = vrot.slane %v1508_v13, 6  ;;  %v14139_v13 = vld [vmem:[#allocation42_spill] sm:$0xff]  ;;  %v3994_v11 = vmul.f32 %v3962_v1, %v9044_v6  ;;  %v3995_v15 = vmul.f32 %v3962_v1, %v9104_v40  ;;  %v3996_v49 = vmul.f32 %v3963_v48, %v9044_v6 }
 0x30f   : > { %14132 = vst [vmem:[#allocation87_spill] sm:$0xff] %v9075_v8  ;;  %v9087_v8 = vadd.f32 %v1949_v32, %v8839_v7  ;;  %v3966_v7 = vperm.slane %v3951_v56, 0  ;;  %v3967_v32 = vperm.slane %v3952_v27, 0  ;;  %v9107_v22 = vadd.f32 %v1961_v52, %v14139_v13  ;;  %v1395_v27 = vpop.f32.mrf.mxu3 }
 0x310   : > { %14133 = vst [vmem:[#allocation88_spill] sm:$0xff] %v9079_v26  ;;  %v9093_v26 = vadd.f32 %v1953_v30, %v8845_v16  ;;  %v14141_v16 = vld [vmem:[#allocation43_spill] sm:$0xff]  ;;  %v3968_v60 = vperm.slane %v3953_v2, 0  ;;  %v3997_v53 = vmul.f32 %v3963_v48, %v9104_v40  ;;  %v3998_v56 = vmul.f32 %v3964_v10, %v9044_v6 }
 0x311   : > { %14134 = vst [vmem:[#allocation89_spill] sm:$0xff] %v9083_v54  ;;  %v3965_v54 = vperm.slane %v3950_v37, 0  ;;  %v9110_v30 = vadd.f32 %v1963_v45, %v14141_v16  ;;  %v3999_v63 = vmul.f32 %v3964_v10, %v9104_v40  ;;  %v4002_v2 = vmul.f32 %v3966_v7, %v9044_v6 }
 0x312   : > { %14136 = vst [vmem:[#allocation40_spill] sm:$0xff] %v9099_v43  ;;  %v4003_v4 = vmul.f32 %v3966_v7, %v9104_v40  ;;  %v4004_v45 = vmul.f32 %v3967_v32, %v9044_v6  ;;  %v4005_v1 = vmul.f32 %v3967_v32, %v9104_v40  ;;  %v4006_v0 = vmul.f32 %v3968_v60, %v9044_v6 }
 0x313   : > { %14138 = vst [vmem:[#allocation41_spill] sm:$0xff] %v9102_v14  ;;  %v4000_v52 = vmul.f32 %v3965_v54, %v9044_v6  ;;  %v4001_v37 = vmul.f32 %v3965_v54, %v9104_v40  ;;  %v4007_v48 = vmul.f32 %v3968_v60, %v9104_v40  ;;  %v4008_v13 = vmul.f32 %v3969_v50, %v9044_v6 }
 0x314   : > { %14140 = vst [vmem:[#allocation42_spill] sm:$0xff] %v9107_v22  ;;  %v4009_v10 = vmul.f32 %v3969_v50, %v9104_v40  ;;  %v9129_v16 = vadd.f32 %v3994_v11, %v8881_v24  ;;  %v9132_v54 = vadd.f32 %v3995_v15, %v8884_v55  ;;  %v1999_v7 = vrot.slane %v1395_v27, 2 }
 0x315   : > { %14142 = vst [vmem:[#allocation43_spill] sm:$0xff] %v9110_v30  ;;  %v1998_v30 = vrot.slane %v1395_v27, 1  ;;  %v9135_v22 = vadd.f32 %v3996_v49, %v8887_v39  ;;  %v9138_v32 = vadd.f32 %v3997_v53, %v8890_v18  ;;  %v2000_v14 = vrot.slane %v1395_v27, 3 }
 0x316   : > { %v2001_v60 = vrot.slane %v1395_v27, 4  ;;  %v9141_v43 = vadd.f32 %v3998_v56, %v8893_v17  ;;  %v9144_v50 = vadd.f32 %v3999_v63, %v8896_v46  ;;  %v9147_v24 = vadd.f32 %v4000_v52, %v8899_v58 }
 0x317   : > { %v2002_v55 = vrot.slane %v1395_v27, 5  ;;  %v9150_v11 = vadd.f32 %v4001_v37, %v8902_v59  ;;  %v2003_v39 = vrot.slane %v1395_v27, 6  ;;  %v2004_v15 = vrot.slane %v1395_v27, 7 }
 0x318   : > { %v2012_v49 = vperm.slane %v1395_v27, 0  ;;  %v9153_v18 = vadd.f32 %v4002_v2, %v8905_v51  ;;  %v9156_v53 = vadd.f32 %v4003_v4, %v8908_v20  ;;  %v2013_v17 = vperm.slane %v1998_v30, 0  ;;  %v14143_v51 = vld [vmem:[#allocation76_spill] sm:$0xff]  ;;  %v1032_v30 = vpop.f32.mrf.mxu0 }
 0x319   : > { %v2014_v56 = vperm.slane %v1999_v7, 0  ;;  %v9159_v46 = vadd.f32 %v4004_v45, %v8911_v23  ;;  %v9162_v58 = vadd.f32 %v4005_v1, %v8914_v36  ;;  %v2015_v63 = vperm.slane %v2000_v14, 0  ;;  %v14145_v2 = vld [vmem:[#allocation44_spill] sm:$0xff]  ;;  %v1511_v14 = vpop.f32.mrf.mxu1  ;;  %7256 = vmatmul.msk.f32.gmra.mxu3 %vm1063_vm2, %v1032_v30  ;;  %7288 = vmatmul.msk.f32.gmra.mxu1 %vm1063_vm2, %v1032_v30 }
 0x31a   : > { %v2016_v59 = vperm.slane %v2001_v60, 0  ;;  %v9165_v52 = vadd.f32 %v4006_v0, %v8917_v34  ;;  %v9168_v37 = vadd.f32 %v4007_v48, %v8920_v9  ;;  %v9171_v27 = vadd.f32 %v4008_v13, %v14143_v51  ;;  %v14147_v36 = vld [vmem:[#allocation8_spill] sm:$0xff]  ;;  %v14149_v34 = vld [vmem:[#allocation10_spill] sm:$0xff] }
 0x31b   : > { %v2017_v20 = vperm.slane %v2002_v55, 0  ;;  %v9174_v4 = vadd.f32 %v4009_v10, %v14145_v2  ;;  %v2018_v23 = vperm.slane %v2003_v39, 0  ;;  %v2019_v45 = vperm.slane %v2004_v15, 0 }
 0x31c   : > { %14144 = vst [vmem:[#allocation76_spill] sm:$0xff] %v9171_v27  ;;  %v9177_v1 = vmul.f32 %v2012_v49, %v14147_v36  ;;  %v2045_v0 = vmul.f32 %v2012_v49, %v14149_v34  ;;  %v9182_v9 = vmul.f32 %v2013_v17, %v14147_v36  ;;  %v2047_v48 = vmul.f32 %v2013_v17, %v14149_v34 }
 0x31d   : > { %14146 = vst [vmem:[#allocation44_spill] sm:$0xff] %v9174_v4  ;;  %v9186_v13 = vmul.f32 %v2014_v56, %v14147_v36  ;;  %v2049_v10 = vmul.f32 %v2014_v56, %v14149_v34  ;;  %v9191_v7 = vmul.f32 %v2015_v63, %v14147_v36  ;;  %v2051_v60 = vmul.f32 %v2015_v63, %v14149_v34 }
 0x31e   : > { %14148 = vst [vmem:[#allocation90_spill] sm:$0xff] %v9177_v1  ;;  %v9195_v55 = vmul.f32 %v2016_v59, %v14147_v36  ;;  %v2053_v39 = vmul.f32 %v2016_v59, %v14149_v34  ;;  %v9199_v15 = vmul.f32 %v2017_v20, %v14147_v36  ;;  %v3955_v49 = vrot.slane %v1511_v14, 1 }
 0x31f   : > { %14150 = vst [vmem:[#allocation10_spill] sm:$0xff] %v9182_v9  ;;  %v3956_v17 = vrot.slane %v1511_v14, 2  ;;  %v2055_v51 = vmul.f32 %v2017_v20, %v14149_v34  ;;  %v9203_v30 = vmul.f32 %v2018_v23, %v14147_v36  ;;  %v3957_v56 = vrot.slane %v1511_v14, 3 }
 0x320   : > { %14151 = vst [vmem:[#allocation91_spill] sm:$0xff] %v9186_v13  ;;  %v3958_v2 = vrot.slane %v1511_v14, 4  ;;  %v9207_v63 = vmul.f32 %v2019_v45, %v14147_v36  ;;  %v3960_v13 = vrot.slane %v1511_v14, 6  ;;  %v2059_v59 = vmul.f32 %v2019_v45, %v14149_v34 }
 0x321   : > { %14152 = vst [vmem:[#allocation92_spill] sm:$0xff] %v9191_v7  ;;  %v2057_v7 = vmul.f32 %v2018_v23, %v14149_v34  ;;  %v3961_v9 = vrot.slane %v1511_v14, 7  ;;  %v3970_v1 = vperm.slane %v1511_v14, 0  ;;  %v9214_v20 = vadd.f32 %v2047_v48, %v8966_v21 }
 0x322   : > { %14153 = vst [vmem:[#allocation93_spill] sm:$0xff] %v9195_v55  ;;  %v3959_v55 = vrot.slane %v1511_v14, 5  ;;  %v3971_v4 = vperm.slane %v3955_v49, 0  ;;  %v3972_v23 = vperm.slane %v3956_v17, 0  ;;  %v9220_v36 = vadd.f32 %v2051_v60, %v8972_v3 }
 0x323   : > { %14154 = vst [vmem:[#allocation94_spill] sm:$0xff] %v9199_v15  ;;  %v9211_v15 = vadd.f32 %v2045_v0, %v8963_v57  ;;  %v3973_v45 = vperm.slane %v3957_v56, 0  ;;  %v3974_v27 = vperm.slane %v3958_v2, 0  ;;  %v9226_v57 = vadd.f32 %v2055_v51, %v8978_v62 }
 0x324   : > { %14155 = vst [vmem:[#allocation95_spill] sm:$0xff] %v9203_v30  ;;  %v9217_v30 = vadd.f32 %v2049_v10, %v8969_v42  ;;  %v9229_v14 = vadd.f32 %v2057_v7, %v8981_v29  ;;  %v3975_v21 = vperm.slane %v3959_v55, 0  ;;  %v3976_v0 = vperm.slane %v3960_v13, 0  ;;  %v14158_v42 = vld [vmem:[#allocation83_spill] sm:$0xff]  ;;  %v9240_v29 = vpop.f32.mrf.mxu3 }
 0x325   : > { %14156 = vst [vmem:[#allocation96_spill] sm:$0xff] %v9207_v63  ;;  %v9223_v63 = vadd.f32 %v2053_v39, %v8975_v47  ;;  %v9232_v48 = vadd.f32 %v2059_v59, %v14158_v42  ;;  %v3977_v10 = vperm.slane %v3961_v9, 0  ;;  %v4010_v3 = vmul.f32 %v3970_v1, %v9044_v6 }
 0x326   : > { %14157 = vst [vmem:[#allocation97_spill] sm:$0xff] %v9229_v14  ;;  %v4011_v60 = vmul.f32 %v3970_v1, %v9104_v40  ;;  %v4012_v47 = vmul.f32 %v3971_v4, %v9044_v6  ;;  %v4013_v39 = vmul.f32 %v3971_v4, %v9104_v40  ;;  %v4014_v62 = vmul.f32 %v3972_v23, %v9044_v6 }
 0x327   : > { %14159 = vst [vmem:[#allocation83_spill] sm:$0xff] %v9232_v48  ;;  %v4015_v49 = vmul.f32 %v3972_v23, %v9104_v40  ;;  %v4016_v13 = vmul.f32 %v3973_v45, %v9044_v6  ;;  %v4017_v7 = vmul.f32 %v3973_v45, %v9104_v40  ;;  %v4018_v9 = vmul.f32 %v3974_v27, %v9044_v6 }
 0x328   : > { %14160 = vst [vmem:[#allocation98_spill] sm:$0xff] %v9240_v29  ;;  %v4019_v55 = vmul.f32 %v3974_v27, %v9104_v40  ;;  %v4020_v1 = vmul.f32 %v3975_v21, %v9044_v6  ;;  %v4021_v17 = vmul.f32 %v3975_v21, %v9104_v40  ;;  %v4022_v4 = vmul.f32 %v3976_v0, %v9044_v6  ;;  %v14161_v27 = vld [vmem:[#allocation84_spill] sm:$0xff] }
 0x329   : > { %v4023_v51 = vmul.f32 %v3976_v0, %v9104_v40  ;;  %v4024_v56 = vmul.f32 %v3977_v10, %v9044_v6  ;;  %v4025_v2 = vmul.f32 %v3977_v10, %v9104_v40  ;;  %v9253_v59 = vadd.f32 %v4010_v3, %v9003_v19  ;;  %v14162_v0 = vld [vmem:[#allocation69_spill] sm:$0xff] }
 0x32a   : > { %v2005_v23 = vrot.slane %v9240_v29, 1  ;;  %v9257_v45 = vadd.f32 %v4011_v60, %v9006_v25  ;;  %v9260_v42 = vadd.f32 %v4012_v47, %v14161_v27  ;;  %v2006_v21 = vrot.slane %v9240_v29, 2  ;;  %v9289_v27 = vpop.f32.mrf.mxu2 }
 0x32b   : > { %v2007_v48 = vrot.slane %v9240_v29, 3  ;;  %v9265_v14 = vadd.f32 %v4013_v39, %v14162_v0  ;;  %v9268_v6 = vadd.f32 %v4014_v62, %v9015_v33  ;;  %v2008_v19 = vrot.slane %v9240_v29, 4 }
 0x32c   : > { %v2009_v40 = vrot.slane %v9240_v29, 5  ;;  %v9273_v25 = vadd.f32 %v4015_v49, %v9018_v61  ;;  %v9276_v10 = vadd.f32 %v4016_v13, %v9021_v31  ;;  %v2010_v3 = vrot.slane %v9240_v29, 6 }
 0x32d   : > { %v2011_v60 = vrot.slane %v9240_v29, 7  ;;  %v9281_v47 = vadd.f32 %v4017_v7, %v9024_v28  ;;  %v9284_v33 = vadd.f32 %v4018_v9, %v9027_v35  ;;  %v9287_v62 = vperm.slane %v2005_v23, 0  ;;  %v1514_v28 = vpop.f32.mrf.mxu1  ;;  %v14167_v7 = vld [vmem:[#allocation70_spill] sm:$0xff] }
 0x32e   : > { %v9292_v61 = vadd.f32 %v4019_v55, %v9030_v5  ;;  %v9295_v31 = vadd.f32 %v4020_v1, %v9033_v44  ;;  %v9297_v49 = vperm.slane %v2006_v21, 0  ;;  %v9299_v13 = vperm.slane %v2007_v48, 0  ;;  %v1035_v5 = vpop.f32.mrf.mxu0  ;;  %v14171_v55 = vld [vmem:[#allocation71_spill] sm:$0xff]  ;;  %v14173_v44 = vld [vmem:[#allocation56_spill] sm:$0xff] }
 0x32f   : > { %14163 = vst [vmem:[#allocation84_spill] sm:$0xff] %v9287_v62  ;;  %v9302_v35 = vadd.f32 %v4021_v17, %v9036_v41  ;;  %v9305_v9 = vadd.f32 %v4022_v4, %v14167_v7  ;;  %v9307_v23 = vperm.slane %v2008_v19, 0  ;;  %v9309_v0 = vperm.slane %v2009_v40, 0  ;;  %7257 = vmatmul.msk.f32.gmra.mxu3 %vm1063_vm2, %v1035_v5  ;;  %v14177_v41 = vld [vmem:[#allocation57_spill] sm:$0xff]  ;;  %7289 = vmatmul.msk.f32.gmra.mxu1 %vm1063_vm2, %v1035_v5 }
 0x330   : > { %14164 = vst [vmem:[#allocation69_spill] sm:$0xff] %v9297_v49  ;;  %v9312_v39 = vadd.f32 %v4023_v51, %v14171_v55  ;;  %v9315_v1 = vadd.f32 %v4024_v56, %v14173_v44  ;;  %v9317_v48 = vperm.slane %v2010_v3, 0  ;;  %v9319_v21 = vperm.slane %v2011_v60, 0 }
 0x331   : > { %14165 = vst [vmem:[#allocation99_spill] sm:$0xff] %v9299_v13  ;;  %v9323_v17 = vadd.f32 %v4025_v2, %v14177_v41  ;;  %v14179_v4 = vperm.slane %v9240_v29, 0  ;;  %v2063_v51 = vmul.f32 %v9287_v62, %v14149_v34  ;;  %v4060_v40 = vrot.slane %v1514_v28, 1 }
 0x332   : > { %14166 = vst [vmem:[#allocation100_spill] sm:$0xff] %v9302_v35  ;;  %v2065_v56 = vmul.f32 %v9297_v49, %v14149_v34  ;;  %v2067_v3 = vmul.f32 %v9299_v13, %v14149_v34  ;;  %v4061_v60 = vrot.slane %v1514_v28, 2  ;;  %v4062_v7 = vrot.slane %v1514_v28, 3 }
 0x333   : > { %14168 = vst [vmem:[#allocation70_spill] sm:$0xff] %v9305_v9  ;;  %v2061_v19 = vmul.f32 %v14179_v4, %v14149_v34  ;;  %v2069_v2 = vmul.f32 %v9307_v23, %v14149_v34  ;;  %v2071_v55 = vmul.f32 %v9309_v0, %v14149_v34  ;;  %v4063_v44 = vrot.slane %v1514_v28, 4  ;;  %v14180_v9 = vld [vmem:[#allocation40_spill] sm:$0xff] }
 0x334   : > { %14169 = vst [vmem:[#allocation101_spill] sm:$0xff] %v9307_v23  ;;  %v4064_v41 = vrot.slane %v1514_v28, 5  ;;  %v2073_v4 = vmul.f32 %v9317_v48, %v14149_v34  ;;  %v2075_v5 = vmul.f32 %v9319_v21, %v14149_v34  ;;  %v4065_v49 = vrot.slane %v1514_v28, 6 }
 0x335   : > { %14170 = vst [vmem:[#allocation102_spill] sm:$0xff] %v9309_v0  ;;  %v4066_v62 = vrot.slane %v1514_v28, 7  ;;  %v9344_v13 = vadd.f32 %v2061_v19, %v9087_v8  ;;  %v9347_v29 = vadd.f32 %v2063_v51, %v9090_v12  ;;  %v4074_v23 = vperm.slane %v1514_v28, 0  ;;  %v9361_v12 = vpop.f32.mrf.mxu2  ;;  %v14182_v28 = vld [vmem:[#allocation42_spill] sm:$0xff] }
 0x336   : > { %14172 = vst [vmem:[#allocation71_spill] sm:$0xff] %v9312_v39  ;;  %v9350_v0 = vadd.f32 %v2065_v56, %v9093_v26  ;;  %v4077_v39 = vperm.slane %v4062_v7, 0  ;;  %v9356_v34 = vadd.f32 %v2069_v2, %v14180_v9  ;;  %v4078_v8 = vperm.slane %v4063_v44, 0  ;;  %v14184_v26 = vld [vmem:[#allocation43_spill] sm:$0xff] }
 0x337   : > { %14174 = vst [vmem:[#allocation56_spill] sm:$0xff] %v9315_v1  ;;  %v9353_v1 = vadd.f32 %v2067_v3, %v9096_v38  ;;  %v4079_v19 = vperm.slane %v4064_v41, 0  ;;  %v9364_v51 = vadd.f32 %v2073_v4, %v14182_v28  ;;  %v4080_v38 = vperm.slane %v4065_v49, 0  ;;  %v9377_v41 = vpop.f32.mrf.mxu3 }
 0x338   : > { %14175 = vst [vmem:[#allocation103_spill] sm:$0xff] %v9317_v48  ;;  %v4076_v48 = vperm.slane %v4061_v60, 0  ;;  %v4081_v56 = vperm.slane %v4066_v62, 0  ;;  %v4106_v3 = vmul.f32 %v4074_v23, %v9289_v27  ;;  %v4107_v9 = vmul.f32 %v4074_v23, %v9361_v12 }
 0x339   : > { %14176 = vst [vmem:[#allocation104_spill] sm:$0xff] %v9319_v21  ;;  %v14181_v21 = vld [vmem:[#allocation41_spill] sm:$0xff]  ;;  %v4113_v44 = vmul.f32 %v4077_v39, %v9361_v12  ;;  %v4114_v62 = vmul.f32 %v4078_v8, %v9289_v27  ;;  %v4115_v49 = vmul.f32 %v4078_v8, %v9361_v12  ;;  %v4116_v23 = vmul.f32 %v4079_v19, %v9289_v27 }
 0x33a   : > { %14178 = vst [vmem:[#allocation57_spill] sm:$0xff] %v9323_v17  ;;  %v4075_v17 = vperm.slane %v4060_v40, 0  ;;  %v9359_v35 = vadd.f32 %v2071_v55, %v14181_v21  ;;  %v9367_v40 = vadd.f32 %v2075_v5, %v14184_v26  ;;  %v4110_v7 = vmul.f32 %v4076_v48, %v9289_v27 }
 0x33b   : > { %14183 = vst [vmem:[#allocation40_spill] sm:$0xff] %v9364_v51  ;;  %v4111_v2 = vmul.f32 %v4076_v48, %v9361_v12  ;;  %v4112_v55 = vmul.f32 %v4077_v39, %v9289_v27  ;;  %v4117_v4 = vmul.f32 %v4079_v19, %v9361_v12  ;;  %v4119_v5 = vmul.f32 %v4080_v38, %v9361_v12 }
 0x33c   : > { %14185 = vst [vmem:[#allocation41_spill] sm:$0xff] %v9367_v40  ;;  %v4108_v60 = vmul.f32 %v4075_v17, %v9289_v27  ;;  %v4109_v21 = vmul.f32 %v4075_v17, %v9361_v12  ;;  %v4118_v17 = vmul.f32 %v4080_v38, %v9289_v27  ;;  %v4120_v48 = vmul.f32 %v4081_v56, %v9289_v27 }
 0x33d   : > { %14186 = vst [vmem:[#allocation42_spill] sm:$0xff] %v9377_v41  ;;  %v4121_v28 = vmul.f32 %v4081_v56, %v9361_v12  ;;  %v9388_v39 = vadd.f32 %v4106_v3, %v9129_v16  ;;  %v9391_v26 = vadd.f32 %v4107_v9, %v9132_v54  ;;  %v2110_v8 = vrot.slane %v9377_v41, 1 }
 0x33e   : > { %v2111_v40 = vrot.slane %v9377_v41, 2  ;;  %v9396_v19 = vadd.f32 %v4108_v60, %v9135_v22  ;;  %v9399_v51 = vadd.f32 %v4109_v21, %v9138_v32  ;;  %v2112_v38 = vrot.slane %v9377_v41, 3  ;;  %v1517_v21 = vpop.f32.mrf.mxu1 }
 0x33f   : > { %v2113_v56 = vrot.slane %v9377_v41, 4  ;;  %v9404_v16 = vadd.f32 %v4110_v7, %v9141_v43  ;;  %v9407_v54 = vadd.f32 %v4111_v2, %v9144_v50  ;;  %v2114_v3 = vrot.slane %v9377_v41, 5 }
 0x340   : > { %v2115_v9 = vrot.slane %v9377_v41, 6  ;;  %v9412_v22 = vadd.f32 %v4112_v55, %v9147_v24  ;;  %v9415_v32 = vadd.f32 %v4113_v44, %v9150_v11  ;;  %v2116_v60 = vrot.slane %v9377_v41, 7 }
 0x341   : > { %v9420_v43 = vadd.f32 %v4114_v62, %v9153_v18  ;;  %v9423_v50 = vadd.f32 %v4115_v49, %v9156_v53  ;;  %v9425_v7 = vperm.slane %v2110_v8, 0  ;;  %v9427_v2 = vperm.slane %v2111_v40, 0  ;;  %v14200_v8 = vld [vmem:[#allocation7_spill] sm:$0xff] }
 0x342   : > { %v9430_v24 = vadd.f32 %v4116_v23, %v9159_v46  ;;  %v9433_v11 = vadd.f32 %v4117_v4, %v9162_v58  ;;  %v9435_v55 = vperm.slane %v2112_v38, 0  ;;  %v9437_v44 = vperm.slane %v2113_v56, 0  ;;  %v14195_v46 = vld [vmem:[#allocation76_spill] sm:$0xff] }
 0x343   : > { %14187 = vst [vmem:[#allocation43_spill] sm:$0xff] %v9425_v7  ;;  %v9440_v18 = vadd.f32 %v4118_v17, %v9165_v52  ;;  %v9443_v53 = vadd.f32 %v4119_v5, %v9168_v37  ;;  %v9445_v62 = vperm.slane %v2114_v3, 0  ;;  %v9447_v40 = vperm.slane %v2115_v9, 0  ;;  %v14197_v58 = vld [vmem:[#allocation44_spill] sm:$0xff]  ;;  %v1038_v3 = vpop.f32.mrf.mxu0 }
 0x344   : > { %14188 = vst [vmem:[#allocation105_spill] sm:$0xff] %v9427_v2  ;;  %v9450_v49 = vadd.f32 %v4120_v48, %v14195_v46  ;;  %v9453_v23 = vadd.f32 %v4121_v28, %v14197_v58  ;;  %v9455_v4 = vperm.slane %v2116_v60, 0  ;;  %v14201_v38 = vperm.slane %v9377_v41, 0  ;;  %7258 = vmatmul.msk.f32.gmra.mxu3 %vm1063_vm2, %v1038_v3  ;;  %7290 = vmatmul.msk.f32.gmra.mxu1 %vm1063_vm2, %v1038_v3 }
 0x345   : > { %14189 = vst [vmem:[#allocation106_spill] sm:$0xff] %v9435_v55  ;;  %v2159_v37 = vmul.f32 %v9425_v7, %v14200_v8  ;;  %v2161_v17 = vmul.f32 %v9427_v2, %v14200_v8  ;;  %v4067_v5 = vrot.slane %v1517_v21, 1  ;;  %v4068_v56 = vrot.slane %v1517_v21, 2 }
 0x346   : > { %14190 = vst [vmem:[#allocation107_spill] sm:$0xff] %v9437_v44  ;;  %v2157_v52 = vmul.f32 %v14201_v38, %v14200_v8  ;;  %v2163_v48 = vmul.f32 %v9435_v55, %v14200_v8  ;;  %v2165_v28 = vmul.f32 %v9437_v44, %v14200_v8  ;;  %v4069_v9 = vrot.slane %v1517_v21, 3 }
 0x347   : > { %14191 = vst [vmem:[#allocation108_spill] sm:$0xff] %v9440_v18  ;;  %v4070_v60 = vrot.slane %v1517_v21, 4  ;;  %v2167_v46 = vmul.f32 %v9445_v62, %v14200_v8  ;;  %v2169_v58 = vmul.f32 %v9447_v40, %v14200_v8  ;;  %v4071_v38 = vrot.slane %v1517_v21, 5 }
 0x348   : > { %14192 = vst [vmem:[#allocation109_spill] sm:$0xff] %v9443_v53  ;;  %v4072_v2 = vrot.slane %v1517_v21, 6  ;;  %v2171_v55 = vmul.f32 %v9455_v4, %v14200_v8  ;;  %v9477_v7 = vadd.f32 %v2157_v52, %v9211_v15  ;;  %v4073_v44 = vrot.slane %v1517_v21, 7 }
 0x349   : > { %14193 = vst [vmem:[#allocation110_spill] sm:$0xff] %v9445_v62  ;;  %v4082_v41 = vperm.slane %v1517_v21, 0  ;;  %v9483_v62 = vadd.f32 %v2161_v17, %v9217_v30  ;;  %v9486_v53 = vadd.f32 %v2163_v48, %v9220_v36  ;;  %v9489_v3 = vadd.f32 %v2165_v28, %v9223_v63  ;;  %v14202_v21 = vld [vmem:[#allocation97_spill] sm:$0xff]  ;;  %v14203_v30 = vld [vmem:[#allocation83_spill] sm:$0xff] }
 0x34a   : > { %14194 = vst [vmem:[#allocation111_spill] sm:$0xff] %v9447_v40  ;;  %v4084_v40 = vperm.slane %v4068_v56, 0  ;;  %v4086_v18 = vperm.slane %v4070_v60, 0  ;;  %v9492_v15 = vadd.f32 %v2167_v46, %v9226_v57  ;;  %v9495_v52 = vadd.f32 %v2169_v58, %v14202_v21 }
 0x34b   : > { %14196 = vst [vmem:[#allocation76_spill] sm:$0xff] %v9450_v49  ;;  %v4083_v49 = vperm.slane %v4067_v5, 0  ;;  %v9498_v17 = vadd.f32 %v2171_v55, %v14203_v30  ;;  %v4089_v5 = vperm.slane %v4073_v44, 0  ;;  %v4122_v36 = vmul.f32 %v4082_v41, %v9289_v27 }
 0x34c   : > { %14198 = vst [vmem:[#allocation44_spill] sm:$0xff] %v9453_v23  ;;  %v9480_v23 = vadd.f32 %v2159_v37, %v9214_v20  ;;  %v4087_v20 = vperm.slane %v4071_v38, 0  ;;  %v4088_v37 = vperm.slane %v4072_v2, 0  ;;  %v4123_v56 = vmul.f32 %v4082_v41, %v9361_v12 }
 0x34d   : > { %14199 = vst [vmem:[#allocation112_spill] sm:$0xff] %v9455_v4  ;;  %v4085_v4 = vperm.slane %v4069_v9, 0  ;;  %v4124_v63 = vmul.f32 %v4083_v49, %v9289_v27  ;;  %v4125_v48 = vmul.f32 %v4083_v49, %v9361_v12  ;;  %v4126_v57 = vmul.f32 %v4084_v40, %v9289_v27  ;;  %v9506_v9 = vpop.f32.mrf.mxu3 }
 0x34e   : > { %14204 = vst [vmem:[#allocation7_spill] sm:$0xff] %v9498_v17  ;;  %v4127_v28 = vmul.f32 %v4084_v40, %v9361_v12  ;;  %v4130_v44 = vmul.f32 %v4086_v18, %v9289_v27  ;;  %v4131_v60 = vmul.f32 %v4086_v18, %v9361_v12  ;;  %v4132_v41 = vmul.f32 %v4087_v20, %v9289_v27 }
 0x34f   : > { %14205 = vst [vmem:[#allocation97_spill] sm:$0xff] %v9506_v9  ;;  %v4128_v2 = vmul.f32 %v4085_v4, %v9289_v27  ;;  %v4129_v55 = vmul.f32 %v4085_v4, %v9361_v12  ;;  %v4133_v46 = vmul.f32 %v4087_v20, %v9361_v12  ;;  %v4134_v49 = vmul.f32 %v4088_v37, %v9289_v27 }
 0x350   : > { %v4135_v58 = vmul.f32 %v4088_v37, %v9361_v12  ;;  %v4136_v40 = vmul.f32 %v4089_v5, %v9289_v27  ;;  %v4137_v38 = vmul.f32 %v4089_v5, %v9361_v12  ;;  %v9519_v21 = vadd.f32 %v4122_v36, %v9253_v59 }
 0x351   : > { %v2117_v4 = vrot.slane %v9506_v9, 1  ;;  %v9523_v30 = vadd.f32 %v4123_v56, %v9257_v45  ;;  %v9526_v18 = vadd.f32 %v4124_v63, %v9260_v42  ;;  %v2118_v20 = vrot.slane %v9506_v9, 2 }
 0x352   : > { %v2119_v17 = vrot.slane %v9506_v9, 3  ;;  %v9531_v37 = vadd.f32 %v4125_v48, %v9265_v14  ;;  %v9534_v27 = vadd.f32 %v4126_v57, %v9268_v6  ;;  %v2120_v59 = vrot.slane %v9506_v9, 4  ;;  %v9555_v48 = vpop.f32.mrf.mxu2 }
 0x353   : > { %v2121_v12 = vrot.slane %v9506_v9, 5  ;;  %v9539_v45 = vadd.f32 %v4127_v28, %v9273_v25  ;;  %v9542_v42 = vadd.f32 %v4128_v2, %v9276_v10  ;;  %v2122_v5 = vrot.slane %v9506_v9, 6  ;;  %v14210_v2 = vld [vmem:[#allocation100_spill] sm:$0xff] }
 0x354   : > { %v2123_v36 = vrot.slane %v9506_v9, 7  ;;  %v9547_v14 = vadd.f32 %v4129_v55, %v9281_v47  ;;  %v9550_v6 = vadd.f32 %v4130_v44, %v9284_v33  ;;  %v9553_v63 = vperm.slane %v2117_v4, 0  ;;  %v1520_v47 = vpop.f32.mrf.mxu1  ;;  %v14211_v55 = vld [vmem:[#allocation70_spill] sm:$0xff] }
 0x355   : > { %v9558_v25 = vadd.f32 %v4131_v60, %v9292_v61  ;;  %v9561_v10 = vadd.f32 %v4132_v41, %v9295_v31  ;;  %v9563_v57 = vperm.slane %v2118_v20, 0  ;;  %v9565_v28 = vperm.slane %v2119_v17, 0  ;;  %v14214_v61 = vld [vmem:[#allocation71_spill] sm:$0xff]  ;;  %v14216_v31 = vld [vmem:[#allocation56_spill] sm:$0xff] }
 0x356   : > { %14206 = vst [vmem:[#allocation83_spill] sm:$0xff] %v9553_v63  ;;  %v9568_v33 = vadd.f32 %v4133_v46, %v14210_v2  ;;  %v9571_v44 = vadd.f32 %v4134_v49, %v14211_v55  ;;  %v9573_v4 = vperm.slane %v2120_v59, 0  ;;  %v9575_v56 = vperm.slane %v2121_v12, 0 }
 0x357   : > { %14207 = vst [vmem:[#allocation113_spill] sm:$0xff] %v9561_v10  ;;  %v9578_v60 = vadd.f32 %v4135_v58, %v14214_v61  ;;  %v9581_v41 = vadd.f32 %v4136_v40, %v14216_v31  ;;  %v9583_v20 = vperm.slane %v2122_v5, 0  ;;  %v9585_v17 = vperm.slane %v2123_v36, 0  ;;  %v14220_v10 = vld [vmem:[#allocation57_spill] sm:$0xff]  ;;  %v1041_v31 = vpop.f32.mrf.mxu0 }
 0x358   : > { %14208 = vst [vmem:[#allocation114_spill] sm:$0xff] %v9563_v57  ;;  %v9588_v46 = vadd.f32 %v4137_v38, %v14220_v10  ;;  %v14222_v49 = vperm.slane %v9506_v9, 0  ;;  %v2175_v12 = vmul.f32 %v9553_v63, %v14200_v8  ;;  %v4172_v2 = vrot.slane %v1520_v47, 1  ;;  %7259 = vmatmul.msk.f32.gmra.mxu3 %vm1063_vm2, %v1041_v31  ;;  %7291 = vmatmul.msk.f32.gmra.mxu1 %vm1063_vm2, %v1041_v31 }
 0x359   : > { %14209 = vst [vmem:[#allocation115_spill] sm:$0xff] %v9565_v28  ;;  %v2177_v58 = vmul.f32 %v9563_v57, %v14200_v8  ;;  %v2179_v40 = vmul.f32 %v9565_v28, %v14200_v8  ;;  %v4173_v5 = vrot.slane %v1520_v47, 2  ;;  %v4174_v36 = vrot.slane %v1520_v47, 3 }
 0x35a   : > { %14212 = vst [vmem:[#allocation100_spill] sm:$0xff] %v9573_v4  ;;  %v2173_v59 = vmul.f32 %v14222_v49, %v14200_v8  ;;  %v2181_v38 = vmul.f32 %v9573_v4, %v14200_v8  ;;  %v2183_v10 = vmul.f32 %v9575_v56, %v14200_v8  ;;  %v4175_v55 = vrot.slane %v1520_v47, 4 }
 0x35b   : > { %14213 = vst [vmem:[#allocation70_spill] sm:$0xff] %v9575_v56  ;;  %v4176_v61 = vrot.slane %v1520_v47, 5  ;;  %v2185_v49 = vmul.f32 %v9583_v20, %v14200_v8  ;;  %v2187_v57 = vmul.f32 %v9585_v17, %v14200_v8  ;;  %v4177_v63 = vrot.slane %v1520_v47, 6 }
 0x35c   : > { %14215 = vst [vmem:[#allocation71_spill] sm:$0xff] %v9578_v60  ;;  %v4178_v9 = vrot.slane %v1520_v47, 7  ;;  %v9609_v28 = vadd.f32 %v2173_v59, %v9344_v13  ;;  %v9612_v4 = vadd.f32 %v2175_v12, %v9347_v29  ;;  %v4186_v56 = vperm.slane %v1520_v47, 0  ;;  %v9627_v47 = vpop.f32.mrf.mxu2  ;;  %v14229_v12 = vld [vmem:[#allocation40_spill] sm:$0xff] }
 0x35d   : > { %14217 = vst [vmem:[#allocation56_spill] sm:$0xff] %v9581_v41  ;;  %v9616_v41 = vadd.f32 %v2177_v58, %v9350_v0  ;;  %v4188_v8 = vperm.slane %v4173_v5, 0  ;;  %v9622_v60 = vadd.f32 %v2181_v38, %v9356_v34  ;;  %v9625_v13 = vadd.f32 %v2183_v10, %v9359_v35  ;;  %v14231_v0 = vld [vmem:[#allocation41_spill] sm:$0xff] }
 0x35e   : > { %14218 = vst [vmem:[#allocation116_spill] sm:$0xff] %v9583_v20  ;;  %v9619_v20 = vadd.f32 %v2179_v40, %v9353_v1  ;;  %v4190_v29 = vperm.slane %v4175_v55, 0  ;;  %v4191_v59 = vperm.slane %v4176_v61, 0  ;;  %v9633_v58 = vadd.f32 %v2187_v57, %v14231_v0  ;;  %v9643_v57 = vpop.f32.mrf.mxu3 }
 0x35f   : > { %14219 = vst [vmem:[#allocation117_spill] sm:$0xff] %v9585_v17  ;;  %v4189_v17 = vperm.slane %v4174_v36, 0  ;;  %v4192_v1 = vperm.slane %v4177_v63, 0  ;;  %v4193_v40 = vperm.slane %v4178_v9, 0  ;;  %v4218_v5 = vmul.f32 %v4186_v56, %v9555_v48 }
 0x360   : > { %14221 = vst [vmem:[#allocation57_spill] sm:$0xff] %v9588_v46  ;;  %v4187_v46 = vperm.slane %v4172_v2, 0  ;;  %v9630_v2 = vadd.f32 %v2185_v49, %v14229_v12  ;;  %v4219_v34 = vmul.f32 %v4186_v56, %v9627_v47  ;;  %v4222_v38 = vmul.f32 %v4188_v8, %v9555_v48 }
 0x361   : > { %14223 = vst [vmem:[#allocation118_spill] sm:$0xff] %v9609_v28  ;;  %v4223_v10 = vmul.f32 %v4188_v8, %v9627_v47  ;;  %v4224_v55 = vmul.f32 %v4189_v17, %v9555_v48  ;;  %v4225_v61 = vmul.f32 %v4189_v17, %v9627_v47  ;;  %v4226_v9 = vmul.f32 %v4190_v29, %v9555_v48 }
 0x362   : > { %14224 = vst [vmem:[#allocation119_spill] sm:$0xff] %v9612_v4  ;;  %v4220_v36 = vmul.f32 %v4187_v46, %v9555_v48  ;;  %v4221_v35 = vmul.f32 %v4187_v46, %v9627_v47  ;;  %v4227_v63 = vmul.f32 %v4190_v29, %v9627_v47  ;;  %v4228_v56 = vmul.f32 %v4191_v59, %v9555_v48 }
 0x363   : > { %14225 = vst [vmem:[#allocation120_spill] sm:$0xff] %v9616_v41  ;;  %v4229_v31 = vmul.f32 %v4191_v59, %v9627_v47  ;;  %v4230_v46 = vmul.f32 %v4192_v1, %v9555_v48  ;;  %v4231_v49 = vmul.f32 %v4192_v1, %v9627_v47  ;;  %v4232_v8 = vmul.f32 %v4193_v40, %v9555_v48 }
 0x364   : > { %14226 = vst [vmem:[#allocation121_spill] sm:$0xff] %v9619_v20  ;;  %v4233_v12 = vmul.f32 %v4193_v40, %v9627_v47  ;;  %v9654_v17 = vadd.f32 %v4218_v5, %v9388_v39  ;;  %v9657_v0 = vadd.f32 %v4219_v34, %v9391_v26  ;;  %v2222_v29 = vrot.slane %v9643_v57, 1 }
 0x365   : > { %14227 = vst [vmem:[#allocation122_spill] sm:$0xff] %v9622_v60  ;;  %v9662_v59 = vadd.f32 %v4220_v36, %v9396_v19  ;;  %v2224_v1 = vrot.slane %v9643_v57, 3  ;;  %v2225_v40 = vrot.slane %v9643_v57, 4  ;;  %v9670_v39 = vadd.f32 %v4222_v38, %v9404_v16 }
 0x366   : > { %14228 = vst [vmem:[#allocation123_spill] sm:$0xff] %v9625_v13  ;;  %v9673_v26 = vadd.f32 %v4223_v10, %v9407_v54  ;;  %v2226_v5 = vrot.slane %v9643_v57, 5  ;;  %v2227_v34 = vrot.slane %v9643_v57, 6  ;;  %v9678_v19 = vadd.f32 %v4224_v55, %v9412_v22 }
 0x367   : > { %14230 = vst [vmem:[#allocation40_spill] sm:$0xff] %v9630_v2  ;;  %v9665_v2 = vadd.f32 %v4221_v35, %v9399_v51  ;;  %v9681_v51 = vadd.f32 %v4225_v61, %v9415_v32  ;;  %v2228_v36 = vrot.slane %v9643_v57, 7  ;;  %v9686_v16 = vadd.f32 %v4226_v9, %v9420_v43  ;;  %v1523_v35 = vpop.f32.mrf.mxu1  ;;  %v14238_v43 = vld [vmem:[#allocation108_spill] sm:$0xff] }
 0x368   : > { %14232 = vst [vmem:[#allocation41_spill] sm:$0xff] %v9633_v58  ;;  %v2223_v58 = vrot.slane %v9643_v57, 2  ;;  %v9689_v54 = vadd.f32 %v4227_v63, %v9423_v50  ;;  %v9691_v38 = vperm.slane %v2222_v29, 0  ;;  %v9696_v22 = vadd.f32 %v4228_v56, %v9430_v24  ;;  %v14239_v50 = vld [vmem:[#allocation109_spill] sm:$0xff]  ;;  %v14242_v24 = vld [vmem:[#allocation76_spill] sm:$0xff] }
 0x369   : > { %14233 = vst [vmem:[#allocation124_spill] sm:$0xff] %v9643_v57  ;;  %v9699_v32 = vadd.f32 %v4229_v31, %v9433_v11  ;;  %v9701_v55 = vperm.slane %v2224_v1, 0  ;;  %v9703_v61 = vperm.slane %v2225_v40, 0  ;;  %v9706_v9 = vadd.f32 %v4230_v46, %v14238_v43  ;;  %v14243_v11 = vld [vmem:[#allocation44_spill] sm:$0xff]  ;;  %v14245_v40 = vld [vmem:[#allocation11_spill] sm:$0xff] }
 0x36a   : > { %14234 = vst [vmem:[#allocation125_spill] sm:$0xff] %v9691_v38  ;;  %v9693_v10 = vperm.slane %v2223_v58, 0  ;;  %v9709_v63 = vadd.f32 %v4231_v49, %v14239_v50  ;;  %v9711_v29 = vperm.slane %v2226_v5, 0  ;;  %v9713_v58 = vperm.slane %v2227_v34, 0 }
 0x36b   : > { %14236 = vst [vmem:[#allocation127_spill] sm:$0xff] %v9701_v55  ;;  %v9716_v56 = vadd.f32 %v4232_v8, %v14242_v24  ;;  %v9719_v31 = vadd.f32 %v4233_v12, %v14243_v11  ;;  %v9721_v1 = vperm.slane %v2228_v36, 0  ;;  %v14246_v13 = vperm.slane %v9643_v57, 0 }
 0x36c   : > { %14235 = vst [vmem:[#allocation126_spill] sm:$0xff] %v9693_v10  ;;  %v2271_v49 = vmul.f32 %v9691_v38, %v14245_v40  ;;  %v2273_v5 = vmul.f32 %v9693_v10, %v14245_v40  ;;  %v4179_v34 = vrot.slane %v1523_v35, 1  ;;  %v4180_v43 = vrot.slane %v1523_v35, 2 }
 0x36d   : > { %14237 = vst [vmem:[#allocation128_spill] sm:$0xff] %v9703_v61  ;;  %v2269_v46 = vmul.f32 %v14246_v13, %v14245_v40  ;;  %v2275_v8 = vmul.f32 %v9701_v55, %v14245_v40  ;;  %v2277_v12 = vmul.f32 %v9703_v61, %v14245_v40  ;;  %v4181_v36 = vrot.slane %v1523_v35, 3 }
 0x36e   : > { %14240 = vst [vmem:[#allocation108_spill] sm:$0xff] %v9711_v29  ;;  %v4182_v50 = vrot.slane %v1523_v35, 4  ;;  %v2279_v24 = vmul.f32 %v9711_v29, %v14245_v40  ;;  %v2281_v13 = vmul.f32 %v9713_v58, %v14245_v40  ;;  %v4183_v11 = vrot.slane %v1523_v35, 5 }
 0x36f   : > { %14241 = vst [vmem:[#allocation109_spill] sm:$0xff] %v9713_v58  ;;  %v4184_v38 = vrot.slane %v1523_v35, 6  ;;  %v2283_v10 = vmul.f32 %v9721_v1, %v14245_v40  ;;  %v9741_v57 = vadd.f32 %v2269_v46, %v9477_v7  ;;  %v4185_v55 = vrot.slane %v1523_v35, 7 }
 0x370   : > { %14244 = vst [vmem:[#allocation76_spill] sm:$0xff] %v9721_v1  ;;  %v4194_v60 = vperm.slane %v1523_v35, 0  ;;  %v9744_v61 = vadd.f32 %v2271_v49, %v9480_v23  ;;  %v9747_v20 = vadd.f32 %v2273_v5, %v9483_v62  ;;  %v4195_v29 = vperm.slane %v4179_v34, 0  ;;  %v14254_v62 = vld [vmem:[#allocation7_spill] sm:$0xff] }
 0x371   : > { %14247 = vst [vmem:[#allocation44_spill] sm:$0xff] %v9741_v57  ;;  %v4196_v41 = vperm.slane %v4180_v43, 0  ;;  %v9750_v58 = vadd.f32 %v2275_v8, %v9486_v53  ;;  %v9753_v4 = vadd.f32 %v2277_v12, %v9489_v3  ;;  %v4197_v1 = vperm.slane %v4181_v36, 0  ;;  %v1526_v12 = vpop.f32.mrf.mxu1 }
 0x372   : > { %14248 = vst [vmem:[#allocation11_spill] sm:$0xff] %v9744_v61  ;;  %v4198_v28 = vperm.slane %v4182_v50, 0  ;;  %v9756_v7 = vadd.f32 %v2279_v24, %v9492_v15  ;;  %v9759_v35 = vadd.f32 %v2281_v13, %v9495_v52  ;;  %v4199_v23 = vperm.slane %v4183_v11, 0  ;;  %v9778_v24 = vpop.f32.mrf.mxu2 }
 0x373   : > { %14249 = vst [vmem:[#allocation129_spill] sm:$0xff] %v9747_v20  ;;  %v4200_v46 = vperm.slane %v4184_v38, 0  ;;  %v9762_v49 = vadd.f32 %v2283_v10, %v14254_v62  ;;  %v4201_v5 = vperm.slane %v4185_v55, 0  ;;  %v4234_v53 = vmul.f32 %v4194_v60, %v9555_v48 }
 0x374   : > { %14250 = vst [vmem:[#allocation130_spill] sm:$0xff] %v9750_v58  ;;  %v4235_v34 = vmul.f32 %v4194_v60, %v9627_v47  ;;  %v4236_v3 = vmul.f32 %v4195_v29, %v9555_v48  ;;  %v4237_v43 = vmul.f32 %v4195_v29, %v9627_v47  ;;  %v4238_v15 = vmul.f32 %v4196_v41, %v9555_v48 }
 0x375   : > { %14251 = vst [vmem:[#allocation131_spill] sm:$0xff] %v9753_v4  ;;  %v4239_v8 = vmul.f32 %v4196_v41, %v9627_v47  ;;  %v4240_v52 = vmul.f32 %v4197_v1, %v9555_v48  ;;  %v4241_v38 = vmul.f32 %v4197_v1, %v9627_v47  ;;  %v4242_v10 = vmul.f32 %v4198_v28, %v9555_v48 }
 0x376   : > { %14252 = vst [vmem:[#allocation132_spill] sm:$0xff] %v9756_v7  ;;  %v4243_v55 = vmul.f32 %v4198_v28, %v9627_v47  ;;  %v4244_v36 = vmul.f32 %v4199_v23, %v9555_v48  ;;  %v4245_v60 = vmul.f32 %v4199_v23, %v9627_v47  ;;  %v4246_v50 = vmul.f32 %v4200_v46, %v9555_v48 }
 0x377   : > { %14253 = vst [vmem:[#allocation133_spill] sm:$0xff] %v9759_v35  ;;  %v4247_v29 = vmul.f32 %v4200_v46, %v9627_v47  ;;  %v4248_v41 = vmul.f32 %v4201_v5, %v9555_v48  ;;  %v4249_v13 = vmul.f32 %v4201_v5, %v9627_v47  ;;  %v9783_v1 = vadd.f32 %v4234_v53, %v9519_v21  ;;  %v9803_v21 = vpop.f32.mrf.mxu3  ;;  %v14257_v53 = vld [vmem:[#allocation113_spill] sm:$0xff] }
 0x378   : > { %14255 = vst [vmem:[#allocation7_spill] sm:$0xff] %v9762_v49  ;;  %v9786_v28 = vadd.f32 %v4235_v34, %v9523_v30  ;;  %v9789_v11 = vadd.f32 %v4236_v3, %v9526_v18  ;;  %v9792_v23 = vadd.f32 %v4237_v43, %v9531_v37  ;;  %v9795_v46 = vadd.f32 %v4238_v15, %v9534_v27  ;;  %v14258_v3 = vld [vmem:[#allocation71_spill] sm:$0xff] }
 0x379   : > { %v4285_v62 = vrot.slane %v1526_v12, 2  ;;  %v9798_v48 = vadd.f32 %v4239_v8, %v9539_v45  ;;  %v9801_v47 = vadd.f32 %v4240_v52, %v9542_v42  ;;  %14256 = vst [vmem:[#allocation134_spill] sm:$0xff] %v9803_v21  ;;  %v4284_v30 = vrot.slane %v1526_v12, 1 }
 0x37a   : > { %v4286_v5 = vrot.slane %v1526_v12, 3  ;;  %v9806_v18 = vadd.f32 %v4241_v38, %v9547_v14  ;;  %v9809_v37 = vadd.f32 %v4242_v10, %v9550_v6  ;;  %v9812_v27 = vadd.f32 %v4243_v55, %v9558_v25  ;;  %v14259_v14 = vld [vmem:[#allocation56_spill] sm:$0xff]  ;;  %v14260_v6 = vld [vmem:[#allocation57_spill] sm:$0xff] }
 0x37b   : > { %v9815_v34 = vadd.f32 %v4244_v36, %v14257_v53  ;;  %v9818_v45 = vadd.f32 %v4245_v60, %v9568_v33  ;;  %v9821_v42 = vadd.f32 %v4246_v50, %v9571_v44  ;;  %v9824_v43 = vadd.f32 %v4247_v29, %v14258_v3 }
 0x37c   : > { %v9827_v15 = vadd.f32 %v4248_v41, %v14259_v14  ;;  %v9830_v8 = vadd.f32 %v4249_v13, %v14260_v6  ;;  %v2229_v25 = vrot.slane %v9803_v21, 1  ;;  %v4287_v52 = vrot.slane %v1526_v12, 4 }
 0x37d   : > { %v4300_v38 = vperm.slane %v4285_v62, 0  ;;  %v2230_v10 = vrot.slane %v9803_v21, 2  ;;  %v4288_v33 = vrot.slane %v1526_v12, 5  ;;  %v4299_v55 = vperm.slane %v4284_v30, 0 }
 0x37e   : > { %v4301_v36 = vperm.slane %v4286_v5, 0  ;;  %v2231_v44 = vrot.slane %v9803_v21, 3  ;;  %v2232_v60 = vrot.slane %v9803_v21, 4  ;;  %v2233_v50 = vrot.slane %v9803_v21, 5  ;;  %v9843_v5 = vpop.f32.mrf.mxu2 }
 0x37f   : > { %v4298_v29 = vperm.slane %v1526_v12, 0  ;;  %v2234_v41 = vrot.slane %v9803_v21, 6  ;;  %v2235_v13 = vrot.slane %v9803_v21, 7  ;;  %v4289_v53 = vrot.slane %v1526_v12, 6 }
 0x380   : > { %v4290_v3 = vrot.slane %v1526_v12, 7  ;;  %v9840_v14 = vperm.slane %v2229_v25, 0  ;;  %v4302_v6 = vperm.slane %v4287_v52, 0  ;;  %v4334_v30 = vmul.f32 %v4300_v38, %v9778_v24 }
 0x381   : > { %v9845_v49 = vperm.slane %v2230_v10, 0  ;;  %v4303_v35 = vperm.slane %v4288_v33, 0  ;;  %v4332_v7 = vmul.f32 %v4299_v55, %v9778_v24  ;;  %v4336_v4 = vmul.f32 %v4301_v36, %v9778_v24 }
 0x382   : > { %14261 = vst [vmem:[#allocation113_spill] sm:$0xff] %v9840_v14  ;;  %v4330_v57 = vmul.f32 %v4298_v29, %v9778_v24  ;;  %v4333_v12 = vmul.f32 %v4299_v55, %v9843_v5  ;;  %v4335_v62 = vmul.f32 %v4300_v38, %v9843_v5  ;;  %v4337_v25 = vmul.f32 %v4301_v36, %v9843_v5 }
 0x383   : > { %14262 = vst [vmem:[#allocation71_spill] sm:$0xff] %v9845_v49  ;;  %v9853_v52 = vperm.slane %v2231_v44, 0  ;;  %v9855_v58 = vperm.slane %v2232_v60, 0  ;;  %v4304_v61 = vperm.slane %v4289_v53, 0  ;;  %v4305_v10 = vperm.slane %v4290_v3, 0  ;;  %v9906_v3 = vpop.f32.mrf.mxu3 }
 0x384   : > { %v4331_v33 = vmul.f32 %v4298_v29, %v9843_v5  ;;  %v4338_v20 = vmul.f32 %v4302_v6, %v9778_v24  ;;  %v4339_v49 = vmul.f32 %v4302_v6, %v9843_v5  ;;  %v9861_v14 = vadd.f32 %v4334_v30, %v9670_v39  ;;  %14271 = vst [vmem:[#allocation141_spill] sm:$0xff] %v9906_v3 }
 0x385   : > { %14263 = vst [vmem:[#allocation56_spill] sm:$0xff] %v9853_v52  ;;  %v4340_v55 = vmul.f32 %v4303_v35, %v9778_v24  ;;  %v4341_v38 = vmul.f32 %v4303_v35, %v9843_v5  ;;  %v9866_v36 = vadd.f32 %v4332_v7, %v9662_v59  ;;  %v9869_v44 = vadd.f32 %v4336_v4, %v9678_v19 }
 0x386   : > { %14264 = vst [vmem:[#allocation57_spill] sm:$0xff] %v9855_v58  ;;  %v9872_v60 = vadd.f32 %v4330_v57, %v9654_v17  ;;  %v9875_v29 = vadd.f32 %v4333_v12, %v9665_v2  ;;  %v9878_v53 = vadd.f32 %v4335_v62, %v9673_v26  ;;  %v9881_v39 = vadd.f32 %v4337_v25, %v9681_v51 }
 0x387   : > { %v4342_v35 = vmul.f32 %v4304_v61, %v9778_v24  ;;  %v4343_v59 = vmul.f32 %v4304_v61, %v9843_v5  ;;  %v4344_v7 = vmul.f32 %v4305_v10, %v9778_v24  ;;  %v4345_v4 = vmul.f32 %v4305_v10, %v9843_v5 }
 0x388   : > { %14265 = vst [vmem:[#allocation135_spill] sm:$0xff] %v9881_v39  ;;  %v9887_v19 = vperm.slane %v2233_v50, 0  ;;  %v9889_v57 = vperm.slane %v2234_v41, 0  ;;  %v9892_v2 = vadd.f32 %v4331_v33, %v9657_v0  ;;  %v4394_v17 = vmax.f32 %v9872_v60, %v9861_v14  ;;  %v1529_v41 = vpop.f32.mrf.mxu1 }
 0x389   : > { %v9896_v26 = vperm.slane %v2235_v13, 0  ;;  %v9899_v51 = vadd.f32 %v4338_v20, %v9686_v16  ;;  %v9902_v61 = vadd.f32 %v4339_v49, %v9689_v54  ;;  %v4395_v50 = vmax.f32 %v9866_v36, %v9869_v44 }
 0x38a   : > { %14266 = vst [vmem:[#allocation136_spill] sm:$0xff] %v9887_v19  ;;  %v9909_v0 = vadd.f32 %v4340_v55, %v9696_v22  ;;  %v9912_v62 = vadd.f32 %v4341_v38, %v9699_v32  ;;  %v4409_v13 = vmax.f32 %v9892_v2, %v9878_v53  ;;  %v4410_v20 = vmax.f32 %v9875_v29, %v9881_v39 }
 0x38b   : > { %14267 = vst [vmem:[#allocation137_spill] sm:$0xff] %v9889_v57  ;;  %v9919_v16 = vadd.f32 %v4342_v35, %v9706_v9  ;;  %v9922_v54 = vadd.f32 %v4343_v59, %v9709_v63  ;;  %v9925_v49 = vadd.f32 %v4344_v7, %v9716_v56  ;;  %v9928_v22 = vadd.f32 %v4345_v4, %v9719_v31 }
 0x38c   : > { %14268 = vst [vmem:[#allocation138_spill] sm:$0xff] %v9896_v26  ;;  %v4396_v32 = vmax.f32 %v4394_v17, %v9899_v51  ;;  %v2334_v6 = vrot.slane %v9906_v3, 1  ;;  %v4291_v30 = vrot.slane %v1529_v41, 1  ;;  %v4292_v12 = vrot.slane %v1529_v41, 2 }
 0x38d   : > { %14269 = vst [vmem:[#allocation139_spill] sm:$0xff] %v9899_v51  ;;  %v4397_v25 = vmax.f32 %v4395_v50, %v9909_v0  ;;  %v2335_v9 = vrot.slane %v9906_v3, 2  ;;  %v2336_v10 = vrot.slane %v9906_v3, 3  ;;  %v4293_v63 = vrot.slane %v1529_v41, 3 }
 0x38e   : > { %14270 = vst [vmem:[#allocation140_spill] sm:$0xff] %v9902_v61  ;;  %v4411_v33 = vmax.f32 %v4409_v13, %v9902_v61  ;;  %v4412_v56 = vmax.f32 %v4410_v20, %v9912_v62  ;;  %v4306_v55 = vperm.slane %v1529_v41, 0  ;;  %v4294_v38 = vrot.slane %v1529_v41, 4 }
 0x38f   : > { %14272 = vst [vmem:[#allocation142_spill] sm:$0xff] %v9909_v0  ;;  %v4295_v35 = vrot.slane %v1529_v41, 5  ;;  %v4307_v59 = vperm.slane %v4291_v30, 0  ;;  %v4308_v7 = vperm.slane %v4292_v12, 0  ;;  %v4398_v4 = vmax.f32 %v4396_v32, %v9919_v16 }
 0x390   : > { %14273 = vst [vmem:[#allocation143_spill] sm:$0xff] %v9912_v62  ;;  %v4296_v0 = vrot.slane %v1529_v41, 6  ;;  %v4399_v51 = vmax.f32 %v4397_v25, %v9925_v49  ;;  %v4297_v39 = vrot.slane %v1529_v41, 7  ;;  %v4309_v13 = vperm.slane %v4293_v63, 0 }
 0x391   : > { %14274 = vst [vmem:[#allocation144_spill] sm:$0xff] %v9919_v16  ;;  %v4346_v20 = vmul.f32 %v4306_v55, %v9778_v24  ;;  %v4413_v31 = vmax.f32 %v4411_v33, %v9922_v54  ;;  %v4347_v62 = vmul.f32 %v4306_v55, %v9843_v5  ;;  %v4348_v30 = vmul.f32 %v4307_v59, %v9778_v24 }
 0x392   : > { %14275 = vst [vmem:[#allocation145_spill] sm:$0xff] %v9925_v49  ;;  %v4349_v12 = vmul.f32 %v4307_v59, %v9843_v5  ;;  %v4414_v32 = vmax.f32 %v4412_v56, %v9928_v22  ;;  %v4310_v17 = vperm.slane %v4294_v38, 0  ;;  %v4311_v16 = vperm.slane %v4295_v35, 0 }
 0x393   : > { %v4350_v50 = vmul.f32 %v4308_v7, %v9778_v24  ;;  %v9949_v61 = vperm.slane %v2334_v6, 0  ;;  %v9951_v41 = vperm.slane %v2335_v9, 0  ;;  %v4312_v25 = vperm.slane %v4296_v0, 0 }
 0x394   : > { %v4351_v63 = vmul.f32 %v4308_v7, %v9843_v5  ;;  %v9954_v33 = vperm.slane %v2336_v10, 0  ;;  %v4313_v55 = vperm.slane %v4297_v39, 0  ;;  %v4352_v49 = vmul.f32 %v4309_v13, %v9778_v24 }
 0x395   : > { %14276 = vst [vmem:[#allocation146_spill] sm:$0xff] %v9949_v61  ;;  %v9958_v59 = vadd.f32 %v4346_v20, %v9783_v1  ;;  %v4353_v56 = vmul.f32 %v4309_v13, %v9843_v5  ;;  %v9962_v38 = vadd.f32 %v4347_v62, %v9786_v28  ;;  %v9965_v6 = vadd.f32 %v4348_v30, %v9789_v11  ;;  %v14279_v30 = vld [vmem:[#allocation16_spill] sm:$0xff] }
 0x396   : > { %14277 = vst [vmem:[#allocation147_spill] sm:$0xff] %v9951_v41  ;;  %v9968_v0 = vadd.f32 %v4349_v12, %v9792_v23  ;;  %v4354_v9 = vmul.f32 %v4310_v17, %v9778_v24  ;;  %v4355_v39 = vmul.f32 %v4310_v17, %v9843_v5  ;;  %v4356_v10 = vmul.f32 %v4311_v16, %v9778_v24  ;;  %v1044_v23 = vpop.f32.mrf.mxu0 }
 0x397   : > { %14278 = vst [vmem:[#allocation148_spill] sm:$0xff] %v9954_v33  ;;  %v9974_v1 = vadd.f32 %v4350_v50, %v9795_v46  ;;  %v4357_v35 = vmul.f32 %v4311_v16, %v9843_v5  ;;  %v4358_v28 = vmul.f32 %v4312_v25, %v9778_v24  ;;  %v4359_v62 = vmul.f32 %v4312_v25, %v9843_v5 }
 0x398   : > { %v9980_v11 = vadd.f32 %v4351_v63, %v9798_v48  ;;  %v4360_v7 = vmul.f32 %v4313_v55, %v9778_v24  ;;  %v4361_v13 = vmul.f32 %v4313_v55, %v9843_v5  ;;  %v9985_v17 = vadd.f32 %v4352_v49, %v9801_v47  ;;  %7260 = vmatmul.msk.f32.gmra.mxu3 %vm1063_vm2, %v1044_v23 }
 0x399   : > { %v4400_v46 = vmax.f32 %v4398_v4, %v9958_v59  ;;  %v9990_v16 = vadd.f32 %v4353_v56, %v9806_v18  ;;  %v4401_v50 = vmax.f32 %v4399_v51, %v9965_v6  ;;  %v4415_v48 = vmax.f32 %v4413_v31, %v9962_v38  ;;  %7292 = vmatmul.msk.f32.gmra.mxu1 %vm1063_vm2, %v1044_v23 }
 0x39a   : > { %v4416_v20 = vmax.f32 %v4414_v32, %v9968_v0  ;;  %v9997_v24 = vadd.f32 %v4354_v9, %v9809_v37  ;;  %v10000_v47 = vadd.f32 %v4355_v39, %v9812_v27  ;;  %v10003_v5 = vadd.f32 %v4356_v10, %v9815_v34 }
 0x39b   : > { %v4402_v18 = vmax.f32 %v4400_v46, %v9974_v1  ;;  %v10007_v49 = vadd.f32 %v4357_v35, %v9818_v45  ;;  %v4403_v51 = vmax.f32 %v4401_v50, %v9985_v17  ;;  %v4417_v31 = vmax.f32 %v4415_v48, %v9980_v11  ;;  %v14284_v50 = vld [vmem:[#allocation113_spill] sm:$0xff] }
 0x39c   : > { %v4418_v4 = vmax.f32 %v4416_v20, %v9990_v16  ;;  %v2339_v37 = vrot.slane %v9906_v3, 6  ;;  %v2385_v27 = vmul.f32 %v9951_v41, %v14279_v30  ;;  %v10016_v12 = vadd.f32 %v4360_v7, %v9827_v15 }
 0x39d   : > { %v10019_v34 = vadd.f32 %v4361_v13, %v9830_v8  ;;  %v4404_v45 = vmax.f32 %v4402_v18, %v9997_v24  ;;  %v4405_v32 = vmax.f32 %v4403_v51, %v10003_v5  ;;  %v4419_v25 = vmax.f32 %v4417_v31, %v10000_v47 }
 0x39e   : > { %v4420_v63 = vmax.f32 %v4418_v4, %v10007_v49  ;;  %v14280_v55 = vrot.slane %v9906_v3, 4  ;;  %v14282_v9 = vperm.slane %v9906_v3, 0  ;;  %v2383_v8 = vmul.f32 %v9949_v61, %v14279_v30  ;;  %v14297_v61 = vld [vmem:[#allocation131_spill] sm:$0xff] }
 0x39f   : > { %v2387_v39 = vmul.f32 %v9954_v33, %v14279_v30  ;;  %v10037_v10 = vadd.f32 %v4358_v28, %v9821_v42  ;;  %v10040_v35 = vadd.f32 %v4359_v62, %v9824_v43  ;;  %v4407_v23 = vmax.f32 %v4405_v32, %v10016_v12  ;;  %v14287_v43 = vld [vmem:[#allocation71_spill] sm:$0xff]  ;;  %v14288_v62 = vld [vmem:[#allocation129_spill] sm:$0xff] }
 0x3a0   : > { %v10027_v56 = vperm.slane %v14280_v55, 0  ;;  %v2381_v15 = vmul.f32 %v14282_v9, %v14279_v30  ;;  %v4422_v7 = vmax.f32 %v4420_v63, %v10019_v34  ;;  %v14283_v13 = vperm.slane %v9803_v21, 0  ;;  %v14290_v55 = vld [vmem:[#allocation11_spill] sm:$0xff] }
 0x3a1   : > { %v2287_v48 = vmul.f32 %v14284_v50, %v14245_v40  ;;  %v2340_v20 = vrot.slane %v9906_v3, 7  ;;  %v14285_v18 = vrot.slane %v9906_v3, 5  ;;  %v2289_v28 = vmul.f32 %v14287_v43, %v14245_v40 }
 0x3a2   : > { %14281 = vst [vmem:[#allocation16_spill] sm:$0xff] %v10027_v56  ;;  %v2285_v46 = vmul.f32 %v14283_v13, %v14245_v40  ;;  %v10057_v51 = vadd.f32 %v2385_v27, %v14288_v62  ;;  %v4406_v31 = vmax.f32 %v4404_v45, %v10037_v10  ;;  %v4421_v4 = vmax.f32 %v4419_v25, %v10040_v35  ;;  %v14291_v13 = vld [vmem:[#allocation130_spill] sm:$0xff]  ;;  %v14292_v27 = vld [vmem:[#allocation44_spill] sm:$0xff] }
 0x3a3   : > { %v10052_v42 = vperm.slane %v14285_v18, 0  ;;  %v2291_v32 = vmul.f32 %v9853_v52, %v14245_v40  ;;  %v10063_v63 = vperm.slane %v2339_v37, 0  ;;  %v10066_v9 = vadd.f32 %v2383_v8, %v14290_v55 }
 0x3a4   : > { %v10069_v18 = vadd.f32 %v2387_v39, %v14291_v13  ;;  %v2389_v33 = vmul.f32 %v10027_v56, %v14279_v30  ;;  %v10074_v62 = vadd.f32 %v2381_v15, %v14292_v27  ;;  %v10076_v45 = vmax.f32 %v4406_v31, %v4407_v23  ;;  %v14294_v23 = vld [vmem:[#allocation118_spill] sm:$0xff] }
 0x3a5   : > { %14286 = vst [vmem:[#allocation149_spill] sm:$0xff] %v10052_v42  ;;  %v10078_v25 = vmax.f32 %v4421_v4, %v4422_v7  ;;  %v2293_v37 = vmul.f32 %v9855_v58, %v14245_v40  ;;  %v2295_v8 = vmul.f32 %v9887_v19, %v14245_v40  ;;  %v10084_v55 = vperm.slane %v2340_v20, 0  ;;  %v14295_v4 = vld [vmem:[#allocation119_spill] sm:$0xff]  ;;  %v14296_v20 = vld [vmem:[#allocation120_spill] sm:$0xff]  ;;  %v10158_v19 = vpop.f32.mrf.mxu3 }
 0x3a6   : > { %14289 = vst [vmem:[#allocation129_spill] sm:$0xff] %v10063_v63  ;;  %v2391_v39 = vmul.f32 %v10052_v42, %v14279_v30  ;;  %v2297_v13 = vmul.f32 %v9889_v57, %v14245_v40  ;;  %v2299_v15 = vmul.f32 %v9896_v26, %v14245_v40  ;;  %v10093_v7 = vadd.f32 %v2285_v46, %v14294_v23  ;;  %v14302_v26 = vld [vmem:[#allocation123_spill] sm:$0xff]  ;;  %v14305_v57 = vld [vmem:[#allocation41_spill] sm:$0xff] }
 0x3a7   : > { %14293 = vst [vmem:[#allocation11_spill] sm:$0xff] %v10084_v55  ;;  %v2459_v31 = vmax.f32 %v10074_v62, %v10057_v51  ;;  %v10098_v27 = vadd.f32 %v2287_v48, %v14295_v4  ;;  %v10101_v56 = vadd.f32 %v2289_v28, %v14296_v20  ;;  %v2393_v42 = vmul.f32 %v10063_v63, %v14279_v30  ;;  %v14298_v28 = vld [vmem:[#allocation121_spill] sm:$0xff]  ;;  %v14299_v63 = vld [vmem:[#allocation132_spill] sm:$0xff] }
 0x3a8   : > { %v2460_v41 = vmax.f32 %v10066_v9, %v10069_v18  ;;  %v10108_v40 = vadd.f32 %v2389_v33, %v14297_v61  ;;  %v4424_v46 = vsub.f32 %v9872_v60, %v10076_v45  ;;  %v4425_v23 = vsub.f32 %v9892_v2, %v10078_v25  ;;  %v14301_v33 = vld [vmem:[#allocation122_spill] sm:$0xff] }
 0x3a9   : > { %v4426_v48 = vsub.f32 %v9866_v36, %v10076_v45  ;;  %v10117_v4 = vadd.f32 %v2291_v32, %v14298_v28  ;;  %v2395_v20 = vmul.f32 %v10084_v55, %v14279_v30  ;;  %v10122_v3 = vadd.f32 %v2391_v39, %v14299_v63  ;;  %v14303_v28 = vld [vmem:[#allocation40_spill] sm:$0xff]  ;;  %v14304_v63 = vld [vmem:[#allocation133_spill] sm:$0xff] }
 0x3aa   : > { %v4427_v61 = vsub.f32 %v9875_v29, %v10078_v25  ;;  %v10127_v60 = vadd.f32 %v2293_v37, %v14301_v33  ;;  %v10130_v2 = vadd.f32 %v2295_v8, %v14302_v26  ;;  %v10133_v36 = vmax.f32 %v2459_v31, %v10108_v40 }
 0x3ab   : > { %14300 = vst [vmem:[#allocation130_spill] sm:$0xff] %v10122_v3  ;;  %v4428_v32 = vsub.f32 %v9861_v14, %v10076_v45  ;;  %v10138_v55 = vadd.f32 %v2297_v13, %v14303_v28  ;;  %v10141_v39 = vadd.f32 %v2393_v42, %v14304_v63  ;;  %v10144_v29 = vmax.f32 %v2460_v41, %v10122_v3  ;;  %v14306_v13 = vld [vmem:[#allocation7_spill] sm:$0xff] }
 0x3ac   : > { %v4429_v37 = vsub.f32 %v9878_v53, %v10078_v25  ;;  %v4430_v26 = vsub.f32 %v9869_v44, %v10076_v45  ;;  %v4456_v8 = vmul.f32 1.442695, %v4424_v46  ;;  %v4458_v31 = vmul.f32 1.442695, %v4425_v23  ;;  %v14307_v42 = vld [vmem:[#allocation135_spill] sm:$0xff]  ;;  %v14310_v53 = vld [vmem:[#allocation142_spill] sm:$0xff] }
 0x3ad   : > { %v4460_v33 = vmul.f32 1.442695, %v4426_v48  ;;  %v10151_v14 = vadd.f32 %v2299_v15, %v14305_v57  ;;  %v10154_v28 = vadd.f32 %v2395_v20, %v14306_v13  ;;  %v4431_v63 = vsub.f32 %v14307_v42, %v10078_v25  ;;  %v14308_v44 = vld [vmem:[#allocation139_spill] sm:$0xff]  ;;  %v14309_v15 = vld [vmem:[#allocation140_spill] sm:$0xff] }
 0x3ae   : > { %v4462_v41 = vmul.f32 1.442695, %v4427_v61  ;;  %v4432_v46 = vsub.f32 %v14308_v44, %v10076_v45  ;;  %7402 = vpow2.f32 %v4456_v8  ;;  %v4464_v23 = vmul.f32 1.442695, %v4428_v32 }
 0x3af   : > { %v4433_v48 = vsub.f32 %v14309_v15, %v10078_v25  ;;  %7404 = vpow2.f32 %v4458_v31  ;;  %v4466_v20 = vmul.f32 1.442695, %v4429_v37  ;;  %v4468_v61 = vmul.f32 1.442695, %v4430_v26  ;;  %v14311_v37 = vld [vmem:[#allocation143_spill] sm:$0xff] }
 0x3b0   : > { %7406 = vpow2.f32 %v4460_v33  ;;  %v2341_v13 = vrot.slane %v10158_v19, 1  ;;  %v2342_v42 = vrot.slane %v10158_v19, 2  ;;  %v4434_v58 = vsub.f32 %v14310_v53, %v10076_v45 }
 0x3b1   : > { %7408 = vpow2.f32 %v4462_v41  ;;  %v4470_v8 = vmul.f32 1.442695, %v4431_v63  ;;  %v2343_v32 = vrot.slane %v10158_v19, 3  ;;  %v4472_v44 = vmul.f32 1.442695, %v4432_v46 }
 0x3b2   : > { %7410 = vpow2.f32 %v4464_v23  ;;  %v2344_v57 = vrot.slane %v10158_v19, 4  ;;  %v2345_v31 = vrot.slane %v10158_v19, 5  ;;  %v4435_v26 = vsub.f32 %v14311_v37, %v10078_v25  ;;  %v14315_v23 = vld [vmem:[#allocation144_spill] sm:$0xff] }
 0x3b3   : > { %7412 = vpow2.f32 %v4466_v20  ;;  %v4474_v33 = vmul.f32 1.442695, %v4433_v48  ;;  %v2346_v15 = vrot.slane %v10158_v19, 6  ;;  %v2347_v63 = vrot.slane %v10158_v19, 7 }
 0x3b4   : > { %v10178_v52 = vpop.eup %7402  ;;  %7414 = vpow2.f32 %v4468_v61  ;;  %v10182_v53 = vperm.slane %v2341_v13, 0  ;;  %v4436_v43 = vsub.f32 %v14315_v23, %v10076_v45  ;;  %v4476_v37 = vmul.f32 1.442695, %v4434_v58 }
 0x3b5   : > { %14312 = vst [vmem:[#allocation44_spill] sm:$0xff] %v10178_v52  ;;  %v10184_v46 = vpop.eup %7404  ;;  %7416 = vpow2.f32 %v4470_v8  ;;  %v10188_v20 = vperm.slane %v2342_v42, 0  ;;  %v10192_v50 = vperm.slane %v2343_v32, 0  ;;  %v10194_v61 = vperm.slane %v2344_v57, 0 }
 0x3b6   : > { %14313 = vst [vmem:[#allocation118_spill] sm:$0xff] %v10182_v53  ;;  %v10190_v48 = vpop.eup %7406  ;;  %7418 = vpow2.f32 %v4472_v44  ;;  %v10196_v21 = vperm.slane %v2345_v31, 0  ;;  %v4437_v41 = vsub.f32 %v9922_v54, %v10078_v25  ;;  %v4478_v23 = vmul.f32 1.442695, %v4435_v26  ;;  %v14322_v26 = vld [vmem:[#allocation145_spill] sm:$0xff] }
 0x3b7   : > { %14314 = vst [vmem:[#allocation119_spill] sm:$0xff] %v10184_v46  ;;  %v10198_v13 = vpop.eup %7408  ;;  %7420 = vpow2.f32 %v4474_v33  ;;  %v4520_v58 = vadd.f32 %v10190_v48, %v10178_v52  ;;  %v10208_v32 = vperm.slane %v2346_v15, 0  ;;  %v14320_v57 = vperm.slane %v10158_v19, 0 }
 0x3b8   : > { %14316 = vst [vmem:[#allocation120_spill] sm:$0xff] %v10190_v48  ;;  %v10204_v42 = vpop.eup %7410  ;;  %v4535_v8 = vadd.f32 %v10198_v13, %v10184_v46  ;;  %v2399_v31 = vmul.f32 %v10182_v53, %v14279_v30  ;;  %v4438_v33 = vsub.f32 %v14322_v26, %v10076_v45  ;;  %7422 = vpow2.f32 %v4476_v37 }
 0x3b9   : > { %14317 = vst [vmem:[#allocation131_spill] sm:$0xff] %v10198_v13  ;;  %v2397_v44 = vmul.f32 %v14320_v57, %v14279_v30  ;;  %v10215_v54 = vpop.eup %7412  ;;  %v4480_v48 = vmul.f32 1.442695, %v4436_v43  ;;  %v4521_v52 = vadd.f32 %v10204_v42, %v4520_v58  ;;  %v4439_v15 = vsub.f32 %v9928_v22, %v10078_v25 }
 0x3ba   : > { %14318 = vst [vmem:[#allocation121_spill] sm:$0xff] %v10204_v42  ;;  %v10220_v3 = vpop.eup %7414  ;;  %v4536_v13 = vadd.f32 %v10215_v54, %v4535_v8  ;;  %v10225_v57 = vperm.slane %v2347_v63, 0  ;;  %v2401_v46 = vmul.f32 %v10188_v20, %v14279_v30  ;;  %v4440_v37 = vsub.f32 %v9958_v59, %v10076_v45 }
 0x3bb   : > { %14319 = vst [vmem:[#allocation132_spill] sm:$0xff] %v10208_v32  ;;  %v10229_v53 = vpop.eup %7416  ;;  %7424 = vpow2.f32 %v4478_v23  ;;  %v4482_v43 = vmul.f32 1.442695, %v4437_v41  ;;  %v4522_v58 = vadd.f32 %v10220_v3, %v4521_v52  ;;  %v2403_v63 = vmul.f32 %v10192_v50, %v14279_v30 }
 0x3bc   : > { %14321 = vst [vmem:[#allocation122_spill] sm:$0xff] %v10215_v54  ;;  %v10234_v26 = vpop.eup %7418  ;;  %v4537_v22 = vadd.f32 %v10229_v53, %v4536_v13  ;;  %v10240_v8 = vadd.f32 %v2397_v44, %v10093_v7  ;;  %v10243_v54 = vadd.f32 %v2399_v31, %v10098_v27  ;;  %7426 = vpow2.f32 %v4480_v48 }
 0x3bd   : > { %14323 = vst [vmem:[#allocation123_spill] sm:$0xff] %v10220_v3  ;;  %v10245_v42 = vpop.eup %7420  ;;  %v4484_v59 = vmul.f32 1.442695, %v4438_v33  ;;  %v4523_v41 = vadd.f32 %v10234_v26, %v4522_v58  ;;  %v2405_v52 = vmul.f32 %v10194_v61, %v14279_v30  ;;  %v4441_v13 = vsub.f32 %v9962_v38, %v10078_v25 }
 0x3be   : > { %14324 = vst [vmem:[#allocation40_spill] sm:$0xff] %v10225_v57  ;;  %v4538_v23 = vadd.f32 %v10245_v42, %v4537_v22  ;;  %v2407_v7 = vmul.f32 %v10196_v21, %v14279_v30  ;;  %v10256_v27 = vadd.f32 %v2401_v46, %v10101_v56  ;;  %v10258_v44 = vpop.eup %7422  ;;  %7428 = vpow2.f32 %v4482_v43 }
 0x3bf   : > { %14325 = vst [vmem:[#allocation133_spill] sm:$0xff] %v10229_v53  ;;  %v4486_v48 = vmul.f32 1.442695, %v4439_v15  ;;  %v2409_v31 = vmul.f32 %v10208_v32, %v14279_v30  ;;  %v2411_v33 = vmul.f32 %v10225_v57, %v14279_v30  ;;  %v4524_v38 = vadd.f32 %v10258_v44, %v4523_v41  ;;  %v14351_v53 = vld [vmem:[#allocation13_spill] sm:$0xff] }
 0x3c0   : > { %14326 = vst [vmem:[#allocation41_spill] sm:$0xff] %v10234_v26  ;;  %v10266_v58 = vadd.f32 %v2403_v63, %v10117_v4  ;;  %v14329_v56 = vmax.f32 %v10133_v36, %v10141_v39  ;;  %v14330_v15 = vmax.f32 %v10144_v29, %v10154_v28  ;;  %v4442_v30 = vsub.f32 %v9965_v6, %v10076_v45  ;;  %v14364_v57 = vld [vmem:[#allocation97_spill] sm:$0xff] }
 0x3c1   : > { %14327 = vst [vmem:[#allocation7_spill] sm:$0xff] %v10245_v42  ;;  %v10276_v22 = vpop.eup %7424  ;;  %7430 = vpow2.f32 %v4484_v59  ;;  %v4488_v41 = vmul.f32 1.442695, %v4440_v37  ;;  %v10281_v4 = vadd.f32 %v2405_v52, %v10127_v60  ;;  %v10285_v36 = vadd.f32 %v2407_v7, %v10130_v2  ;;  %v14335_v7 = vld [vmem:[#allocation8_spill] sm:$0xff] }
 0x3c2   : > { %14328 = vst [vmem:[#allocation135_spill] sm:$0xff] %v10258_v44  ;;  %v2465_v46 = vmax.f32 %v14329_v56, %v10240_v8  ;;  %v2466_v43 = vmax.f32 %v14330_v15, %v10243_v54  ;;  %v4539_v63 = vadd.f32 %v10276_v22, %v4538_v23  ;;  %v10289_v15 = vpop.eup %7426  ;;  %v4443_v42 = vsub.f32 %v9968_v0, %v10078_v25 }
 0x3c3   : > { %14331 = vst [vmem:[#allocation139_spill] sm:$0xff] %v10276_v22  ;;  %7432 = vpow2.f32 %v4486_v48  ;;  %v4490_v6 = vmul.f32 1.442695, %v4441_v13  ;;  %v10294_v37 = vadd.f32 %v2409_v31, %v10138_v55  ;;  %v4525_v60 = vadd.f32 %v10289_v15, %v4524_v38  ;;  %v14338_v48 = vld [vmem:[#allocation84_spill] sm:$0xff] }
 0x3c4   : > { %v2467_v56 = vmax.f32 %v2465_v46, %v10256_v27  ;;  %v2468_v29 = vmax.f32 %v2466_v43, %v10266_v58  ;;  %14332 = vst [vmem:[#allocation140_spill] sm:$0xff] %v10289_v15  ;;  %v10298_v59 = vadd.f32 %v2411_v33, %v10151_v14  ;;  %v10302_v23 = vpop.eup %7428  ;;  %v14336_v46 = vld [vmem:[#allocation98_spill] sm:$0xff]  ;;  %v4444_v55 = vsub.f32 %v9974_v1, %v10076_v45  ;;  %v14355_v15 = vld [vmem:[#allocation105_spill] sm:$0xff] }
 0x3c5   : > { %14334 = vst [vmem:[#allocation143_spill] sm:$0xff] %v10302_v23  ;;  %v14337_v43 = vperm.slane %v14336_v46, 0  ;;  %7434 = vpow2.f32 %v4488_v41  ;;  %v4492_v13 = vmul.f32 1.442695, %v4442_v30  ;;  %v10313_v14 = vmul.f32 %v14338_v48, %v14335_v7  ;;  %v14341_v41 = vld [vmem:[#allocation99_spill] sm:$0xff] }
 0x3c6   : > { %14333 = vst [vmem:[#allocation142_spill] sm:$0xff] %v10298_v59  ;;  %v2469_v2 = vmax.f32 %v2467_v56, %v10281_v4  ;;  %v2470_v52 = vmax.f32 %v2468_v29, %v10285_v36  ;;  %v4540_v31 = vadd.f32 %v10302_v23, %v4539_v63  ;;  %v14340_v29 = vld [vmem:[#allocation69_spill] sm:$0xff]  ;;  %v4445_v1 = vsub.f32 %v9980_v11, %v10078_v25 }
 0x3c7   : > { %v10307_v0 = vmul.f32 %v14337_v43, %v14335_v7  ;;  %v10318_v56 = vpop.eup %7430  ;;  %v10322_v46 = vmul.f32 %v14340_v29, %v14335_v7  ;;  %7436 = vpow2.f32 %v4490_v6  ;;  %v4494_v30 = vmul.f32 1.442695, %v4443_v42  ;;  %v14344_v29 = vld [vmem:[#allocation101_spill] sm:$0xff]  ;;  %v14345_v6 = vld [vmem:[#allocation102_spill] sm:$0xff] }
 0x3c8   : > { %v2471_v33 = vmax.f32 %v2469_v2, %v10294_v37  ;;  %v2472_v38 = vmax.f32 %v2470_v52, %v10298_v59  ;;  %14339 = vst [vmem:[#allocation144_spill] sm:$0xff] %v10318_v56  ;;  %v10328_v43 = vmul.f32 %v14341_v41, %v14335_v7  ;;  %v4446_v63 = vsub.f32 %v9985_v17, %v10076_v45  ;;  %v14346_v17 = vld [vmem:[#allocation103_spill] sm:$0xff] }
 0x3c9   : > { %v4526_v2 = vadd.f32 %v10318_v56, %v4525_v60  ;;  %v10335_v48 = vpop.eup %7432  ;;  %v10339_v23 = vmul.f32 %v14344_v29, %v14335_v7  ;;  %v4447_v11 = vsub.f32 %v9990_v16, %v10078_v25  ;;  %7438 = vpow2.f32 %v4492_v13  ;;  %v14352_v16 = vld [vmem:[#allocation42_spill] sm:$0xff] }
 0x3ca   : > { %v10333_v52 = vmax.f32 %v2471_v33, %v2472_v38  ;;  %14343 = vst [vmem:[#allocation8_spill] sm:$0xff] %v10335_v48  ;;  %v4496_v42 = vmul.f32 1.442695, %v4444_v55  ;;  %v10345_v41 = vmul.f32 %v14345_v6, %v14335_v7  ;;  %v10349_v60 = vmul.f32 %v14346_v17, %v14335_v7  ;;  %v14348_v33 = vld [vmem:[#allocation104_spill] sm:$0xff]  ;;  %v14354_v6 = vld [vmem:[#allocation43_spill] sm:$0xff] }
 0x3cb   : > { %v10353_v38 = vmul.f32 %v14348_v33, %v14335_v7  ;;  %v4541_v29 = vadd.f32 %v10335_v48, %v4540_v31  ;;  %v10356_v22 = vpop.eup %7434  ;;  %v14353_v13 = vperm.slane %v14352_v16, 0  ;;  %v10365_v56 = vmul.f32 %v14354_v6, %v14351_v53 }
 0x3cc   : > { %14342 = vst [vmem:[#allocation145_spill] sm:$0xff] %v10333_v52  ;;  %7440 = vpow2.f32 %v4494_v30  ;;  %v4498_v17 = vmul.f32 1.442695, %v4445_v1  ;;  %v10369_v44 = vmul.f32 %v14355_v15, %v14351_v53  ;;  %v4500_v7 = vmul.f32 1.442695, %v4446_v63  ;;  %v14357_v30 = vld [vmem:[#allocation106_spill] sm:$0xff] }
 0x3cd   : > { %14347 = vst [vmem:[#allocation98_spill] sm:$0xff] %v10349_v60  ;;  %v10361_v55 = vmul.f32 %v14353_v13, %v14351_v53  ;;  %v4527_v31 = vadd.f32 %v10356_v22, %v4526_v2  ;;  %v2475_v33 = vsub.f32 %v10074_v62, %v10333_v52  ;;  %v10374_v48 = vpop.eup %7436  ;;  %v4448_v16 = vsub.f32 %v9997_v24, %v10076_v45  ;;  %v14358_v63 = vld [vmem:[#allocation107_spill] sm:$0xff]  ;;  %v14359_v62 = vld [vmem:[#allocation110_spill] sm:$0xff] }
 0x3ce   : > { %14349 = vst [vmem:[#allocation84_spill] sm:$0xff] %v10353_v38  ;;  %7442 = vpow2.f32 %v4496_v42  ;;  %v4502_v13 = vmul.f32 1.442695, %v4447_v11  ;;  %v2477_v1 = vsub.f32 %v10066_v9, %v10333_v52  ;;  %v10382_v15 = vmul.f32 %v14357_v30, %v14351_v53  ;;  %v14361_v11 = vld [vmem:[#allocation111_spill] sm:$0xff]  ;;  %v14362_v9 = vld [vmem:[#allocation112_spill] sm:$0xff] }
 0x3cf   : > { %14350 = vst [vmem:[#allocation69_spill] sm:$0xff] %v10356_v22  ;;  %v10386_v2 = vmul.f32 %v14358_v63, %v14351_v53  ;;  %v10390_v6 = vmul.f32 %v14359_v62, %v14351_v53  ;;  %v4542_v22 = vadd.f32 %v10374_v48, %v4541_v29  ;;  %v10393_v24 = vpop.eup %7438  ;;  %v10397_v42 = vmul.f32 %v14361_v11, %v14351_v53 }
 0x3d0   : > { %14356 = vst [vmem:[#allocation99_spill] sm:$0xff] %v10374_v48  ;;  %v10401_v30 = vmul.f32 %v14362_v9, %v14351_v53  ;;  %v4449_v63 = vsub.f32 %v10000_v47, %v10078_v25  ;;  %7444 = vpow2.f32 %v4498_v17  ;;  %v4450_v62 = vsub.f32 %v10003_v5, %v10076_v45 }
 0x3d1   : > { %14360 = vst [vmem:[#allocation101_spill] sm:$0xff] %v10393_v24  ;;  %7446 = vpow2.f32 %v4500_v7  ;;  %v4528_v29 = vadd.f32 %v10393_v24, %v4527_v31  ;;  %v2508_v48 = vmul.f32 1.442695, %v2475_v33  ;;  %v4504_v11 = vmul.f32 1.442695, %v4448_v16  ;;  %v14367_v31 = vld [vmem:[#allocation83_spill] sm:$0xff] }
 0x3d2   : > { %v10408_v26 = vpop.eup %7440  ;;  %7448 = vpow2.f32 %v4502_v13  ;;  %v2479_v3 = vsub.f32 %v10057_v51, %v10333_v52  ;;  %v2512_v9 = vmul.f32 1.442695, %v2477_v1  ;;  %v14365_v32 = vperm.slane %v14364_v57, 0 }
 0x3d3   : > { %14363 = vst [vmem:[#allocation102_spill] sm:$0xff] %v10408_v26  ;;  %v4451_v5 = vsub.f32 %v10007_v49, %v10078_v25  ;;  %v4543_v17 = vadd.f32 %v10408_v26, %v4542_v22  ;;  %7450 = vpow2.f32 %v2508_v48  ;;  %v10424_v33 = vmul.f32 %v14367_v31, %v14351_v53  ;;  %v14370_v49 = vld [vmem:[#allocation115_spill] sm:$0xff]  ;;  %v14373_v31 = vld [vmem:[#allocation100_spill] sm:$0xff]  ;;  %v14376_v26 = vld [vmem:[#allocation70_spill] sm:$0xff] }
 0x3d4   : > { %v10415_v47 = vmul.f32 %v14365_v32, %v14351_v53  ;;  %v10420_v7 = vpop.eup %7442  ;;  %v4506_v16 = vmul.f32 1.442695, %v4449_v63  ;;  %v2481_v51 = vsub.f32 %v10069_v18, %v10333_v52  ;;  %7452 = vpow2.f32 %v2512_v9  ;;  %v14368_v32 = vld [vmem:[#allocation114_spill] sm:$0xff] }
 0x3d5   : > { %14366 = vst [vmem:[#allocation103_spill] sm:$0xff] %v10420_v7  ;;  %v10430_v57 = vmul.f32 %v14368_v32, %v14351_v53  ;;  %v10434_v13 = vmul.f32 %v14370_v49, %v14351_v53  ;;  %v4508_v22 = vmul.f32 1.442695, %v4450_v62  ;;  %v4529_v48 = vadd.f32 %v10420_v7, %v4528_v29 }
 0x3d6   : > { %v10437_v1 = vpop.eup %7444  ;;  %v10441_v63 = vmul.f32 %v14373_v31, %v14351_v53  ;;  %v4452_v18 = vsub.f32 %v10037_v10, %v10076_v45  ;;  %7454 = vpow2.f32 %v4504_v11  ;;  %v2516_v9 = vmul.f32 1.442695, %v2479_v3  ;;  %v14379_v31 = vld [vmem:[#allocation116_spill] sm:$0xff] }
 0x3d7   : > { %14369 = vst [vmem:[#allocation104_spill] sm:$0xff] %v10430_v57  ;;  %v10445_v32 = vpop.eup %7446  ;;  %v10449_v49 = vmul.f32 %v14376_v26, %v14351_v53  ;;  %v4453_v62 = vsub.f32 %v10040_v35, %v10078_v25  ;;  %v4510_v29 = vmul.f32 1.442695, %v4451_v5  ;;  %v4544_v7 = vadd.f32 %v10437_v1, %v4543_v17  ;;  %v14382_v26 = vld [vmem:[#allocation117_spill] sm:$0xff]  ;;  %v14385_v5 = vld [vmem:[#allocation124_spill] sm:$0xff]  ;;  %v14487_v57 = vld [vmem:[#allocation55_spill] sm:$0xff] }
 0x3d8   : > { %14371 = vst [vmem:[#allocation13_spill] sm:$0xff] %v10434_v13  ;;  %v10454_v24 = vpop.eup %7448  ;;  %7456 = vpow2.f32 %v4506_v16  ;;  %v2483_v3 = vsub.f32 %v10108_v40, %v10333_v52  ;;  %v2520_v10 = vmul.f32 1.442695, %v2481_v51  ;;  %v14384_v35 = vld [vmem:[#allocation9_spill] sm:$0xff]  ;;  %v14386_v17 = vperm.slane %v14385_v5, 0 }
 0x3d9   : > { %14372 = vst [vmem:[#allocation42_spill] sm:$0xff] %v10437_v1  ;;  %v10462_v11 = vpop.eup %7450  ;;  %7458 = vpow2.f32 %v4508_v22  ;;  %v14388_v16 = vld [vmem:[#allocation125_spill] sm:$0xff]  ;;  %v4454_v51 = vsub.f32 %v10016_v12, %v10076_v45  ;;  %v4512_v38 = vmul.f32 1.442695, %v4452_v18  ;;  %v4545_v22 = vadd.f32 %v10454_v24, %v4544_v7  ;;  %v14392_v45 = vld [vmem:[#allocation127_spill] sm:$0xff] }
 0x3da   : > { %14374 = vst [vmem:[#allocation43_spill] sm:$0xff] %v10441_v63  ;;  %v10458_v63 = vmul.f32 %v14379_v31, %v14351_v53  ;;  %v10471_v1 = vmul.f32 %v14386_v17, %v14384_v35  ;;  %v4530_v31 = vadd.f32 %v10445_v32, %v4529_v48  ;;  %v10478_v40 = vmul.f32 %v14388_v16, %v14384_v35  ;;  %v14390_v48 = vld [vmem:[#allocation126_spill] sm:$0xff] }
 0x3db   : > { %14375 = vst [vmem:[#allocation105_spill] sm:$0xff] %v10445_v32  ;;  %7460 = vpow2.f32 %v2516_v9  ;;  %v10489_v17 = vmul.f32 %v14390_v48, %v14384_v35  ;;  %v14391_v16 = vld [vmem:[#allocation130_spill] sm:$0xff]  ;;  %v2524_v12 = vmul.f32 1.442695, %v2483_v3  ;;  %v10495_v18 = vmul.f32 %v14392_v45, %v14384_v35  ;;  %v14396_v3 = vld [vmem:[#allocation109_spill] sm:$0xff] }
 0x3dc   : > { %14377 = vst [vmem:[#allocation106_spill] sm:$0xff] %v10449_v49  ;;  %v10466_v49 = vmul.f32 %v14382_v26, %v14351_v53  ;;  %v4455_v53 = vsub.f32 %v10019_v34, %v10078_v25  ;;  %7462 = vpow2.f32 %v4510_v29  ;;  %v4514_v26 = vmul.f32 1.442695, %v4453_v62  ;;  %v14393_v34 = vld [vmem:[#allocation128_spill] sm:$0xff] }
 0x3dd   : > { %14378 = vst [vmem:[#allocation107_spill] sm:$0xff] %v10454_v24  ;;  %v2485_v32 = vsub.f32 %v14391_v16, %v10333_v52  ;;  %7464 = vpow2.f32 %v2520_v10  ;;  %v10499_v25 = vmul.f32 %v14393_v34, %v14384_v35  ;;  %v14395_v29 = vld [vmem:[#allocation108_spill] sm:$0xff]  ;;  %v10512_v10 = vmul.f32 %v14396_v3, %v14384_v35 }
 0x3de   : > { %14380 = vst [vmem:[#allocation110_spill] sm:$0xff] %v10458_v63  ;;  %v10474_v63 = vpop.eup %7452  ;;  %v10508_v48 = vmul.f32 %v14395_v29, %v14384_v35  ;;  %7466 = vpow2.f32 %v4512_v38  ;;  %v4516_v16 = vmul.f32 1.442695, %v4454_v51  ;;  %v14399_v34 = vld [vmem:[#allocation76_spill] sm:$0xff]  ;;  %v14402_v29 = vld [vmem:[#allocation134_spill] sm:$0xff]  ;;  %v2487_v38 = vsub.f32 %v10141_v39, %v10333_v52 }
 0x3df   : > { %14381 = vst [vmem:[#allocation111_spill] sm:$0xff] %v10462_v11  ;;  %v10485_v5 = vpop.eup %7454  ;;  %v2585_v9 = vadd.f32 %v10474_v63, %v10462_v11  ;;  %7468 = vpow2.f32 %v4514_v26  ;;  %v14403_v24 = vperm.slane %v14402_v29, 0  ;;  %v2528_v51 = vmul.f32 1.442695, %v2485_v32  ;;  %v14411_v39 = vld [vmem:[#allocation56_spill] sm:$0xff]  ;;  %v14413_v32 = vld [vmem:[#allocation57_spill] sm:$0xff] }
 0x3e0   : > { %14383 = vst [vmem:[#allocation112_spill] sm:$0xff] %v10466_v49  ;;  %v4531_v7 = vadd.f32 %v10485_v5, %v4530_v31  ;;  %v10504_v62 = vpop.eup %7456  ;;  %v10518_v31 = vmul.f32 %v14399_v34, %v14384_v35  ;;  %7470 = vpow2.f32 %v2524_v12  ;;  %v14406_v34 = vld [vmem:[#allocation113_spill] sm:$0xff]  ;;  %v10546_v12 = vmul.f32 %v14411_v39, %v14384_v35 }
 0x3e1   : > { %14387 = vst [vmem:[#allocation97_spill] sm:$0xff] %v10474_v63  ;;  %v10514_v45 = vpop.eup %7458  ;;  %v4518_v63 = vmul.f32 1.442695, %v4455_v53  ;;  %v4546_v11 = vadd.f32 %v10504_v62, %v4545_v22  ;;  %v10526_v49 = vmul.f32 %v14403_v24, %v14384_v35  ;;  %v10534_v26 = vmul.f32 %v14406_v34, %v14384_v35  ;;  %v14408_v53 = vld [vmem:[#allocation71_spill] sm:$0xff]  ;;  %v14415_v34 = vld [vmem:[#allocation136_spill] sm:$0xff] }
 0x3e2   : > { %14389 = vst [vmem:[#allocation83_spill] sm:$0xff] %v10485_v5  ;;  %v10521_v5 = vpop.eup %7460  ;;  %v10538_v22 = vmul.f32 %v14408_v53, %v14384_v35  ;;  %7472 = vpow2.f32 %v4516_v16  ;;  %v14417_v53 = vld [vmem:[#allocation137_spill] sm:$0xff]  ;;  %v2532_v16 = vmul.f32 1.442695, %v2487_v38  ;;  %v14429_v38 = vld [vmem:[#allocation148_spill] sm:$0xff] }
 0x3e3   : > { %14394 = vst [vmem:[#allocation114_spill] sm:$0xff] %v10504_v62  ;;  %v10530_v3 = vpop.eup %7462  ;;  %v4532_v62 = vadd.f32 %v10514_v45, %v4531_v7  ;;  %v2586_v24 = vadd.f32 %v10521_v5, %v2585_v9  ;;  %v10558_v7 = vmul.f32 %v14417_v53, %v14384_v35  ;;  %7474 = vpow2.f32 %v4518_v63  ;;  %v14423_v53 = vld [vmem:[#allocation14_spill] sm:$0xff] }
 0x3e4   : > { %14397 = vst [vmem:[#allocation115_spill] sm:$0xff] %v10512_v10  ;;  %v10542_v29 = vpop.eup %7464  ;;  %v4547_v9 = vadd.f32 %v10530_v3, %v4546_v11  ;;  %7476 = vpow2.f32 %v2528_v51  ;;  %v14426_v11 = vld [vmem:[#allocation146_spill] sm:$0xff]  ;;  %v10590_v51 = vmul.f32 %v14429_v38, %v14423_v53 }
 0x3e5   : > { %14398 = vst [vmem:[#allocation100_spill] sm:$0xff] %v10514_v45  ;;  %v10562_v39 = vpop.eup %7466  ;;  %v14420_v45 = vld [vmem:[#allocation138_spill] sm:$0xff]  ;;  %7478 = vpow2.f32 %v2532_v16 }
 0x3e6   : > { %14400 = vst [vmem:[#allocation70_spill] sm:$0xff] %v10518_v31 }
 0x3e7   : > { %14401 = vst [vmem:[#allocation116_spill] sm:$0xff] %v10521_v5  ;;  %v2587_v5 = vadd.f32 %v10542_v29, %v2586_v24  ;;  %v10579_v24 = vmul.f32 %v14426_v11, %v14423_v53 }
 0x3e8   : > { %14404 = vst [vmem:[#allocation117_spill] sm:$0xff] %v10526_v49  ;;  %v10550_v49 = vmul.f32 %v14413_v32, %v14384_v35  ;;  %v10566_v32 = vmul.f32 %v14420_v45, %v14384_v35  ;;  %v4533_v45 = vadd.f32 %v10562_v39, %v4532_v62  ;;  %v14437_v62 = vld [vmem:[#allocation11_spill] sm:$0xff] }
 0x3e9   : > { %14405 = vst [vmem:[#allocation9_spill] sm:$0xff] %v10530_v3  ;;  %v14432_v3 = vld [vmem:[#allocation149_spill] sm:$0xff] }
 0x3ea   : > { %14407 = vst [vmem:[#allocation124_spill] sm:$0xff] %v10534_v26  ;;  %v10554_v26 = vmul.f32 %v14415_v34, %v14384_v35  ;;  %v2489_v34 = vsub.f32 %v10154_v28, %v10333_v52  ;;  %v10598_v11 = vmul.f32 %v14432_v3, %v14423_v53 }
 0x3eb   : > { %14409 = vst [vmem:[#allocation125_spill] sm:$0xff] %v10538_v22 }
 0x3ec   : > { %14410 = vst [vmem:[#allocation126_spill] sm:$0xff] %v10542_v29  ;;  %v14427_v29 = vld [vmem:[#allocation147_spill] sm:$0xff] }
 0x3ed   : > { %14412 = vst [vmem:[#allocation130_spill] sm:$0xff] %v10546_v12  ;;  %v10583_v35 = vmul.f32 %v14427_v29, %v14423_v53  ;;  %v10604_v12 = vpop.f32.mrf.mxu1 }
 0x3ee   : > { %14414 = vst [vmem:[#allocation127_spill] sm:$0xff] %v10550_v49 }
 0x3ef   : > { %14416 = vst [vmem:[#allocation128_spill] sm:$0xff] %v10554_v26  ;;  %v10570_v26 = vpop.eup %7468 }
 0x3f0   : > { %14418 = vst [vmem:[#allocation108_spill] sm:$0xff] %v10558_v7  ;;  %v14424_v7 = vld [vmem:[#allocation141_spill] sm:$0xff]  ;;  %v10586_v28 = vpop.eup %7470  ;;  %v4548_v38 = vadd.f32 %v10570_v26, %v4547_v9 }
 0x3f1   : > { %14419 = vst [vmem:[#allocation109_spill] sm:$0xff] %v10562_v39  ;;  %v14425_v63 = vperm.slane %v14424_v7, 0  ;;  %v14430_v7 = vld [vmem:[#allocation16_spill] sm:$0xff]  ;;  %v10608_v39 = vmul.f32 %v14437_v62, %v14423_v53  ;;  %v2588_v3 = vadd.f32 %v10586_v28, %v2587_v5  ;;  %v2536_v62 = vmul.f32 1.442695, %v2489_v34 }
 0x3f2   : > { %14421 = vst [vmem:[#allocation76_spill] sm:$0xff] %v10566_v32  ;;  %v14434_v32 = vld [vmem:[#allocation129_spill] sm:$0xff]  ;;  %v10634_v5 = vmul.f32 %v10192_v50, %v14423_v53  ;;  %v10645_v34 = vmul.f32 %v10196_v21, %v14423_v53  ;;  %v2493_v50 = vsub.f32 %v10243_v54, %v10333_v52  ;;  %v2499_v21 = vsub.f32 %v10281_v4, %v10333_v52 }
 0x3f3   : > { %14422 = vst [vmem:[#allocation134_spill] sm:$0xff] %v10570_v26  ;;  %v10575_v49 = vmul.f32 %v14425_v63, %v14423_v53  ;;  %v10594_v63 = vmul.f32 %v14430_v7, %v14423_v53  ;;  %v10602_v29 = vmul.f32 %v14434_v32, %v14423_v53  ;;  %v14439_v7 = vperm.slane %v10158_v19, 0  ;;  %v14442_v32 = vld [vmem:[#allocation118_spill] sm:$0xff] }
 0x3f4   : > { %14428 = vst [vmem:[#allocation113_spill] sm:$0xff] %v10586_v28  ;;  %v10630_v19 = vmul.f32 %v10188_v20, %v14423_v53  ;;  %v2495_v28 = vsub.f32 %v10256_v27, %v10333_v52  ;;  %v2497_v26 = vsub.f32 %v10266_v58, %v10333_v52  ;;  %7480 = vpow2.f32 %v2536_v62  ;;  %v14454_v58 = vld [vmem:[#allocation18_spill] sm:$0xff]  ;;  %v14456_v62 = vld [vmem:[#allocation20_spill] sm:$0xff] }
 0x3f5   : > { %14431 = vst [vmem:[#allocation71_spill] sm:$0xff] %v10594_v63  ;;  %v10614_v22 = vmul.f32 %v14439_v7, %v14423_v53  ;;  %v2491_v63 = vsub.f32 %v10240_v8, %v10333_v52  ;;  %v4586_v7 = vrot.slane %v10604_v12, 1  ;;  %v10641_v8 = vmul.f32 %v10194_v61, %v14423_v53  ;;  %v1129_v61 = vpop.f32.mrf.mxu0 }
 0x3f6   : > { %14433 = vst [vmem:[#allocation56_spill] sm:$0xff] %v10598_v11  ;;  %v10617_v11 = vpop.eup %7472  ;;  %v2503_v54 = vsub.f32 %v10294_v37, %v10333_v52 }
 0x3f7   : > { %14435 = vst [vmem:[#allocation57_spill] sm:$0xff] %v10602_v29  ;;  %v10621_v29 = vmul.f32 %v14442_v32, %v14423_v53  ;;  %v4534_v9 = vadd.f32 %v10617_v11, %v4533_v45  ;;  %v2540_v16 = vmul.f32 1.442695, %v2491_v63  ;;  %v10663_v20 = vperm.slane %v4586_v7, 0 }
 0x3f8   : > { %14436 = vst [vmem:[#allocation136_spill] sm:$0xff] %v10604_v12  ;;  %v1630_v53 = vmul.f32 %v14454_v58, %v1129_v61  ;;  %v1634_v63 = vmul.f32 %v14456_v62, %v1129_v61  ;;  %v2548_v7 = vmul.f32 1.442695, %v2495_v28 }
 0x3f9   : > { %14438 = vst [vmem:[#allocation137_spill] sm:$0xff] %v10608_v39  ;;  %v10625_v39 = vpop.eup %7474  ;;  %7482 = vrcp.f32 %v4534_v9  ;;  %v2544_v9 = vmul.f32 1.442695, %v2493_v50 }
 0x3fa   : > { %14440 = vst [vmem:[#allocation138_spill] sm:$0xff] %v10614_v22  ;;  %v10637_v32 = vpop.eup %7476  ;;  %v4549_v45 = vadd.f32 %v10625_v39, %v4548_v38  ;;  %v2501_v38 = vsub.f32 %v10285_v36, %v10333_v52  ;;  %v14463_v36 = vld [vmem:[#allocation49_spill] sm:$0xff]  ;;  %v14464_v52 = vld [vmem:[#allocation50_spill] sm:$0xff] }
 0x3fb   : > { %14441 = vst [vmem:[#allocation141_spill] sm:$0xff] %v10617_v11  ;;  %v2589_v11 = vadd.f32 %v10637_v32, %v2588_v3  ;;  %v10665_v27 = vpop.eup %7478  ;;  %v14452_v3 = vld [vmem:[#allocation17_spill] sm:$0xff]  ;;  %v1742_v50 = vadd.f32 %v14463_v36, %v1630_v53  ;;  %v14473_v36 = vld [vmem:[#allocation35_spill] sm:$0xff] }
 0x3fc   : > { %14443 = vst [vmem:[#allocation146_spill] sm:$0xff] %v10621_v29  ;;  %7484 = vrcp.f32 %v4549_v45  ;;  %v10681_v62 = vpop.eup %7480  ;;  %v14462_v45 = vld [vmem:[#allocation48_spill] sm:$0xff]  ;;  %v14471_v29 = vld [vmem:[#allocation33_spill] sm:$0xff] }
 0x3fd   : > { %14444 = vst [vmem:[#allocation147_spill] sm:$0xff] %v10625_v39  ;;  %v14453_v39 = vperm.slane %v14452_v3, 0  ;;  %v2590_v37 = vadd.f32 %v10665_v27, %v2589_v11  ;;  %7486 = vpow2.f32 %v2540_v16  ;;  %v14459_v3 = vld [vmem:[#allocation21_spill] sm:$0xff]  ;;  %v14465_v16 = vld [vmem:[#allocation51_spill] sm:$0xff] }
 0x3fe   : > { %14445 = vst [vmem:[#allocation148_spill] sm:$0xff] %v10630_v19  ;;  %v10675_v19 = vmul.f32 1.442695, %v2501_v38  ;;  %v1636_v58 = vmul.f32 %v14459_v3, %v1129_v61  ;;  %v1746_v28 = vadd.f32 %v14465_v16, %v1634_v63  ;;  %v14467_v38 = vld [vmem:[#allocation23_spill] sm:$0xff]  ;;  %7488 = vpow2.f32 %v2544_v9  ;;  %v14475_v63 = vld [vmem:[#allocation36_spill] sm:$0xff]  ;;  %v14480_v9 = vld [vmem:[#allocation46_spill] sm:$0xff] }
 0x3ff   : > { %14446 = vst [vmem:[#allocation16_spill] sm:$0xff] %v10634_v5  ;;  %v2556_v5 = vmul.f32 1.442695, %v2499_v21  ;;  %v2591_v21 = vadd.f32 %v10681_v62, %v2590_v37  ;;  %7490 = vpow2.f32 %v2548_v7  ;;  %v1652_v16 = vmul.f32 %v14475_v63, %v1129_v61  ;;  %v14476_v37 = vld [vmem:[#allocation52_spill] sm:$0xff]  ;;  %v14483_v7 = vld [vmem:[#allocation37_spill] sm:$0xff]  ;;  %v14484_v63 = vld [vmem:[#allocation38_spill] sm:$0xff] }
 0x400   : > { %14447 = vst [vmem:[#allocation149_spill] sm:$0xff] %v10637_v32  ;;  %v1628_v32 = vmul.f32 %v14453_v39, %v1129_v61  ;;  %v10677_v39 = vmul.f32 1.442695, %v2503_v54  ;;  %v1640_v54 = vmul.f32 %v14467_v38, %v1129_v61  ;;  %v14477_v38 = vld [vmem:[#allocation53_spill] sm:$0xff]  ;;  %v1854_v31 = vadd.f32 %v14480_v9, %v1742_v50  ;;  %v14489_v9 = vld [vmem:[#allocation59_spill] sm:$0xff] }
 0x401   : > { %14448 = vst [vmem:[#allocation129_spill] sm:$0xff] %v10641_v8  ;;  %v2552_v8 = vmul.f32 1.442695, %v2497_v26  ;;  %v10687_v26 = vpop.eup %7482  ;;  %v1656_v13 = vmul.f32 %v14484_v63, %v1129_v61  ;;  %v14494_v63 = vld [vmem:[#allocation6_spill] sm:$0xff] }
 0x402   : > { %14449 = vst [vmem:[#allocation11_spill] sm:$0xff] %v10645_v34  ;;  %v14455_v34 = vld [vmem:[#allocation19_spill] sm:$0xff]  ;;  %v1740_v12 = vadd.f32 %v14462_v45, %v1628_v32  ;;  %v1646_v32 = vmul.f32 %v14471_v29, %v1129_v61  ;;  %v14472_v45 = vld [vmem:[#allocation34_spill] sm:$0xff] }
 0x403   : > { %14450 = vst [vmem:[#allocation118_spill] sm:$0xff] %v10663_v20  ;;  %v1632_v4 = vmul.f32 %v14455_v34, %v1129_v61  ;;  %v14460_v34 = vld [vmem:[#allocation22_spill] sm:$0xff]  ;;  %v1648_v53 = vmul.f32 %v14472_v45, %v1129_v61  ;;  %v14481_v29 = vld [vmem:[#allocation47_spill] sm:$0xff]  ;;  %v14482_v45 = vld [vmem:[#allocation12_spill] sm:$0xff]  ;;  %7492 = vpow2.f32 %v2552_v8 }
 0x404   : > { %14451 = vst [vmem:[#allocation150_spill] sm:$0xff] %v10665_v27  ;;  %v1638_v20 = vmul.f32 %v14460_v34, %v1129_v61  ;;  %v14468_v27 = vld [vmem:[#allocation24_spill] sm:$0xff]  ;;  %v1858_v60 = vadd.f32 %v14482_v45, %v1746_v28  ;;  %7494 = vpow2.f32 %v2556_v5  ;;  %v14491_v8 = vld [vmem:[#allocation66_spill] sm:$0xff]  ;;  %v1966_v5 = vadd.f32 %v14494_v63, %v1854_v31  ;;  %v14503_v31 = vld [vmem:[#allocation63_spill] sm:$0xff] }
 0x405   : > { %14457 = vst [vmem:[#allocation17_spill] sm:$0xff] %v10675_v19  ;;  %v1744_v11 = vadd.f32 %v14464_v52, %v1632_v4  ;;  %v1642_v3 = vmul.f32 %v14468_v27, %v1129_v61  ;;  %v1650_v52 = vmul.f32 %v14473_v36, %v1129_v61  ;;  %v10697_v4 = vpop.eup %7484  ;;  %v14495_v19 = vld [vmem:[#allocation77_spill] sm:$0xff] }
 0x406   : > { %14458 = vst [vmem:[#allocation18_spill] sm:$0xff] %v10677_v39  ;;  %v14469_v39 = vld [vmem:[#allocation25_spill] sm:$0xff]  ;;  %v1750_v22 = vadd.f32 %v14477_v38, %v1638_v20  ;;  %v10702_v27 = vpop.eup %7486 }
 0x407   : > { %14461 = vst [vmem:[#allocation19_spill] sm:$0xff] %v10681_v62  ;;  %v14470_v34 = vperm.slane %v14469_v39, 0  ;;  %v1748_v62 = vadd.f32 %v14476_v37, %v1636_v58  ;;  %v14479_v39 = vld [vmem:[#allocation45_spill] sm:$0xff]  ;;  %v1856_v10 = vadd.f32 %v14481_v29, %v1744_v11  ;;  %v2592_v36 = vadd.f32 %v10702_v27, %v2591_v21  ;;  %v14485_v58 = vld [vmem:[#allocation39_spill] sm:$0xff]  ;;  %v14486_v37 = vld [vmem:[#allocation54_spill] sm:$0xff]  ;;  %v10718_v21 = vpop.eup %7488 }
 0x408   : > { %14466 = vst [vmem:[#allocation20_spill] sm:$0xff] %v10687_v26  ;;  %v1658_v20 = vmul.f32 %v14485_v58, %v1129_v61  ;;  %v1752_v38 = vadd.f32 %v14486_v37, %v1640_v54  ;;  %v1758_v11 = vadd.f32 %v14489_v9, %v1646_v32  ;;  %v14490_v29 = vld [vmem:[#allocation15_spill] sm:$0xff]  ;;  %v1862_v45 = vadd.f32 %v14491_v8, %v1750_v22  ;;  %v14496_v58 = vld [vmem:[#allocation78_spill] sm:$0xff]  ;;  %v10724_v37 = vpop.eup %7490  ;;  %v14500_v22 = vld [vmem:[#allocation60_spill] sm:$0xff] }
 0x409   : > { %v1644_v59 = vmul.f32 %v14470_v34, %v1129_v61  ;;  %14474 = vst [vmem:[#allocation21_spill] sm:$0xff] %v10697_v4  ;;  %v1852_v34 = vadd.f32 %v14479_v39, %v1740_v12  ;;  %v1654_v4 = vmul.f32 %v14483_v7, %v1129_v61  ;;  %v1754_v12 = vadd.f32 %v14487_v57, %v1642_v3  ;;  %v14488_v39 = vld [vmem:[#allocation58_spill] sm:$0xff]  ;;  %v14493_v7 = vld [vmem:[#allocation5_spill] sm:$0xff]  ;;  %v14498_v57 = vld [vmem:[#allocation44_spill] sm:$0xff] }
 0x40a   : > { %14478 = vst [vmem:[#allocation22_spill] sm:$0xff] %v10702_v27  ;;  %v1860_v28 = vadd.f32 %v14490_v29, %v1748_v62  ;;  %v1968_v61 = vadd.f32 %v14495_v19, %v1856_v10  ;;  %v1970_v54 = vadd.f32 %v14496_v58, %v1858_v60  ;;  %v10731_v62 = vmul.f32 %v10687_v26, %v14498_v57  ;;  %v14501_v32 = vld [vmem:[#allocation61_spill] sm:$0xff]  ;;  %v14504_v10 = vld [vmem:[#allocation67_spill] sm:$0xff]  ;;  %v14505_v60 = vld [vmem:[#allocation68_spill] sm:$0xff] }
 0x40b   : > { %v1756_v50 = vadd.f32 %v14488_v39, %v1644_v59  ;;  %14492 = vst [vmem:[#allocation48_spill] sm:$0xff] %v10718_v21  ;;  %v1964_v27 = vadd.f32 %v14493_v7, %v1852_v34  ;;  %v10727_v59 = vadd.f32 %v10718_v21, %v2592_v36  ;;  %v1760_v3 = vadd.f32 %v14500_v22, %v1648_v53  ;;  %v14502_v34 = vld [vmem:[#allocation62_spill] sm:$0xff]  ;;  %v10739_v7 = vpop.eup %7492  ;;  %v14507_v36 = vld [vmem:[#allocation29_spill] sm:$0xff]  ;;  %v14509_v57 = vld [vmem:[#allocation79_spill] sm:$0xff] }
 0x40c   : > { %14497 = vst [vmem:[#allocation49_spill] sm:$0xff] %v10724_v37  ;;  %v1762_v39 = vadd.f32 %v14501_v32, %v1650_v52  ;;  %v1764_v9 = vadd.f32 %v14502_v34, %v1652_v16  ;;  %v1766_v29 = vadd.f32 %v14503_v31, %v1654_v4  ;;  %v1864_v19 = vadd.f32 %v14504_v10, %v1752_v38  ;;  %v14508_v58 = vld [vmem:[#allocation30_spill] sm:$0xff]  ;;  %v14510_v26 = vld [vmem:[#allocation80_spill] sm:$0xff]  ;;  %v10745_v22 = vpop.eup %7494  ;;  %v14514_v34 = vld [vmem:[#allocation91_spill] sm:$0xff] }
 0x40d   : > { %14499 = vst [vmem:[#allocation50_spill] sm:$0xff] %v10731_v62  ;;  %v1866_v8 = vadd.f32 %v14505_v60, %v1754_v12  ;;  %v1868_v63 = vadd.f32 %v14507_v36, %v1756_v50  ;;  %v1870_v21 = vadd.f32 %v14508_v58, %v1758_v11  ;;  %v1972_v62 = vadd.f32 %v14509_v57, %v1860_v28  ;;  %v14512_v52 = vld [vmem:[#allocation90_spill] sm:$0xff]  ;;  %v14515_v31 = vld [vmem:[#allocation92_spill] sm:$0xff]  ;;  %v14518_v36 = vld [vmem:[#allocation31_spill] sm:$0xff] }
 0x40e   : > { %14506 = vst [vmem:[#allocation51_spill] sm:$0xff] %v10739_v7  ;;  %v1974_v53 = vadd.f32 %v14510_v26, %v1862_v45  ;;  %v2076_v16 = vadd.f32 %v14512_v52, %v1964_v27  ;;  %v14513_v32 = vld [vmem:[#allocation10_spill] sm:$0xff]  ;;  %v2080_v38 = vadd.f32 %v14514_v34, %v1968_v61  ;;  %v2082_v12 = vadd.f32 %v14515_v31, %v1970_v54  ;;  %v14516_v10 = vld [vmem:[#allocation64_spill] sm:$0xff]  ;;  %v14517_v7 = vld [vmem:[#allocation65_spill] sm:$0xff] }
 0x40f   : > { %14511 = vst [vmem:[#allocation23_spill] sm:$0xff] %v10745_v22  ;;  %v2078_v4 = vadd.f32 %v14513_v32, %v1966_v5  ;;  %v1768_v60 = vadd.f32 %v14516_v10, %v1656_v13  ;;  %v1770_v50 = vadd.f32 %v14517_v7, %v1658_v20  ;;  %v1872_v11 = vadd.f32 %v14518_v36, %v1760_v3  ;;  %v14519_v58 = vld [vmem:[#allocation32_spill] sm:$0xff]  ;;  %v14521_v45 = vld [vmem:[#allocation73_spill] sm:$0xff]  ;;  %v14523_v52 = vld [vmem:[#allocation82_spill] sm:$0xff] }
 0x410   : > { %v1874_v28 = vadd.f32 %v14519_v58, %v1762_v39  ;;  %v14520_v57 = vld [vmem:[#allocation72_spill] sm:$0xff]  ;;  %v1878_v22 = vadd.f32 %v14521_v45, %v1766_v29  ;;  %v14522_v37 = vld [vmem:[#allocation81_spill] sm:$0xff]  ;;  %v1978_v5 = vadd.f32 %v14523_v52, %v1866_v8  ;;  %v14524_v32 = vld [vmem:[#allocation26_spill] sm:$0xff]  ;;  %v2188_v3 = vadd.f32 %v10361_v55, %v2076_v16 }
 0x411   : > { %v1876_v26 = vadd.f32 %v14520_v57, %v1764_v9  ;;  %v1976_v27 = vadd.f32 %v14522_v37, %v1864_v19  ;;  %v1980_v61 = vadd.f32 %v14524_v32, %v1868_v63  ;;  %v14525_v34 = vld [vmem:[#allocation27_spill] sm:$0xff]  ;;  %v14526_v31 = vld [vmem:[#allocation93_spill] sm:$0xff]  ;;  %v14527_v10 = vld [vmem:[#allocation94_spill] sm:$0xff]  ;;  %v2190_v39 = vadd.f32 %v10365_v56, %v2078_v4 }
 0x412   : > { %v1982_v54 = vadd.f32 %v14525_v34, %v1870_v21  ;;  %v2084_v13 = vadd.f32 %v14526_v31, %v1972_v62  ;;  %v2086_v20 = vadd.f32 %v14527_v10, %v1974_v53  ;;  %v2192_v9 = vadd.f32 %v10369_v44, %v2080_v38  ;;  %v14528_v7 = vld [vmem:[#allocation74_spill] sm:$0xff]  ;;  %v14529_v19 = vld [vmem:[#allocation75_spill] sm:$0xff]  ;;  %v14530_v36 = vld [vmem:[#allocation28_spill] sm:$0xff] }
 0x413   : > { %v2194_v29 = vadd.f32 %v10382_v15, %v2082_v12  ;;  %v1880_v37 = vadd.f32 %v14528_v7, %v1768_v60  ;;  %v1882_v8 = vadd.f32 %v14529_v19, %v1770_v50  ;;  %v1984_v63 = vadd.f32 %v14530_v36, %v1872_v11  ;;  %v14531_v58 = vld [vmem:[#allocation85_spill] sm:$0xff]  ;;  %v14532_v57 = vld [vmem:[#allocation86_spill] sm:$0xff]  ;;  %v14533_v45 = vld [vmem:[#allocation87_spill] sm:$0xff] }
 0x414   : > { %v1986_v21 = vadd.f32 %v14531_v58, %v1874_v28  ;;  %v1988_v62 = vadd.f32 %v14532_v57, %v1876_v26  ;;  %v1990_v53 = vadd.f32 %v14533_v45, %v1878_v22  ;;  %v14534_v52 = vld [vmem:[#allocation95_spill] sm:$0xff]  ;;  %v14535_v16 = vld [vmem:[#allocation96_spill] sm:$0xff]  ;;  %v2092_v44 = vadd.f32 %v10307_v0, %v1980_v61  ;;  %v14537_v26 = vld [vmem:[#allocation89_spill] sm:$0xff] }
 0x415   : > { %v2088_v55 = vadd.f32 %v14534_v52, %v1976_v27  ;;  %v2090_v56 = vadd.f32 %v14535_v16, %v1978_v5  ;;  %v2094_v15 = vadd.f32 %v10313_v14, %v1982_v54  ;;  %v2196_v4 = vadd.f32 %v10386_v2, %v2084_v13  ;;  %v14536_v11 = vld [vmem:[#allocation88_spill] sm:$0xff]  ;;  %v14544_v31 = vld [vmem:[#allocation115_spill] sm:$0xff]  ;;  %v14556_v52 = vld [vmem:[#allocation125_spill] sm:$0xff] }
 0x416   : > { %v2198_v38 = vadd.f32 %v10390_v6, %v2086_v20  ;;  %v2300_v12 = vadd.f32 %v10471_v1, %v2188_v3  ;;  %v2302_v60 = vadd.f32 %v10478_v40, %v2190_v39  ;;  %v2304_v50 = vadd.f32 %v10489_v17, %v2192_v9  ;;  %v14543_v54 = vld [vmem:[#allocation84_spill] sm:$0xff]  ;;  %v14546_v20 = vld [vmem:[#allocation43_spill] sm:$0xff]  ;;  %v14547_v3 = vld [vmem:[#allocation106_spill] sm:$0xff] }
 0x417   : > { %v2306_v22 = vadd.f32 %v10495_v18, %v2194_v29  ;;  %v1992_v28 = vadd.f32 %v14536_v11, %v1880_v37  ;;  %v1994_v27 = vadd.f32 %v14537_v26, %v1882_v8  ;;  %v2096_v0 = vadd.f32 %v10322_v46, %v1984_v63  ;;  %v14548_v9 = vld [vmem:[#allocation117_spill] sm:$0xff]  ;;  %v14549_v7 = vld [vmem:[#allocation124_spill] sm:$0xff]  ;;  %v14550_v37 = vld [vmem:[#allocation71_spill] sm:$0xff] }
 0x418   : > { %v2098_v14 = vadd.f32 %v10328_v43, %v1986_v21  ;;  %v2100_v2 = vadd.f32 %v10339_v23, %v1988_v62  ;;  %v2102_v6 = vadd.f32 %v10345_v41, %v1990_v53  ;;  %v2200_v1 = vadd.f32 %v10397_v42, %v2088_v55  ;;  %v14538_v42 = vld [vmem:[#allocation17_spill] sm:$0xff]  ;;  %v14551_v8 = vld [vmem:[#allocation56_spill] sm:$0xff]  ;;  %v14552_v21 = vld [vmem:[#allocation51_spill] sm:$0xff] }
 0x419   : > { %v2202_v40 = vadd.f32 %v10401_v30, %v2090_v56  ;;  %v2204_v17 = vadd.f32 %v10415_v47, %v2092_v44  ;;  %v2206_v18 = vadd.f32 %v10424_v33, %v2094_v15  ;;  %v2308_v5 = vadd.f32 %v10499_v25, %v2196_v4  ;;  %v14539_v30 = vld [vmem:[#allocation49_spill] sm:$0xff]  ;;  %v14540_v33 = vld [vmem:[#allocation104_spill] sm:$0xff]  ;;  %v14557_v16 = vld [vmem:[#allocation130_spill] sm:$0xff] }
 0x41a   : > { %v2310_v32 = vadd.f32 %v10508_v48, %v2198_v38  ;;  %v10796_v46 = vadd.f32 %v10575_v49, %v2300_v12  ;;  %v10799_v43 = vadd.f32 %v10579_v24, %v2302_v60  ;;  %v10802_v23 = vadd.f32 %v10583_v35, %v2304_v50  ;;  %v14541_v48 = vld [vmem:[#allocation13_spill] sm:$0xff]  ;;  %v14542_v49 = vld [vmem:[#allocation98_spill] sm:$0xff]  ;;  %v14553_v62 = vld [vmem:[#allocation120_spill] sm:$0xff] }
 0x41b   : > { %v10805_v41 = vadd.f32 %v10590_v51, %v2306_v22  ;;  %7496 = vpow2.f32 %v14538_v42  ;;  %v2594_v47 = vadd.f32 %v14539_v30, %v10727_v59  ;;  %v2208_v25 = vadd.f32 %v14540_v33, %v2096_v0  ;;  %v14545_v35 = vld [vmem:[#allocation70_spill] sm:$0xff]  ;;  %v14554_v45 = vld [vmem:[#allocation20_spill] sm:$0xff]  ;;  %v14558_v44 = vld [vmem:[#allocation57_spill] sm:$0xff] }
 0x41c   : > { %v2210_v61 = vadd.f32 %v14541_v48, %v2098_v14  ;;  %v2104_v34 = vadd.f32 %v14542_v49, %v1992_v28  ;;  %v2106_v24 = vadd.f32 %v14543_v54, %v1994_v27  ;;  %v2312_v13 = vadd.f32 %v14544_v31, %v2200_v1  ;;  %v14559_v4 = vld [vmem:[#allocation137_spill] sm:$0xff]  ;;  %v14560_v22 = vld [vmem:[#allocation110_spill] sm:$0xff]  ;;  %v14561_v28 = vld [vmem:[#allocation112_spill] sm:$0xff] }
 0x41d   : > { %v2314_v10 = vadd.f32 %v14545_v35, %v2202_v40  ;;  %v2212_v51 = vadd.f32 %v14546_v20, %v2100_v2  ;;  %v2214_v39 = vadd.f32 %v14547_v3, %v2102_v6  ;;  %v2316_v29 = vadd.f32 %v14548_v9, %v2204_v17  ;;  %v14562_v27 = vld [vmem:[#allocation127_spill] sm:$0xff]  ;;  %v14563_v14 = vld [vmem:[#allocation128_spill] sm:$0xff]  ;;  %v14564_v6 = vld [vmem:[#allocation138_spill] sm:$0xff] }
 0x41e   : > { %v2318_v59 = vadd.f32 %v14549_v7, %v2206_v18  ;;  %v10821_v19 = vadd.f32 %v14550_v37, %v2308_v5  ;;  %v10824_v36 = vadd.f32 %v14551_v8, %v2310_v32  ;;  %v2444_v63 = vmax.f32 %v10796_v46, %v10802_v23  ;;  %v14565_v40 = vld [vmem:[#allocation146_spill] sm:$0xff]  ;;  %v14567_v42 = vld [vmem:[#allocation145_spill] sm:$0xff]  ;;  %v14571_v49 = vld [vmem:[#allocation136_spill] sm:$0xff] }
 0x41f   : > { %v2445_v58 = vmax.f32 %v10799_v43, %v10805_v41  ;;  %v2595_v57 = vadd.f32 %v14552_v21, %v2594_v47  ;;  %v10833_v53 = vmul.f32 %v14554_v45, %v14553_v62  ;;  %v2320_v55 = vadd.f32 %v14556_v52, %v2208_v25  ;;  %v14566_v32 = vld [vmem:[#allocation142_spill] sm:$0xff]  ;;  %v14569_v25 = vld [vmem:[#allocation23_spill] sm:$0xff]  ;;  %v14577_v9 = vld [vmem:[#allocation121_spill] sm:$0xff] }
 0x420   : > { %v2322_v56 = vadd.f32 %v14557_v16, %v2210_v61  ;;  %v10838_v15 = vadd.f32 %v14558_v44, %v2312_v13  ;;  %v10841_v38 = vadd.f32 %v14559_v4, %v2314_v10  ;;  %v2446_v12 = vmax.f32 %v2444_v63, %v10821_v19  ;;  %v14570_v61 = vld [vmem:[#allocation50_spill] sm:$0xff]  ;;  %v14574_v13 = vld [vmem:[#allocation148_spill] sm:$0xff]  ;;  %v14581_v63 = vld [vmem:[#allocation129_spill] sm:$0xff] }
 0x421   : > { %14555 = vst [vmem:[#allocation24_spill] sm:$0xff] %v10833_v53  ;;  %v2447_v60 = vmax.f32 %v2445_v58, %v10824_v36  ;;  %v10845_v50 = vpop.eup %7496  ;;  %v2216_v11 = vadd.f32 %v14560_v22, %v2104_v34  ;;  %v2218_v26 = vadd.f32 %v14561_v28, %v2106_v24  ;;  %v2324_v0 = vadd.f32 %v14562_v27, %v2212_v51  ;;  %v14573_v24 = vld [vmem:[#allocation118_spill] sm:$0xff]  ;;  %v14575_v10 = vld [vmem:[#allocation16_spill] sm:$0xff] }
 0x422   : > { %v2326_v2 = vadd.f32 %v14563_v14, %v2214_v39  ;;  %v10852_v1 = vadd.f32 %v14564_v6, %v2316_v29  ;;  %v10855_v17 = vadd.f32 %v14565_v40, %v2318_v59  ;;  %v2448_v18 = vmax.f32 %v2446_v12, %v10838_v15  ;;  %v14576_v39 = vld [vmem:[#allocation18_spill] sm:$0xff]  ;;  %v14579_v7 = vld [vmem:[#allocation108_spill] sm:$0xff]  ;;  %v10903_v14 = vpop.f32.mrf.mxu1  ;;  %v14588_v40 = vld [vmem:[#allocation123_spill] sm:$0xff] }
 0x423   : > { %v2449_v5 = vmax.f32 %v2447_v60, %v10841_v38  ;;  %v14568_v47 = vsub.f32 %v14566_v32, %v14567_v42  ;;  %v2596_v48 = vadd.f32 %v14569_v25, %v2595_v57  ;;  %v14572_v34 = vperm.slane %v14571_v49, 0  ;;  %v14580_v37 = vld [vmem:[#allocation76_spill] sm:$0xff]  ;;  %v14582_v57 = vld [vmem:[#allocation11_spill] sm:$0xff]  ;;  %v14583_v16 = vld [vmem:[#allocation14_spill] sm:$0xff]  ;;  %14587 = vst [vmem:[#allocation33_spill] sm:$0xff] %v10903_v14 }
 0x424   : > { %v4634_v31 = vmul.f32 %v14573_v24, %v10833_v53  ;;  %v10869_v35 = vadd.f32 %v14574_v13, %v2320_v55  ;;  %v10872_v20 = vadd.f32 %v14575_v10, %v2322_v56  ;;  %v2450_v51 = vmax.f32 %v2448_v18, %v10852_v1  ;;  %v14584_v56 = vld [vmem:[#allocation132_spill] sm:$0xff] }
 0x425   : > { %v2568_v33 = vmul.f32 1.442695, %v14568_v47  ;;  %v4632_v54 = vmul.f32 %v14572_v34, %v14570_v61  ;;  %v2451_v3 = vmax.f32 %v2449_v5, %v10855_v17  ;;  %7498 = vpow2.f32 %v14576_v39  ;;  %v14585_v4 = vld [vmem:[#allocation40_spill] sm:$0xff] }
 0x426   : > { %v10879_v29 = vmul.f32 %v14554_v45, %v14577_v9  ;;  %v2328_v59 = vadd.f32 %v14579_v7, %v2216_v11  ;;  %v2330_v8 = vadd.f32 %v14580_v37, %v2218_v26  ;;  %v10884_v58 = vadd.f32 %v14581_v63, %v2324_v0  ;;  %v14594_v37 = vld [vmem:[#allocation119_spill] sm:$0xff] }
 0x427   : > { %v10887_v62 = vadd.f32 %v14582_v57, %v2326_v2  ;;  %v2452_v52 = vmax.f32 %v2450_v51, %v10869_v35  ;;  %v2453_v55 = vmax.f32 %v2451_v3, %v10872_v20  ;;  %v2408_v44 = vmul.f32 %v14584_v56, %v14583_v16  ;;  %v14591_v3 = vld [vmem:[#allocation41_spill] sm:$0xff]  ;;  %v14597_v57 = vld [vmem:[#allocation131_spill] sm:$0xff] }
 0x428   : > { %14578 = vst [vmem:[#allocation25_spill] sm:$0xff] %v10879_v29  ;;  %v2410_v12 = vmul.f32 %v14585_v4, %v14583_v16  ;;  %v4588_v60 = vrot.slane %v14571_v49, 3  ;;  %v14586_v22 = vrot.slane %v14571_v49, 2  ;;  %v2597_v28 = vadd.f32 %v10845_v50, %v2596_v48 }
 0x429   : > { %v4664_v26 = vadd.f32 %v4634_v31, %v4632_v54  ;;  %v2454_v27 = vmax.f32 %v2452_v52, %v10884_v58  ;;  %v2455_v0 = vmax.f32 %v2453_v55, %v10887_v62  ;;  %7500 = vpow2.f32 %v2568_v33  ;;  %v10922_v54 = vpop.f32.mrf.mxu3 }
 0x42a   : > { %v10898_v11 = vperm.slane %v14586_v22, 0  ;;  %v10905_v2 = vadd.f32 %v2408_v44, %v2328_v59  ;;  %v10907_v6 = vadd.f32 %v2410_v12, %v2330_v8  ;;  %v10911_v18 = vmul.f32 %v14554_v45, %v14588_v40  ;;  %v14595_v8 = vld [vmem:[#allocation21_spill] sm:$0xff] }
 0x42b   : > { %v4589_v5 = vrot.slane %v14571_v49, 4  ;;  %v10916_v42 = vpop.eup %7498  ;;  %v4590_v47 = vrot.slane %v14571_v49, 5  ;;  %v4591_v48 = vrot.slane %v14571_v49, 6  ;;  %v4592_v13 = vrot.slane %v14571_v49, 7  ;;  %v14608_v40 = vld [vmem:[#allocation69_spill] sm:$0xff] }
 0x42c   : > { %14589 = vst [vmem:[#allocation34_spill] sm:$0xff] %v10911_v18  ;;  %v4636_v32 = vmul.f32 %v10898_v11, %v10879_v29  ;;  %v2456_v33 = vmax.f32 %v2454_v27, %v10905_v2  ;;  %v2457_v34 = vmax.f32 %v2455_v0, %v10907_v6  ;;  %v2598_v31 = vadd.f32 %v10916_v42, %v2597_v28  ;;  %v14604_v28 = vld [vmem:[#allocation140_spill] sm:$0xff] }
 0x42d   : > { %14590 = vst [vmem:[#allocation35_spill] sm:$0xff] %v10916_v42  ;;  %v4603_v10 = vperm.slane %v4588_v60, 0  ;;  %v10928_v39 = vmul.f32 %v14554_v45, %v14591_v3  ;;  %v4604_v9 = vperm.slane %v4589_v5, 0  ;;  %v10935_v63 = vmul.f32 %v14595_v8, %v14594_v37  ;;  %v14602_v60 = vld [vmem:[#allocation135_spill] sm:$0xff]  ;;  %v14606_v27 = vld [vmem:[#allocation144_spill] sm:$0xff] }
 0x42e   : > { %v4665_v51 = vadd.f32 %v4664_v26, %v4636_v32  ;;  %v10939_v52 = vmul.f32 %v14595_v8, %v14597_v57  ;;  %v10941_v55 = vperm.slane %v4590_v47, 0  ;;  %v10943_v16 = vmax.f32 %v2456_v33, %v2457_v34  ;;  %v14610_v32 = vld [vmem:[#allocation99_spill] sm:$0xff]  ;;  %v14614_v34 = vld [vmem:[#allocation102_spill] sm:$0xff] }
 0x42f   : > { %14592 = vst [vmem:[#allocation36_spill] sm:$0xff] %v10928_v39  ;;  %v4638_v7 = vmul.f32 %v4603_v10, %v10911_v18  ;;  %v10931_v59 = vpop.eup %7500  ;;  %v10946_v44 = vperm.slane %v4591_v48, 0  ;;  %v10948_v4 = vperm.slane %v4592_v13, 0  ;;  %v10952_v22 = vmul.f32 %v14554_v45, %v14602_v60  ;;  %v14612_v48 = vld [vmem:[#allocation101_spill] sm:$0xff]  ;;  %v14617_v3 = vld [vmem:[#allocation103_spill] sm:$0xff] }
 0x430   : > { %14593 = vst [vmem:[#allocation52_spill] sm:$0xff] %v10931_v59  ;;  %v2599_v56 = vadd.f32 %v10931_v59, %v2598_v31  ;;  %v10956_v26 = vmul.f32 %v14554_v45, %v14604_v28  ;;  %v10960_v0 = vmul.f32 %v14554_v45, %v14606_v27  ;;  %v10964_v5 = vmul.f32 %v14554_v45, %v14608_v40  ;;  %v14620_v27 = vld [vmem:[#allocation42_spill] sm:$0xff] }
 0x431   : > { %14596 = vst [vmem:[#allocation53_spill] sm:$0xff] %v10935_v63  ;;  %v4666_v12 = vadd.f32 %v4665_v51, %v4638_v7  ;;  %v10968_v47 = vmul.f32 %v14595_v8, %v14610_v32  ;;  %v10972_v33 = vmul.f32 %v14554_v45, %v14612_v48  ;;  %v10976_v31 = vmul.f32 %v14595_v8, %v14614_v34  ;;  %v10979_v51 = vpop.f32.mrf.mxu1  ;;  %v14622_v34 = vld [vmem:[#allocation105_spill] sm:$0xff] }
 0x432   : > { %14598 = vst [vmem:[#allocation45_spill] sm:$0xff] %v10939_v52  ;;  %v4640_v13 = vmul.f32 %v4604_v9, %v10928_v39  ;;  %v10983_v7 = vmul.f32 %v14554_v45, %v14617_v3  ;;  %v14619_v37 = vperm.slane %v14571_v49, 0  ;;  %v4635_v60 = vmul.f32 %v14573_v24, %v10939_v52  ;;  %v14624_v49 = vld [vmem:[#allocation107_spill] sm:$0xff] }
 0x433   : > { %14599 = vst [vmem:[#allocation46_spill] sm:$0xff] %v10941_v55  ;;  %v2474_v28 = vsub.f32 %v10796_v46, %v10943_v16  ;;  %v10994_v40 = vmul.f32 %v14595_v8, %v14620_v27  ;;  %7502 = vrcp.f32 %v2599_v56  ;;  %v2476_v48 = vsub.f32 %v10799_v43, %v10943_v16  ;;  %v14626_v24 = vld [vmem:[#allocation83_spill] sm:$0xff]  ;;  %v11014_v56 = vpop.f32.mrf.mxu3 }
 0x434   : > { %14600 = vst [vmem:[#allocation47_spill] sm:$0xff] %v10946_v44  ;;  %v4633_v57 = vmul.f32 %v14619_v37, %v10935_v63  ;;  %v4667_v32 = vadd.f32 %v4666_v12, %v4640_v13  ;;  %v11000_v3 = vmul.f32 %v14554_v45, %v14622_v34  ;;  %v11004_v37 = vmul.f32 %v14595_v8, %v14624_v49  ;;  %v14631_v12 = vld [vmem:[#allocation114_spill] sm:$0xff]  ;;  %v14633_v13 = vld [vmem:[#allocation133_spill] sm:$0xff] }
 0x435   : > { %14601 = vst [vmem:[#allocation12_spill] sm:$0xff] %v10948_v4  ;;  %v11008_v46 = vmul.f32 %v14554_v45, %v14626_v24  ;;  %v11018_v43 = vmul.f32 %v14595_v8, %v14631_v12  ;;  %v11022_v34 = vmul.f32 %v14595_v8, %v14633_v13  ;;  %v4642_v49 = vmul.f32 %v10941_v55, %v10952_v22 }
 0x436   : > { %14603 = vst [vmem:[#allocation37_spill] sm:$0xff] %v10952_v22  ;;  %v2478_v24 = vsub.f32 %v10802_v23, %v10943_v16  ;;  %v4679_v12 = vadd.f32 %v4635_v60, %v4633_v57  ;;  %v2510_v55 = vmul.f32 1.442695, %v2476_v48  ;;  %v14641_v23 = vld [vmem:[#allocation109_spill] sm:$0xff] }
 0x437   : > { %14605 = vst [vmem:[#allocation38_spill] sm:$0xff] %v10956_v26 }
 0x438   : > { %14607 = vst [vmem:[#allocation39_spill] sm:$0xff] %v10960_v0  ;;  %v2514_v48 = vmul.f32 1.442695, %v2478_v24  ;;  %v14656_v24 = vld [vmem:[#allocation48_spill] sm:$0xff] }
 0x439   : > { %14609 = vst [vmem:[#allocation54_spill] sm:$0xff] %v10964_v5  ;;  %v11056_v60 = vpop.eup %7502 }
 0x43a   : > { %14611 = vst [vmem:[#allocation55_spill] sm:$0xff] %v10968_v47  ;;  %v14639_v47 = vld [vmem:[#allocation9_spill] sm:$0xff] }
 0x43b   : > { %14613 = vst [vmem:[#allocation58_spill] sm:$0xff] %v10972_v33  ;;  %v11038_v13 = vmul.f32 %v14595_v8, %v14639_v47  ;;  %v11044_v33 = vmul.f32 %v14554_v45, %v14641_v23 }
 0x43c   : > { %14615 = vst [vmem:[#allocation59_spill] sm:$0xff] %v10976_v31  ;;  %v14628_v31 = vld [vmem:[#allocation122_spill] sm:$0xff] }
 0x43d   : > { %14616 = vst [vmem:[#allocation15_spill] sm:$0xff] %v10979_v51  ;;  %v11012_v27 = vmul.f32 %v14595_v8, %v14628_v31 }
 0x43e   : > { %14618 = vst [vmem:[#allocation66_spill] sm:$0xff] %v10983_v7  ;;  %v2480_v7 = vsub.f32 %v10805_v41, %v10943_v16  ;;  %v11059_v41 = vmul.f32 %v4603_v10, %v11022_v34  ;;  %v2484_v10 = vsub.f32 %v10824_v36, %v10943_v16  ;;  %v2486_v36 = vsub.f32 %v10838_v15, %v10943_v16 }
 0x43f   : > { %14621 = vst [vmem:[#allocation5_spill] sm:$0xff] %v10994_v40  ;;  %v14637_v40 = vld [vmem:[#allocation7_spill] sm:$0xff]  ;;  %v4637_v47 = vmul.f32 %v10898_v11, %v11012_v27 }
 0x440   : > { %14623 = vst [vmem:[#allocation6_spill] sm:$0xff] %v11000_v3  ;;  %v4668_v3 = vadd.f32 %v4667_v32, %v4642_v49  ;;  %v2482_v32 = vsub.f32 %v10821_v19, %v10943_v16  ;;  %v14654_v19 = vld [vmem:[#allocation22_spill] sm:$0xff]  ;;  %v2526_v15 = vmul.f32 1.442695, %v2484_v10  ;;  %v2530_v10 = vmul.f32 1.442695, %v2486_v36 }
 0x441   : > { %14625 = vst [vmem:[#allocation77_spill] sm:$0xff] %v11004_v37  ;;  %v14635_v37 = vld [vmem:[#allocation100_spill] sm:$0xff]  ;;  %v11072_v11 = vadd.f32 %v4679_v12, %v4637_v47  ;;  %v11101_v12 = vmul.f32 %v11056_v60, %v14569_v25  ;;  %v2637_v47 = vrot.slane %v10922_v54, 2  ;;  %v11115_v25 = vmul.f32 %v11056_v60, %v10845_v50 }
 0x442   : > { %14627 = vst [vmem:[#allocation78_spill] sm:$0xff] %v11008_v46  ;;  %v11030_v31 = vmul.f32 %v14554_v45, %v14635_v37  ;;  %v11034_v46 = vmul.f32 %v14595_v8, %v14637_v40  ;;  %v14643_v37 = vld [vmem:[#allocation134_spill] sm:$0xff]  ;;  %v14645_v40 = vld [vmem:[#allocation141_spill] sm:$0xff]  ;;  %v2492_v36 = vsub.f32 %v10855_v17, %v10943_v16 }
 0x443   : > { %14629 = vst [vmem:[#allocation44_spill] sm:$0xff] %v11012_v27  ;;  %v11052_v57 = vmul.f32 %v14554_v45, %v14645_v40  ;;  %v11070_v45 = vmul.f32 %v10948_v4, %v10960_v0  ;;  %v11078_v40 = vpop.f32.mrf.mxu1  ;;  %v11128_v50 = vperm.slane %v2637_v47, 0  ;;  %v4594_v47 = vrot.slane %v10903_v14, 2 }
 0x444   : > { %14630 = vst [vmem:[#allocation60_spill] sm:$0xff] %v11014_v56  ;;  %v11066_v49 = vmul.f32 %v4604_v9, %v11034_v46  ;;  %v11082_v9 = vmul.f32 %v11056_v60, %v14654_v19  ;;  %v11106_v19 = vpop.f32.mrf.mxu3 }
 0x445   : > { %14632 = vst [vmem:[#allocation61_spill] sm:$0xff] %v11018_v43  ;;  %v2506_v43 = vmul.f32 1.442695, %v2474_v28  ;;  %v4644_v28 = vmul.f32 %v10946_v44, %v10956_v26  ;;  %v11165_v17 = vperm.slane %v4594_v47, 0 }
 0x446   : > { %14634 = vst [vmem:[#allocation62_spill] sm:$0xff] %v11022_v34 }
 0x447   : > { %14636 = vst [vmem:[#allocation63_spill] sm:$0xff] %v11030_v31  ;;  %v11048_v31 = vmul.f32 %v14595_v8, %v14643_v37  ;;  %7504 = vpow2.f32 %v2506_v43  ;;  %v11074_v23 = vadd.f32 %v4668_v3, %v4644_v28  ;;  %v2518_v37 = vmul.f32 1.442695, %v2480_v7 }
 0x448   : > { %14638 = vst [vmem:[#allocation67_spill] sm:$0xff] %v11034_v46  ;;  %7506 = vpow2.f32 %v2510_v55  ;;  %v11090_v43 = vmul.f32 %v11056_v60, %v14539_v30  ;;  %v11094_v3 = vmul.f32 %v11056_v60, %v14552_v21  ;;  %v2522_v55 = vmul.f32 1.442695, %v2482_v32 }
 0x449   : > { %14640 = vst [vmem:[#allocation68_spill] sm:$0xff] %v11038_v13  ;;  %7508 = vpow2.f32 %v2514_v48  ;;  %v2636_v7 = vrot.slane %v10922_v54, 1  ;;  %v2638_v30 = vrot.slane %v10922_v54, 3  ;;  %v2639_v28 = vrot.slane %v10922_v54, 4 }
 0x44a   : > { %14642 = vst [vmem:[#allocation29_spill] sm:$0xff] %v11044_v33  ;;  %v2488_v21 = vsub.f32 %v10841_v38, %v10943_v16  ;;  %7510 = vpow2.f32 %v2518_v37  ;;  %v2640_v32 = vrot.slane %v10922_v54, 5  ;;  %v2642_v13 = vrot.slane %v10922_v54, 7 }
 0x44b   : > { %14644 = vst [vmem:[#allocation30_spill] sm:$0xff] %v11048_v31  ;;  %v11086_v31 = vmul.f32 %v11056_v60, %v14656_v24  ;;  %v2641_v24 = vrot.slane %v10922_v54, 6  ;;  %v2490_v38 = vsub.f32 %v10852_v1, %v10943_v16  ;;  %7512 = vpow2.f32 %v2522_v55 }
 0x44c   : > { %14646 = vst [vmem:[#allocation79_spill] sm:$0xff] %v11052_v57  ;;  %v11124_v37 = vperm.slane %v2636_v7, 0  ;;  %v11130_v4 = vperm.slane %v2638_v30, 0  ;;  %v2534_v57 = vmul.f32 1.442695, %v2488_v21  ;;  %7514 = vpow2.f32 %v2526_v15  ;;  %v11150_v15 = vpop.f32.mrf.mxu1 }
 0x44d   : > { %14647 = vst [vmem:[#allocation80_spill] sm:$0xff] %v11056_v60  ;;  %v11111_v48 = vpop.eup %7504  ;;  %v4593_v1 = vrot.slane %v10903_v14, 1  ;;  %v11142_v7 = vperm.slane %v2641_v24, 0  ;;  %7516 = vpow2.f32 %v2530_v10  ;;  %v4699_v24 = vrot.slane %v10979_v51, 2 }
 0x44e   : > { %14648 = vst [vmem:[#allocation90_spill] sm:$0xff] %v11059_v41  ;;  %v11120_v33 = vpop.eup %7506  ;;  %7518 = vpow2.f32 %v2534_v57  ;;  %v2494_v10 = vsub.f32 %v10869_v35, %v10943_v16  ;;  %v2542_v21 = vmul.f32 1.442695, %v2492_v36  ;;  %v4702_v57 = vrot.slane %v10979_v51, 5 }
 0x44f   : > { %14649 = vst [vmem:[#allocation10_spill] sm:$0xff] %v11066_v49  ;;  %v2570_v0 = vadd.f32 %v11120_v33, %v11111_v48  ;;  %v11134_v44 = vpop.eup %7508  ;;  %v11136_v49 = vperm.slane %v2640_v32, 0 }
 0x450   : > { %14650 = vst [vmem:[#allocation91_spill] sm:$0xff] %v11070_v45  ;;  %v11145_v30 = vpop.eup %7510  ;;  %v11167_v45 = vpop.f32.mrf.mxu3 }
 0x451   : > { %14651 = vst [vmem:[#allocation92_spill] sm:$0xff] %v11072_v11  ;;  %v2571_v55 = vadd.f32 %v11134_v44, %v2570_v0  ;;  %v11147_v11 = vperm.slane %v2642_v13, 0  ;;  %v4698_v0 = vrot.slane %v10979_v51, 1  ;;  %v11156_v41 = vpop.eup %7512  ;;  %v4700_v13 = vrot.slane %v10979_v51, 3 }
 0x452   : > { %14652 = vst [vmem:[#allocation64_spill] sm:$0xff] %v11074_v23  ;;  %v11158_v23 = vperm.slane %v4593_v1, 0  ;;  %v4703_v1 = vrot.slane %v10979_v51, 6 }
 0x453   : > { %14653 = vst [vmem:[#allocation65_spill] sm:$0xff] %v11078_v40  ;;  %v11132_v40 = vperm.slane %v2639_v28, 0  ;;  %v2538_v28 = vmul.f32 1.442695, %v2490_v38  ;;  %v2572_v32 = vadd.f32 %v11145_v30, %v2571_v55  ;;  %v4701_v38 = vrot.slane %v10979_v51, 4 }
 0x454   : > { %14655 = vst [vmem:[#allocation31_spill] sm:$0xff] %v11082_v9  ;;  %v4713_v36 = vperm.slane %v4698_v0, 0  ;;  %v2500_v0 = vsub.f32 %v10887_v62, %v10943_v16  ;;  %v2504_v9 = vsub.f32 %v10907_v6, %v10943_v16  ;;  %v11207_v59 = vpop.f32.mrf.mxu1  ;;  %v4810_v6 = vrot.slane %v11150_v15, 1 }
 0x455   : > { %14657 = vst [vmem:[#allocation32_spill] sm:$0xff] %v11086_v31  ;;  %v2573_v55 = vadd.f32 %v11156_v41, %v2572_v32  ;;  %7520 = vpow2.f32 %v2538_v28  ;;  %v4714_v32 = vperm.slane %v4699_v24, 0  ;;  %v11183_v28 = vperm.slane %v4701_v38, 0 }
 0x456   : > { %14658 = vst [vmem:[#allocation72_spill] sm:$0xff] %v11090_v43  ;;  %7522 = vpow2.f32 %v2542_v21  ;;  %v11192_v24 = vperm.slane %v4702_v57, 0  ;;  %v2502_v38 = vsub.f32 %v10905_v2, %v10943_v16  ;;  %v11204_v57 = vperm.slane %v4703_v1, 0 }
 0x457   : > { %14659 = vst [vmem:[#allocation73_spill] sm:$0xff] %v11094_v3  ;;  %v2748_v3 = vrot.slane %v11106_v19, 1  ;;  %v2558_v42 = vmul.f32 1.442695, %v2500_v0  ;;  %v4812_v0 = vrot.slane %v11150_v15, 3 }
 0x458   : > { %14660 = vst [vmem:[#allocation81_spill] sm:$0xff] %v11101_v12  ;;  %v2496_v12 = vsub.f32 %v10872_v20, %v10943_v16  ;;  %v2749_v20 = vrot.slane %v11106_v19, 2 }
 0x459   : > { %14661 = vst [vmem:[#allocation82_spill] sm:$0xff] %v11106_v19 }
 0x45a   : > { %14662 = vst [vmem:[#allocation26_spill] sm:$0xff] %v11115_v25  ;;  %v11169_v25 = vpop.eup %7514  ;;  %v2550_v21 = vmul.f32 1.442695, %v2496_v12  ;;  %v11210_v12 = vperm.slane %v2748_v3, 0  ;;  %v2566_v3 = vmul.f32 1.442695, %v2504_v9  ;;  %v4747_v9 = vmul.f32 %v4713_v36, %v10939_v52 }
 0x45b   : > { %14663 = vst [vmem:[#allocation27_spill] sm:$0xff] %v11130_v4  ;;  %v2574_v35 = vadd.f32 %v11169_v25, %v2573_v55  ;;  %v11177_v47 = vpop.eup %7516 }
 0x45c   : > { %14664 = vst [vmem:[#allocation93_spill] sm:$0xff] %v11132_v40  ;;  %v11188_v55 = vpop.eup %7518 }
 0x45d   : > { %14665 = vst [vmem:[#allocation94_spill] sm:$0xff] %v11136_v49  ;;  %v2575_v43 = vadd.f32 %v11177_v47, %v2574_v35  ;;  %v2752_v35 = vrot.slane %v11106_v19, 5  ;;  %v11200_v31 = vpop.eup %7520  ;;  %v4814_v49 = vrot.slane %v11150_v15, 5 }
 0x45e   : > { %14666 = vst [vmem:[#allocation74_spill] sm:$0xff] %v11142_v7 }
 0x45f   : > { %14667 = vst [vmem:[#allocation75_spill] sm:$0xff] %v11147_v11  ;;  %v11221_v1 = vperm.slane %v2752_v35, 0  ;;  %v4746_v35 = vmul.f32 %v4713_v36, %v10833_v53  ;;  %v4748_v36 = vmul.f32 %v4714_v32, %v10879_v29 }
 0x460   : > { %14668 = vst [vmem:[#allocation28_spill] sm:$0xff] %v11150_v15 }
 0x461   : > { %14669 = vst [vmem:[#allocation85_spill] sm:$0xff] %v11158_v23  ;;  %v4712_v23 = vperm.slane %v10979_v51, 0  ;;  %v2546_v51 = vmul.f32 1.442695, %v2494_v10  ;;  %v2576_v10 = vadd.f32 %v11188_v55, %v2575_v43  ;;  %v11212_v43 = vperm.slane %v2749_v20, 0 }
 0x462   : > { %14670 = vst [vmem:[#allocation86_spill] sm:$0xff] %v11165_v17  ;;  %v2498_v17 = vsub.f32 %v10884_v58, %v10943_v16  ;;  %v2750_v58 = vrot.slane %v11106_v19, 3  ;;  %v11219_v16 = vpop.eup %7522 }
 0x463   : > { %14671 = vst [vmem:[#allocation87_spill] sm:$0xff] %v11167_v45  ;;  %v11181_v45 = vperm.slane %v4700_v13, 0  ;;  %v2751_v13 = vrot.slane %v11106_v19, 4  ;;  %7524 = vpow2.f32 %v2546_v51  ;;  %v2577_v2 = vadd.f32 %v11200_v31, %v2576_v10  ;;  %v11224_v10 = vpop.f32.mrf.mxu3 }
 0x464   : > { %14672 = vst [vmem:[#allocation95_spill] sm:$0xff] %v11188_v55  ;;  %v2554_v62 = vmul.f32 1.442695, %v2498_v17  ;;  %v11214_v11 = vperm.slane %v2750_v58, 0  ;;  %7526 = vpow2.f32 %v2550_v21  ;;  %v2562_v17 = vmul.f32 1.442695, %v2502_v38 }
 0x465   : > { %14673 = vst [vmem:[#allocation96_spill] sm:$0xff] %v11192_v24  ;;  %v11216_v56 = vperm.slane %v2751_v13, 0  ;;  %v4811_v51 = vrot.slane %v11150_v15, 2  ;;  %v2578_v20 = vadd.f32 %v11219_v16, %v2577_v2  ;;  %v14682_v58 = vld [vmem:[#allocation111_spill] sm:$0xff]  ;;  %v14683_v24 = vld [vmem:[#allocation97_spill] sm:$0xff]  ;;  %v4744_v38 = vmul.f32 %v4712_v23, %v14570_v61 }
 0x466   : > { %14674 = vst [vmem:[#allocation88_spill] sm:$0xff] %v11200_v31  ;;  %7528 = vpow2.f32 %v2554_v62  ;;  %v11230_v13 = vmul.f32 %v11056_v60, %v14682_v58  ;;  %v11234_v21 = vmul.f32 %v11056_v60, %v14683_v24  ;;  %v4745_v62 = vmul.f32 %v4712_v23, %v10935_v63  ;;  %v14685_v58 = vld [vmem:[#allocation116_spill] sm:$0xff]  ;;  %v14687_v24 = vld [vmem:[#allocation126_spill] sm:$0xff] }
 0x467   : > { %14675 = vst [vmem:[#allocation89_spill] sm:$0xff] %v11204_v57  ;;  %7530 = vpow2.f32 %v2558_v42  ;;  %v4813_v2 = vrot.slane %v11150_v15, 4  ;;  %v11245_v57 = vmul.f32 %v11056_v60, %v14685_v58  ;;  %v14689_v42 = vperm.slane %v10903_v14, 0 }
 0x468   : > { %14676 = vst [vmem:[#allocation17_spill] sm:$0xff] %v11207_v59  ;;  %7532 = vpow2.f32 %v2562_v17  ;;  %v4749_v31 = vmul.f32 %v4714_v32, %v11012_v27  ;;  %v11261_v17 = vmul.f32 %v11181_v45, %v10911_v18  ;;  %v14693_v55 = vperm.slane %v11106_v19, 0 }
 0x469   : > { %14677 = vst [vmem:[#allocation49_spill] sm:$0xff] %v11210_v12  ;;  %v11241_v59 = vpop.eup %7524  ;;  %7534 = vpow2.f32 %v2566_v3  ;;  %v11274_v32 = vmul.f32 %v11181_v45, %v11022_v34  ;;  %v11282_v3 = vmul.f32 %v11183_v28, %v11034_v46  ;;  %v11293_v45 = vmul.f32 %v11128_v50, %v11245_v57 }
 0x46a   : > { %14678 = vst [vmem:[#allocation104_spill] sm:$0xff] %v11216_v56  ;;  %v2579_v23 = vadd.f32 %v11241_v59, %v2578_v20  ;;  %v11263_v58 = vpop.eup %7526  ;;  %v2795_v14 = vmul.f32 %v14693_v55, %v11230_v13  ;;  %v14699_v55 = vperm.slane %v10922_v54, 0 }
 0x46b   : > { %14679 = vst [vmem:[#allocation13_spill] sm:$0xff] %v11219_v16  ;;  %v11254_v16 = vmul.f32 %v14689_v42, %v10964_v5  ;;  %v2797_v42 = vmul.f32 %v11210_v12, %v11234_v21  ;;  %v11278_v5 = vmul.f32 %v11183_v28, %v10928_v39  ;;  %v11313_v40 = vpop.f32.mrf.mxu3 }
 0x46c   : > { %14680 = vst [vmem:[#allocation98_spill] sm:$0xff] %v11221_v1  ;;  %v11249_v1 = vmul.f32 %v11056_v60, %v14687_v24  ;;  %v4776_v24 = vadd.f32 %v4746_v35, %v4744_v38  ;;  %v11270_v20 = vpop.eup %7528  ;;  %v4791_v38 = vadd.f32 %v4747_v9, %v4745_v62  ;;  %v11284_v35 = vpop.f32.mrf.mxu1  ;;  %v2580_v62 = vadd.f32 %v11263_v58, %v2579_v23  ;;  %v14703_v9 = vld [vmem:[#allocation113_spill] sm:$0xff] }
 0x46d   : > { %14681 = vst [vmem:[#allocation84_spill] sm:$0xff] %v11224_v10  ;;  %v11299_v28 = vpop.eup %7530 }
 0x46e   : > { %14684 = vst [vmem:[#allocation115_spill] sm:$0xff] %v11241_v59  ;;  %v11307_v59 = vpop.eup %7532  ;;  %v11309_v7 = vadd.f32 %v4776_v24, %v4748_v36  ;;  %v11323_v36 = vadd.f32 %v4791_v38, %v4749_v31  ;;  %v2860_v24 = vrot.slane %v11224_v10, 1  ;;  %v4827_v31 = vperm.slane %v4812_v0, 0 }
 0x46f   : > { %14686 = vst [vmem:[#allocation70_spill] sm:$0xff] %v11245_v57  ;;  %v11339_v38 = vperm.slane %v4814_v49, 0  ;;  %v2863_v49 = vrot.slane %v11224_v10, 4 }
 0x470   : > { %14688 = vst [vmem:[#allocation43_spill] sm:$0xff] %v11249_v1 }
 0x471   : > { %14690 = vst [vmem:[#allocation106_spill] sm:$0xff] %v11254_v16  ;;  %v2685_v16 = vmul.f32 %v11124_v37, %v11234_v21 }
 0x472   : > { %14691 = vst [vmem:[#allocation117_spill] sm:$0xff] %v11261_v17  ;;  %v2683_v17 = vmul.f32 %v14699_v55, %v11230_v13  ;;  %v4824_v55 = vperm.slane %v11150_v15, 0 }
 0x473   : > { %14692 = vst [vmem:[#allocation124_spill] sm:$0xff] %v11263_v58 }
 0x474   : > { %14694 = vst [vmem:[#allocation71_spill] sm:$0xff] %v11270_v20  ;;  %v4856_v23 = vmul.f32 %v4824_v55, %v14570_v61  ;;  %v4857_v58 = vmul.f32 %v4824_v55, %v10935_v63  ;;  %v11321_v12 = vadd.f32 %v2685_v16, %v2683_v17  ;;  %v11331_v55 = vmul.f32 %v11214_v11, %v11249_v1 }
 0x475   : > { %14695 = vst [vmem:[#allocation56_spill] sm:$0xff] %v11274_v32  ;;  %v11297_v32 = vmul.f32 %v11130_v4, %v11249_v1  ;;  %v4828_v17 = vperm.slane %v4813_v2, 0  ;;  %v2864_v2 = vrot.slane %v11224_v10, 5 }
 0x476   : > { %14696 = vst [vmem:[#allocation51_spill] sm:$0xff] %v11278_v5  ;;  %v4825_v5 = vperm.slane %v4810_v6, 0  ;;  %v11319_v6 = vpop.eup %7534 }
 0x477   : > { %14697 = vst [vmem:[#allocation120_spill] sm:$0xff] %v11282_v3  ;;  %v11304_v3 = vmul.f32 %v11056_v60, %v14703_v9 }
 0x478   : > { %14698 = vst [vmem:[#allocation20_spill] sm:$0xff] %v11284_v35  ;;  %v4858_v9 = vmul.f32 %v4825_v5, %v10833_v53  ;;  %v4859_v4 = vmul.f32 %v4825_v5, %v10939_v52 }
 0x479   : > { %14700 = vst [vmem:[#allocation125_spill] sm:$0xff] %v11293_v45  ;;  %v2841_v45 = vadd.f32 %v2797_v42, %v2795_v14  ;;  %v2799_v14 = vmul.f32 %v11212_v43, %v11245_v57  ;;  %v2581_v42 = vadd.f32 %v11270_v20, %v2580_v62  ;;  %v11335_v5 = vmul.f32 %v11216_v56, %v11304_v3 }
 0x47a   : > { %14701 = vst [vmem:[#allocation130_spill] sm:$0xff] %v11297_v32  ;;  %v4815_v32 = vrot.slane %v11150_v15, 6  ;;  %v4826_v15 = vperm.slane %v4811_v51, 0  ;;  %v4888_v62 = vadd.f32 %v4858_v9, %v4856_v23  ;;  %v13873_v56 = vperm.slane %v11224_v10, 0 }
 0x47b   : > { %14702 = vst [vmem:[#allocation57_spill] sm:$0xff] %v11299_v28  ;;  %v11337_v16 = vadd.f32 %v2841_v45, %v2799_v14  ;;  %v2582_v51 = vadd.f32 %v11299_v28, %v2581_v42  ;;  %v4922_v23 = vrot.slane %v11284_v35, 1  ;;  %v11368_v9 = vmul.f32 %v4827_v31, %v11022_v34 }
 0x47c   : > { %14704 = vst [vmem:[#allocation137_spill] sm:$0xff] %v11304_v3  ;;  %v4861_v0 = vmul.f32 %v4826_v15, %v11012_v27  ;;  %v2907_v45 = vmul.f32 %v13873_v56, %v11230_v13  ;;  %v11371_v14 = vmul.f32 %v4828_v17, %v10928_v39  ;;  %v2865_v56 = vrot.slane %v11224_v10, 6 }
 0x47d   : > { %14705 = vst [vmem:[#allocation110_spill] sm:$0xff] %v11307_v59 }
 0x47e   : > { %14706 = vst [vmem:[#allocation112_spill] sm:$0xff] %v11309_v7  ;;  %v4860_v7 = vmul.f32 %v4826_v15, %v10879_v29 }
 0x47f   : > { %14707 = vst [vmem:[#allocation127_spill] sm:$0xff] %v11313_v40  ;;  %v4903_v40 = vadd.f32 %v4859_v4, %v4857_v58  ;;  %v5527_v4 = vld [vmem:[%s13652_s1 + $0x78] sm:$0xff]  ;;  %v11359_v58 = vmul.f32 %v4827_v31, %v10911_v18  ;;  %v2583_v31 = vadd.f32 %v11307_v59, %v2582_v51  ;;  %v4925_v51 = vrot.slane %v11284_v35, 4 }
 0x480   : > { %14708 = vst [vmem:[#allocation128_spill] sm:$0xff] %v11319_v6  ;;  %5544 = vmatpush.msra.mxu2 %v5527_v4  ;;  %v11376_v42 = vadd.f32 %v4888_v62, %v4860_v7  ;;  %v11385_v4 = vpop.f32.mrf.mxu3  ;;  %v4936_v62 = vperm.slane %v11284_v35, 0 }
 0x481   : > { %14709 = vst [vmem:[#allocation138_spill] sm:$0xff] %v11321_v12  ;;  %v2861_v12 = vrot.slane %v11224_v10, 2 }
 0x482   : > { %14710 = vst [vmem:[#allocation146_spill] sm:$0xff] %v11323_v36  ;;  %v11341_v36 = vperm.slane %v4815_v32, 0  ;;  %v11353_v32 = vpop.f32.mrf.mxu1 }
 0x483   : > { %14711 = vst [vmem:[#allocation142_spill] sm:$0xff] %v11331_v55  ;;  %v2862_v55 = vrot.slane %v11224_v10, 3 }
 0x484   : > { %14712 = vst [vmem:[#allocation145_spill] sm:$0xff] %v11335_v5  ;;  %v11347_v5 = vperm.slane %v2860_v24, 0  ;;  %v11374_v24 = vmul.f32 %v4828_v17, %v11034_v46  ;;  %v4923_v17 = vrot.slane %v11284_v35, 2 }
 0x485   : > { %14713 = vst [vmem:[#allocation23_spill] sm:$0xff] %v11337_v16 }
 0x486   : > { %14714 = vst [vmem:[#allocation136_spill] sm:$0xff] %v11339_v38  ;;  %v2909_v15 = vmul.f32 %v11347_v5, %v11234_v21  ;;  %v11383_v38 = vperm.slane %v2862_v55, 0 }
 0x487   : > { %14715 = vst [vmem:[#allocation118_spill] sm:$0xff] %v11341_v36  ;;  %v11381_v36 = vperm.slane %v2861_v12, 0  ;;  %v5526_v12 = vld [vmem:[%s13652_s1 + $0x70] sm:$0xff] }
 0x488   : > { %14716 = vst [vmem:[#allocation148_spill] sm:$0xff] %v11353_v32  ;;  %v11378_v32 = vadd.f32 %v4903_v40, %v4861_v0  ;;  %v2953_v7 = vadd.f32 %v2909_v15, %v2907_v45  ;;  %v4924_v40 = vrot.slane %v11284_v35, 3  ;;  %v4937_v0 = vperm.slane %v4922_v23, 0  ;;  %5545 = vmatpush.msra.mxu2 %v5526_v12 }
 0x489   : > { %14717 = vst [vmem:[#allocation16_spill] sm:$0xff] %v11359_v58  ;;  %v2911_v55 = vmul.f32 %v11381_v36, %v11245_v57  ;;  %v4968_v45 = vmul.f32 %v4936_v62, %v14570_v61  ;;  %v4969_v15 = vmul.f32 %v4936_v62, %v10935_v63  ;;  %v11411_v58 = vperm.slane %v2865_v56, 0  ;;  %v5524_v56 = vld [vmem:[%s13652_s1 + $0x60] sm:$0xff] }
 0x48a   : > { %14718 = vst [vmem:[#allocation18_spill] sm:$0xff] %v11368_v9  ;;  %v11388_v9 = vperm.slane %v2863_v49, 0  ;;  %v4926_v49 = vrot.slane %v11284_v35, 5  ;;  %v4970_v23 = vmul.f32 %v4937_v0, %v10833_v53  ;;  %v11416_v12 = vmul.f32 %v11383_v38, %v11249_v1 }
 0x48b   : > { %14719 = vst [vmem:[#allocation121_spill] sm:$0xff] %v11371_v14  ;;  %v11390_v14 = vperm.slane %v2864_v2, 0  ;;  %v4927_v2 = vrot.slane %v11284_v35, 6  ;;  %v2972_v35 = vrot.slane %v11385_v4, 1  ;;  %v4939_v16 = vperm.slane %v4924_v40, 0 }
 0x48c   : > { %14720 = vst [vmem:[#allocation108_spill] sm:$0xff] %v11374_v24  ;;  %v4971_v24 = vmul.f32 %v4937_v0, %v10939_v52  ;;  %v11420_v62 = vmul.f32 %v11388_v9, %v11304_v3  ;;  %v11422_v0 = vadd.f32 %v2953_v7, %v2911_v55  ;;  %v2973_v40 = vrot.slane %v11385_v4, 2  ;;  %v5523_v55 = vld [vmem:[%s13652_s1 + $0x58] sm:$0xff] }
 0x48d   : > { %14721 = vst [vmem:[#allocation76_spill] sm:$0xff] %v11376_v42  ;;  %v2584_v42 = vadd.f32 %v11319_v6, %v2583_v31  ;;  %v4940_v31 = vperm.slane %v4925_v51, 0  ;;  %v11432_v6 = vpop.f32.mrf.mxu1  ;;  %v2974_v51 = vrot.slane %v11385_v4, 3 }
 0x48e   : > { %14722 = vst [vmem:[#allocation129_spill] sm:$0xff] %v11378_v32  ;;  %v5525_v32 = vld [vmem:[%s13652_s1 + $0x68] sm:$0xff]  ;;  %v5015_v7 = vadd.f32 %v4971_v24, %v4969_v15  ;;  %v2977_v24 = vrot.slane %v11385_v4, 6  ;;  %v5034_v15 = vrot.slane %v11432_v6, 1  ;;  %v5036_v59 = vrot.slane %v11432_v6, 3 }
 0x48f   : > { %14723 = vst [vmem:[#allocation11_spill] sm:$0xff] %v11385_v4  ;;  %5546 = vmatpush.msra.mxu2 %v5525_v32  ;;  %7536 = vrcp.f32 %v2584_v42  ;;  %v5522_v42 = vld [vmem:[%s13652_s1 + $0x50] sm:$0xff] }
 0x490   : > { %14724 = vst [vmem:[#allocation14_spill] sm:$0xff] %v11390_v14  ;;  %v4938_v14 = vperm.slane %v4923_v17, 0  ;;  %v11427_v17 = vperm.slane %v4926_v49, 0  ;;  %v13883_v49 = vperm.slane %v11385_v4, 0 }
 0x491   : > { %14725 = vst [vmem:[#allocation132_spill] sm:$0xff] %v11411_v58  ;;  %v11429_v58 = vperm.slane %v4927_v2, 0  ;;  %5547 = vmatpush.msra.mxu2 %v5524_v56  ;;  %v11441_v2 = vperm.slane %v2972_v35, 0  ;;  %v2975_v56 = vrot.slane %v11385_v4, 4  ;;  %v11456_v35 = vmul.f32 %v4939_v16, %v11022_v34 }
 0x492   : > { %14726 = vst [vmem:[#allocation40_spill] sm:$0xff] %v11416_v12  ;;  %v4972_v32 = vmul.f32 %v4938_v14, %v10879_v29  ;;  %v4973_v12 = vmul.f32 %v4938_v14, %v11012_v27  ;;  %v2976_v14 = vrot.slane %v11385_v4, 5 }
 0x493   : > { %14727 = vst [vmem:[#allocation123_spill] sm:$0xff] %v11420_v62  ;;  %v5000_v62 = vadd.f32 %v4970_v23, %v4968_v45  ;;  %5548 = vmatpush.msra.mxu2 %v5523_v55  ;;  %v11446_v45 = vpop.f32.mrf.mxu3  ;;  %v11453_v23 = vmul.f32 %v4939_v16, %v10911_v18  ;;  %v3019_v55 = vmul.f32 %v13883_v49, %v11230_v13  ;;  %v5521_v16 = vld [vmem:[%s13652_s1 + $0x48] sm:$0xff]  ;;  %v11478_v49 = vperm.slane %v2974_v51, 0 }
 0x494   : > { %14728 = vst [vmem:[#allocation41_spill] sm:$0xff] %v11422_v0 }
 0x495   : > { %14729 = vst [vmem:[#allocation119_spill] sm:$0xff] %v11427_v17  ;;  %5549 = vmatpush.msra.mxu2 %v5522_v42  ;;  %v11464_v17 = vmul.f32 %v4940_v31, %v10928_v39  ;;  %v11469_v0 = vadd.f32 %v5000_v62, %v4972_v32  ;;  %v5035_v42 = vrot.slane %v11432_v6, 2  ;;  %v11486_v62 = vperm.slane %v2977_v24, 0  ;;  %v5520_v32 = vld [vmem:[%s13652_s1 + $0x40] sm:$0xff] }
 0x496   : > { %14730 = vst [vmem:[#allocation131_spill] sm:$0xff] %v11429_v58  ;;  %v3021_v58 = vmul.f32 %v11441_v2, %v11234_v21  ;;  %v5039_v24 = vrot.slane %v11432_v6, 6 }
 0x497   : > { %14731 = vst [vmem:[#allocation135_spill] sm:$0xff] %v11446_v45  ;;  %v11467_v45 = vmul.f32 %v4940_v31, %v11034_v46  ;;  %5550 = vmatpush.msra.mxu2 %v5521_v16  ;;  %v11484_v31 = vperm.slane %v2976_v14, 0  ;;  %v11499_v14 = vmul.f32 %v11478_v49, %v11249_v1  ;;  %v5048_v16 = vperm.slane %v11432_v6, 0 }
 0x498   : > { %14732 = vst [vmem:[#allocation140_spill] sm:$0xff] %v11453_v23  ;;  %v11471_v23 = vadd.f32 %v5015_v7, %v4973_v12  ;;  %v5049_v12 = vperm.slane %v5034_v15, 0  ;;  %v11491_v7 = vpop.eup %7536  ;;  %v3065_v51 = vadd.f32 %v3021_v58, %v3019_v55  ;;  %v5040_v15 = vrot.slane %v11432_v6, 7  ;;  %v14743_v58 = vld [vmem:[#allocation139_spill] sm:$0xff] }
 0x499   : > { %14733 = vst [vmem:[#allocation144_spill] sm:$0xff] %v11456_v35  ;;  %v11476_v35 = vperm.slane %v2973_v40, 0  ;;  %5551 = vmatpush.msra.mxu2 %v5520_v32  ;;  %v11510_v55 = vmul.f32 %v14595_v8, %v14743_v58  ;;  %v5051_v32 = vperm.slane %v5036_v59, 0  ;;  %v14746_v59 = vld [vmem:[#allocation143_spill] sm:$0xff]  ;;  %v5080_v1 = vmul.f32 %v5048_v16, %v14570_v61 }
 0x49a   : > { %14734 = vst [vmem:[#allocation69_spill] sm:$0xff] %v11464_v17  ;;  %v11482_v17 = vperm.slane %v2975_v56, 0  ;;  %v5038_v56 = vrot.slane %v11432_v6, 5 }
 0x49b   : > { %14735 = vst [vmem:[#allocation99_spill] sm:$0xff] %v11467_v45  ;;  %v3023_v40 = vmul.f32 %v11476_v35, %v11245_v57  ;;  %v5037_v45 = vrot.slane %v11432_v6, 4  ;;  %v11521_v6 = vmul.f32 %v11491_v7, %v11120_v33  ;;  %v5081_v33 = vmul.f32 %v5048_v16, %v10935_v63  ;;  %v11535_v57 = vpop.f32.mrf.mxu3 }
 0x49c   : > { %14736 = vst [vmem:[#allocation101_spill] sm:$0xff] %v11469_v0  ;;  %v5050_v0 = vperm.slane %v5035_v42, 0  ;;  %v11529_v42 = vmul.f32 %v14595_v8, %v14746_v59  ;;  %v5053_v20 = vperm.slane %v5038_v56, 0  ;;  %v11548_v59 = vpop.f32.mrf.mxu1  ;;  %v5516_v8 = vld [vmem:[%s13652_s1 + $0x20] sm:$0xff] }
 0x49d   : > { %14737 = vst [vmem:[#allocation102_spill] sm:$0xff] %v11471_v23  ;;  %v11506_v23 = vmul.f32 %v11482_v17, %v11304_v3  ;;  %v11525_v58 = vadd.f32 %v3065_v51, %v3023_v40  ;;  %v5052_v28 = vperm.slane %v5037_v45, 0  ;;  %v5054_v3 = vperm.slane %v5039_v24, 0 }
 0x49e   : > { %14738 = vst [vmem:[#allocation103_spill] sm:$0xff] %v11484_v31  ;;  %v5083_v31 = vmul.f32 %v5049_v12, %v10939_v52  ;;  %v5085_v40 = vmul.f32 %v5050_v0, %v11012_v27  ;;  %v5086_v51 = vmul.f32 %v5051_v32, %v10911_v18  ;;  %v14749_v45 = vperm.slane %v10922_v54, 0 }
 0x49f   : > { %14739 = vst [vmem:[#allocation42_spill] sm:$0xff] %v11486_v62  ;;  %v11517_v62 = vmul.f32 %v11491_v7, %v11111_v48  ;;  %v11531_v48 = vperm.slane %v5040_v15, 0  ;;  %v2684_v24 = vmul.f32 %v11124_v37, %v11521_v6  ;;  %v11560_v54 = vmul.f32 %v5053_v20, %v10952_v22 }
 0x4a0   : > { %14740 = vst [vmem:[#allocation105_spill] sm:$0xff] %v11491_v7  ;;  %v5127_v16 = vadd.f32 %v5083_v31, %v5081_v33  ;;  %v11567_v37 = vmul.f32 %v11491_v7, %v11134_v44  ;;  %v14755_v31 = vld [vmem:[#allocation149_spill] sm:$0xff]  ;;  %v14756_v33 = vld [vmem:[#allocation150_spill] sm:$0xff]  ;;  %v3084_v44 = vrot.slane %v11535_v57, 1 }
 0x4a1   : > { %14741 = vst [vmem:[#allocation107_spill] sm:$0xff] %v11499_v14  ;;  %v5519_v14 = vld [vmem:[%s13652_s1 + $0x38] sm:$0xff]  ;;  %v2682_v56 = vmul.f32 %v14749_v45, %v11517_v62  ;;  %v11563_v45 = vmul.f32 %v5053_v20, %v11510_v55  ;;  %v5517_v20 = vld [vmem:[%s13652_s1 + $0x28] sm:$0xff] }
 0x4a2   : > { %14742 = vst [vmem:[#allocation83_spill] sm:$0xff] %v11506_v23  ;;  %v5082_v23 = vmul.f32 %v5049_v12, %v10833_v53  ;;  %5552 = vmatpush.msra.mxu2 %v5519_v14  ;;  %v5084_v12 = vmul.f32 %v5050_v0, %v10879_v29  ;;  %v11541_v14 = vmul.f32 %v5051_v32, %v11022_v34  ;;  %v5518_v0 = vld [vmem:[%s13652_s1 + $0x30] sm:$0xff] }
 0x4a3   : > { %14744 = vst [vmem:[#allocation122_spill] sm:$0xff] %v11510_v55  ;;  %v11557_v32 = vmul.f32 %v5052_v28, %v11034_v46  ;;  %v3099_v55 = vperm.slane %v3084_v44, 0  ;;  %v11628_v22 = vpop.f32.mrf.mxu3  ;;  %v14766_v44 = vld [vmem:[#allocation74_spill] sm:$0xff] }
 0x4a4   : > { %14745 = vst [vmem:[#allocation114_spill] sm:$0xff] %v11525_v58  ;;  %v5112_v15 = vadd.f32 %v5082_v23, %v5080_v1  ;;  %5553 = vmatpush.msra.mxu2 %v5518_v0  ;;  %v11570_v1 = vmul.f32 %v5054_v3, %v10956_v26  ;;  %v11573_v23 = vmul.f32 %v5054_v3, %v11529_v42  ;;  %v3098_v26 = vperm.slane %v11535_v57, 0 }
 0x4a5   : > { %14747 = vst [vmem:[#allocation133_spill] sm:$0xff] %v11529_v42  ;;  %v11584_v0 = vmul.f32 %v11056_v60, %v14756_v33  ;;  %v2714_v3 = vadd.f32 %v2684_v24, %v2682_v56  ;;  %v11595_v33 = vmul.f32 %v11491_v7, %v11145_v30  ;;  %v11599_v58 = vmul.f32 %v11491_v7, %v11156_v41  ;;  %v5515_v41 = vld [vmem:[%s13652_s1 + $0x18] sm:$0xff] }
 0x4a6   : > { %14748 = vst [vmem:[#allocation100_spill] sm:$0xff] %v11531_v48  ;;  %v11554_v48 = vmul.f32 %v5052_v28, %v10928_v39  ;;  %v11577_v28 = vmul.f32 %v11056_v60, %v14755_v31  ;;  %5554 = vmatpush.msra.mxu2 %v5517_v20  ;;  %v3087_v31 = vrot.slane %v11535_v57, 4  ;;  %v3088_v60 = vrot.slane %v11535_v57, 5 }
 0x4a7   : > { %14750 = vst [vmem:[#allocation7_spill] sm:$0xff] %v11548_v59  ;;  %v3089_v56 = vrot.slane %v11535_v57, 6  ;;  %v2686_v30 = vmul.f32 %v11128_v50, %v11567_v37  ;;  %v3090_v24 = vrot.slane %v11535_v57, 7  ;;  %v2908_v50 = vmul.f32 %v11347_v5, %v11521_v6 }
 0x4a8   : > { %14751 = vst [vmem:[#allocation9_spill] sm:$0xff] %v11560_v54  ;;  %v5128_v54 = vadd.f32 %v5127_v16, %v5085_v40  ;;  %5555 = vmatpush.msra.mxu2 %v5516_v8  ;;  %v11609_v40 = vmul.f32 %v11491_v7, %v11177_v47  ;;  %v14758_v8 = vperm.slane %v11106_v19, 0  ;;  %v14760_v47 = vperm.slane %v11224_v10, 0 }
 0x4a9   : > { %14752 = vst [vmem:[#allocation109_spill] sm:$0xff] %v11563_v45  ;;  %v3085_v45 = vrot.slane %v11535_v57, 2  ;;  %v14764_v5 = vperm.slane %v11385_v4, 0  ;;  %v2910_v4 = vmul.f32 %v11381_v36, %v11567_v37  ;;  %v11679_v36 = vmul.f32 %v11388_v9, %v11599_v58 }
 0x4aa   : > { %14753 = vst [vmem:[#allocation134_spill] sm:$0xff] %v11570_v1  ;;  %v3086_v1 = vrot.slane %v11535_v57, 3  ;;  %v2906_v20 = vmul.f32 %v14760_v47, %v11517_v62  ;;  %5556 = vmatpush.msra.mxu2 %v5515_v41  ;;  %v14763_v47 = vld [vmem:[#allocation93_spill] sm:$0xff]  ;;  %v3020_v57 = vmul.f32 %v11441_v2, %v11521_v6  ;;  %v11652_v41 = vmul.f32 %v11212_v43, %v11567_v37  ;;  %v5513_v2 = vld [vmem:[%s13652_s1 + $0x8] sm:$0xff] }
 0x4ab   : > { %14754 = vst [vmem:[#allocation141_spill] sm:$0xff] %v11573_v23  ;;  %v5113_v23 = vadd.f32 %v5112_v15, %v5084_v12  ;;  %v11605_v12 = vmul.f32 %v11491_v7, %v11169_v25  ;;  %v2794_v15 = vmul.f32 %v14758_v8, %v11517_v62  ;;  %v14759_v25 = vld [vmem:[#allocation49_spill] sm:$0xff]  ;;  %v2715_v7 = vadd.f32 %v2714_v3, %v2686_v30  ;;  %v5514_v8 = vld [vmem:[%s13652_s1 + $0x10] sm:$0xff] }
 0x4ac   : > { %14757 = vst [vmem:[#allocation22_spill] sm:$0xff] %v11599_v58  ;;  %v2796_v16 = vmul.f32 %v14759_v25, %v11521_v6  ;;  %v14762_v25 = vld [vmem:[#allocation27_spill] sm:$0xff]  ;;  %v2690_v10 = vmul.f32 %v14763_v47, %v11599_v58  ;;  %v3018_v3 = vmul.f32 %v14764_v5, %v11517_v62  ;;  %5557 = vmatpush.msra.mxu2 %v5514_v8  ;;  %v11658_v5 = vpop.f32.mrf.mxu1 }
 0x4ad   : > { %v5114_v42 = vadd.f32 %v5113_v23, %v5086_v51  ;;  %14761 = vst [vmem:[#allocation48_spill] sm:$0xff] %v11628_v22  ;;  %v2688_v19 = vmul.f32 %v14762_v25, %v11595_v33  ;;  %v14765_v51 = vld [vmem:[#allocation94_spill] sm:$0xff]  ;;  %v11648_v30 = vmul.f32 %v14766_v44, %v11609_v40  ;;  %v11656_v25 = vmul.f32 %v11214_v11, %v11595_v33 }
 0x4ae   : > { %v11644_v23 = vmul.f32 %v14765_v51, %v11605_v12  ;;  %14767 = vst [vmem:[#allocation111_spill] sm:$0xff] %v11652_v41  ;;  %v11663_v8 = vadd.f32 %v2796_v16, %v2794_v15  ;;  %v11669_v44 = vmul.f32 %v11383_v38, %v11595_v33  ;;  %v2938_v43 = vadd.f32 %v2908_v50, %v2906_v20  ;;  %v5512_v15 = vld [vmem:[%s13652_s1] sm:$0xff] }
 0x4af   : > { %14768 = vst [vmem:[#allocation97_spill] sm:$0xff] %v11656_v25  ;;  %5558 = vmatpush.msra.mxu2 %v5513_v2  ;;  %v2716_v41 = vadd.f32 %v2715_v7, %v2688_v19  ;;  %v5129_v11 = vadd.f32 %v5128_v54, %v11541_v14  ;;  %v3130_v25 = vmul.f32 %v3098_v26, %v11517_v62  ;;  %v5146_v20 = vrot.slane %v11658_v5, 1 }
 0x4b0   : > { %14769 = vst [vmem:[#allocation116_spill] sm:$0xff] %v11669_v44  ;;  %v3132_v51 = vmul.f32 %v3099_v55, %v11521_v6  ;;  %v3050_v16 = vadd.f32 %v3020_v57, %v3018_v3  ;;  %v3133_v38 = vmul.f32 %v3099_v55, %v11234_v21  ;;  %v3022_v19 = vmul.f32 %v11476_v35, %v11567_v37 }
 0x4b1   : > { %14770 = vst [vmem:[#allocation126_spill] sm:$0xff] %v11679_v36  ;;  %5559 = vmatpush.msra.mxu2 %v5512_v15  ;;  %v11687_v7 = vmul.f32 %v11478_v49, %v11595_v33  ;;  %v11691_v14 = vmul.f32 %v11482_v17, %v11599_v58  ;;  %v3100_v54 = vperm.slane %v3085_v45, 0  ;;  %v11693_v9 = vadd.f32 %v2938_v43, %v2910_v4 }
 0x4b2   : > { %v11696_v50 = vadd.f32 %v5114_v42, %v11554_v48  ;;  %v3101_v55 = vperm.slane %v3086_v1, 0  ;;  %v3131_v3 = vmul.f32 %v3098_v26, %v11230_v13  ;;  %v11699_v57 = vadd.f32 %v2716_v41, %v2690_v10  ;;  %v14778_v48 = vld [vmem:[#allocation70_spill] sm:$0xff]  ;;  %v11710_v26 = vpop.f32.mrf.mxu3 }
 0x4b3   : > { %14771 = vst [vmem:[#allocation113_spill] sm:$0xff] %v11687_v7  ;;  %v11702_v35 = vadd.f32 %v5129_v11, %v11557_v32  ;;  %v3102_v49 = vperm.slane %v3087_v31, 0  ;;  %v3162_v2 = vadd.f32 %v3132_v51, %v3130_v25  ;;  %v11704_v15 = vadd.f32 %v3050_v16, %v3022_v19  ;;  %v14779_v32 = vld [vmem:[#allocation43_spill] sm:$0xff]  ;;  %v14780_v25 = vld [vmem:[#allocation137_spill] sm:$0xff] }
 0x4b4   : > { %14772 = vst [vmem:[#allocation139_spill] sm:$0xff] %v11691_v14  ;;  %v3103_v17 = vperm.slane %v3088_v60, 0  ;;  %v3177_v14 = vadd.f32 %v3133_v38, %v3131_v3  ;;  %v5161_v45 = vperm.slane %v5146_v20, 0  ;;  %v3104_v4 = vperm.slane %v3089_v56, 0 }
 0x4b5   : > { %14773 = vst [vmem:[#allocation143_spill] sm:$0xff] %v11693_v9  ;;  %v11706_v43 = vperm.slane %v3090_v24, 0  ;;  %v3134_v42 = vmul.f32 %v3100_v54, %v11567_v37  ;;  %v3135_v1 = vmul.f32 %v3100_v54, %v14778_v48  ;;  %v3136_v10 = vmul.f32 %v3101_v55, %v11595_v33  ;;  %v14794_v9 = vld [vmem:[#allocation38_spill] sm:$0xff] }
 0x4b6   : > { %14774 = vst [vmem:[#allocation149_spill] sm:$0xff] %v11696_v50  ;;  %v3137_v41 = vmul.f32 %v3101_v55, %v14779_v32  ;;  %v5147_v31 = vrot.slane %v11658_v5, 2  ;;  %v5160_v51 = vperm.slane %v11658_v5, 0  ;;  %v3138_v60 = vmul.f32 %v3102_v49, %v11599_v58 }
 0x4b7   : > { %14775 = vst [vmem:[#allocation150_spill] sm:$0xff] %v11702_v35  ;;  %v3139_v56 = vmul.f32 %v3102_v49, %v14780_v25  ;;  %v11719_v24 = vmul.f32 %v3103_v17, %v11605_v12  ;;  %v3163_v11 = vadd.f32 %v3162_v2, %v3134_v42  ;;  %v11722_v16 = vmul.f32 %v3103_v17, %v11577_v28 }
 0x4b8   : > { %14776 = vst [vmem:[#allocation49_spill] sm:$0xff] %v11704_v15  ;;  %v3178_v38 = vadd.f32 %v3177_v14, %v3135_v1  ;;  %v5194_v20 = vmul.f32 %v5161_v45, %v10833_v53  ;;  %v3196_v19 = vrot.slane %v11710_v26, 1  ;;  %v11727_v54 = vmul.f32 %v3104_v4, %v11609_v40 }
 0x4b9   : > { %14777 = vst [vmem:[#allocation27_spill] sm:$0xff] %v11706_v43  ;;  %v11730_v55 = vmul.f32 %v3104_v4, %v11584_v0  ;;  %v5195_v49 = vmul.f32 %v5161_v45, %v10939_v52  ;;  %v5148_v17 = vrot.slane %v11658_v5, 3  ;;  %v5162_v42 = vperm.slane %v5147_v31, 0  ;;  %v11744_v43 = vpop.f32.mrf.mxu1 }
 0x4ba   : > { %14781 = vst [vmem:[#allocation93_spill] sm:$0xff] %v11719_v24  ;;  %v5192_v14 = vmul.f32 %v5160_v51, %v14570_v61  ;;  %v3164_v1 = vadd.f32 %v3163_v11, %v3136_v10  ;;  %v5149_v35 = vrot.slane %v11658_v5, 4  ;;  %v5150_v50 = vrot.slane %v11658_v5, 5 }
 0x4bb   : > { %14782 = vst [vmem:[#allocation70_spill] sm:$0xff] %v11722_v16  ;;  %v5193_v16 = vmul.f32 %v5160_v51, %v10935_v63  ;;  %v3179_v4 = vadd.f32 %v3178_v38, %v3137_v41  ;;  %v5152_v31 = vrot.slane %v11658_v5, 7  ;;  %v5163_v10 = vperm.slane %v5148_v17, 0 }
 0x4bc   : > { %14783 = vst [vmem:[#allocation151_spill] sm:$0xff] %v11727_v54  ;;  %v5224_v3 = vadd.f32 %v5194_v20, %v5192_v14  ;;  %v3211_v54 = vperm.slane %v3196_v19, 0  ;;  %v5196_v11 = vmul.f32 %v5162_v42, %v10879_v29  ;;  %v3197_v24 = vrot.slane %v11710_v26, 2 }
 0x4bd   : > { %14784 = vst [vmem:[#allocation152_spill] sm:$0xff] %v11730_v55  ;;  %v5151_v55 = vrot.slane %v11658_v5, 6  ;;  %v5239_v59 = vadd.f32 %v5195_v49, %v5193_v16  ;;  %v3210_v41 = vperm.slane %v11710_v26, 0  ;;  %v11749_v51 = vadd.f32 %v3164_v1, %v3138_v60  ;;  %v11755_v49 = vpop.f32.mrf.mxu3 }
 0x4be   : > { %14785 = vst [vmem:[#allocation153_spill] sm:$0xff] %v11744_v43  ;;  %v5164_v38 = vperm.slane %v5149_v35, 0  ;;  %v5165_v20 = vperm.slane %v5150_v50, 0  ;;  %v5197_v19 = vmul.f32 %v5162_v42, %v11012_v27  ;;  %v11752_v14 = vadd.f32 %v3179_v4, %v3139_v56 }
 0x4bf   : > { %14786 = vst [vmem:[#allocation154_spill] sm:$0xff] %v11749_v51  ;;  %v5166_v2 = vperm.slane %v5151_v55, 0  ;;  %v5225_v5 = vadd.f32 %v5224_v3, %v5196_v11  ;;  %v3244_v16 = vmul.f32 %v3211_v54, %v11521_v6  ;;  %v11757_v17 = vperm.slane %v5152_v31, 0  ;;  %v14790_v51 = vld [vmem:[#allocation37_spill] sm:$0xff] }
 0x4c0   : > { %14787 = vst [vmem:[#allocation155_spill] sm:$0xff] %v11752_v14  ;;  %v5240_v45 = vadd.f32 %v5239_v59, %v5197_v19  ;;  %v3198_v22 = vrot.slane %v11710_v26, 3  ;;  %v3245_v60 = vmul.f32 %v3211_v54, %v11234_v21  ;;  %v5198_v35 = vmul.f32 %v5163_v10, %v10911_v18 }
 0x4c1   : > { %14788 = vst [vmem:[#allocation156_spill] sm:$0xff] %v11755_v49  ;;  %v3199_v50 = vrot.slane %v11710_v26, 4  ;;  %v3212_v42 = vperm.slane %v3197_v24, 0  ;;  %v3242_v56 = vmul.f32 %v3210_v41, %v11517_v62  ;;  %v5199_v55 = vmul.f32 %v5163_v10, %v11022_v34  ;;  %v14792_v10 = vld [vmem:[#allocation122_spill] sm:$0xff] }
 0x4c2   : > { %14789 = vst [vmem:[#allocation157_spill] sm:$0xff] %v11757_v17  ;;  %v3200_v3 = vrot.slane %v11710_v26, 5  ;;  %v3201_v1 = vrot.slane %v11710_v26, 6  ;;  %v3243_v4 = vmul.f32 %v3210_v41, %v11230_v13  ;;  %v5200_v59 = vmul.f32 %v5164_v38, %v10928_v39 }
 0x4c3   : > { %v5226_v31 = vadd.f32 %v5225_v5, %v5198_v35  ;;  %v3202_v54 = vrot.slane %v11710_v26, 7  ;;  %v3274_v11 = vadd.f32 %v3244_v16, %v3242_v56  ;;  %v5201_v19 = vmul.f32 %v5164_v38, %v11034_v46  ;;  %v1568_v38 = vpop.f32.mrf.mxu1 }
 0x4c4   : > { %v5241_v17 = vadd.f32 %v5240_v45, %v5199_v55  ;;  %v3213_v24 = vperm.slane %v3198_v22, 0  ;;  %v3289_v14 = vadd.f32 %v3245_v60, %v3243_v4  ;;  %v11772_v15 = vmul.f32 %v5165_v20, %v14790_v51  ;;  %v14796_v45 = vld [vmem:[#allocation133_spill] sm:$0xff] }
 0x4c5   : > { %v11775_v7 = vmul.f32 %v5165_v20, %v14792_v10  ;;  %v3214_v36 = vperm.slane %v3199_v50, 0  ;;  %v3246_v41 = vmul.f32 %v3212_v42, %v11567_v37  ;;  %v11779_v44 = vmul.f32 %v5166_v2, %v14794_v9 }
 0x4c6   : > { %14791 = vst [vmem:[#allocation158_spill] sm:$0xff] %v11772_v15  ;;  %v3215_v5 = vperm.slane %v3200_v3, 0  ;;  %v3216_v26 = vperm.slane %v3201_v1, 0  ;;  %v3247_v16 = vmul.f32 %v3212_v42, %v14778_v48  ;;  %v11783_v22 = vmul.f32 %v5166_v2, %v14796_v45  ;;  %v11795_v2 = vpop.f32.mrf.mxu3 }
 0x4c7   : > { %14793 = vst [vmem:[#allocation159_spill] sm:$0xff] %v11775_v7  ;;  %v11785_v60 = vadd.f32 %v5226_v31, %v5200_v59  ;;  %v11787_v35 = vperm.slane %v3202_v54, 0  ;;  %v3275_v20 = vadd.f32 %v3274_v11, %v3246_v41  ;;  %v11789_v56 = vadd.f32 %v5241_v17, %v5201_v19 }
 0x4c8   : > { %14795 = vst [vmem:[#allocation160_spill] sm:$0xff] %v11779_v44  ;;  %v3248_v50 = vmul.f32 %v3213_v24, %v11595_v33  ;;  %v3249_v55 = vmul.f32 %v3213_v24, %v14779_v32  ;;  %v3290_v4 = vadd.f32 %v3289_v14, %v3247_v16  ;;  %v3250_v3 = vmul.f32 %v3214_v36, %v11599_v58 }
 0x4c9   : > { %14797 = vst [vmem:[#allocation161_spill] sm:$0xff] %v11783_v22  ;;  %v3251_v42 = vmul.f32 %v3214_v36, %v14780_v25  ;;  %v5258_v1 = vrot.slane %v1568_v38, 1  ;;  %v5259_v7 = vrot.slane %v1568_v38, 2  ;;  %v11798_v59 = vmul.f32 %v3215_v5, %v11605_v12 }
 0x4ca   : > { %14798 = vst [vmem:[#allocation162_spill] sm:$0xff] %v11785_v60  ;;  %v11801_v31 = vmul.f32 %v3215_v5, %v11577_v28  ;;  %v11804_v17 = vmul.f32 %v3216_v26, %v11609_v40  ;;  %v5260_v54 = vrot.slane %v1568_v38, 3  ;;  %v3276_v11 = vadd.f32 %v3275_v20, %v3248_v50 }
 0x4cb   : > { %14799 = vst [vmem:[#allocation163_spill] sm:$0xff] %v11787_v35  ;;  %v5261_v14 = vrot.slane %v1568_v38, 4  ;;  %v5262_v19 = vrot.slane %v1568_v38, 5  ;;  %v5263_v24 = vrot.slane %v1568_v38, 6  ;;  %v3291_v41 = vadd.f32 %v3290_v4, %v3249_v55 }
 0x4cc   : > { %14800 = vst [vmem:[#allocation164_spill] sm:$0xff] %v11789_v56  ;;  %v5264_v36 = vrot.slane %v1568_v38, 7  ;;  %v5272_v16 = vperm.slane %v1568_v38, 0  ;;  %v3308_v22 = vrot.slane %v11795_v2, 1  ;;  %v11808_v56 = vmul.f32 %v3216_v26, %v11584_v0 }
 0x4cd   : > { %14801 = vst [vmem:[#allocation165_spill] sm:$0xff] %v11798_v59  ;;  %v5273_v5 = vperm.slane %v5258_v1, 0  ;;  %v5274_v60 = vperm.slane %v5259_v7, 0  ;;  %v5275_v50 = vperm.slane %v5260_v54, 0  ;;  %v11814_v9 = vadd.f32 %v3276_v11, %v3250_v3 }
 0x4ce   : > { %14802 = vst [vmem:[#allocation166_spill] sm:$0xff] %v11801_v31  ;;  %v5276_v55 = vperm.slane %v5261_v14, 0  ;;  %v11816_v38 = vperm.slane %v5262_v19, 0  ;;  %v11818_v4 = vperm.slane %v5263_v24, 0  ;;  %v11820_v26 = vadd.f32 %v3291_v41, %v3251_v42 }
 0x4cf   : > { %14803 = vst [vmem:[#allocation167_spill] sm:$0xff] %v11804_v17  ;;  %v11822_v10 = vperm.slane %v5264_v36, 0  ;;  %v5304_v7 = vmul.f32 %v5272_v16, %v14570_v61  ;;  %v3323_v1 = vperm.slane %v3308_v22, 0  ;;  %v11826_v15 = vmul.f32 %v5272_v16, %v10935_v63  ;;  %v14821_v63 = vld [vmem:[#allocation88_spill] sm:$0xff] }
 0x4d0   : > { %14804 = vst [vmem:[#allocation168_spill] sm:$0xff] %v11808_v56  ;;  %v5306_v44 = vmul.f32 %v5273_v5, %v10833_v53  ;;  %v11830_v3 = vmul.f32 %v5273_v5, %v10939_v52  ;;  %v11833_v54 = vmul.f32 %v5274_v60, %v10879_v29  ;;  %v11836_v11 = vmul.f32 %v5274_v60, %v11012_v27 }
 0x4d1   : > { %14805 = vst [vmem:[#allocation169_spill] sm:$0xff] %v11814_v9  ;;  %v3309_v42 = vrot.slane %v11795_v2, 2  ;;  %v3310_v14 = vrot.slane %v11795_v2, 3  ;;  %v3322_v22 = vperm.slane %v11795_v2, 0  ;;  %v11842_v19 = vmul.f32 %v5275_v50, %v10911_v18  ;;  %v14870_v9 = vld [vmem:[#allocation98_spill] sm:$0xff] }
 0x4d2   : > { %14806 = vst [vmem:[#allocation170_spill] sm:$0xff] %v11816_v38  ;;  %v11845_v24 = vmul.f32 %v5275_v50, %v11022_v34  ;;  %v11848_v41 = vmul.f32 %v5276_v55, %v10928_v39  ;;  %v3311_v36 = vrot.slane %v11795_v2, 4  ;;  %v3312_v60 = vrot.slane %v11795_v2, 5  ;;  %v14819_v34 = vld [vmem:[#allocation95_spill] sm:$0xff]  ;;  %v14820_v39 = vld [vmem:[#allocation105_spill] sm:$0xff] }
 0x4d3   : > { %14807 = vst [vmem:[#allocation171_spill] sm:$0xff] %v11818_v4  ;;  %v3313_v16 = vrot.slane %v11795_v2, 6  ;;  %v3356_v5 = vmul.f32 %v3323_v1, %v11521_v6  ;;  %v3357_v20 = vmul.f32 %v3323_v1, %v11234_v21  ;;  %v11856_v45 = vmul.f32 %v5276_v55, %v11034_v46  ;;  %v14822_v55 = vld [vmem:[#allocation60_spill] sm:$0xff] }
 0x4d4   : > { %14808 = vst [vmem:[#allocation172_spill] sm:$0xff] %v11820_v26  ;;  %v3314_v50 = vrot.slane %v11795_v2, 7  ;;  %v11863_v18 = vmul.f32 %v14820_v39, %v14819_v34  ;;  %v3324_v27 = vperm.slane %v3309_v42, 0  ;;  %v3325_v29 = vperm.slane %v3310_v14, 0  ;;  %v11874_v42 = vpop.f32.mrf.mxu3  ;;  %v14824_v14 = vld [vmem:[#allocation13_spill] sm:$0xff]  ;;  %v14845_v26 = vld [vmem:[#allocation80_spill] sm:$0xff] }
 0x4d5   : > { %14809 = vst [vmem:[#allocation173_spill] sm:$0xff] %v11822_v10  ;;  %v11858_v10 = vadd.f32 %v5306_v44, %v5304_v7  ;;  %v3354_v52 = vmul.f32 %v3322_v22, %v11517_v62  ;;  %v3355_v43 = vmul.f32 %v3322_v22, %v11230_v13  ;;  %v3326_v53 = vperm.slane %v3311_v36, 0 }
 0x4d6   : > { %14810 = vst [vmem:[#allocation174_spill] sm:$0xff] %v11826_v15  ;;  %v11869_v1 = vmul.f32 %v14820_v39, %v14821_v63  ;;  %v2643_v44 = vrot.slane %v14822_v55, 1  ;;  %v2718_v2 = vadd.f32 %v11699_v57, %v11644_v23  ;;  %v3327_v7 = vperm.slane %v3312_v60, 0  ;;  %v14825_v63 = vld [vmem:[#allocation75_spill] sm:$0xff]  ;;  %v14839_v15 = vld [vmem:[#allocation128_spill] sm:$0xff] }
 0x4d7   : > { %14811 = vst [vmem:[#allocation175_spill] sm:$0xff] %v11830_v3  ;;  %v3328_v46 = vperm.slane %v3313_v16, 0  ;;  %v3386_v34 = vadd.f32 %v3356_v5, %v3354_v52  ;;  %v3401_v61 = vadd.f32 %v3357_v20, %v3355_v43  ;;  %v2644_v22 = vrot.slane %v14822_v55, 2  ;;  %v14827_v57 = vld [vmem:[#allocation115_spill] sm:$0xff]  ;;  %v14841_v3 = vld [vmem:[#allocation138_spill] sm:$0xff] }
 0x4d8   : > { %14812 = vst [vmem:[#allocation176_spill] sm:$0xff] %v11833_v54  ;;  %v2696_v36 = vmul.f32 %v14825_v63, %v11863_v18  ;;  %v11884_v4 = vperm.slane %v3314_v50, 0  ;;  %v3358_v23 = vmul.f32 %v3324_v27, %v11567_v37  ;;  %v3359_v52 = vmul.f32 %v3324_v27, %v14778_v48 }
 0x4d9   : > { %14813 = vst [vmem:[#allocation177_spill] sm:$0xff] %v11836_v11  ;;  %v11890_v43 = vmul.f32 %v14820_v39, %v14827_v57  ;;  %v2645_v20 = vrot.slane %v14822_v55, 3  ;;  %v11893_v60 = vperm.slane %v2643_v44, 0  ;;  %v14828_v16 = vperm.slane %v14822_v55, 0 }
 0x4da   : > { %14814 = vst [vmem:[#allocation178_spill] sm:$0xff] %v11842_v19  ;;  %v3387_v50 = vadd.f32 %v3386_v34, %v3358_v23  ;;  %v2646_v57 = vrot.slane %v14822_v55, 4  ;;  %v11904_v19 = vperm.slane %v2644_v22, 0  ;;  %v3361_v51 = vmul.f32 %v3325_v29, %v14779_v32  ;;  %v14830_v34 = vld [vmem:[#allocation71_spill] sm:$0xff] }
 0x4db   : > { %14815 = vst [vmem:[#allocation179_spill] sm:$0xff] %v11845_v24  ;;  %v2698_v5 = vmul.f32 %v14828_v16, %v11869_v1  ;;  %v14829_v24 = vld [vmem:[#allocation124_spill] sm:$0xff]  ;;  %v11916_v23 = vperm.slane %v2645_v20, 0  ;;  %v11921_v16 = vmul.f32 %v3327_v7, %v11605_v12  ;;  %v11931_v54 = vmul.f32 %v3327_v7, %v11577_v28 }
 0x4dc   : > { %14816 = vst [vmem:[#allocation180_spill] sm:$0xff] %v11848_v41  ;;  %v2719_v41 = vadd.f32 %v2718_v2, %v11648_v30  ;;  %v3360_v30 = vmul.f32 %v3325_v29, %v11595_v33  ;;  %v3402_v2 = vadd.f32 %v3401_v61, %v3359_v52  ;;  %v11901_v27 = vmul.f32 %v14820_v39, %v14829_v24 }
 0x4dd   : > { %14817 = vst [vmem:[#allocation181_spill] sm:$0xff] %v11856_v45  ;;  %v11878_v45 = vmul.f32 %v14820_v39, %v14824_v14  ;;  %v11913_v61 = vmul.f32 %v14820_v39, %v14830_v34  ;;  %v2647_v24 = vrot.slane %v14822_v55, 5  ;;  %v2702_v22 = vmul.f32 %v11904_v19, %v11890_v43 }
 0x4de   : > { %14818 = vst [vmem:[#allocation182_spill] sm:$0xff] %v11858_v10  ;;  %v2720_v14 = vadd.f32 %v2719_v41, %v2696_v36  ;;  %v3362_v41 = vmul.f32 %v3326_v53, %v11599_v58  ;;  %v3363_v36 = vmul.f32 %v3326_v53, %v14780_v25  ;;  %v3388_v29 = vadd.f32 %v3387_v50, %v3360_v30  ;;  %v14836_v50 = vld [vmem:[#allocation110_spill] sm:$0xff] }
 0x4df   : > { %14823 = vst [vmem:[#allocation95_spill] sm:$0xff] %v11874_v42  ;;  %v2700_v44 = vmul.f32 %v11893_v60, %v11878_v45  ;;  %v2648_v34 = vrot.slane %v14822_v55, 6  ;;  %v2662_v11 = vperm.slane %v2646_v57, 0  ;;  %v2704_v20 = vmul.f32 %v11916_v23, %v11901_v27 }
 0x4e0   : > { %14826 = vst [vmem:[#allocation105_spill] sm:$0xff] %v11884_v4  ;;  %v2721_v38 = vadd.f32 %v2720_v14, %v2698_v5  ;;  %v3403_v5 = vadd.f32 %v3402_v2, %v3361_v51  ;;  %v14832_v14 = vld [vmem:[#allocation57_spill] sm:$0xff]  ;;  %v11937_v30 = vmul.f32 %v3328_v46, %v11584_v0  ;;  %v2649_v51 = vrot.slane %v14822_v55, 7 }
 0x4e1   : > { %14831 = vst [vmem:[#allocation88_spill] sm:$0xff] %v11921_v16  ;;  %v11925_v53 = vmul.f32 %v14820_v39, %v14832_v14  ;;  %v11942_v2 = vmul.f32 %v14820_v39, %v14836_v50  ;;  %v2663_v57 = vperm.slane %v2647_v24, 0  ;;  %v2804_v59 = vmul.f32 %v14870_v9, %v11605_v12 }
 0x4e2   : > { %v2722_v52 = vadd.f32 %v2721_v38, %v2700_v44  ;;  %14833 = vst [vmem:[#allocation60_spill] sm:$0xff] %v11931_v54  ;;  %v11934_v38 = vmul.f32 %v3328_v46, %v11609_v40  ;;  %v2706_v44 = vmul.f32 %v2662_v11, %v11913_v61  ;;  %v11947_v7 = vadd.f32 %v3403_v5, %v3363_v36  ;;  %v14840_v5 = vld [vmem:[#allocation125_spill] sm:$0xff] }
 0x4e3   : > { %14835 = vst [vmem:[#allocation75_spill] sm:$0xff] %v11937_v30  ;;  %v11953_v30 = vmul.f32 %v14820_v39, %v14839_v15  ;;  %v2664_v54 = vperm.slane %v2648_v34, 0  ;;  %v2708_v50 = vmul.f32 %v2663_v57, %v11925_v53 }
 0x4e4   : > { %v2723_v10 = vadd.f32 %v2722_v52, %v2702_v22  ;;  %14834 = vst [vmem:[#allocation13_spill] sm:$0xff] %v11934_v38  ;;  %v1461_v22 = vpop.f32.mrf.mxu3  ;;  %v11945_v52 = vadd.f32 %v3388_v29, %v3362_v41  ;;  %v2665_v38 = vperm.slane %v2649_v51, 0  ;;  %v2691_v51 = vmul.f32 %v14763_v47, %v14780_v25 }
 0x4e5   : > { %14838 = vst [vmem:[#allocation124_spill] sm:$0xff] %v11947_v7  ;;  %v3420_v4 = vrot.slane %v1461_v22, 1  ;;  %v2710_v41 = vmul.f32 %v2664_v54, %v11942_v2  ;;  %v3423_v29 = vrot.slane %v1461_v22, 4  ;;  %v2730_v7 = vadd.f32 %v14841_v3, %v14840_v5 }
 0x4e6   : > { %v2724_v14 = vadd.f32 %v2723_v10, %v2704_v20  ;;  %14837 = vst [vmem:[#allocation115_spill] sm:$0xff] %v11945_v52  ;;  %v3421_v10 = vrot.slane %v1461_v22, 2  ;;  %v3422_v20 = vrot.slane %v1461_v22, 3  ;;  %v3424_v46 = vrot.slane %v1461_v22, 5 }
 0x4e7   : > { %v3425_v42 = vrot.slane %v1461_v22, 6  ;;  %v3426_v52 = vrot.slane %v1461_v22, 7  ;;  %v3434_v39 = vperm.slane %v1461_v22, 0  ;;  %v2712_v15 = vmul.f32 %v2665_v38, %v11953_v30  ;;  %v14847_v22 = vld [vmem:[#allocation94_spill] sm:$0xff] }
 0x4e8   : > { %v2725_v24 = vadd.f32 %v2724_v14, %v2706_v44  ;;  %v14842_v44 = vld [vmem:[#allocation130_spill] sm:$0xff]  ;;  %v3435_v16 = vperm.slane %v3420_v4, 0  ;;  %v11963_v56 = vperm.slane %v3421_v10, 0  ;;  %v11971_v31 = vperm.slane %v3423_v29, 0  ;;  %v14852_v10 = vld [vmem:[#allocation35_spill] sm:$0xff]  ;;  %v14853_v29 = vld [vmem:[#allocation52_spill] sm:$0xff] }
 0x4e9   : > { %v2731_v14 = vadd.f32 %v2730_v7, %v14842_v44  ;;  %v11975_v17 = vperm.slane %v3424_v46, 0  ;;  %v11977_v47 = vperm.slane %v3425_v42, 0  ;;  %v11979_v4 = vperm.slane %v3426_v52, 0 }
 0x4ea   : > { %v2726_v36 = vadd.f32 %v2725_v24, %v2708_v50  ;;  %v11965_v50 = vperm.slane %v3422_v20, 0  ;;  %v14844_v24 = vld [vmem:[#allocation19_spill] sm:$0xff]  ;;  %14846 = vst [vmem:[#allocation57_spill] sm:$0xff] %v11971_v31  ;;  %v11982_v7 = vmul.f32 %v3434_v39, %v11517_v62  ;;  %v11986_v20 = vmul.f32 %v14845_v26, %v14852_v10  ;;  %v14863_v10 = vld [vmem:[#allocation81_spill] sm:$0xff] }
 0x4eb   : > { %v11969_v3 = vmul.f32 %v14845_v26, %v14844_v24  ;;  %14848 = vst [vmem:[#allocation110_spill] sm:$0xff] %v11975_v17  ;;  %v11995_v42 = vmul.f32 %v3434_v39, %v11230_v13  ;;  %v11998_v52 = vmul.f32 %v3435_v16, %v11521_v6  ;;  %v12001_v62 = vmul.f32 %v3435_v16, %v11234_v21  ;;  %v14864_v16 = vld [vmem:[#allocation26_spill] sm:$0xff] }
 0x4ec   : > { %v2727_v34 = vadd.f32 %v2726_v36, %v2710_v41  ;;  %14843 = vst [vmem:[#allocation71_spill] sm:$0xff] %v11965_v50  ;;  %v2693_v41 = vmul.f32 %v14847_v22, %v11577_v28  ;;  %v2732_v36 = vadd.f32 %v2731_v14, %v2691_v51  ;;  %v14858_v14 = vld [vmem:[#allocation31_spill] sm:$0xff]  ;;  %v2707_v21 = vmul.f32 %v2662_v11, %v14863_v10 }
 0x4ed   : > { %14849 = vst [vmem:[#allocation128_spill] sm:$0xff] %v11977_v47  ;;  %v2697_v44 = vmul.f32 %v14825_v63, %v11969_v3  ;;  %v2805_v31 = vmul.f32 %v14870_v9, %v11577_v28 }
 0x4ee   : > { %v2728_v5 = vadd.f32 %v2727_v34, %v2712_v15  ;;  %14850 = vst [vmem:[#allocation125_spill] sm:$0xff] %v11979_v4  ;;  %v11990_v15 = vmul.f32 %v14845_v26, %v14853_v29  ;;  %v14854_v34 = vld [vmem:[#allocation74_spill] sm:$0xff]  ;;  %v2733_v51 = vadd.f32 %v2732_v36, %v2693_v41  ;;  %v14859_v26 = vperm.slane %v14822_v55, 0  ;;  %v14861_v41 = vld [vmem:[#allocation72_spill] sm:$0xff]  ;;  %v14862_v36 = vld [vmem:[#allocation73_spill] sm:$0xff] }
 0x4ef   : > { %14851 = vst [vmem:[#allocation138_spill] sm:$0xff] %v11982_v7  ;;  %v2695_v46 = vmul.f32 %v14854_v34, %v11584_v0  ;;  %v2703_v13 = vmul.f32 %v11904_v19, %v14861_v41  ;;  %v2705_v6 = vmul.f32 %v11916_v23, %v14862_v36  ;;  %v2709_v29 = vmul.f32 %v2663_v57, %v14864_v16  ;;  %v14865_v34 = vld [vmem:[#allocation82_spill] sm:$0xff] }
 0x4f0   : > { %5560 = vmatmul.f32.vlgmr.msra.gmra.mxu2 %v2728_v5  ;;  %14855 = vst [vmem:[#allocation130_spill] sm:$0xff] %v11995_v42  ;;  %v2699_v24 = vmul.f32 %v14859_v26, %v14858_v14  ;;  %v14860_v5 = vld [vmem:[#allocation32_spill] sm:$0xff]  ;;  %v2753_v63 = vrot.slane %v14865_v34, 6  ;;  %v2711_v4 = vmul.f32 %v2664_v54, %v11986_v20  ;;  %v12019_v55 = vmul.f32 %v2665_v38, %v11990_v15  ;;  %v14869_v38 = vld [vmem:[#allocation97_spill] sm:$0xff] }
 0x4f1   : > { %14856 = vst [vmem:[#allocation19_spill] sm:$0xff] %v11998_v52  ;;  %v2701_v22 = vmul.f32 %v11893_v60, %v14860_v5  ;;  %v2734_v39 = vadd.f32 %v2733_v51, %v2695_v46  ;;  %v14866_v60 = vld [vmem:[#allocation111_spill] sm:$0xff]  ;;  %v2754_v19 = vrot.slane %v14865_v34, 7  ;;  %v14868_v54 = vld [vmem:[#allocation104_spill] sm:$0xff] }
 0x4f2   : > { %14857 = vst [vmem:[#allocation80_spill] sm:$0xff] %v12001_v62  ;;  %v2827_v47 = vadd.f32 %v11663_v8, %v14866_v60  ;;  %v14867_v46 = vld [vmem:[#allocation87_spill] sm:$0xff]  ;;  %v2802_v25 = vmul.f32 %v14868_v54, %v11599_v58  ;;  %v2768_v34 = vperm.slane %v2753_v63, 0  ;;  %v14873_v63 = vld [vmem:[#allocation145_spill] sm:$0xff] }
 0x4f3   : > { %v2735_v26 = vadd.f32 %v2734_v39, %v2697_v44  ;;  %v2755_v51 = vrot.slane %v14867_v46, 1  ;;  %v2756_v23 = vrot.slane %v14867_v46, 2  ;;  %v2757_v11 = vrot.slane %v14867_v46, 3 }
 0x4f4   : > { %v2758_v17 = vrot.slane %v14867_v46, 4  ;;  %v2828_v35 = vadd.f32 %v2827_v47, %v14869_v38  ;;  %v2759_v44 = vrot.slane %v14867_v46, 5  ;;  %v2760_v8 = vrot.slane %v14867_v46, 6 }
 0x4f5   : > { %v2736_v57 = vadd.f32 %v2735_v26, %v2699_v24  ;;  %v2761_v39 = vrot.slane %v14867_v46, 7  ;;  %v14871_v24 = vld [vmem:[#allocation142_spill] sm:$0xff]  ;;  %v14872_v26 = vld [vmem:[#allocation23_spill] sm:$0xff]  ;;  %v2769_v49 = vperm.slane %v2754_v19, 0  ;;  %v2770_v54 = vperm.slane %v14867_v46, 0 }
 0x4f6   : > { %v2829_v62 = vadd.f32 %v2828_v35, %v2802_v25  ;;  %v2843_v42 = vadd.f32 %v14872_v26, %v14871_v24  ;;  %v2771_v52 = vperm.slane %v2755_v51, 0  ;;  %v2806_v47 = vmul.f32 %v2768_v34, %v11609_v40 }
 0x4f7   : > { %v2737_v60 = vadd.f32 %v2736_v57, %v2701_v22  ;;  %v2772_v57 = vperm.slane %v2756_v23, 0  ;;  %v2773_v58 = vperm.slane %v2757_v11, 0  ;;  %v2774_v32 = vperm.slane %v2758_v17, 0 }
 0x4f8   : > { %v2830_v7 = vadd.f32 %v2829_v62, %v2804_v59  ;;  %v2844_v22 = vadd.f32 %v2843_v42, %v14873_v63  ;;  %v2808_v25 = vmul.f32 %v2769_v49, %v11863_v18  ;;  %v2807_v19 = vmul.f32 %v2768_v34, %v11584_v0 }
 0x4f9   : > { %v2738_v38 = vadd.f32 %v2737_v60, %v2703_v13  ;;  %v2775_v51 = vperm.slane %v2759_v44, 0  ;;  %v2776_v26 = vperm.slane %v2760_v8, 0  ;;  %v2777_v50 = vperm.slane %v2761_v39, 0 }
 0x4fa   : > { %v2831_v24 = vadd.f32 %v2830_v7, %v2806_v47  ;;  %v2845_v46 = vadd.f32 %v2844_v22, %v2805_v31  ;;  %v2810_v59 = vmul.f32 %v2770_v54, %v11869_v1  ;;  %v2809_v9 = vmul.f32 %v2769_v49, %v11969_v3 }
 0x4fb   : > { %v2739_v35 = vadd.f32 %v2738_v38, %v2705_v6  ;;  %v2812_v23 = vmul.f32 %v2771_v52, %v11878_v45  ;;  %v2814_v17 = vmul.f32 %v2772_v57, %v11890_v43  ;;  %v2816_v6 = vmul.f32 %v2773_v58, %v11901_v27 }
 0x4fc   : > { %v2832_v13 = vadd.f32 %v2831_v24, %v2808_v25  ;;  %v2846_v42 = vadd.f32 %v2845_v46, %v2807_v19  ;;  %v2818_v7 = vmul.f32 %v2774_v32, %v11913_v61  ;;  %v2811_v44 = vmul.f32 %v2770_v54, %v14858_v14  ;;  %v14874_v25 = vld [vmem:[#allocation84_spill] sm:$0xff]  ;;  %v14876_v24 = vld [vmem:[#allocation143_spill] sm:$0xff] }
 0x4fd   : > { %v2740_v62 = vadd.f32 %v2739_v35, %v2707_v21  ;;  %v2820_v39 = vmul.f32 %v2775_v51, %v11925_v53  ;;  %v2822_v21 = vmul.f32 %v2776_v26, %v11942_v2  ;;  %v2824_v49 = vmul.f32 %v2777_v50, %v11953_v30  ;;  %v14875_v35 = vld [vmem:[#allocation116_spill] sm:$0xff] }
 0x4fe   : > { %v2833_v31 = vadd.f32 %v2832_v13, %v2810_v59  ;;  %v2847_v8 = vadd.f32 %v2846_v42, %v2809_v9  ;;  %v2813_v34 = vmul.f32 %v2771_v52, %v14860_v5  ;;  %v2815_v38 = vmul.f32 %v2772_v57, %v14861_v41 }
 0x4ff   : > { %v2741_v11 = vadd.f32 %v2740_v62, %v2709_v29  ;;  %v2817_v22 = vmul.f32 %v2773_v58, %v14862_v36  ;;  %v2819_v29 = vmul.f32 %v2774_v32, %v14863_v10  ;;  %v2866_v54 = vrot.slane %v14874_v25, 7  ;;  %v14877_v58 = vld [vmem:[#allocation14_spill] sm:$0xff] }
 0x500   : > { %v2834_v47 = vadd.f32 %v2833_v31, %v2812_v23  ;;  %v2848_v63 = vadd.f32 %v2847_v8, %v2811_v44  ;;  %v2940_v19 = vadd.f32 %v14876_v24, %v14875_v35  ;;  %v2821_v62 = vmul.f32 %v2775_v51, %v14864_v16  ;;  %v14878_v32 = vld [vmem:[#allocation126_spill] sm:$0xff] }
 0x501   : > { %v2742_v60 = vadd.f32 %v2741_v11, %v2711_v4  ;;  %v2823_v4 = vmul.f32 %v2776_v26, %v11986_v20  ;;  %v12066_v57 = vmul.f32 %v2777_v50, %v11990_v15  ;;  %v2916_v13 = vmul.f32 %v14877_v58, %v11605_v12  ;;  %v14879_v11 = vld [vmem:[#allocation127_spill] sm:$0xff]  ;;  %v14880_v26 = vld [vmem:[#allocation132_spill] sm:$0xff] }
 0x502   : > { %v2835_v59 = vadd.f32 %v2834_v47, %v2814_v17  ;;  %v2849_v52 = vadd.f32 %v2848_v63, %v2813_v34  ;;  %v2941_v9 = vadd.f32 %v2940_v19, %v14878_v32  ;;  %v2867_v31 = vrot.slane %v14879_v11, 1  ;;  %v14881_v47 = vld [vmem:[#allocation40_spill] sm:$0xff]  ;;  %v14882_v63 = vld [vmem:[#allocation41_spill] sm:$0xff] }
 0x503   : > { %v2743_v46 = vadd.f32 %v2742_v60, %v12019_v55  ;;  %v2868_v55 = vrot.slane %v14879_v11, 2  ;;  %v2869_v51 = vrot.slane %v14879_v11, 3  ;;  %v2881_v17 = vperm.slane %v2866_v54, 0 }
 0x504   : > { %v2836_v42 = vadd.f32 %v2835_v59, %v2816_v6  ;;  %v2850_v23 = vadd.f32 %v2849_v52, %v2815_v38  ;;  %v2918_v44 = vmul.f32 %v14880_v26, %v11609_v40  ;;  %v2942_v50 = vadd.f32 %v2941_v9, %v2916_v13  ;;  %v14883_v59 = vld [vmem:[#allocation123_spill] sm:$0xff] }
 0x505   : > { %5563 = vmatmul.f32.gmra.mxu2 %v2743_v46  ;;  %v2870_v60 = vrot.slane %v14879_v11, 4  ;;  %v2955_v25 = vadd.f32 %v14882_v63, %v14881_v47  ;;  %v2871_v6 = vrot.slane %v14879_v11, 5  ;;  %v2882_v38 = vperm.slane %v14879_v11, 0 }
 0x506   : > { %v2837_v8 = vadd.f32 %v2836_v42, %v2818_v7  ;;  %v2851_v34 = vadd.f32 %v2850_v23, %v2817_v22  ;;  %v2920_v35 = vmul.f32 %v2881_v17, %v11863_v18  ;;  %v2943_v24 = vadd.f32 %v2942_v50, %v2918_v44 }
 0x507   : > { %v2917_v46 = vmul.f32 %v14877_v58, %v11577_v28  ;;  %v2956_v7 = vadd.f32 %v2955_v25, %v14883_v59  ;;  %v2872_v22 = vrot.slane %v14879_v11, 6  ;;  %v2883_v52 = vperm.slane %v2867_v31, 0 }
 0x508   : > { %v2838_v19 = vadd.f32 %v2837_v8, %v2820_v39  ;;  %v2852_v54 = vadd.f32 %v2851_v34, %v2819_v29  ;;  %v2922_v13 = vmul.f32 %v2882_v38, %v11869_v1  ;;  %v2944_v32 = vadd.f32 %v2943_v24, %v2920_v35 }
 0x509   : > { %v2873_v42 = vrot.slane %v14879_v11, 7  ;;  %v2919_v23 = vmul.f32 %v14880_v26, %v11584_v0  ;;  %v2957_v44 = vadd.f32 %v2956_v7, %v2917_v46  ;;  %v2884_v39 = vperm.slane %v2868_v55, 0 }
 0x50a   : > { %v2839_v9 = vadd.f32 %v2838_v19, %v2822_v21  ;;  %v2885_v29 = vperm.slane %v2869_v51, 0  ;;  %v2924_v50 = vmul.f32 %v2883_v52, %v11878_v45  ;;  %v2945_v58 = vadd.f32 %v2944_v32, %v2922_v13  ;;  %v14884_v32 = vld [vmem:[#allocation11_spill] sm:$0xff] }
 0x50b   : > { %v2853_v34 = vadd.f32 %v2852_v54, %v2821_v62  ;;  %v2921_v47 = vmul.f32 %v2881_v17, %v11969_v3  ;;  %v2958_v31 = vadd.f32 %v2957_v44, %v2919_v23  ;;  %v2886_v63 = vperm.slane %v2870_v60, 0  ;;  %v14886_v23 = vld [vmem:[#allocation49_spill] sm:$0xff] }
 0x50c   : > { %v2840_v8 = vadd.f32 %v2839_v9, %v2824_v49  ;;  %v2887_v25 = vperm.slane %v2871_v6, 0  ;;  %v2926_v21 = vmul.f32 %v2884_v39, %v11890_v43  ;;  %v2946_v35 = vadd.f32 %v2945_v58, %v2924_v50 }
 0x50d   : > { %v2888_v11 = vperm.slane %v2872_v22, 0  ;;  %v2889_v24 = vperm.slane %v2873_v42, 0  ;;  %v2923_v26 = vmul.f32 %v2882_v38, %v14858_v14  ;;  %v2959_v55 = vadd.f32 %v2958_v31, %v2921_v47  ;;  %v14885_v42 = vld [vmem:[#allocation113_spill] sm:$0xff]  ;;  %v14888_v47 = vld [vmem:[#allocation139_spill] sm:$0xff] }
 0x50e   : > { %5566 = vmatmul.f32.gmra.mxu2 %v2840_v8  ;;  %v2928_v51 = vmul.f32 %v2885_v29, %v11901_v27  ;;  %v2930_v19 = vmul.f32 %v2886_v63, %v11913_v61  ;;  %v2932_v49 = vmul.f32 %v2887_v25, %v11925_v53  ;;  %v2947_v62 = vadd.f32 %v2946_v35, %v2926_v21  ;;  %v14889_v21 = vld [vmem:[#allocation135_spill] sm:$0xff] }
 0x50f   : > { %v2854_v17 = vadd.f32 %v2853_v34, %v2823_v4  ;;  %v2934_v60 = vmul.f32 %v2888_v11, %v11942_v2  ;;  %v2925_v6 = vmul.f32 %v2883_v52, %v14860_v5  ;;  %v2960_v54 = vadd.f32 %v2959_v55, %v2923_v26 }
 0x510   : > { %v2936_v46 = vmul.f32 %v2889_v24, %v11953_v30  ;;  %v2948_v59 = vadd.f32 %v2947_v62, %v2928_v51  ;;  %v2927_v7 = vmul.f32 %v2884_v39, %v14861_v41  ;;  %v2929_v38 = vmul.f32 %v2885_v29, %v14862_v36  ;;  %v14887_v29 = vld [vmem:[#allocation103_spill] sm:$0xff] }
 0x511   : > { %v2931_v22 = vmul.f32 %v2886_v63, %v14863_v10  ;;  %v2961_v13 = vadd.f32 %v2960_v54, %v2925_v6  ;;  %v2978_v9 = vrot.slane %v14884_v32, 7  ;;  %v3052_v4 = vadd.f32 %v14886_v23, %v14885_v42  ;;  %v14892_v6 = vld [vmem:[#allocation114_spill] sm:$0xff]  ;;  %v14893_v23 = vld [vmem:[#allocation83_spill] sm:$0xff] }
 0x512   : > { %v2949_v44 = vadd.f32 %v2948_v59, %v2930_v19  ;;  %v2933_v50 = vmul.f32 %v2887_v25, %v14864_v16  ;;  %v2935_v52 = vmul.f32 %v2888_v11, %v11986_v20  ;;  %v12109_v58 = vmul.f32 %v2889_v24, %v11990_v15  ;;  %v14890_v24 = vld [vmem:[#allocation42_spill] sm:$0xff] }
 0x513   : > { %v2855_v39 = vadd.f32 %v2854_v17, %v12066_v57  ;;  %v2962_v8 = vadd.f32 %v2961_v13, %v2927_v7  ;;  %v3028_v34 = vmul.f32 %v14887_v29, %v11605_v12  ;;  %v3053_v31 = vadd.f32 %v3052_v4, %v14888_v47 }
 0x514   : > { %v2950_v63 = vadd.f32 %v2949_v44, %v2932_v49  ;;  %v2979_v35 = vrot.slane %v14889_v21, 1  ;;  %v2980_v26 = vrot.slane %v14889_v21, 2  ;;  %v2981_v25 = vrot.slane %v14889_v21, 3  ;;  %v14891_v49 = vld [vmem:[#allocation107_spill] sm:$0xff] }
 0x515   : > { %v2963_v11 = vadd.f32 %v2962_v8, %v2929_v38  ;;  %v2993_v55 = vperm.slane %v2978_v9, 0  ;;  %v3030_v51 = vmul.f32 %v14890_v24, %v11609_v40  ;;  %v3054_v57 = vadd.f32 %v3053_v31, %v3028_v34 }
 0x516   : > { %5569 = vmatmul.f32.gmra.mxu2 %v2855_v39  ;;  %v2982_v19 = vrot.slane %v14889_v21, 4  ;;  %v2983_v62 = vrot.slane %v14889_v21, 5  ;;  %v2994_v17 = vperm.slane %v14889_v21, 0  ;;  %v3067_v54 = vadd.f32 %v14892_v6, %v14891_v49 }
 0x517   : > { %v2951_v59 = vadd.f32 %v2950_v63, %v2934_v60  ;;  %v2964_v7 = vadd.f32 %v2963_v11, %v2931_v22  ;;  %v3032_v13 = vmul.f32 %v2993_v55, %v11863_v18  ;;  %v3055_v32 = vadd.f32 %v3054_v57, %v3030_v51 }
 0x518   : > { %v2984_v38 = vrot.slane %v14889_v21, 6  ;;  %v2985_v9 = vrot.slane %v14889_v21, 7  ;;  %v3029_v42 = vmul.f32 %v14887_v29, %v11577_v28  ;;  %v3068_v4 = vadd.f32 %v3067_v54, %v14893_v23  ;;  %v14896_v23 = vld [vmem:[#allocation48_spill] sm:$0xff] }
 0x519   : > { %v2995_v44 = vperm.slane %v2979_v35, 0  ;;  %v2996_v39 = vperm.slane %v2980_v26, 0  ;;  %v3034_v8 = vmul.f32 %v2994_v17, %v11869_v1  ;;  %v3056_v34 = vadd.f32 %v3055_v32, %v3032_v13  ;;  %v14895_v13 = vld [vmem:[#allocation154_spill] sm:$0xff] }
 0x51a   : > { %v2997_v47 = vperm.slane %v2981_v25, 0  ;;  %v2998_v60 = vperm.slane %v2982_v19, 0  ;;  %v3031_v22 = vmul.f32 %v14890_v24, %v11584_v0  ;;  %v3069_v31 = vadd.f32 %v3068_v4, %v3029_v42 }
 0x51b   : > { %v2952_v63 = vadd.f32 %v2951_v59, %v2936_v46  ;;  %v2965_v11 = vadd.f32 %v2964_v7, %v2933_v50  ;;  %v3036_v21 = vmul.f32 %v2995_v44, %v11878_v45  ;;  %v3057_v51 = vadd.f32 %v3056_v34, %v3034_v8  ;;  %v14894_v7 = vld [vmem:[#allocation93_spill] sm:$0xff] }
 0x51c   : > { %v2999_v57 = vperm.slane %v2983_v62, 0  ;;  %v12135_v29 = vperm.slane %v2984_v38, 0  ;;  %v3033_v35 = vmul.f32 %v2993_v55, %v11969_v3  ;;  %v3070_v26 = vadd.f32 %v3069_v31, %v3031_v22  ;;  %v14898_v22 = vld [vmem:[#allocation151_spill] sm:$0xff] }
 0x51d   : > { %v12138_v49 = vperm.slane %v2985_v9, 0  ;;  %v3038_v25 = vmul.f32 %v2996_v39, %v11890_v43  ;;  %v3040_v19 = vmul.f32 %v2997_v47, %v11901_v27  ;;  %v3058_v24 = vadd.f32 %v3057_v51, %v3036_v21 }
 0x51e   : > { %5572 = vmatmul.f32.gmra.mxu2 %v2952_v63  ;;  %v3042_v46 = vmul.f32 %v2998_v60, %v11913_v61  ;;  %v3044_v50 = vmul.f32 %v2999_v57, %v11925_v53  ;;  %v3035_v6 = vmul.f32 %v2994_v17, %v14858_v14  ;;  %v3071_v62 = vadd.f32 %v3070_v26, %v3033_v35  ;;  %v14897_v17 = vld [vmem:[#allocation27_spill] sm:$0xff] }
 0x51f   : > { %v2966_v54 = vadd.f32 %v2965_v11, %v2935_v52  ;;  %v3046_v55 = vmul.f32 %v12135_v29, %v11942_v2  ;;  %v3059_v59 = vadd.f32 %v3058_v24, %v3038_v25  ;;  %v3166_v32 = vadd.f32 %v14895_v13, %v14894_v7 }
 0x520   : > { %v3037_v38 = vmul.f32 %v2995_v44, %v14860_v5  ;;  %v3039_v9 = vmul.f32 %v2996_v39, %v14861_v41  ;;  %v3072_v42 = vadd.f32 %v3071_v62, %v3035_v6  ;;  %v3092_v4 = vrot.slane %v14896_v23, 2 }
 0x521   : > { %v3060_v8 = vadd.f32 %v3059_v59, %v3040_v19  ;;  %v3041_v34 = vmul.f32 %v2997_v47, %v14862_v36  ;;  %v3144_v52 = vmul.f32 %v14897_v17, %v11863_v18  ;;  %v3167_v31 = vadd.f32 %v3166_v32, %v14898_v22  ;;  %v14901_v47 = vld [vmem:[#allocation70_spill] sm:$0xff]  ;;  %v14902_v19 = vld [vmem:[#allocation155_spill] sm:$0xff] }
 0x522   : > { %v3073_v63 = vadd.f32 %v3072_v42, %v3037_v38  ;;  %v3093_v11 = vrot.slane %v14896_v23, 3  ;;  %v14899_v21 = vrot.slane %v14896_v23, 1  ;;  %v14900_v44 = vperm.slane %v14896_v23, 0  ;;  %v14903_v42 = vld [vmem:[#allocation152_spill] sm:$0xff] }
 0x523   : > { %v2967_v35 = vadd.f32 %v2966_v54, %v12109_v58  ;;  %v3061_v26 = vadd.f32 %v3060_v8, %v3042_v46  ;;  %v3168_v25 = vadd.f32 %v3167_v31, %v3144_v52  ;;  %v3181_v24 = vadd.f32 %v14902_v19, %v14901_v47 }
 0x524   : > { %v3107_v51 = vperm.slane %v14899_v21, 0  ;;  %v3146_v39 = vmul.f32 %v14900_v44, %v11869_v1  ;;  %v3043_v6 = vmul.f32 %v2998_v60, %v14863_v10  ;;  %v3074_v62 = vadd.f32 %v3073_v63, %v3039_v9 }
 0x525   : > { %v3108_v59 = vperm.slane %v3092_v4, 0  ;;  %v3062_v13 = vadd.f32 %v3061_v26, %v3044_v50  ;;  %v3145_v38 = vmul.f32 %v14897_v17, %v11969_v3  ;;  %v3182_v22 = vadd.f32 %v3181_v24, %v14903_v42 }
 0x526   : > { %v3148_v7 = vmul.f32 %v3107_v51, %v11878_v45  ;;  %5575 = vmatmul.f32.gmra.mxu2 %v2967_v35  ;;  %v3169_v32 = vadd.f32 %v3168_v25, %v3146_v39  ;;  %v3075_v58 = vadd.f32 %v3074_v62, %v3041_v34  ;;  %v3094_v46 = vrot.slane %v14896_v23, 4  ;;  %v14905_v35 = vld [vmem:[#allocation71_spill] sm:$0xff] }
 0x527   : > { %v3109_v54 = vperm.slane %v3093_v11, 0  ;;  %v3150_v8 = vmul.f32 %v3108_v59, %v11890_v43  ;;  %v3063_v52 = vadd.f32 %v3062_v13, %v3046_v55  ;;  %v14904_v9 = vmov %v14900_v44 }
 0x528   : > { %v3170_v60 = vadd.f32 %v3169_v32, %v3148_v7  ;;  %v3147_v4 = vmul.f32 %v14904_v9, %v14858_v14  ;;  %v3183_v31 = vadd.f32 %v3182_v22, %v3145_v38  ;;  %v3470_v50 = vmul.f32 %v11963_v56, %v11567_v37  ;;  %v14908_v7 = vld [vmem:[#allocation57_spill] sm:$0xff] }
 0x529   : > { %v3048_v17 = vmul.f32 %v12138_v49, %v11953_v30  ;;  %v3045_v34 = vmul.f32 %v2999_v57, %v14864_v16  ;;  %v3076_v63 = vadd.f32 %v3075_v58, %v3043_v6  ;;  %v3152_v11 = vmul.f32 %v3109_v54, %v11901_v27  ;;  %v14906_v6 = vld [vmem:[#allocation43_spill] sm:$0xff]  ;;  %v14911_v58 = vld [vmem:[#allocation156_spill] sm:$0xff] }
 0x52a   : > { %v3171_v21 = vadd.f32 %v3170_v60, %v3150_v8  ;;  %v3149_v55 = vmul.f32 %v3107_v51, %v14860_v5  ;;  %v3184_v44 = vadd.f32 %v3183_v31, %v3147_v4  ;;  %v3471_v39 = vmul.f32 %v11963_v56, %v14778_v48  ;;  %v14907_v51 = vld [vmem:[#allocation22_spill] sm:$0xff]  ;;  %v14910_v56 = vld [vmem:[#allocation19_spill] sm:$0xff]  ;;  %v14914_v31 = vld [vmem:[#allocation165_spill] sm:$0xff] }
 0x52b   : > { %v12186_v26 = vmul.f32 %v14905_v35, %v11595_v33  ;;  %v3095_v37 = vrot.slane %v14896_v23, 5  ;;  %v3110_v25 = vperm.slane %v3094_v46, 0  ;;  %v3064_v47 = vadd.f32 %v3063_v52, %v3048_v17  ;;  %v14909_v48 = vld [vmem:[#allocation138_spill] sm:$0xff]  ;;  %v14913_v52 = vld [vmem:[#allocation80_spill] sm:$0xff]  ;;  %v14915_v17 = vld [vmem:[#allocation169_spill] sm:$0xff] }
 0x52c   : > { %v3077_v19 = vadd.f32 %v3076_v63, %v3045_v34  ;;  %v3172_v57 = vadd.f32 %v3171_v21, %v3152_v11  ;;  %v3185_v24 = vadd.f32 %v3184_v44, %v3149_v55  ;;  %v12191_v62 = vmul.f32 %v14905_v35, %v14906_v6  ;;  %v14912_v8 = vld [vmem:[#allocation130_spill] sm:$0xff]  ;;  %v14917_v35 = vld [vmem:[#allocation163_spill] sm:$0xff] }
 0x52d   : > { %v12195_v13 = vmul.f32 %v14908_v7, %v14907_v51  ;;  %v3498_v32 = vadd.f32 %v14910_v56, %v14909_v48  ;;  %v3151_v33 = vmul.f32 %v3108_v59, %v14861_v41  ;;  %v3047_v38 = vmul.f32 %v12135_v29, %v11986_v20  ;;  %v14918_v6 = vld [vmem:[#allocation167_spill] sm:$0xff] }
 0x52e   : > { %5578 = vmatmul.f32.gmra.mxu2 %v3064_v47  ;;  %v3096_v42 = vrot.slane %v14896_v23, 6  ;;  %v3154_v22 = vmul.f32 %v3110_v25, %v11913_v61  ;;  %v3204_v46 = vrot.slane %v14911_v58, 2  ;;  %v3513_v60 = vadd.f32 %v14913_v52, %v14912_v8 }
 0x52f   : > { %v3049_v9 = vmul.f32 %v12138_v49, %v11990_v15  ;;  %v3186_v4 = vadd.f32 %v3185_v24, %v3151_v33  ;;  %v3278_v59 = vadd.f32 %v14915_v17, %v14914_v31  ;;  %v3078_v34 = vadd.f32 %v3077_v19, %v3047_v38  ;;  %v14921_v33 = vld [vmem:[#allocation172_spill] sm:$0xff] }
 0x530   : > { %v3097_v63 = vrot.slane %v14896_v23, 7  ;;  %v3111_v29 = vperm.slane %v3095_v37, 0  ;;  %v3173_v11 = vadd.f32 %v3172_v57, %v3154_v22  ;;  %v3153_v21 = vmul.f32 %v3109_v54, %v14862_v36  ;;  %v14920_v57 = vld [vmem:[#allocation166_spill] sm:$0xff] }
 0x531   : > { %v14916_v55 = vrot.slane %v14911_v58, 1  ;;  %v3256_v47 = vmul.f32 %v14917_v35, %v11863_v18  ;;  %v3279_v51 = vadd.f32 %v3278_v59, %v14918_v6  ;;  %v3112_v49 = vperm.slane %v3096_v42, 0 }
 0x532   : > { %v3156_v24 = vmul.f32 %v3111_v29, %v11925_v53  ;;  %v3205_v48 = vrot.slane %v14911_v58, 3  ;;  %v3220_v19 = vperm.slane %v3204_v46, 0  ;;  %v3187_v56 = vadd.f32 %v3186_v4, %v3153_v21  ;;  %v14922_v4 = vld [vmem:[#allocation168_spill] sm:$0xff] }
 0x533   : > { %v3219_v44 = vperm.slane %v14916_v55, 0  ;;  %v14919_v23 = vperm.slane %v14911_v58, 0  ;;  %v3280_v54 = vadd.f32 %v3279_v51, %v3256_v47  ;;  %v3293_v38 = vadd.f32 %v14921_v33, %v14920_v57 }
 0x534   : > { %v3079_v22 = vadd.f32 %v3078_v34, %v3049_v9  ;;  %v3174_v8 = vadd.f32 %v3173_v11, %v3156_v24  ;;  %v3155_v52 = vmul.f32 %v3110_v25, %v14863_v10  ;;  %v3206_v42 = vrot.slane %v14911_v58, 4  ;;  %v14924_v24 = vld [vmem:[#allocation137_spill] sm:$0xff] }
 0x535   : > { %v3258_v37 = vmul.f32 %v14919_v23, %v11869_v1  ;;  %v3260_v31 = vmul.f32 %v3219_v44, %v11878_v45  ;;  %v3257_v46 = vmul.f32 %v14917_v35, %v11969_v3  ;;  %v3294_v59 = vadd.f32 %v3293_v38, %v14922_v4 }
 0x536   : > { %v3499_v21 = vadd.f32 %v3498_v32, %v3470_v50  ;;  %5581 = vmatmul.f32.gmra.mxu2 %v3079_v22  ;;  %v3158_v55 = vmul.f32 %v3112_v49, %v11942_v2  ;;  %v3221_v47 = vperm.slane %v3205_v48, 0  ;;  %v3262_v9 = vmul.f32 %v3220_v19, %v11890_v43 }
 0x537   : > { %v3281_v17 = vadd.f32 %v3280_v54, %v3258_v37  ;;  %v3188_v34 = vadd.f32 %v3187_v56, %v3155_v52  ;;  %v14923_v25 = vmov %v14919_v23  ;;  %v3295_v51 = vadd.f32 %v3294_v59, %v3257_v46  ;;  %v14926_v46 = vld [vmem:[#allocation115_spill] sm:$0xff] }
 0x538   : > { %v3259_v6 = vmul.f32 %v14923_v25, %v14858_v14  ;;  %v12238_v23 = vmul.f32 %v14908_v7, %v14924_v24  ;;  %v3113_v35 = vperm.slane %v3097_v63, 0  ;;  %v3175_v37 = vadd.f32 %v3174_v8, %v3158_v55 }
 0x539   : > { %v3282_v11 = vadd.f32 %v3281_v17, %v3260_v31  ;;  %v3157_v50 = vmul.f32 %v3111_v29, %v14864_v16  ;;  %v3207_v32 = vrot.slane %v14911_v58, 5  ;;  %v3222_v48 = vperm.slane %v3206_v42, 0  ;;  %v14925_v42 = vld [vmem:[#allocation88_spill] sm:$0xff] }
 0x53a   : > { %v3296_v57 = vadd.f32 %v3295_v51, %v3259_v6  ;;  %v3514_v56 = vadd.f32 %v3513_v60, %v3471_v39  ;;  %v3160_v33 = vmul.f32 %v3113_v35, %v11953_v30  ;;  %v3264_v38 = vmul.f32 %v3221_v47, %v11901_v27  ;;  %v5543_v6 = vld [vmem:[%s13652_s1 + $0xf8] sm:$0xff]  ;;  %v5542_v51 = vld [vmem:[%s13652_s1 + $0xf0] sm:$0xff] }
 0x53b   : > { %v3283_v54 = vadd.f32 %v3282_v11, %v3262_v9  ;;  %v3261_v22 = vmul.f32 %v3219_v44, %v14860_v5  ;;  %v3500_v52 = vadd.f32 %v3499_v21, %v12186_v26  ;;  %v3159_v7 = vmul.f32 %v3112_v49, %v11986_v20  ;;  %v14927_v26 = vld [vmem:[#allocation95_spill] sm:$0xff]  ;;  %v14929_v9 = vld [vmem:[#allocation105_spill] sm:$0xff]  ;;  %5609 = vmatpush.msrb.mxu2 %v5543_v6 }
 0x53c   : > { %v3189_v63 = vadd.f32 %v3188_v34, %v3157_v50  ;;  %v3208_v8 = vrot.slane %v14911_v58, 6  ;;  %v3176_v29 = vadd.f32 %v3175_v37, %v3160_v33  ;;  %v3390_v4 = vadd.f32 %v14926_v46, %v14925_v42  ;;  %v14930_v11 = vld [vmem:[#allocation13_spill] sm:$0xff]  ;;  %v14931_v37 = vld [vmem:[#allocation60_spill] sm:$0xff] }
 0x53d   : > { %v3284_v31 = vadd.f32 %v3283_v54, %v3264_v38  ;;  %v3297_v17 = vadd.f32 %v3296_v57, %v3261_v22  ;;  %v3161_v39 = vmul.f32 %v3113_v35, %v11990_v15  ;;  %v12251_v60 = vperm.slane %v3207_v32, 0  ;;  %v14932_v50 = vld [vmem:[#allocation124_spill] sm:$0xff]  ;;  %5610 = vmatpush.msrb.mxu2 %v5542_v51 }
 0x53e   : > { %v3266_v59 = vmul.f32 %v3222_v48, %v11913_v61  ;;  %v3263_v44 = vmul.f32 %v3220_v19, %v14861_v41  ;;  %5584 = vmatmul.f32.gmra.mxu2 %v3176_v29  ;;  %v3316_v49 = vrot.slane %v14927_v26, 2  ;;  %v14928_v21 = vrot.slane %v14927_v26, 1  ;;  %v5541_v29 = vld [vmem:[%s13652_s1 + $0xe8] sm:$0xff] }
 0x53f   : > { %v3368_v34 = vmul.f32 %v14929_v9, %v11863_v18  ;;  %v3391_v25 = vadd.f32 %v3390_v4, %v14930_v11  ;;  %v3190_v19 = vadd.f32 %v3189_v63, %v3159_v7  ;;  %v3209_v24 = vrot.slane %v14911_v58, 7  ;;  %5611 = vmatpush.msrb.mxu2 %v5541_v29 }
 0x540   : > { %v3331_v55 = vperm.slane %v14928_v21, 0  ;;  %v3224_v35 = vperm.slane %v3208_v8, 0  ;;  %v3405_v32 = vadd.f32 %v14932_v50, %v14931_v37  ;;  %v3285_v54 = vadd.f32 %v3284_v31, %v3266_v59  ;;  %v14934_v8 = vld [vmem:[#allocation75_spill] sm:$0xff]  ;;  %v5540_v59 = vld [vmem:[%s13652_s1 + $0xe0] sm:$0xff]  ;;  %v12293_v37 = vpop.f32.mrf.mxu3 }
 0x541   : > { %v3298_v57 = vadd.f32 %v3297_v17, %v3263_v44  ;;  %v14933_v33 = vperm.slane %v14927_v26, 0  ;;  %v3392_v22 = vadd.f32 %v3391_v25, %v3368_v34  ;;  %v3268_v7 = vmul.f32 %v12251_v60, %v11925_v53  ;;  %v14935_v44 = vld [vmem:[#allocation110_spill] sm:$0xff]  ;;  %5612 = vmatpush.msrb.mxu2 %v5540_v59 }
 0x542   : > { %v3265_v58 = vmul.f32 %v3221_v47, %v14862_v36  ;;  %v3369_v63 = vmul.f32 %v14929_v9, %v11969_v3  ;;  %v3406_v31 = vadd.f32 %v3405_v32, %v14934_v8  ;;  %v3317_v17 = vrot.slane %v14927_v26, 3 }
 0x543   : > { %v3370_v38 = vmul.f32 %v14933_v33, %v11869_v1  ;;  %v3332_v42 = vperm.slane %v3316_v49, 0  ;;  %v3372_v46 = vmul.f32 %v3331_v55, %v11878_v45  ;;  %v3476_v21 = vmul.f32 %v14935_v44, %v11605_v12 }
 0x544   : > { %v3477_v47 = vmul.f32 %v14935_v44, %v11577_v28  ;;  %v3515_v9 = vadd.f32 %v3514_v56, %v12191_v62  ;;  %v3407_v34 = vadd.f32 %v3406_v31, %v3369_v63  ;;  %v3191_v11 = vadd.f32 %v3190_v19, %v3161_v39 }
 0x545   : > { %v3393_v4 = vadd.f32 %v3392_v22, %v3370_v38  ;;  %v3286_v25 = vadd.f32 %v3285_v54, %v3268_v7  ;;  %v3299_v49 = vadd.f32 %v3298_v57, %v3265_v58  ;;  %v3501_v51 = vadd.f32 %v3500_v52, %v12195_v13  ;;  %v5539_v13 = vld [vmem:[%s13652_s1 + $0xd8] sm:$0xff]  ;;  %v5538_v52 = vld [vmem:[%s13652_s1 + $0xd0] sm:$0xff]  ;;  %v5537_v58 = vld [vmem:[%s13652_s1 + $0xc8] sm:$0xff] }
 0x546   : > { %v12295_v50 = vperm.slane %v3209_v24, 0  ;;  %v3270_v32 = vmul.f32 %v3224_v35, %v11942_v2  ;;  %v14936_v28 = vmov %v14933_v33  ;;  %5587 = vmatmul.f32.gmra.mxu2 %v3191_v11  ;;  %v3267_v62 = vmul.f32 %v3222_v48, %v14863_v10  ;;  %v14937_v24 = vld [vmem:[#allocation128_spill] sm:$0xff] }
 0x547   : > { %v3394_v6 = vadd.f32 %v3393_v4, %v3372_v46  ;;  %v3371_v12 = vmul.f32 %v14936_v28, %v14858_v14  ;;  %v3318_v56 = vrot.slane %v14927_v26, 4  ;;  %v3333_v39 = vperm.slane %v3317_v17, 0  ;;  %5613 = vmatpush.msrb.mxu2 %v5539_v13  ;;  %v5536_v4 = vld [vmem:[%s13652_s1 + $0xc0] sm:$0xff] }
 0x548   : > { %v3374_v19 = vmul.f32 %v3332_v42, %v11890_v43  ;;  %v3478_v54 = vmul.f32 %v14937_v24, %v11609_v40  ;;  %v3479_v57 = vmul.f32 %v14937_v24, %v11584_v0  ;;  %v3516_v48 = vadd.f32 %v3515_v9, %v12238_v23 }
 0x549   : > { %v3408_v33 = vadd.f32 %v3407_v34, %v3371_v12  ;;  %v3427_v38 = vrot.slane %v12293_v37, 1  ;;  %v3287_v22 = vadd.f32 %v3286_v25, %v3270_v32  ;;  %v3300_v29 = vadd.f32 %v3299_v49, %v3267_v62  ;;  %5614 = vmatpush.msrb.mxu2 %v5538_v52  ;;  %v5535_v62 = vld [vmem:[%s13652_s1 + $0xb8] sm:$0xff] }
 0x54a   : > { %v3395_v7 = vadd.f32 %v3394_v6, %v3374_v19  ;;  %v3442_v63 = vperm.slane %v12293_v37, 0  ;;  %v3319_v40 = vrot.slane %v14927_v26, 5  ;;  %v3373_v8 = vmul.f32 %v3331_v55, %v14860_v5  ;;  %v14938_v55 = vld [vmem:[#allocation125_spill] sm:$0xff] }
 0x54b   : > { %v3502_v0 = vadd.f32 %v3501_v51, %v3476_v21  ;;  %v3272_v23 = vmul.f32 %v12295_v50, %v11953_v30  ;;  %v3269_v31 = vmul.f32 %v12251_v60, %v14864_v16  ;;  %v3334_v17 = vperm.slane %v3318_v56, 0  ;;  %5615 = vmatpush.msrb.mxu2 %v5537_v58  ;;  %v14939_v56 = vld [vmem:[#allocation174_spill] sm:$0xff] }
 0x54c   : > { %v3376_v46 = vmul.f32 %v3333_v39, %v11901_v27  ;;  %v3271_v59 = vmul.f32 %v3224_v35, %v11986_v20  ;;  %v3409_v44 = vadd.f32 %v3408_v33, %v3373_v8  ;;  %v3480_v21 = vmul.f32 %v14938_v55, %v11863_v18 }
 0x54d   : > { %v3503_v9 = vadd.f32 %v3502_v0, %v3478_v54  ;;  %v3288_v34 = vadd.f32 %v3287_v22, %v3272_v23  ;;  %v3301_v11 = vadd.f32 %v3300_v29, %v3269_v31  ;;  %v3320_v25 = vrot.slane %v14927_v26, 6  ;;  %5616 = vmatpush.msrb.mxu2 %v5536_v4  ;;  %v14941_v22 = vld [vmem:[#allocation176_spill] sm:$0xff]  ;;  %v14942_v29 = vld [vmem:[#allocation182_spill] sm:$0xff]  ;;  %v5532_v31 = vld [vmem:[%s13652_s1 + $0xa0] sm:$0xff] }
 0x54e   : > { %v3396_v60 = vadd.f32 %v3395_v7, %v3376_v46  ;;  %v12334_v49 = vperm.slane %v3319_v40, 0  ;;  %v3375_v6 = vmul.f32 %v3332_v42, %v14861_v41  ;;  %v3517_v32 = vadd.f32 %v3516_v48, %v3477_v47  ;;  %v5534_v42 = vld [vmem:[%s13652_s1 + $0xb0] sm:$0xff]  ;;  %v14943_v46 = vld [vmem:[#allocation177_spill] sm:$0xff] }
 0x54f   : > { %v3504_v51 = vadd.f32 %v3503_v9, %v3480_v21  ;;  %5590 = vmatmul.f32.gmra.mxu2 %v3288_v34  ;;  %v3378_v35 = vmul.f32 %v3334_v17, %v11913_v61  ;;  %v3428_v28 = vrot.slane %v12293_v37, 2  ;;  %v3443_v12 = vperm.slane %v3427_v38, 0  ;;  %v14940_v47 = vld [vmem:[#allocation175_spill] sm:$0xff]  ;;  %v5533_v38 = vld [vmem:[%s13652_s1 + $0xa8] sm:$0xff] }
 0x550   : > { %v3482_v18 = vmul.f32 %v3442_v63, %v11869_v1  ;;  %v5351_v19 = vadd.f32 %v14940_v47, %v14939_v56  ;;  %v3321_v13 = vrot.slane %v14927_v26, 7  ;;  %v3410_v52 = vadd.f32 %v3409_v44, %v3375_v6  ;;  %5617 = vmatpush.msrb.mxu2 %v5535_v62  ;;  %v14949_v56 = vld [vmem:[#allocation179_spill] sm:$0xff] }
 0x551   : > { %v3518_v24 = vadd.f32 %v3517_v32, %v3479_v57  ;;  %v3302_v54 = vadd.f32 %v3301_v11, %v3271_v59  ;;  %v12351_v48 = vperm.slane %v3320_v25, 0  ;;  %v3397_v1 = vadd.f32 %v3396_v60, %v3378_v35  ;;  %v5530_v32 = vld [vmem:[%s13652_s1 + $0x90] sm:$0xff]  ;;  %v14944_v35 = vld [vmem:[#allocation37_spill] sm:$0xff] }
 0x552   : > { %v3505_v33 = vadd.f32 %v3504_v51, %v3482_v18  ;;  %v5337_v7 = vadd.f32 %v14942_v29, %v14941_v22  ;;  %v3273_v58 = vmul.f32 %v12295_v50, %v11990_v15  ;;  %v3377_v26 = vmul.f32 %v3333_v39, %v14862_v36  ;;  %5618 = vmatpush.msrb.mxu2 %v5534_v42 }
 0x553   : > { %v3481_v57 = vmul.f32 %v14938_v55, %v11969_v3  ;;  %v3380_v40 = vmul.f32 %v12334_v49, %v11925_v53  ;;  %v3429_v8 = vrot.slane %v12293_v37, 3  ;;  %v3444_v0 = vperm.slane %v3428_v28, 0  ;;  %v14945_v28 = vld [vmem:[#allocation170_spill] sm:$0xff] }
 0x554   : > { %v3484_v23 = vmul.f32 %v3443_v12, %v11878_v45  ;;  %v5352_v50 = vadd.f32 %v5351_v19, %v14943_v46  ;;  %v3337_v4 = vperm.slane %v3321_v13, 0  ;;  %v3411_v39 = vadd.f32 %v3410_v52, %v3377_v26  ;;  %5619 = vmatpush.msrb.mxu2 %v5533_v38  ;;  %v5529_v52 = vld [vmem:[%s13652_s1 + $0x88] sm:$0xff] }
 0x555   : > { %v3519_v59 = vadd.f32 %v3518_v24, %v3481_v57  ;;  %v3303_v44 = vadd.f32 %v3302_v54, %v3273_v58  ;;  %v3382_v3 = vmul.f32 %v12351_v48, %v11942_v2  ;;  %v3398_v55 = vadd.f32 %v3397_v1, %v3380_v40  ;;  %v5528_v58 = vld [vmem:[%s13652_s1 + $0x80] sm:$0xff]  ;;  %v14950_v26 = vld [vmem:[#allocation38_spill] sm:$0xff]  ;;  %v14951_v57 = vld [vmem:[#allocation171_spill] sm:$0xff] }
 0x556   : > { %v3506_v21 = vadd.f32 %v3505_v33, %v3484_v23  ;;  %v3379_v9 = vmul.f32 %v3334_v17, %v14863_v10  ;;  %v3430_v45 = vrot.slane %v12293_v37, 4  ;;  %v3431_v34 = vrot.slane %v12293_v37, 5  ;;  %5620 = vmatpush.msrb.mxu2 %v5532_v31  ;;  %v5531_v17 = vld [vmem:[%s13652_s1 + $0x98] sm:$0xff] }
 0x557   : > { %v3483_v11 = vmul.f32 %v3442_v63, %v14858_v14  ;;  %5593 = vmatmul.f32.gmra.mxu2 %v3303_v44  ;;  %v3432_v25 = vrot.slane %v12293_v37, 6  ;;  %v3433_v60 = vrot.slane %v12293_v37, 7  ;;  %v3445_v6 = vperm.slane %v3429_v8, 0  ;;  %v14946_v14 = vld [vmem:[#allocation122_spill] sm:$0xff]  ;;  %v14953_v31 = vld [vmem:[#allocation64_spill] sm:$0xff]  ;;  %v14957_v44 = vld [vmem:[#allocation181_spill] sm:$0xff] }
 0x558   : > { %v3486_v51 = vmul.f32 %v3444_v0, %v11890_v43  ;;  %v12390_v18 = vmul.f32 %v14945_v28, %v14944_v35  ;;  %v12394_v63 = vmul.f32 %v14945_v28, %v14946_v14  ;;  %v3412_v37 = vadd.f32 %v3411_v39, %v3379_v9  ;;  %5621 = vmatpush.msrb.mxu2 %v5531_v17  ;;  %v14948_v43 = vld [vmem:[#allocation178_spill] sm:$0xff]  ;;  %v14959_v17 = vld [vmem:[#allocation33_spill] sm:$0xff] }
 0x559   : > { %v3520_v62 = vadd.f32 %v3519_v59, %v3483_v11  ;;  %v5338_v42 = vadd.f32 %v5337_v7, %v14948_v43  ;;  %v5353_v47 = vadd.f32 %v5352_v50, %v14949_v56  ;;  %v3399_v19 = vadd.f32 %v3398_v55, %v3382_v3  ;;  %v14956_v50 = vld [vmem:[#allocation180_spill] sm:$0xff]  ;;  %v14960_v28 = vld [vmem:[#allocation106_spill] sm:$0xff] }
 0x55a   : > { %14947 = vst [vmem:[#allocation94_spill] sm:$0xff] %v12394_v63  ;;  %v3507_v13 = vadd.f32 %v3506_v21, %v3486_v51  ;;  %v3384_v24 = vmul.f32 %v3337_v4, %v11953_v30  ;;  %v3381_v54 = vmul.f32 %v12334_v49, %v14864_v16  ;;  %v3446_v1 = vperm.slane %v3430_v45, 0  ;;  %5622 = vmatpush.msrb.mxu2 %v5530_v32  ;;  %v14952_v49 = vld [vmem:[#allocation91_spill] sm:$0xff] }
 0x55b   : > { %v3485_v33 = vmul.f32 %v3443_v12, %v14860_v5  ;;  %v3447_v38 = vperm.slane %v3431_v34, 0  ;;  %v3448_v22 = vperm.slane %v3432_v25, 0  ;;  %v3449_v29 = vperm.slane %v3433_v60, 0  ;;  %v14954_v12 = vld [vmem:[#allocation133_spill] sm:$0xff] }
 0x55c   : > { %v3488_v7 = vmul.f32 %v3445_v6, %v11901_v27  ;;  %v12411_v40 = vmul.f32 %v14951_v57, %v14950_v26  ;;  %v3413_v8 = vadd.f32 %v3412_v37, %v3381_v54  ;;  %5623 = vmatpush.msrb.mxu2 %v5529_v52  ;;  %v4670_v5 = vadd.f32 %v14953_v31, %v14952_v49  ;;  %v14965_v54 = vld [vmem:[#allocation8_spill] sm:$0xff]  ;;  %v14971_v31 = vld [vmem:[#allocation47_spill] sm:$0xff] }
 0x55d   : > { %v3521_v23 = vadd.f32 %v3520_v62, %v3485_v33  ;;  %v12417_v46 = vmul.f32 %v14951_v57, %v14954_v12  ;;  %v12420_v27 = vadd.f32 %v5338_v42, %v14956_v50  ;;  %v3400_v39 = vadd.f32 %v3399_v19, %v3384_v24  ;;  %v14962_v62 = vld [vmem:[#allocation85_spill] sm:$0xff]  ;;  %v14969_v57 = vld [vmem:[#allocation66_spill] sm:$0xff] }
 0x55e   : > { %v3508_v59 = vadd.f32 %v3507_v13, %v3488_v7  ;;  %v12423_v3 = vadd.f32 %v5353_v47, %v14957_v44  ;;  %v3383_v55 = vmul.f32 %v12351_v48, %v11986_v20  ;;  %v3385_v21 = vmul.f32 %v3337_v4, %v11990_v15  ;;  %5624 = vmatpush.msrb.mxu2 %v5528_v58 }
 0x55f   : > { %14955 = vst [vmem:[#allocation35_spill] sm:$0xff] %v12417_v46  ;;  %v3487_v9 = vmul.f32 %v3444_v0, %v14861_v41  ;;  %5596 = vmatmul.f32.gmra.mxu2 %v3400_v39  ;;  %v3490_v45 = vmul.f32 %v3446_v1, %v11913_v61  ;;  %v3492_v34 = vmul.f32 %v3447_v38, %v11925_v53  ;;  %v4595_v32 = vrot.slane %v14959_v17, 3  ;;  %v14972_v39 = vld [vmem:[#allocation15_spill] sm:$0xff] }
 0x560   : > { %14958 = vst [vmem:[#allocation52_spill] sm:$0xff] %v12423_v3  ;;  %v3494_v11 = vmul.f32 %v3448_v22, %v11942_v2  ;;  %v3496_v25 = vmul.f32 %v3449_v29, %v11953_v30  ;;  %v3414_v60 = vadd.f32 %v3413_v8, %v3383_v55  ;;  %v4671_v48 = vadd.f32 %v4670_v5, %v14960_v28  ;;  %v14961_v30 = vld [vmem:[#allocation58_spill] sm:$0xff] }
 0x561   : > { %v3522_v51 = vadd.f32 %v3521_v23, %v3487_v9  ;;  %v3509_v37 = vadd.f32 %v3508_v59, %v3490_v45  ;;  %v3489_v4 = vmul.f32 %v3445_v6, %v14862_v36  ;;  %v3491_v41 = vmul.f32 %v3446_v1, %v14863_v10  ;;  %v14963_v6 = vld [vmem:[#allocation90_spill] sm:$0xff]  ;;  %v14964_v10 = vld [vmem:[#allocation92_spill] sm:$0xff]  ;;  %v14966_v1 = vld [vmem:[#allocation21_spill] sm:$0xff] }
 0x562   : > { %v3493_v0 = vmul.f32 %v3447_v38, %v14864_v16  ;;  %v4596_v61 = vrot.slane %v14959_v17, 4  ;;  %v4597_v53 = vrot.slane %v14959_v17, 5  ;;  %v4598_v2 = vrot.slane %v14959_v17, 6  ;;  %v14967_v38 = vld [vmem:[#allocation46_spill] sm:$0xff]  ;;  %v14974_v45 = vld [vmem:[#allocation117_spill] sm:$0xff] }
 0x563   : > { %v4650_v43 = vmul.f32 %v14962_v62, %v14961_v30  ;;  %v3495_v42 = vmul.f32 %v3448_v22, %v11986_v20  ;;  %v12445_v56 = vmul.f32 %v3449_v29, %v11990_v15  ;;  %v4599_v36 = vrot.slane %v14959_v17, 7  ;;  %v14968_v22 = vld [vmem:[#allocation10_spill] sm:$0xff] }
 0x564   : > { %v4681_v47 = vadd.f32 %v14964_v10, %v14963_v6  ;;  %v3415_v16 = vadd.f32 %v3414_v60, %v3385_v21  ;;  %v3523_v19 = vadd.f32 %v3522_v51, %v3489_v4  ;;  %v4611_v13 = vperm.slane %v4595_v32, 0  ;;  %v14970_v8 = vld [vmem:[#allocation86_spill] sm:$0xff]  ;;  %v14973_v21 = vld [vmem:[#allocation65_spill] sm:$0xff]  ;;  %v14976_v32 = vld [vmem:[#allocation12_spill] sm:$0xff] }
 0x565   : > { %v4672_v52 = vadd.f32 %v4671_v48, %v4650_v43  ;;  %v3510_v24 = vadd.f32 %v3509_v37, %v3492_v34  ;;  %v12452_v33 = vmul.f32 %v14966_v1, %v14965_v54  ;;  %v4643_v20 = vmul.f32 %v14967_v38, %v14946_v14  ;;  %v14975_v34 = vld [vmem:[#allocation112_spill] sm:$0xff]  ;;  %v14977_v4 = vld [vmem:[#allocation6_spill] sm:$0xff]  ;;  %v14979_v43 = vld [vmem:[#allocation51_spill] sm:$0xff] }
 0x566   : > { %v4682_v15 = vadd.f32 %v4681_v47, %v14968_v22  ;;  %v12457_v29 = vperm.slane %v4596_v61, 0  ;;  %v12459_v7 = vperm.slane %v4597_v53, 0  ;;  %v12461_v58 = vperm.slane %v4598_v2, 0  ;;  %v14978_v2 = vld [vmem:[#allocation96_spill] sm:$0xff]  ;;  %v14980_v6 = vld [vmem:[#allocation55_spill] sm:$0xff]  ;;  %v14982_v54 = vld [vmem:[#allocation89_spill] sm:$0xff] }
 0x567   : > { %v4652_v23 = vmul.f32 %v14970_v8, %v14969_v57  ;;  %5599 = vmatmul.f32.gmra.mxu2 %v3415_v16  ;;  %v12465_v49 = vperm.slane %v4599_v36, 0  ;;  %v4645_v5 = vmul.f32 %v14971_v31, %v14954_v12  ;;  %v4704_v59 = vrot.slane %v14972_v39, 7 }
 0x568   : > { %v4683_v50 = vadd.f32 %v4682_v15, %v4643_v20  ;;  %v3524_v44 = vadd.f32 %v3523_v19, %v3491_v41  ;;  %v4705_v9 = vrot.slane %v14973_v21, 1  ;;  %v4778_v60 = vadd.f32 %v14975_v34, %v14974_v45  ;;  %v14983_v15 = vld [vmem:[#allocation59_spill] sm:$0xff] }
 0x569   : > { %v4673_v55 = vadd.f32 %v4672_v52, %v4652_v23  ;;  %v3511_v51 = vadd.f32 %v3510_v24, %v3494_v11  ;;  %v4647_v28 = vmul.f32 %v14976_v32, %v12452_v33  ;;  %v4706_v37 = vrot.slane %v14973_v21, 2 }
 0x56a   : > { %v4684_v48 = vadd.f32 %v4683_v50, %v4645_v5  ;;  %v4654_v61 = vmul.f32 %v4611_v13, %v14977_v4  ;;  %v4707_v53 = vrot.slane %v14973_v21, 3  ;;  %v4754_v41 = vmul.f32 %v14978_v2, %v14944_v35  ;;  %v14984_v5 = vld [vmem:[#allocation56_spill] sm:$0xff]  ;;  %v14985_v50 = vld [vmem:[#allocation146_spill] sm:$0xff] }
 0x56b   : > { %v4779_v36 = vadd.f32 %v4778_v60, %v14979_v43  ;;  %v14981_v10 = vperm.slane %v14959_v17, 0  ;;  %v4708_v16 = vrot.slane %v14973_v21, 4  ;;  %v4719_v19 = vperm.slane %v4704_v59, 0  ;;  %v14986_v17 = vld [vmem:[#allocation78_spill] sm:$0xff]  ;;  %v14987_v59 = vld [vmem:[#allocation39_spill] sm:$0xff] }
 0x56c   : > { %v4685_v11 = vadd.f32 %v4684_v48, %v4647_v28  ;;  %v3525_v52 = vadd.f32 %v3524_v44, %v3493_v0  ;;  %v4674_v24 = vadd.f32 %v4673_v55, %v4654_v61  ;;  %v4756_v38 = vmul.f32 %v14982_v54, %v14950_v26  ;;  %v14988_v55 = vld [vmem:[#allocation5_spill] sm:$0xff]  ;;  %v14990_v61 = vld [vmem:[#allocation54_spill] sm:$0xff] }
 0x56d   : > { %v4649_v47 = vmul.f32 %v14981_v10, %v14980_v6  ;;  %v4780_v20 = vadd.f32 %v4779_v36, %v4754_v41  ;;  %v3512_v22 = vadd.f32 %v3511_v51, %v3496_v25  ;;  %v4651_v23 = vmul.f32 %v14962_v62, %v14983_v15  ;;  %v14989_v51 = vld [vmem:[#allocation120_spill] sm:$0xff] }
 0x56e   : > { %v4793_v39 = vadd.f32 %v14985_v50, %v14984_v5  ;;  %v4656_v45 = vmul.f32 %v12457_v29, %v14986_v17  ;;  %v4720_v34 = vperm.slane %v14973_v21, 0  ;;  %v4758_v0 = vmul.f32 %v4719_v19, %v14987_v59  ;;  %v14994_v5 = vld [vmem:[#allocation76_spill] sm:$0xff] }
 0x56f   : > { %v4686_v31 = vadd.f32 %v4685_v11, %v4649_v47  ;;  %v4781_v44 = vadd.f32 %v4780_v20, %v4756_v38  ;;  %5602 = vmatmul.f32.gmra.mxu2 %v3512_v22  ;;  %v4653_v60 = vmul.f32 %v14970_v8, %v14988_v55  ;;  %v4755_v62 = vmul.f32 %v14978_v2, %v14946_v14  ;;  %v14991_v38 = vld [vmem:[#allocation63_spill] sm:$0xff]  ;;  %v14992_v20 = vld [vmem:[#allocation77_spill] sm:$0xff] }
 0x570   : > { %v4794_v32 = vadd.f32 %v4793_v39, %v14989_v51  ;;  %v3526_v28 = vadd.f32 %v3525_v52, %v3495_v42  ;;  %v4675_v48 = vadd.f32 %v4674_v24, %v4656_v45  ;;  %v4760_v41 = vmul.f32 %v4720_v34, %v14990_v61  ;;  %v14993_v24 = vld [vmem:[#allocation16_spill] sm:$0xff]  ;;  %v14998_v51 = vld [vmem:[#allocation29_spill] sm:$0xff] }
 0x571   : > { %v4687_v25 = vadd.f32 %v4686_v31, %v4651_v23  ;;  %v4782_v43 = vadd.f32 %v4781_v44, %v4758_v0  ;;  %v4721_v10 = vperm.slane %v4705_v9, 0  ;;  %v4757_v47 = vmul.f32 %v14982_v54, %v14954_v12  ;;  %v14995_v45 = vld [vmem:[#allocation28_spill] sm:$0xff] }
 0x572   : > { %v4795_v11 = vadd.f32 %v4794_v32, %v4755_v62  ;;  %v4658_v8 = vmul.f32 %v12459_v7, %v14991_v38  ;;  %v4655_v22 = vmul.f32 %v4611_v13, %v14992_v20  ;;  %v4722_v23 = vperm.slane %v4706_v37, 0  ;;  %v14996_v13 = vld [vmem:[#allocation136_spill] sm:$0xff]  ;;  %v14999_v32 = vld [vmem:[#allocation61_spill] sm:$0xff] }
 0x573   : > { %v4688_v36 = vadd.f32 %v4687_v25, %v4653_v60  ;;  %v4783_v2 = vadd.f32 %v4782_v43, %v4760_v41  ;;  %v4762_v31 = vmul.f32 %v4721_v10, %v14961_v30  ;;  %v4759_v42 = vmul.f32 %v4719_v19, %v12452_v33  ;;  %v14997_v25 = vld [vmem:[#allocation121_spill] sm:$0xff] }
 0x574   : > { %v4796_v52 = vadd.f32 %v4795_v11, %v4757_v47  ;;  %v4890_v50 = vadd.f32 %v14994_v5, %v14993_v24  ;;  %v3527_v9 = vadd.f32 %v3526_v28, %v12445_v56  ;;  %v4676_v39 = vadd.f32 %v4675_v48, %v4658_v8  ;;  %v15001_v24 = vld [vmem:[#allocation18_spill] sm:$0xff]  ;;  %v15002_v5 = vld [vmem:[#allocation129_spill] sm:$0xff] }
 0x575   : > { %v4689_v54 = vadd.f32 %v4688_v36, %v4655_v22  ;;  %v4816_v0 = vrot.slane %v14995_v45, 7  ;;  %v4784_v44 = vadd.f32 %v4783_v2, %v4762_v31  ;;  %v4866_v37 = vmul.f32 %v14996_v13, %v14944_v35  ;;  %v15000_v36 = vld [vmem:[#allocation118_spill] sm:$0xff]  ;;  %v15003_v45 = vld [vmem:[#allocation79_spill] sm:$0xff] }
 0x576   : > { %v4797_v60 = vadd.f32 %v4796_v52, %v4759_v42  ;;  %v4891_v62 = vadd.f32 %v4890_v50, %v14997_v25  ;;  %v4660_v19 = vmul.f32 %v12461_v58, %v14998_v51  ;;  %v4657_v41 = vmul.f32 %v12457_v29, %v14999_v32  ;;  %v15004_v25 = vld [vmem:[#allocation68_spill] sm:$0xff] }
 0x577   : > { %v4709_v43 = vrot.slane %v14973_v21, 5  ;;  %v4710_v56 = vrot.slane %v14973_v21, 6  ;;  %5605 = vmatmul.f32.gmra.mxu2 %v3527_v9  ;;  %v4764_v28 = vmul.f32 %v4722_v23, %v14969_v57  ;;  %v4761_v48 = vmul.f32 %v4720_v34, %v14980_v6 }
 0x578   : > { %v4868_v47 = vmul.f32 %v15000_v36, %v14950_v26  ;;  %v4892_v11 = vadd.f32 %v4891_v62, %v4866_v37  ;;  %v4677_v8 = vadd.f32 %v4676_v39, %v4660_v19  ;;  %v4690_v22 = vadd.f32 %v4689_v54, %v4657_v41  ;;  %v15006_v37 = vld [vmem:[#allocation17_spill] sm:$0xff] }
 0x579   : > { %v4723_v2 = vperm.slane %v4707_v53, 0  ;;  %v4831_v31 = vperm.slane %v4816_v0, 0  ;;  %v4785_v42 = vadd.f32 %v4784_v44, %v4764_v28  ;;  %v4798_v52 = vadd.f32 %v4797_v60, %v4761_v48  ;;  %v15005_v0 = vld [vmem:[#allocation108_spill] sm:$0xff] }
 0x57a   : > { %v4893_v29 = vadd.f32 %v4892_v11, %v4868_v47  ;;  %v4905_v50 = vadd.f32 %v15002_v5, %v15001_v24  ;;  %v4662_v9 = vmul.f32 %v12465_v49, %v15003_v45  ;;  %v4659_v34 = vmul.f32 %v12459_v7, %v15004_v25  ;;  %v12539_v47 = vpop.f32.mrf.mxu2 }
 0x57b   : > { %v4724_v46 = vperm.slane %v4708_v16, 0  ;;  %v4870_v3 = vmul.f32 %v4831_v31, %v14987_v59  ;;  %v4766_v39 = vmul.f32 %v4723_v2, %v14977_v4  ;;  %v4763_v53 = vmul.f32 %v4721_v10, %v14983_v15  ;;  %15007 = vst [vmem:[#allocation74_spill] sm:$0xff] %v12539_v47 }
 0x57c   : > { %v4867_v54 = vmul.f32 %v14996_v13, %v14946_v14  ;;  %v4906_v44 = vadd.f32 %v4905_v50, %v15005_v0  ;;  %v4678_v60 = vadd.f32 %v4677_v8, %v4662_v9  ;;  %v4817_v62 = vrot.slane %v15006_v37, 1  ;;  %v15008_v8 = vld [vmem:[#allocation147_spill] sm:$0xff] }
 0x57d   : > { %v4832_v19 = vperm.slane %v15006_v37, 0  ;;  %v4894_v41 = vadd.f32 %v4893_v29, %v4870_v3  ;;  %v4691_v28 = vadd.f32 %v4690_v22, %v4659_v34  ;;  %v4786_v7 = vadd.f32 %v4785_v42, %v4766_v39  ;;  %v15009_v3 = vld [vmem:[#allocation30_spill] sm:$0xff] }
 0x57e   : > { %v4799_v16 = vadd.f32 %v4798_v52, %v4763_v53  ;;  %v4907_v48 = vadd.f32 %v4906_v44, %v4867_v54  ;;  %v4711_v11 = vrot.slane %v14973_v21, 7  ;;  %v4725_v10 = vperm.slane %v4709_v43, 0 }
 0x57f   : > { %v4872_v24 = vmul.f32 %v4832_v19, %v14990_v61  ;;  %v4869_v13 = vmul.f32 %v15000_v36, %v14954_v12  ;;  %5625 = vmatmul.f32.vlgmr.msrb.gmra.mxu2 %v4678_v60  ;;  %v12547_v5 = vmul.f32 %v14966_v1, %v15008_v8  ;;  %v4661_v22 = vmul.f32 %v12461_v58, %v15009_v3  ;;  %v15011_v8 = vld [vmem:[#allocation140_spill] sm:$0xff] }
 0x580   : > { %v4768_v42 = vmul.f32 %v4724_v46, %v14986_v17  ;;  %v4765_v52 = vmul.f32 %v4722_v23, %v14988_v55  ;;  %v4818_v21 = vrot.slane %v15006_v37, 2  ;;  %v4833_v43 = vperm.slane %v4817_v62, 0 }
 0x581   : > { %v4895_v29 = vadd.f32 %v4894_v41, %v4872_v24  ;;  %v4908_v50 = vadd.f32 %v4907_v48, %v4869_v13  ;;  %v4692_v9 = vadd.f32 %v4691_v28, %v4661_v22  ;;  %v4726_v34 = vperm.slane %v4710_v56, 0  ;;  %v15010_v24 = vld [vmem:[#allocation20_spill] sm:$0xff] }
 0x582   : > { %v4787_v36 = vadd.f32 %v4786_v7, %v4768_v42  ;;  %v4800_v39 = vadd.f32 %v4799_v16, %v4765_v52  ;;  %v12554_v53 = vperm.slane %v4711_v11, 0  ;;  %v4819_v1 = vrot.slane %v15006_v37, 3 }
 0x583   : > { %v4874_v54 = vmul.f32 %v4833_v43, %v14961_v30  ;;  %v4871_v58 = vmul.f32 %v4831_v31, %v12452_v33  ;;  %v4663_v23 = vmul.f32 %v12465_v49, %v12547_v5  ;;  %v4770_v0 = vmul.f32 %v4725_v10, %v14991_v38 }
 0x584   : > { %v4767_v44 = vmul.f32 %v4723_v2, %v14992_v20  ;;  %v4820_v60 = vrot.slane %v15006_v37, 4  ;;  %v4821_v56 = vrot.slane %v15006_v37, 5  ;;  %v4834_v62 = vperm.slane %v4818_v21, 0  ;;  %v15012_v2 = vld [vmem:[#allocation101_spill] sm:$0xff] }
 0x585   : > { %v4896_v41 = vadd.f32 %v4895_v29, %v4874_v54  ;;  %v4909_v28 = vadd.f32 %v4908_v50, %v4871_v58  ;;  %v4693_v7 = vadd.f32 %v4692_v9, %v4663_v23  ;;  %v4772_v16 = vmul.f32 %v4726_v34, %v14998_v51  ;;  %v15015_v54 = vld [vmem:[#allocation69_spill] sm:$0xff]  ;;  %v12580_v23 = vpop.f32.mrf.mxu1 }
 0x586   : > { %v4788_v48 = vadd.f32 %v4787_v36, %v4770_v0  ;;  %v4801_v11 = vadd.f32 %v4800_v39, %v4767_v44  ;;  %v4876_v31 = vmul.f32 %v4834_v62, %v14969_v57  ;;  %v4873_v49 = vmul.f32 %v4832_v19, %v14980_v6  ;;  %v15014_v19 = vld [vmem:[#allocation119_spill] sm:$0xff]  ;;  %15016 = vst [vmem:[#allocation32_spill] sm:$0xff] %v12580_v23 }
 0x587   : > { %v4928_v13 = vrot.slane %v15010_v24, 7  ;;  %v5002_v22 = vadd.f32 %v15012_v2, %v15011_v8  ;;  %5628 = vmatmul.f32.gmra.mxu2 %v4693_v7  ;;  %v4774_v42 = vmul.f32 %v12554_v53, %v15003_v45  ;;  %v4769_v52 = vmul.f32 %v4724_v46, %v14999_v32  ;;  %v15017_v24 = vld [vmem:[#allocation131_spill] sm:$0xff] }
 0x588   : > { %v4771_v21 = vmul.f32 %v4725_v10, %v15004_v25  ;;  %v4835_v29 = vperm.slane %v4819_v1, 0  ;;  %v12575_v50 = vpop.f32.mrf.mxu2  ;;  %v4897_v9 = vadd.f32 %v4896_v41, %v4876_v31  ;;  %v4910_v36 = vadd.f32 %v4909_v28, %v4873_v49  ;;  %v15018_v49 = vld [vmem:[#allocation148_spill] sm:$0xff] }
 0x589   : > { %15013 = vst [vmem:[#allocation31_spill] sm:$0xff] %v12575_v50  ;;  %v4978_v39 = vmul.f32 %v15014_v19, %v14944_v35  ;;  %v5003_v58 = vadd.f32 %v5002_v22, %v15015_v54  ;;  %v4789_v0 = vadd.f32 %v4788_v48, %v4772_v16  ;;  %v4773_v44 = vmul.f32 %v4726_v34, %v15009_v3  ;;  %v15019_v22 = vld [vmem:[#allocation144_spill] sm:$0xff]  ;;  %v15020_v54 = vld [vmem:[#allocation102_spill] sm:$0xff]  ;;  %v15021_v50 = vld [vmem:[#allocation99_spill] sm:$0xff] }
 0x58a   : > { %v4802_v7 = vadd.f32 %v4801_v11, %v4769_v52  ;;  %v4878_v46 = vmul.f32 %v4835_v29, %v14977_v4  ;;  %v4875_v10 = vmul.f32 %v4833_v43, %v14983_v15  ;;  %v4943_v1 = vperm.slane %v4928_v13, 0 }
 0x58b   : > { %v4980_v41 = vmul.f32 %v15017_v24, %v14950_v26  ;;  %v5004_v28 = vadd.f32 %v5003_v58, %v4978_v39  ;;  %v4836_v31 = vperm.slane %v4820_v60, 0  ;;  %v4929_v8 = vrot.slane %v15018_v49, 1 }
 0x58c   : > { %v4944_v2 = vperm.slane %v15018_v49, 0  ;;  %v5017_v16 = vadd.f32 %v15020_v54, %v15019_v22  ;;  %v4898_v48 = vadd.f32 %v4897_v9, %v4878_v46  ;;  %v4911_v34 = vadd.f32 %v4910_v36, %v4875_v10 }
 0x58d   : > { %v4982_v11 = vmul.f32 %v4943_v1, %v14987_v59  ;;  %v5005_v52 = vadd.f32 %v5004_v28, %v4980_v41  ;;  %v4790_v47 = vadd.f32 %v4789_v0, %v4774_v42  ;;  %v4803_v43 = vadd.f32 %v4802_v7, %v4771_v21  ;;  %v12610_v54 = vpop.f32.mrf.mxu1 }
 0x58e   : > { %v4979_v13 = vmul.f32 %v15014_v19, %v14946_v14  ;;  %v5018_v39 = vadd.f32 %v5017_v16, %v15021_v50  ;;  %v4880_v60 = vmul.f32 %v4836_v31, %v14986_v17  ;;  %v4877_v58 = vmul.f32 %v4834_v62, %v14988_v55 }
 0x58f   : > { %v4930_v26 = vrot.slane %v15018_v49, 2  ;;  %v5006_v63 = vadd.f32 %v5005_v52, %v4982_v11  ;;  %5631 = vmatmul.f32.gmra.mxu2 %v4790_v47  ;;  %v4945_v9 = vperm.slane %v4929_v8, 0  ;;  %v4984_v36 = vmul.f32 %v4944_v2, %v14990_v61 }
 0x590   : > { %v4981_v42 = vmul.f32 %v15017_v24, %v14954_v12  ;;  %v5019_v21 = vadd.f32 %v5018_v39, %v4979_v13  ;;  %v4822_v0 = vrot.slane %v15006_v37, 6  ;;  %v4837_v19 = vperm.slane %v4821_v56, 0  ;;  %v15023_v39 = vld [vmem:[#allocation9_spill] sm:$0xff]  ;;  %v15030_v12 = vld [vmem:[#allocation7_spill] sm:$0xff] }
 0x591   : > { %v4899_v7 = vadd.f32 %v4898_v48, %v4880_v60  ;;  %v4912_v50 = vadd.f32 %v4911_v34, %v4877_v58  ;;  %v4804_v10 = vadd.f32 %v4803_v43, %v4773_v44  ;;  %v5007_v62 = vadd.f32 %v5006_v63, %v4984_v36  ;;  %v12604_v47 = vpop.f32.mrf.mxu2  ;;  %v15024_v60 = vld [vmem:[#allocation149_spill] sm:$0xff] }
 0x592   : > { %v5020_v41 = vadd.f32 %v5019_v21, %v4981_v42  ;;  %15022 = vst [vmem:[#allocation72_spill] sm:$0xff] %v12604_v47  ;;  %v4775_v8 = vmul.f32 %v12554_v53, %v12547_v5  ;;  %v4882_v24 = vmul.f32 %v4837_v19, %v14991_v38  ;;  %v4879_v22 = vmul.f32 %v4835_v29, %v14992_v20 }
 0x593   : > { %v4931_v56 = vrot.slane %v15018_v49, 3  ;;  %v4946_v16 = vperm.slane %v4930_v26, 0  ;;  %v4986_v44 = vmul.f32 %v4945_v9, %v14961_v30  ;;  %v4983_v63 = vmul.f32 %v4943_v1, %v12452_v33 }
 0x594   : > { %v4823_v48 = vrot.slane %v15006_v37, 7  ;;  %v4838_v34 = vperm.slane %v4822_v0, 0  ;;  %v4900_v11 = vadd.f32 %v4899_v7, %v4882_v24  ;;  %v4913_v52 = vadd.f32 %v4912_v50, %v4879_v22 }
 0x595   : > { %v4805_v43 = vadd.f32 %v4804_v10, %v4775_v8  ;;  %v5008_v53 = vadd.f32 %v5007_v62, %v4986_v44  ;;  %v5021_v13 = vadd.f32 %v5020_v41, %v4983_v63  ;;  %v5116_v29 = vadd.f32 %v15024_v60, %v15023_v39 }
 0x596   : > { %v5370_v58 = vrot.slane %v12610_v54, 1  ;;  %v4884_v36 = vmul.f32 %v4838_v34, %v14998_v51  ;;  %v4881_v26 = vmul.f32 %v4836_v31, %v14999_v32  ;;  %v4932_v42 = vrot.slane %v15018_v49, 4  ;;  %v15025_v31 = vld [vmem:[#allocation134_spill] sm:$0xff] }
 0x597   : > { %v5371_v1 = vrot.slane %v12610_v54, 2  ;;  %5634 = vmatmul.f32.gmra.mxu2 %v4805_v43  ;;  %v4947_v37 = vperm.slane %v4931_v56, 0  ;;  %v4988_v21 = vmul.f32 %v4946_v16, %v14969_v57  ;;  %v4985_v0 = vmul.f32 %v4944_v2, %v14980_v6 }
 0x598   : > { %v5372_v7 = vrot.slane %v12610_v54, 3  ;;  %v4839_v50 = vperm.slane %v4823_v48, 0  ;;  %v4901_v10 = vadd.f32 %v4900_v11, %v4884_v36  ;;  %v4914_v62 = vadd.f32 %v4913_v52, %v4881_v26  ;;  %v15027_v52 = vld [vmem:[#allocation100_spill] sm:$0xff] }
 0x599   : > { %v5373_v41 = vrot.slane %v12610_v54, 4  ;;  %v5009_v8 = vadd.f32 %v5008_v53, %v4988_v21  ;;  %v5022_v24 = vadd.f32 %v5021_v13, %v4985_v0  ;;  %v5117_v22 = vadd.f32 %v5116_v29, %v15025_v31  ;;  %v12628_v44 = vpop.f32.mrf.mxu2  ;;  %v15028_v0 = vld [vmem:[#allocation109_spill] sm:$0xff] }
 0x59a   : > { %15026 = vst [vmem:[#allocation73_spill] sm:$0xff] %v12628_v44  ;;  %v4886_v63 = vmul.f32 %v4839_v50, %v15003_v45  ;;  %v4883_v56 = vmul.f32 %v4837_v19, %v15004_v25  ;;  %v4933_v43 = vrot.slane %v15018_v49, 5  ;;  %v4948_v2 = vperm.slane %v4932_v42, 0  ;;  %v15029_v42 = vld [vmem:[#allocation150_spill] sm:$0xff] }
 0x59b   : > { %v5374_v39 = vrot.slane %v12610_v54, 5  ;;  %v4990_v48 = vmul.f32 %v4947_v37, %v14977_v4  ;;  %v4987_v11 = vmul.f32 %v4945_v9, %v14983_v15  ;;  %v5094_v53 = vmul.f32 %v15027_v52, %v14987_v59 }
 0x59c   : > { %v5375_v13 = vrot.slane %v12610_v54, 6  ;;  %v5376_v60 = vrot.slane %v12610_v54, 7  ;;  %v4902_v29 = vadd.f32 %v4901_v10, %v4886_v63  ;;  %v4915_v36 = vadd.f32 %v4914_v62, %v4883_v56 }
 0x59d   : > { %v5010_v26 = vadd.f32 %v5009_v8, %v4990_v48  ;;  %v5023_v19 = vadd.f32 %v5022_v24, %v4987_v11  ;;  %v5118_v21 = vadd.f32 %v5117_v22, %v5094_v53  ;;  %v5131_v31 = vadd.f32 %v15029_v42, %v15028_v0 }
 0x59e   : > { %v4885_v28 = vmul.f32 %v4838_v34, %v15009_v3  ;;  %v4934_v46 = vrot.slane %v15018_v49, 6  ;;  %v4949_v9 = vperm.slane %v4933_v43, 0  ;;  %v4992_v47 = vmul.f32 %v4948_v2, %v14986_v17 }
 0x59f   : > { %5637 = vmatmul.f32.gmra.mxu2 %v4902_v29  ;;  %v4989_v44 = vmul.f32 %v4946_v16, %v14988_v55  ;;  %v5042_v14 = vrot.slane %v15030_v12, 2  ;;  %v15031_v10 = vrot.slane %v15030_v12, 1  ;;  %v15032_v8 = vperm.slane %v15030_v12, 0  ;;  %v15033_v16 = vld [vmem:[#allocation141_spill] sm:$0xff] }
 0x5a0   : > { %v5384_v22 = vperm.slane %v12610_v54, 0  ;;  %v12653_v34 = vperm.slane %v5370_v58, 0  ;;  %v4887_v63 = vmul.f32 %v4839_v50, %v12547_v5  ;;  %v4916_v56 = vadd.f32 %v4915_v36, %v4885_v28 }
 0x5a1   : > { %v5057_v62 = vperm.slane %v15031_v10, 0  ;;  %v5096_v24 = vmul.f32 %v15032_v8, %v14990_v61  ;;  %v5011_v43 = vadd.f32 %v5010_v26, %v4992_v47  ;;  %v5024_v48 = vadd.f32 %v5023_v19, %v4989_v44  ;;  %v12657_v29 = vpop.f32.mrf.mxu2  ;;  %v15035_v26 = vld [vmem:[#allocation158_spill] sm:$0xff] }
 0x5a2   : > { %v5132_v53 = vadd.f32 %v5131_v31, %v15033_v16  ;;  %15034 = vst [vmem:[#allocation81_spill] sm:$0xff] %v12657_v29  ;;  %v4935_v0 = vrot.slane %v15018_v49, 7  ;;  %v4950_v42 = vperm.slane %v4934_v46, 0  ;;  %v4994_v10 = vmul.f32 %v4949_v9, %v14991_v38  ;;  %v15036_v49 = vld [vmem:[#allocation162_spill] sm:$0xff] }
 0x5a3   : > { %v5119_v11 = vadd.f32 %v5118_v21, %v5096_v24  ;;  %v4991_v8 = vmul.f32 %v4947_v37, %v14992_v20  ;;  %v5043_v54 = vrot.slane %v15030_v12, 3  ;;  %v5058_v58 = vperm.slane %v5042_v14, 0 }
 0x5a4   : > { %v5098_v50 = vmul.f32 %v5057_v62, %v14961_v30  ;;  %v5095_v28 = vmul.f32 %v15027_v52, %v12452_v33  ;;  %v12666_v47 = vperm.slane %v5371_v1, 0  ;;  %v12668_v44 = vperm.slane %v5372_v7, 0 }
 0x5a5   : > { %v4917_v36 = vadd.f32 %v4916_v56, %v4887_v63  ;;  %v5228_v46 = vadd.f32 %v15036_v49, %v15035_v26  ;;  %v5012_v19 = vadd.f32 %v5011_v43, %v4994_v10  ;;  %v5025_v21 = vadd.f32 %v5024_v48, %v4991_v8 }
 0x5a6   : > { %v5120_v31 = vadd.f32 %v5119_v11, %v5098_v50  ;;  %v5133_v37 = vadd.f32 %v5132_v53, %v5095_v28  ;;  %v12672_v24 = vperm.slane %v5373_v41, 0  ;;  %v4951_v14 = vperm.slane %v4935_v0, 0  ;;  %v15040_v11 = vld [vmem:[#allocation160_spill] sm:$0xff]  ;;  %v15041_v50 = vld [vmem:[#allocation50_spill] sm:$0xff] }
 0x5a7   : > { %v4996_v16 = vmul.f32 %v4950_v42, %v14998_v51  ;;  %v4993_v29 = vmul.f32 %v4948_v2, %v14999_v32  ;;  %5640 = vmatmul.f32.gmra.mxu2 %v4917_v36  ;;  %v5044_v1 = vrot.slane %v15030_v12, 4  ;;  %v5059_v7 = vperm.slane %v5043_v54, 0 }
 0x5a8   : > { %v5100_v52 = vmul.f32 %v5058_v58, %v14969_v57  ;;  %v15037_v63 = vperm.slane %v15030_v12, 0  ;;  %v12681_v43 = vperm.slane %v5374_v39, 0  ;;  %v12683_v48 = vperm.slane %v5375_v13, 0  ;;  %v15043_v39 = vld [vmem:[#allocation157_spill] sm:$0xff] }
 0x5a9   : > { %v12685_v41 = vperm.slane %v5376_v60, 0  ;;  %v5229_v53 = vadd.f32 %v5228_v46, %v15040_v11  ;;  %v5013_v0 = vadd.f32 %v5012_v19, %v4996_v16  ;;  %v5026_v2 = vadd.f32 %v5025_v21, %v4993_v29  ;;  %v12689_v28 = vpop.f32.mrf.mxu2  ;;  %v15044_v19 = vld [vmem:[#allocation53_spill] sm:$0xff] }
 0x5aa   : > { %v5097_v56 = vmul.f32 %v15037_v63, %v14980_v6  ;;  %15038 = vst [vmem:[#allocation26_spill] sm:$0xff] %v12683_v48  ;;  %v5121_v10 = vadd.f32 %v5120_v31, %v5100_v52  ;;  %v5416_v54 = vmul.f32 %v5384_v22, %v15041_v50  ;;  %v4998_v36 = vmul.f32 %v4951_v14, %v15003_v45  ;;  %v15045_v31 = vld [vmem:[#allocation24_spill] sm:$0xff]  ;;  %v15046_v52 = vld [vmem:[#allocation159_spill] sm:$0xff] }
 0x5ab   : > { %15039 = vst [vmem:[#allocation82_spill] sm:$0xff] %v12685_v41  ;;  %v4995_v26 = vmul.f32 %v4949_v9, %v15004_v25  ;;  %v5206_v13 = vmul.f32 %v15043_v39, %v14987_v59  ;;  %v5045_v60 = vrot.slane %v15030_v12, 5  ;;  %v5060_v49 = vperm.slane %v5044_v1, 0  ;;  %v15047_v63 = vld [vmem:[#allocation164_spill] sm:$0xff]  ;;  %v15048_v41 = vld [vmem:[#allocation153_spill] sm:$0xff] }
 0x5ac   : > { %v5134_v8 = vadd.f32 %v5133_v37, %v5097_v56  ;;  %15042 = vst [vmem:[#allocation111_spill] sm:$0xff] %v12689_v28  ;;  %v5102_v46 = vmul.f32 %v5059_v7, %v14977_v4  ;;  %v5099_v29 = vmul.f32 %v5057_v62, %v14983_v15  ;;  %v12699_v21 = vmul.f32 %v5384_v22, %v15044_v19 }
 0x5ad   : > { %v5418_v37 = vmul.f32 %v12653_v34, %v15045_v31  ;;  %v5230_v16 = vadd.f32 %v5229_v53, %v5206_v13  ;;  %v5243_v9 = vadd.f32 %v15047_v63, %v15046_v52  ;;  %v5014_v56 = vadd.f32 %v5013_v0, %v4998_v36 }
 0x5ae   : > { %v5027_v11 = vadd.f32 %v5026_v2, %v4995_v26  ;;  %v5122_v50 = vadd.f32 %v5121_v10, %v5102_v46  ;;  %v5135_v28 = vadd.f32 %v5134_v8, %v5099_v29  ;;  %v4997_v1 = vmul.f32 %v4950_v42, %v15009_v3  ;;  %v15051_v10 = vld [vmem:[#allocation45_spill] sm:$0xff] }
 0x5af   : > { %v5154_v48 = vrot.slane %v15048_v41, 2  ;;  %v15049_v62 = vrot.slane %v15048_v41, 1  ;;  %v15050_v22 = vperm.slane %v15048_v41, 0  ;;  %5643 = vmatmul.f32.gmra.mxu2 %v5014_v56  ;;  %v5046_v53 = vrot.slane %v15030_v12, 6  ;;  %v15052_v8 = vld [vmem:[#allocation25_spill] sm:$0xff] }
 0x5b0   : > { %v5061_v13 = vperm.slane %v5045_v60, 0  ;;  %v5104_v0 = vmul.f32 %v5060_v49, %v14986_v17  ;;  %v5101_v2 = vmul.f32 %v5058_v58, %v14988_v55  ;;  %v5419_v42 = vmul.f32 %v12653_v34, %v15051_v10  ;;  %v15053_v46 = vld [vmem:[#allocation161_spill] sm:$0xff] }
 0x5b1   : > { %v5169_v23 = vperm.slane %v15049_v62, 0  ;;  %v5208_v19 = vmul.f32 %v15050_v22, %v14990_v61  ;;  %v5420_v36 = vmul.f32 %v12666_v47, %v15052_v8  ;;  %v5244_v29 = vadd.f32 %v5243_v9, %v15053_v46  ;;  %v12721_v62 = vpop.f32.mrf.mxu2 }
 0x5b2   : > { %v4999_v31 = vmul.f32 %v4951_v14, %v12547_v5  ;;  %v5028_v52 = vadd.f32 %v5027_v11, %v4997_v1  ;;  %v5123_v63 = vadd.f32 %v5122_v50, %v5104_v0  ;;  %v5136_v56 = vadd.f32 %v5135_v28, %v5101_v2  ;;  %15054 = vst [vmem:[#allocation87_spill] sm:$0xff] %v12721_v62  ;;  %v15055_v11 = vld [vmem:[#allocation44_spill] sm:$0xff]  ;;  %v15057_v62 = vld [vmem:[#allocation34_spill] sm:$0xff] }
 0x5b3   : > { %v5231_v26 = vadd.f32 %v5230_v16, %v5208_v19  ;;  %v5155_v60 = vrot.slane %v15048_v41, 3  ;;  %v5170_v22 = vperm.slane %v5154_v48, 0  ;;  %v5210_v58 = vmul.f32 %v5169_v23, %v14961_v30 }
 0x5b4   : > { %v5207_v34 = vmul.f32 %v15043_v39, %v12452_v33  ;;  %v5047_v10 = vrot.slane %v15030_v12, 7  ;;  %v5062_v16 = vperm.slane %v5046_v53, 0  ;;  %v5106_v9 = vmul.f32 %v5061_v13, %v14991_v38 }
 0x5b5   : > { %v5103_v14 = vmul.f32 %v5059_v7, %v14992_v20  ;;  %v5421_v28 = vmul.f32 %v12666_v47, %v15055_v11  ;;  %v5448_v50 = vadd.f32 %v5418_v37, %v5416_v54  ;;  %v5232_v1 = vadd.f32 %v5231_v26, %v5210_v58 }
 0x5b6   : > { %v5245_v19 = vadd.f32 %v5244_v29, %v5207_v34  ;;  %v5029_v0 = vadd.f32 %v5028_v52, %v4999_v31  ;;  %v5124_v48 = vadd.f32 %v5123_v63, %v5106_v9  ;;  %v5340_v8 = vadd.f32 %v12420_v27, %v12390_v18  ;;  %v15058_v29 = vld [vmem:[#allocation62_spill] sm:$0xff]  ;;  %v15059_v63 = vld [vmem:[#allocation36_spill] sm:$0xff] }
 0x5b7   : > { %v5137_v2 = vadd.f32 %v5136_v56, %v5103_v14  ;;  %v5156_v39 = vrot.slane %v15048_v41, 4  ;;  %v5171_v12 = vperm.slane %v5155_v60, 0  ;;  %v5212_v53 = vmul.f32 %v5170_v22, %v14969_v57 }
 0x5b8   : > { %v15056_v7 = vperm.slane %v15048_v41, 0  ;;  %v5422_v47 = vmul.f32 %v12668_v44, %v15057_v62  ;;  %5646 = vmatmul.f32.gmra.mxu2 %v5029_v0  ;;  %v5063_v54 = vperm.slane %v5047_v10, 0  ;;  %v5108_v37 = vmul.f32 %v5062_v16, %v14998_v51 }
 0x5b9   : > { %v5105_v26 = vmul.f32 %v5060_v49, %v14999_v32  ;;  %v5423_v18 = vmul.f32 %v12668_v44, %v15058_v29  ;;  %v5449_v27 = vadd.f32 %v5448_v50, %v5420_v36  ;;  %v5233_v31 = vadd.f32 %v5232_v1, %v5212_v53  ;;  %v12748_v62 = vpop.f32.mrf.mxu2  ;;  %v15060_v50 = vld [vmem:[#allocation173_spill] sm:$0xff]  ;;  %v15061_v53 = vld [vmem:[#allocation94_spill] sm:$0xff] }
 0x5ba   : > { %v5209_v46 = vmul.f32 %v15056_v7, %v14980_v6  ;;  %v5424_v56 = vmul.f32 %v12672_v24, %v15059_v63  ;;  %v5125_v60 = vadd.f32 %v5124_v48, %v5108_v37  ;;  %v5341_v34 = vadd.f32 %v5340_v8, %v12411_v40 }
 0x5bb   : > { %v5138_v58 = vadd.f32 %v5137_v2, %v5105_v26  ;;  %v5157_v10 = vrot.slane %v15048_v41, 5  ;;  %v5172_v9 = vperm.slane %v5156_v39, 0  ;;  %v5214_v49 = vmul.f32 %v5171_v12, %v14977_v4  ;;  %v15063_v26 = vld [vmem:[#allocation32_spill] sm:$0xff] }
 0x5bc   : > { %v5246_v52 = vadd.f32 %v5245_v19, %v5209_v46  ;;  %v5211_v14 = vmul.f32 %v5169_v23, %v14983_v15  ;;  %v5426_v44 = vmul.f32 %v12681_v43, %v14944_v35  ;;  %v5110_v36 = vmul.f32 %v5063_v54, %v15003_v45  ;;  %v15062_v23 = vld [vmem:[#allocation52_spill] sm:$0xff] }
 0x5bd   : > { %v5107_v11 = vmul.f32 %v5061_v13, %v15004_v25  ;;  %v5318_v1 = vmul.f32 %v15060_v50, %v14987_v59  ;;  %v5450_v40 = vadd.f32 %v5449_v27, %v5422_v47  ;;  %v5463_v19 = vadd.f32 %v5419_v42, %v12699_v21 }
 0x5be   : > { %v5234_v0 = vadd.f32 %v5233_v31, %v5214_v49  ;;  %v5247_v48 = vadd.f32 %v5246_v52, %v5211_v14  ;;  %v5126_v2 = vadd.f32 %v5125_v60, %v5110_v36  ;;  %v5355_v7 = vadd.f32 %v15062_v23, %v15061_v53  ;;  %v15066_v49 = vld [vmem:[#allocation35_spill] sm:$0xff] }
 0x5bf   : > { %v5139_v8 = vadd.f32 %v5138_v58, %v5107_v11  ;;  %v5342_v39 = vadd.f32 %v5341_v34, %v5318_v1  ;;  %v5158_v35 = vrot.slane %v15048_v41, 6  ;;  %v5173_v46 = vperm.slane %v5157_v10, 0 }
 0x5c0   : > { %v5216_v37 = vmul.f32 %v5172_v9, %v14986_v17  ;;  %v5213_v13 = vmul.f32 %v5170_v22, %v14988_v55  ;;  %5649 = vmatmul.f32.gmra.mxu2 %v5126_v2  ;;  %v5109_v47 = vmul.f32 %v5062_v16, %v15009_v3  ;;  %v5266_v21 = vrot.slane %v15063_v26, 2 }
 0x5c1   : > { %v15064_v42 = vrot.slane %v15063_v26, 1  ;;  %v15065_v27 = vperm.slane %v15063_v26, 0  ;;  %v5451_v52 = vadd.f32 %v5450_v40, %v5424_v56  ;;  %v5464_v63 = vadd.f32 %v5463_v19, %v5421_v28  ;;  %v12774_v16 = vpop.f32.mrf.mxu2  ;;  %v15067_v19 = vld [vmem:[#allocation67_spill] sm:$0xff] }
 0x5c2   : > { %v5235_v60 = vadd.f32 %v5234_v0, %v5216_v37  ;;  %v5248_v58 = vadd.f32 %v5247_v48, %v5213_v13  ;;  %v5111_v34 = vmul.f32 %v5063_v54, %v12547_v5  ;;  %v5140_v10 = vadd.f32 %v5139_v8, %v5109_v47 }
 0x5c3   : > { %v5281_v29 = vperm.slane %v15064_v42, 0  ;;  %v5320_v31 = vmul.f32 %v15065_v27, %v14990_v61  ;;  %v5356_v14 = vadd.f32 %v5355_v7, %v15066_v49  ;;  %v5159_v36 = vrot.slane %v15048_v41, 7 }
 0x5c4   : > { %v5174_v11 = vperm.slane %v5158_v35, 0  ;;  %v5218_v1 = vmul.f32 %v5173_v46, %v14991_v38  ;;  %v5215_v2 = vmul.f32 %v5171_v12, %v14992_v20  ;;  %v5267_v56 = vrot.slane %v15063_v26, 3  ;;  %v12785_v35 = vpop.f32.mrf.mxu1 }
 0x5c5   : > { %v5343_v22 = vadd.f32 %v5342_v39, %v5320_v31  ;;  %v5282_v28 = vperm.slane %v5266_v21, 0  ;;  %v5322_v40 = vmul.f32 %v5281_v29, %v14961_v30  ;;  %v5319_v54 = vmul.f32 %v15060_v50, %v12452_v33  ;;  %v15068_v50 = vld [vmem:[#allocation38_spill] sm:$0xff] }
 0x5c6   : > { %v5425_v0 = vmul.f32 %v12672_v24, %v15067_v19  ;;  %v5465_v48 = vadd.f32 %v5464_v63, %v5423_v18  ;;  %v5236_v8 = vadd.f32 %v5235_v60, %v5218_v1  ;;  %v5249_v39 = vadd.f32 %v5248_v58, %v5215_v2  ;;  %v15069_v21 = vld [vmem:[#allocation26_spill] sm:$0xff] }
 0x5c7   : > { %v5141_v41 = vadd.f32 %v5140_v10, %v5111_v34  ;;  %v5344_v53 = vadd.f32 %v5343_v22, %v5322_v40  ;;  %v5357_v23 = vadd.f32 %v5356_v14, %v5319_v54  ;;  %v5452_v7 = vadd.f32 %v5451_v52, %v5426_v44  ;;  %v15070_v31 = vld [vmem:[#allocation122_spill] sm:$0xff] }
 0x5c8   : > { %v5175_v12 = vperm.slane %v5159_v36, 0  ;;  %v5220_v37 = vmul.f32 %v5174_v11, %v14998_v51  ;;  %v5217_v13 = vmul.f32 %v5172_v9, %v14999_v32  ;;  %v5268_v47 = vrot.slane %v15063_v26, 4  ;;  %v15071_v54 = vld [vmem:[#allocation82_spill] sm:$0xff] }
 0x5c9   : > { %v5428_v42 = vmul.f32 %v15069_v21, %v15068_v50  ;;  %5652 = vmatmul.f32.gmra.mxu2 %v5141_v41  ;;  %v5283_v24 = vperm.slane %v5267_v56, 0  ;;  %v5324_v18 = vmul.f32 %v5282_v28, %v14969_v57  ;;  %v5321_v44 = vmul.f32 %v15065_v27, %v14980_v6  ;;  %v12799_v49 = vpop.f32.mrf.mxu2 }
 0x5ca   : > { %v5427_v52 = vmul.f32 %v12681_v43, %v15070_v31  ;;  %v5466_v63 = vadd.f32 %v5465_v48, %v5425_v0  ;;  %v5237_v60 = vadd.f32 %v5236_v8, %v5220_v37  ;;  %v5250_v58 = vadd.f32 %v5249_v39, %v5217_v13  ;;  %v15072_v0 = vld [vmem:[#allocation133_spill] sm:$0xff] }
 0x5cb   : > { %v5377_v9 = vrot.slane %v12785_v35, 1  ;;  %v5345_v34 = vadd.f32 %v5344_v53, %v5324_v18  ;;  %v5358_v10 = vadd.f32 %v5357_v23, %v5321_v44  ;;  %v5453_v22 = vadd.f32 %v5452_v7, %v5428_v42 }
 0x5cc   : > { %v5222_v14 = vmul.f32 %v5175_v12, %v15003_v45  ;;  %v5219_v36 = vmul.f32 %v5173_v46, %v15004_v25  ;;  %v5269_v1 = vrot.slane %v15063_v26, 5  ;;  %v5284_v2 = vperm.slane %v5268_v47, 0 }
 0x5cd   : > { %v5392_v56 = vperm.slane %v12785_v35, 0  ;;  %v5326_v43 = vmul.f32 %v5283_v24, %v14977_v4  ;;  %v5323_v40 = vmul.f32 %v5281_v29, %v14983_v15  ;;  %v5430_v19 = vmul.f32 %v15071_v54, %v14987_v59 }
 0x5ce   : > { %v5429_v48 = vmul.f32 %v15069_v21, %v15072_v0  ;;  %v5238_v8 = vadd.f32 %v5237_v60, %v5222_v14  ;;  %v5251_v39 = vadd.f32 %v5250_v58, %v5219_v36  ;;  %v5467_v23 = vadd.f32 %v5466_v63, %v5427_v52 }
 0x5cf   : > { %v5346_v41 = vadd.f32 %v5345_v34, %v5326_v43  ;;  %v5359_v53 = vadd.f32 %v5358_v10, %v5323_v40  ;;  %v5454_v46 = vadd.f32 %v5453_v22, %v5430_v19  ;;  %v5221_v7 = vmul.f32 %v5174_v11, %v15009_v3 }
 0x5d0   : > { %v5270_v37 = vrot.slane %v15063_v26, 6  ;;  %v5285_v13 = vperm.slane %v5269_v1, 0  ;;  %v5328_v47 = vmul.f32 %v5284_v2, %v14986_v17  ;;  %v5325_v29 = vmul.f32 %v5282_v28, %v14988_v55 }
 0x5d1   : > { %5655 = vmatmul.f32.gmra.mxu2 %v5238_v8  ;;  %v5378_v59 = vrot.slane %v12785_v35, 2  ;;  %v5393_v50 = vperm.slane %v5377_v9, 0  ;;  %v5432_v21 = vmul.f32 %v5392_v56, %v14990_v61  ;;  %v5223_v42 = vmul.f32 %v5175_v12, %v12547_v5 }
 0x5d2   : > { %v5252_v18 = vadd.f32 %v5251_v39, %v5221_v7  ;;  %v5347_v27 = vadd.f32 %v5346_v41, %v5328_v47  ;;  %v5360_v44 = vadd.f32 %v5359_v53, %v5325_v29  ;;  %v5468_v11 = vadd.f32 %v5467_v23, %v5429_v48  ;;  %v12818_v52 = vpop.f32.mrf.mxu2 }
 0x5d3   : > { %v5455_v31 = vadd.f32 %v5454_v46, %v5432_v21  ;;  %v5271_v63 = vrot.slane %v15063_v26, 7  ;;  %v5286_v60 = vperm.slane %v5270_v37, 0  ;;  %v5330_v58 = vmul.f32 %v5285_v13, %v14991_v38 }
 0x5d4   : > { %v5327_v28 = vmul.f32 %v5283_v24, %v14992_v20  ;;  %v5379_v9 = vrot.slane %v12785_v35, 3  ;;  %v5394_v34 = vperm.slane %v5378_v59, 0  ;;  %v5434_v61 = vmul.f32 %v5393_v50, %v14961_v30 }
 0x5d5   : > { %v5431_v12 = vmul.f32 %v15071_v54, %v12452_v33  ;;  %v5253_v10 = vadd.f32 %v5252_v18, %v5223_v42  ;;  %v5348_v22 = vadd.f32 %v5347_v27, %v5330_v58  ;;  %v5287_v43 = vperm.slane %v5271_v63, 0  ;;  %v5771_v63 = vld [vmem:[%s7708_s0] sm:$0xff] }
 0x5d6   : > { %v5361_v14 = vadd.f32 %v5360_v44, %v5327_v28  ;;  %v5456_v36 = vadd.f32 %v5455_v31, %v5434_v61  ;;  %v5332_v26 = vmul.f32 %v5286_v60, %v14998_v51  ;;  %v5329_v40 = vmul.f32 %v5284_v2, %v14999_v32 }
 0x5d7   : > { %v5469_v1 = vadd.f32 %v5468_v11, %v5431_v12  ;;  %v5380_v24 = vrot.slane %v12785_v35, 4  ;;  %v5395_v19 = vperm.slane %v5379_v9, 0  ;;  %v5436_v0 = vmul.f32 %v5394_v34, %v14969_v57 }
 0x5d8   : > { %v5433_v30 = vmul.f32 %v5392_v56, %v14980_v6  ;;  %v5349_v48 = vadd.f32 %v5348_v22, %v5332_v26  ;;  %v5362_v33 = vadd.f32 %v5361_v14, %v5329_v40  ;;  %v5334_v41 = vmul.f32 %v5287_v43, %v15003_v45  ;;  %v5772_v22 = vld [vmem:[%s7708_s0 + $0x8] sm:$0xff] }
 0x5d9   : > { %5658 = vmatmul.f32.gmra.mxu2 %v5253_v10  ;;  %v5457_v54 = vadd.f32 %v5456_v36, %v5436_v0  ;;  %v5331_v53 = vmul.f32 %v5285_v13, %v15004_v25  ;;  %v5381_v2 = vrot.slane %v12785_v35, 5  ;;  %v5396_v46 = vperm.slane %v5380_v24, 0  ;;  %v5773_v10 = vld [vmem:[%s7708_s0 + $0x10] sm:$0xff]  ;;  %v5780_v24 = vld [vmem:[%s7708_s0 + $0x48] sm:$0xff]  ;;  %v5775_v0 = vld [vmem:[%s7708_s0 + $0x20] sm:$0xff] }
 0x5da   : > { %v5470_v8 = vadd.f32 %v5469_v1, %v5433_v30  ;;  %v12832_v39 = vpop.f32.mrf.mxu2  ;;  %v5438_v23 = vmul.f32 %v5395_v19, %v14977_v4  ;;  %v5435_v7 = vmul.f32 %v5393_v50, %v14983_v15  ;;  %v5350_v57 = vadd.f32 %v5349_v48, %v5334_v41  ;;  %v5783_v30 = vld [vmem:[%s7708_s0 + $0x60] sm:$0xff] }
 0x5db   : > { %v5363_v37 = vadd.f32 %v5362_v33, %v5331_v53  ;;  %v5333_v47 = vmul.f32 %v5286_v60, %v15009_v3  ;;  %v5382_v29 = vrot.slane %v12785_v35, 6  ;;  %v5397_v59 = vperm.slane %v5381_v2, 0  ;;  %v5784_v33 = vld [vmem:[%s7708_s0 + $0x68] sm:$0xff]  ;;  %v5883_v53 = vld [vmem:[%s7728_s29] sm:$0xff] }
 0x5dc   : > { %v5458_v6 = vadd.f32 %v5457_v54, %v5438_v23  ;;  %v5471_v56 = vadd.f32 %v5470_v8, %v5435_v7  ;;  %v5440_v13 = vmul.f32 %v5396_v46, %v14986_v17  ;;  %v5437_v21 = vmul.f32 %v5394_v34, %v14988_v55  ;;  %v5776_v54 = vld [vmem:[%s7708_s0 + $0x28] sm:$0xff]  ;;  %v5786_v8 = vld [vmem:[%s7708_s0 + $0x78] sm:$0xff]  ;;  %v5779_v2 = vld [vmem:[%s7708_s0 + $0x40] sm:$0xff] }
 0x5dd   : > { %v5364_v42 = vadd.f32 %v5363_v37, %v5333_v47  ;;  %v5335_v15 = vmul.f32 %v5287_v43, %v12547_v5  ;;  %v5383_v50 = vrot.slane %v12785_v35, 7  ;;  %v5398_v44 = vperm.slane %v5382_v29, 0  ;;  %v5777_v43 = vld [vmem:[%s7708_s0 + $0x30] sm:$0xff]  ;;  %v5886_v7 = vld [vmem:[%s7728_s29 + $0x18] sm:$0xff]  ;;  %v5888_v37 = vld [vmem:[%s7728_s29 + $0x28] sm:$0xff] }
 0x5de   : > { %v5459_v18 = vadd.f32 %v5458_v6, %v5440_v13  ;;  %v5472_v4 = vadd.f32 %v5471_v56, %v5437_v21  ;;  %v5442_v31 = vmul.f32 %v5397_v59, %v14991_v38  ;;  %v5439_v11 = vmul.f32 %v5395_v19, %v14992_v20  ;;  %v5889_v56 = vld [vmem:[%s7728_s29 + $0x30] sm:$0xff]  ;;  %v5891_v29 = vld [vmem:[%s7728_s29 + $0x40] sm:$0xff]  ;;  %v5892_v13 = vld [vmem:[%s7728_s29 + $0x48] sm:$0xff] }
 0x5df   : > { %v7601_v60 = vmov 0   ;;  %v5365_v17 = vadd.f32 %v5364_v42, %v5335_v15  ;;  %v5399_v28 = vperm.slane %v5383_v50, 0  ;;  %v5444_v35 = vmul.f32 %v5398_v44, %v14998_v51  ;;  %v5785_v47 = vld [vmem:[%s7708_s0 + $0x70] sm:$0xff]  ;;  %v5884_v21 = vld [vmem:[%s7728_s29 + $0x8] sm:$0xff]  ;;  %v5898_v42 = vld [vmem:[%s7728_s29 + $0x78] sm:$0xff] }
 0x5e0   : > { %7399 = vset.pattern.permute.xlu0 %v7601_v60  ;;  %7400 = vset.pattern.permute.xlu1 %v7601_v60  ;;  %v5460_v55 = vadd.f32 %v5459_v18, %v5442_v31  ;;  %v5473_v58 = vadd.f32 %v5472_v4, %v5439_v11  ;;  %v5441_v9 = vmul.f32 %v5396_v46, %v14999_v32  ;;  %v5885_v46 = vld [vmem:[%s7728_s29 + $0x10] sm:$0xff]  ;;  %v5887_v15 = vld [vmem:[%s7728_s29 + $0x20] sm:$0xff]  ;;  %v5896_v50 = vld [vmem:[%s7728_s29 + $0x68] sm:$0xff] }
 0x5e1   : > { %5661 = vmatmul.f32.gmra.mxu2 %v5350_v57  ;;  %5789 = vperm.xlu0 %7399, %v5771_v63   ;;  %v5446_v61 = vmul.f32 %v5399_v28, %v15003_v45  ;;  %v5443_v12 = vmul.f32 %v5397_v59, %v15004_v25  ;;  %v5445_v51 = vmul.f32 %v5398_v44, %v15009_v3  ;;  %v5774_v25 = vld [vmem:[%s7708_s0 + $0x18] sm:$0xff]  ;;  %v5897_v4 = vld [vmem:[%s7728_s29 + $0x70] sm:$0xff]  ;;  %v5912_v63 = vld [vmem:[%s7733_s24 + $0x68] sm:$0xff] }
 0x5e2   : > { %v12843_v27 = vpop.f32.mrf.mxu2  ;;  %7401 = vset.pattern.permute.xlu2 %v7601_v60  ;;  %v5461_v38 = vadd.f32 %v5460_v55, %v5444_v35  ;;  %v5474_v20 = vadd.f32 %v5473_v58, %v5441_v9  ;;  %5799 = vperm.xlu1 %7400, %v5773_v10   ;;  %v5447_v45 = vmul.f32 %v5399_v28, %v12547_v5  ;;  %v5778_v3 = vld [vmem:[%s7708_s0 + $0x38] sm:$0xff]  ;;  %v5781_v5 = vld [vmem:[%s7708_s0 + $0x50] sm:$0xff]  ;;  %v5904_v10 = vld [vmem:[%s7733_s24 + $0x28] sm:$0xff] }
 0x5e3   : > { %5809 = vperm.xlu2 %7401, %v5775_v0   ;;  %v5782_v57 = vld [vmem:[%s7708_s0 + $0x58] sm:$0xff]  ;;  %v5913_v31 = vld [vmem:[%s7733_s24 + $0x70] sm:$0xff]  ;;  %v6350_v0 = vld [vmem:[%s7723_s26 + $0x20] sm:$0xff] }
 0x5e4   : > { %v5462_v14 = vadd.f32 %v5461_v38, %v5446_v61  ;;  %v5475_v36 = vadd.f32 %v5474_v20, %v5443_v12  ;;  %v5890_v11 = vld [vmem:[%s7728_s29 + $0x38] sm:$0xff]  ;;  %v5893_v55 = vld [vmem:[%s7728_s29 + $0x50] sm:$0xff]  ;;  %v5907_v38 = vld [vmem:[%s7733_s24 + $0x40] sm:$0xff] }
 0x5e5   : > { %v5910_v58 = vld [vmem:[%s7733_s24 + $0x58] sm:$0xff]  ;;  %v5909_v35 = vld [vmem:[%s7733_s24 + $0x50] sm:$0xff]  ;;  %v5895_v12 = vld [vmem:[%s7728_s29 + $0x60] sm:$0xff] }
 0x5e6   : > { %v5476_v32 = vadd.f32 %v5475_v36, %v5445_v51  ;;  %v5914_v9 = vld [vmem:[%s7733_s24 + $0x78] sm:$0xff]  ;;  %v5911_v36 = vld [vmem:[%s7733_s24 + $0x60] sm:$0xff]  ;;  %v5901_v51 = vld [vmem:[%s7733_s24 + $0x10] sm:$0xff] }
 0x5e7   : > { %v5906_v61 = vld [vmem:[%s7733_s24 + $0x38] sm:$0xff] }
 0x5e8   : > { %v5477_v26 = vadd.f32 %v5476_v32, %v5447_v45  ;;  %v5900_v32 = vld [vmem:[%s7733_s24 + $0x8] sm:$0xff] }
 0x5e9   : > { %5664 = vmatmul.f32.gmra.mxu2 %v5365_v17  ;;  %5794 = vperm.xlu0 %7399, %v5772_v22   ;;  %v5894_v17 = vld [vmem:[%s7728_s29 + $0x58] sm:$0xff] }
 0x5ea   : > { %v12852_v34 = vpop.f32.mrf.mxu2  ;;  %5804 = vperm.xlu1 %7400, %v5774_v25   ;;  %v5908_v25 = vld [vmem:[%s7733_s24 + $0x48] sm:$0xff] }
 0x5eb   : > { %5814 = vperm.xlu2 %7401, %v5776_v54   ;;  %v6352_v54 = vld [vmem:[%s7723_s26 + $0x30] sm:$0xff] }
 0x5f1   : > { %5667 = vmatmul.f32.gmra.mxu2 %v5462_v14  ;;  %5819 = vperm.xlu0 %7399, %v5777_v43   ;;  %v5903_v14 = vld [vmem:[%s7733_s24 + $0x20] sm:$0xff] }
 0x5f2   : > { %v12859_v1 = vpop.f32.mrf.mxu2  ;;  %5824 = vperm.xlu1 %7400, %v5778_v3   ;;  %v6346_v43 = vld [vmem:[%s7723_s26] sm:$0xff] }
 0x5f3   : > { %5829 = vperm.xlu2 %7401, %v5779_v2  }
 0x5f9   : > { %5670 = vmatmul.f32.gmra.mxu2 %v5477_v26  ;;  %5834 = vperm.xlu0 %7399, %v5780_v24   ;;  %v6347_v26 = vld [vmem:[%s7723_s26 + $0x8] sm:$0xff]  ;;  %v5905_v24 = vld [vmem:[%s7733_s24 + $0x30] sm:$0xff] }
 0x5fa   : > { %v12864_v40 = vpop.f32.mrf.mxu2  ;;  %5839 = vperm.xlu1 %7400, %v5781_v5   ;;  %v6349_v5 = vld [vmem:[%s7723_s26 + $0x18] sm:$0xff] }
 0x5fb   : > { %5844 = vperm.xlu2 %7401, %v5782_v57  }
 0x601   : > { %5849 = vperm.xlu0 %7399, %v5783_v30  }
 0x602   : > { %v12868_v19 = vpop.f32.mrf.mxu2  ;;  %5854 = vperm.xlu1 %7400, %v5784_v33   ;;  %v5902_v33 = vld [vmem:[%s7733_s24 + $0x18] sm:$0xff] }
 0x603   : > { %5859 = vperm.xlu2 %7401, %v5785_v47   ;;  %v6356_v47 = vld [vmem:[%s7723_s26 + $0x50] sm:$0xff] }
 0x609   : > { %5864 = vperm.xlu0 %7399, %v5786_v8   ;;  %v6353_v8 = vld [vmem:[%s7723_s26 + $0x38] sm:$0xff] }
 0x60a   : > { %v12873_v48 = vpop.f32.mrf.mxu2  ;;  %6059 = vperm.xlu1 %7400, %v5883_v53  }
 0x60b   : > { %6064 = vperm.xlu2 %7401, %v5884_v21  }
 0x611   : > { %6069 = vperm.xlu0 %7399, %v5885_v46   ;;  %v5899_v46 = vld [vmem:[%s7733_s24] sm:$0xff] }
 0x612   : > { %v12878_v41 = vpop.f32.mrf.mxu2  ;;  %6074 = vperm.xlu1 %7400, %v5886_v7   ;;  %v6355_v7 = vld [vmem:[%s7723_s26 + $0x48] sm:$0xff] }
 0x613   : > { %6079 = vperm.xlu2 %7401, %v5887_v15  }
 0x619   : > { %6084 = vperm.xlu0 %7399, %v5888_v37  }
 0x61a   : > { %v12883_v23 = vpop.f32.mrf.mxu2  ;;  %6089 = vperm.xlu1 %7400, %v5889_v56  }
 0x61b   : > { %6094 = vperm.xlu2 %7401, %v5890_v11  }
 0x621   : > { %6099 = vperm.xlu0 %7399, %v5891_v29   ;;  %v6348_v29 = vld [vmem:[%s7723_s26 + $0x10] sm:$0xff] }
 0x622   : > { %v12888_v6 = vpop.f32.mrf.mxu2  ;;  %6104 = vperm.xlu1 %7400, %v5892_v13   ;;  %v6358_v13 = vld [vmem:[%s7723_s26 + $0x60] sm:$0xff] }
 0x623   : > { %6109 = vperm.xlu2 %7401, %v5893_v55   ;;  %v15079_v55 = vld [vmem:[#allocation74_spill] sm:$0xff] }
 0x629   : > { %6134 = vperm.xlu0 %7399, %v5898_v42   ;;  %v6361_v42 = vld [vmem:[%s7723_s26 + $0x78] sm:$0xff] }
 0x62a   : > { %v12893_v59 = vpop.f32.mrf.mxu2  ;;  %6129 = vperm.xlu1 %7400, %v5897_v4   ;;  %v15073_v4 = vld [vmem:[#allocation87_spill] sm:$0xff] }
 0x62b   : > { %6230 = vperm.xlu2 %7401, %v5914_v9   ;;  %v6464_v9 = vld [vmem:[%s7738_s21 + $0x30] sm:$0xff] }
 0x631   : > { %6124 = vperm.xlu0 %7399, %v5896_v50   ;;  %v15075_v50 = vld [vmem:[#allocation81_spill] sm:$0xff] }
 0x632   : > { %v12898_v18 = vpop.f32.mrf.mxu2  ;;  %6225 = vperm.xlu1 %7400, %v5913_v31   ;;  %v5639_v31 = vadd.f32 %v12888_v6, %v15075_v50  ;;  %v15078_v6 = vld [vmem:[#allocation31_spill] sm:$0xff] }
 0x633   : > { %6119 = vperm.xlu2 %7401, %v5895_v12   ;;  %v5645_v15 = vadd.f32 %v12898_v18, %v15073_v4  ;;  %v6354_v18 = vld [vmem:[%s7723_s26 + $0x40] sm:$0xff]  ;;  %v6459_v12 = vld [vmem:[%s7738_s21 + $0x8] sm:$0xff]  ;;  %v5689_v4 = vld [vmem:[%s7703_s28 + $0x78] sm:$0xff] }
 0x639   : > { %6220 = vperm.xlu0 %7399, %v5912_v63   ;;  %v6460_v63 = vld [vmem:[%s7738_s21 + $0x10] sm:$0xff] }
 0x63a   : > { %6114 = vperm.xlu1 %7400, %v5894_v17   ;;  %v5630_v17 = vadd.f32 %v12873_v48, %v15078_v6  ;;  %v5675_v48 = vld [vmem:[%s7703_s28 + $0x8] sm:$0xff] }
 0x63b   : > { %v12903_v44 = vpop.f32.mrf.mxu2  ;;  %6215 = vperm.xlu2 %7401, %v5911_v36   ;;  %v6462_v36 = vld [vmem:[%s7738_s21 + $0x20] sm:$0xff] }
 0x63c   : > { %v5648_v21 = vadd.f32 %v12903_v44, %v12748_v62  ;;  %v6458_v62 = vld [vmem:[%s7738_s21] sm:$0xff] }
 0x63d   : > { %v15076_v44 = vld [vmem:[#allocation73_spill] sm:$0xff] }
 0x63e   : > { %v5636_v11 = vadd.f32 %v12883_v23, %v15076_v44  ;;  %v5627_v23 = vadd.f32 %v12868_v19, %v15079_v55  ;;  %v6360_v19 = vld [vmem:[%s7723_s26 + $0x70] sm:$0xff]  ;;  %v7545_v44 = vld [vmem:[#allocation2 + $0x8] sm:$0xff] }
 0x641   : > { %6210 = vperm.xlu0 %7399, %v5910_v58   ;;  %v5674_v58 = vld [vmem:[%s7703_s28] sm:$0xff] }
 0x642   : > { %6205 = vperm.xlu1 %7400, %v5909_v35   ;;  %v6463_v35 = vld [vmem:[%s7738_s21 + $0x28] sm:$0xff] }
 0x643   : > { %v12908_v60 = vpop.f32.mrf.mxu2  ;;  %6200 = vperm.xlu2 %7401, %v5908_v25   ;;  %v6465_v25 = vld [vmem:[%s7738_s21 + $0x38] sm:$0xff] }
 0x649   : > { %6195 = vperm.xlu0 %7399, %v5907_v38   ;;  %v6466_v38 = vld [vmem:[%s7738_s21 + $0x40] sm:$0xff] }
 0x64a   : > { %6190 = vperm.xlu1 %7400, %v5906_v61   ;;  %v6467_v61 = vld [vmem:[%s7738_s21 + $0x48] sm:$0xff] }
 0x64b   : > { %6185 = vperm.xlu2 %7401, %v5905_v24   ;;  %v6468_v24 = vld [vmem:[%s7738_s21 + $0x50] sm:$0xff] }
 0x64c   : > { %v12913_v28 = vpop.f32.mrf.mxu2 }
 0x651   : > { %6180 = vperm.xlu0 %7399, %v5904_v10   ;;  %v6469_v10 = vld [vmem:[%s7738_s21 + $0x58] sm:$0xff] }
 0x652   : > { %6175 = vperm.xlu1 %7400, %v5903_v14   ;;  %v6470_v14 = vld [vmem:[%s7738_s21 + $0x60] sm:$0xff] }
 0x653   : > { %6170 = vperm.xlu2 %7401, %v5902_v33   ;;  %v6471_v33 = vld [vmem:[%s7738_s21 + $0x68] sm:$0xff] }
 0x654   : > { %v5656_v20 = vpop.f32.mrf.mxu2 }
 0x659   : > { %6165 = vperm.xlu0 %7399, %v5901_v51   ;;  %v6472_v51 = vld [vmem:[%s7738_s21 + $0x70] sm:$0xff] }
 0x65a   : > { %6160 = vperm.xlu1 %7400, %v5900_v32   ;;  %v5678_v32 = vld [vmem:[%s7703_s28 + $0x20] sm:$0xff] }
 0x65b   : > { %6155 = vperm.xlu2 %7401, %v5899_v46   ;;  %v6484_v46 = vld [vmem:[%s7743_s15 + $0x50] sm:$0xff] }
 0x65c   : > { %v5659_v22 = vpop.f32.mrf.mxu2 }
 0x661   : > { %6364 = vperm.xlu0 %7399, %v6346_v43   ;;  %v6475_v43 = vld [vmem:[%s7743_s15 + $0x8] sm:$0xff] }
 0x662   : > { %6369 = vperm.xlu1 %7400, %v6347_v26   ;;  %v5679_v26 = vld [vmem:[%s7703_s28 + $0x28] sm:$0xff] }
 0x663   : > { %6374 = vperm.xlu2 %7401, %v6348_v29   ;;  %v6480_v29 = vld [vmem:[%s7743_s15 + $0x30] sm:$0xff] }
 0x664   : > { %v5662_v45 = vpop.f32.mrf.mxu2 }
 0x665   : > { %v5663_v56 = vadd.f32 %v5662_v45, %v12843_v27  ;;  %v5651_v27 = vadd.f32 %v12908_v60, %v12774_v16  ;;  %v15077_v60 = vld [vmem:[#allocation72_spill] sm:$0xff] }
 0x666   : > { %v6473_v45 = vld [vmem:[%s7738_s21 + $0x78] sm:$0xff] }
 0x669   : > { %6379 = vperm.xlu0 %7399, %v6349_v5   ;;  %v6478_v5 = vld [vmem:[%s7743_s15 + $0x20] sm:$0xff] }
 0x66a   : > { %6384 = vperm.xlu1 %7400, %v6350_v0   ;;  %v5680_v0 = vld [vmem:[%s7703_s28 + $0x30] sm:$0xff] }
 0x66c   : > { %v5665_v3 = vpop.f32.mrf.mxu2 }
 0x66d   : > { %v5666_v37 = vadd.f32 %v5665_v3, %v12852_v34  ;;  %v5654_v34 = vadd.f32 %v12913_v28, %v12799_v49  ;;  %v15074_v49 = vld [vmem:[#allocation111_spill] sm:$0xff]  ;;  %v6461_v28 = vld [vmem:[%s7738_s21 + $0x18] sm:$0xff] }
 0x66e   : > { %v5642_v16 = vadd.f32 %v12893_v59, %v15074_v49  ;;  %v5633_v59 = vadd.f32 %v12878_v41, %v15077_v60  ;;  %v6357_v41 = vld [vmem:[%s7723_s26 + $0x58] sm:$0xff]  ;;  %v6476_v3 = vld [vmem:[%s7743_s15 + $0x10] sm:$0xff] }
 0x671   : > { %6394 = vperm.xlu0 %7399, %v6352_v54   ;;  %v6481_v54 = vld [vmem:[%s7743_s15 + $0x38] sm:$0xff] }
 0x672   : > { %6399 = vperm.xlu1 %7400, %v6353_v8   ;;  %v5681_v8 = vld [vmem:[%s7703_s28 + $0x38] sm:$0xff] }
 0x674   : > { %v5668_v30 = vpop.f32.mrf.mxu2 }
 0x675   : > { %v5669_v57 = vadd.f32 %v5668_v30, %v12859_v1  ;;  %v5657_v1 = vadd.f32 %v5656_v20, %v12818_v52  ;;  %v6351_v52 = vld [vmem:[%s7723_s26 + $0x28] sm:$0xff]  ;;  %v5676_v20 = vld [vmem:[%s7703_s28 + $0x10] sm:$0xff] }
 0x676   : > { %6389 = vperm.xlu2 %7401, %v6351_v52   ;;  %v6479_v30 = vld [vmem:[%s7743_s15 + $0x28] sm:$0xff] }
 0x677   : > { %v5687_v52 = vld [vmem:[%s7703_s28 + $0x68] sm:$0xff] }
 0x679   : > { %6409 = vperm.xlu0 %7399, %v6355_v7   ;;  %v5682_v7 = vld [vmem:[%s7703_s28 + $0x40] sm:$0xff] }
 0x67a   : > { %6414 = vperm.xlu1 %7400, %v6356_v47   ;;  %v5683_v47 = vld [vmem:[%s7703_s28 + $0x48] sm:$0xff] }
 0x67c   : > { %v5671_v53 = vpop.f32.mrf.mxu2 }
 0x67d   : > { %v5672_v2 = vadd.f32 %v5671_v53, %v12864_v40  ;;  %v5660_v40 = vadd.f32 %v5659_v22, %v12832_v39  ;;  %v6359_v39 = vld [vmem:[%s7723_s26 + $0x68] sm:$0xff]  ;;  %v5677_v22 = vld [vmem:[%s7703_s28 + $0x18] sm:$0xff]  ;;  %v6482_v53 = vld [vmem:[%s7743_s15 + $0x40] sm:$0xff] }
 0x67e   : > { %6404 = vperm.xlu2 %7401, %v6354_v18  }
 0x67f   : > { %5690 = vmatpush.msra.mxu3 %v5672_v2  ;;  %v6474_v2 = vld [vmem:[%s7743_s15] sm:$0xff] }
 0x681   : > { %5691 = vmatpush.msra.mxu3 %v5669_v57  ;;  %6424 = vperm.xlu0 %7399, %v6358_v13   ;;  %v6485_v57 = vld [vmem:[%s7743_s15 + $0x58] sm:$0xff]  ;;  %v5684_v13 = vld [vmem:[%s7703_s28 + $0x50] sm:$0xff] }
 0x682   : > { %6429 = vperm.xlu1 %7400, %v6359_v39   ;;  %v5686_v39 = vld [vmem:[%s7703_s28 + $0x60] sm:$0xff] }
 0x683   : > { %5692 = vmatpush.msra.mxu3 %v5666_v37  ;;  %v6477_v37 = vld [vmem:[%s7743_s15 + $0x18] sm:$0xff] }
 0x685   : > { %5693 = vmatpush.msra.mxu3 %v5663_v56  ;;  %v6487_v56 = vld [vmem:[%s7743_s15 + $0x68] sm:$0xff] }
 0x686   : > { %6419 = vperm.xlu2 %7401, %v6357_v41  }
 0x687   : > { %5694 = vmatpush.msra.mxu3 %v5660_v40  ;;  %v6488_v40 = vld [vmem:[%s7743_s15 + $0x70] sm:$0xff] }
 0x689   : > { %5695 = vmatpush.msra.mxu3 %v5657_v1  ;;  %6439 = vperm.xlu0 %7399, %v6361_v42   ;;  %v6483_v1 = vld [vmem:[%s7743_s15 + $0x48] sm:$0xff]  ;;  %v5688_v42 = vld [vmem:[%s7703_s28 + $0x70] sm:$0xff] }
 0x68a   : > { %6627 = vperm.xlu1 %7400, %v6458_v62  }
 0x68b   : > { %5696 = vmatpush.msra.mxu3 %v5654_v34  ;;  %v5685_v34 = vld [vmem:[%s7703_s28 + $0x58] sm:$0xff] }
 0x68d   : > { %5697 = vmatpush.msra.mxu3 %v5651_v27  ;;  %v6486_v27 = vld [vmem:[%s7743_s15 + $0x60] sm:$0xff] }
 0x68e   : > { %6434 = vperm.xlu2 %7401, %v6360_v19  }
 0x68f   : > { %5698 = vmatpush.msra.mxu3 %v5648_v21  ;;  %v6489_v21 = vld [vmem:[%s7743_s15 + $0x78] sm:$0xff] }
 0x691   : > { %5699 = vmatpush.msra.mxu3 %v5645_v15  ;;  %6637 = vperm.xlu0 %7399, %v6460_v63   ;;  %v5790_v15 = vpop.permute.xlu0 %5789 }
 0x692   : > { %6642 = vperm.xlu1 %7400, %v6461_v28  }
 0x693   : > { %5700 = vmatpush.msra.mxu3 %v5642_v16  ;;  %v7544_v16 = vld [vmem:[#allocation2] sm:$0xff] }
 0x695   : > { %5701 = vmatpush.msra.mxu3 %v5639_v31 }
 0x696   : > { %6632 = vperm.xlu2 %7401, %v6459_v12  }
 0x697   : > { %5702 = vmatpush.msra.mxu3 %v5636_v11 }
 0x699   : > { %5703 = vmatpush.msra.mxu3 %v5633_v59  ;;  %6652 = vperm.xlu0 %7399, %v6463_v35   ;;  %v5795_v18 = vpop.permute.xlu0 %5794 }
 0x69a   : > { %6657 = vperm.xlu1 %7400, %v6464_v9   ;;  %v7547_v9 = vld [vmem:[#allocation2 + $0x18] sm:$0xff] }
 0x69b   : > { %5704 = vmatpush.msra.mxu3 %v5630_v17  ;;  %v5800_v17 = vpop.permute.xlu1 %5799 }
 0x69d   : > { %5705 = vmatpush.msra.mxu3 %v5627_v23  ;;  %v7546_v23 = vld [vmem:[#allocation2 + $0x10] sm:$0xff] }
 0x69e   : > { %5706 = vmatmul.f32.vlgmr.msra.gmra.mxu3 %v5674_v58  ;;  %6647 = vperm.xlu2 %7401, %v6462_v36   ;;  %v5810_v36 = vpop.permute.xlu2 %5809 }
 0x6a1   : > { %6667 = vperm.xlu0 %7399, %v6466_v38  }
 0x6a2   : > { %6672 = vperm.xlu1 %7400, %v6467_v61  }
 0x6a3   : > { %v5805_v38 = vpop.permute.xlu1 %5804 }
 0x6a6   : > { %5709 = vmatmul.f32.gmra.mxu3 %v5675_v48  ;;  %6662 = vperm.xlu2 %7401, %v6465_v25  }
 0x6a9   : > { %6682 = vperm.xlu0 %7399, %v6469_v10  }
 0x6aa   : > { %6687 = vperm.xlu1 %7400, %v6470_v14  }
 0x6ae   : > { %5712 = vmatmul.f32.gmra.mxu3 %v5676_v20  ;;  %6677 = vperm.xlu2 %7401, %v6468_v24  }
 0x6b1   : > { %6697 = vperm.xlu0 %7399, %v6472_v51  }
 0x6b2   : > { %6702 = vperm.xlu1 %7400, %v6473_v45  }
 0x6b6   : > { %5715 = vmatmul.f32.gmra.mxu3 %v5677_v22  ;;  %6692 = vperm.xlu2 %7401, %v6471_v33   ;;  %v7548_v22 = vld [vmem:[#allocation2 + $0x20] sm:$0xff]  ;;  %v5820_v33 = vpop.permute.xlu0 %5819 }
 0x6b9   : > { %6728 = vperm.xlu0 %7399, %v6475_v43  }
 0x6ba   : > { %6733 = vperm.xlu1 %7400, %v6476_v3  }
 0x6be   : > { %5718 = vmatmul.f32.gmra.mxu3 %v5678_v32  ;;  %6723 = vperm.xlu2 %7401, %v6474_v2  }
 0x6c1   : > { %6743 = vperm.xlu0 %7399, %v6478_v5  }
 0x6c2   : > { %6748 = vperm.xlu1 %7400, %v6479_v30  }
 0x6c6   : > { %5721 = vmatmul.f32.gmra.mxu3 %v5679_v26  ;;  %6738 = vperm.xlu2 %7401, %v6477_v37  }
 0x6c9   : > { %6758 = vperm.xlu0 %7399, %v6481_v54   ;;  %v5825_v54 = vpop.permute.xlu1 %5824 }
 0x6ca   : > { %6763 = vperm.xlu1 %7400, %v6482_v53  }
 0x6ce   : > { %5724 = vmatmul.f32.gmra.mxu3 %v5680_v0  ;;  %6753 = vperm.xlu2 %7401, %v6480_v29   ;;  %v5815_v0 = vpop.permute.xlu2 %5814  ;;  %v7552_v29 = vld [vmem:[#allocation2 + $0x40] sm:$0xff] }
 0x6d1   : > { %6773 = vperm.xlu0 %7399, %v6484_v46  }
 0x6d2   : > { %6778 = vperm.xlu1 %7400, %v6485_v57  }
 0x6d6   : > { %5727 = vmatmul.f32.gmra.mxu3 %v5681_v8  ;;  %6768 = vperm.xlu2 %7401, %v6483_v1   ;;  %v7549_v8 = vld [vmem:[#allocation2 + $0x28] sm:$0xff]  ;;  %v5830_v2 = vpop.permute.xlu2 %5829  ;;  %v5835_v1 = vpop.permute.xlu0 %5834 }
 0x6d9   : > { %6788 = vperm.xlu0 %7399, %v6487_v56   ;;  %v7551_v56 = vld [vmem:[#allocation2 + $0x38] sm:$0xff] }
 0x6da   : > { %6793 = vperm.xlu1 %7400, %v6488_v40  }
 0x6de   : > { %5730 = vmatmul.f32.gmra.mxu3 %v5682_v7  ;;  %6783 = vperm.xlu2 %7401, %v6486_v27   ;;  %v7550_v7 = vld [vmem:[#allocation2 + $0x30] sm:$0xff] }
 0x6e6   : > { %5733 = vmatmul.f32.gmra.mxu3 %v5683_v47  ;;  %6798 = vperm.xlu2 %7401, %v6489_v21  }
 0x6ee   : > { %5736 = vmatmul.f32.gmra.mxu3 %v5684_v13 }
 0x6f6   : > { %5739 = vmatmul.f32.gmra.mxu3 %v5685_v34 }
 0x6fe   : > { %5742 = vmatmul.f32.gmra.mxu3 %v5686_v39  ;;  %v7553_v39 = vld [vmem:[#allocation2 + $0x48] sm:$0xff] }
 0x706   : > { %5745 = vmatmul.f32.gmra.mxu3 %v5687_v52  ;;  %v5840_v52 = vpop.permute.xlu1 %5839 }
 0x70e   : > { %5748 = vmatmul.f32.gmra.mxu3 %v5688_v42 }
 0x716   : > { %5751 = vmatmul.f32.gmra.mxu3 %v5689_v4 }
 0x721   : > { %v5707_v49 = vpop.f32.mrf.mxu3 }
 0x722   : > { %v5755_v50 = vadd.f32 %v7544_v16, %v5707_v49  ;;  %v7554_v49 = vld [vmem:[#allocation2 + $0x50] sm:$0xff] }
 0x724   : > { %v13019_v62 = vadd.f32 %v5790_v15, %v5755_v50  ;;  %v5845_v50 = vpop.permute.xlu2 %5844 }
 0x726   : > { %v5915_v60 = vsel %vm1063_vm2, %v13019_v62, 0.0 }
 0x729   : > { %v5710_v31 = vpop.f32.mrf.mxu3 }
 0x72a   : > { %v5756_v11 = vadd.f32 %v7545_v44, %v5710_v31 }
 0x72c   : > { %v13021_v63 = vadd.f32 %v5795_v18, %v5756_v11  ;;  %v7555_v18 = vld [vmem:[#allocation2 + $0x58] sm:$0xff] }
 0x72e   : > { %v5916_v59 = vsel %vm1063_vm2, %v13021_v63, 0.0 }
 0x72f   : > { %v5917_v6 = vadd.f32 %v5916_v59, %v5915_v60 }
 0x731   : > { %v5713_v55 = vpop.f32.mrf.mxu3 }
 0x732   : > { %v5757_v58 = vadd.f32 %v7546_v23, %v5713_v55  ;;  %v7556_v55 = vld [vmem:[#allocation2 + $0x60] sm:$0xff] }
 0x734   : > { %v13027_v28 = vadd.f32 %v5800_v17, %v5757_v58 }
 0x736   : > { %v5918_v41 = vsel %vm1063_vm2, %v13027_v28, 0.0 }
 0x737   : > { %v5919_v35 = vadd.f32 %v5918_v41, %v5917_v6 }
 0x739   : > { %v5716_v48 = vpop.f32.mrf.mxu3 }
 0x73a   : > { %v5758_v19 = vadd.f32 %v7547_v9, %v5716_v48  ;;  %v7557_v48 = vld [vmem:[#allocation2 + $0x68] sm:$0xff] }
 0x73c   : > { %v13031_v20 = vadd.f32 %v5805_v38, %v5758_v19  ;;  %v5850_v19 = vpop.permute.xlu0 %5849 }
 0x73e   : > { %v5920_v61 = vsel %vm1063_vm2, %v13031_v20, 0.0 }
 0x73f   : > { %v5921_v12 = vadd.f32 %v5920_v61, %v5919_v35 }
 0x741   : > { %v5719_v10 = vpop.f32.mrf.mxu3 }
 0x742   : > { %v5759_v14 = vadd.f32 %v7548_v22, %v5719_v10 }
 0x744   : > { %v13035_v51 = vadd.f32 %v5810_v36, %v5759_v14  ;;  %v7558_v14 = vld [vmem:[#allocation2 + $0x70] sm:$0xff] }
 0x746   : > { %v5922_v32 = vsel %vm1063_vm2, %v13035_v51, 0.0 }
 0x747   : > { %v5923_v45 = vadd.f32 %v5922_v32, %v5921_v12  ;;  %v7602_v12 = vmov 128.0   ;;  %v5855_v32 = vpop.permute.xlu1 %5854 }
 0x748   : > { %7538 = vrcp.f32 %v7602_v12 }
 0x749   : > { %v5722_v25 = vpop.f32.mrf.mxu3 }
 0x74a   : > { %v5760_v53 = vadd.f32 %v7549_v8, %v5722_v25 }
 0x74c   : > { %v13039_v37 = vadd.f32 %v5815_v0, %v5760_v53 }
 0x74e   : > { %v5924_v34 = vsel %vm1063_vm2, %v13039_v37, 0.0  ;;  %v7539_v0 = vpop.eup %7538 }
 0x74f   : > { %v5925_v31 = vadd.f32 %v5924_v34, %v5923_v45  ;;  %vm5957_vm3 = vweird.f32 %v7539_v0 }
 0x751   : > { %v5725_v43 = vpop.f32.mrf.mxu3 }
 0x752   : > { %v5761_v57 = vadd.f32 %v7550_v7, %v5725_v43  ;;  %v5953_v7 = vmul.f32 128.0, %v7539_v0 }
 0x754   : > { %v13041_v40 = vadd.f32 %v5820_v33, %v5761_v57  ;;  %v5865_v57 = vpop.permute.xlu0 %5864 }
 0x756   : > { %v5926_v4 = vsel %vm1063_vm2, %v13041_v40, 0.0 }
 0x757   : > { %v5927_v59 = vadd.f32 %v5926_v4, %v5925_v31 }
 0x759   : > { %v5728_v26 = vpop.f32.mrf.mxu3 }
 0x75a   : > { %v5762_v47 = vadd.f32 %v7551_v56, %v5728_v26  ;;  %v5860_v26 = vpop.permute.xlu2 %5859 }
 0x75c   : > { %v13045_v27 = vadd.f32 %v5825_v54, %v5762_v47 }
 0x75e   : > { %v5928_v44 = vsel %vm1063_vm2, %v13045_v27, 0.0 }
 0x75f   : > { %v5929_v58 = vadd.f32 %v5928_v44, %v5927_v59 }
 0x761   : > { %v5731_v3 = vpop.f32.mrf.mxu3 }
 0x762   : > { %v5763_v13 = vadd.f32 %v7552_v29, %v5731_v3 }
 0x764   : > { %v13049_v15 = vadd.f32 %v5830_v2, %v5763_v13  ;;  %v7559_v2 = vld [vmem:[#allocation2 + $0x78] sm:$0xff] }
 0x766   : > { %v5930_v6 = vsel %vm1063_vm2, %v13049_v15, 0.0 }
 0x767   : > { %v5931_v38 = vadd.f32 %v5930_v6, %v5929_v58 }
 0x769   : > { %v5734_v24 = vpop.f32.mrf.mxu3 }
 0x76a   : > { %v5764_v21 = vadd.f32 %v7553_v39, %v5734_v24 }
 0x76c   : > { %v13053_v11 = vadd.f32 %v5835_v1, %v5764_v21  ;;  %v5954_v1 = vsub.f32 1.0, %v5953_v7 }
 0x76e   : > { %v5932_v41 = vsel %vm1063_vm2, %v13053_v11, 0.0  ;;  %v5955_v21 = vmul.f32 %v7539_v0, %v5954_v1 }
 0x76f   : > { %v5933_v45 = vadd.f32 %v5932_v41, %v5931_v38  ;;  %v13107_v41 = vpop.permute.xlu2 %6064 }
 0x770   : > { %v5956_v4 = vadd.f32 %v7539_v0, %v5955_v21 }
 0x771   : > { %v5737_v5 = vpop.f32.mrf.mxu3 }
 0x772   : > { %v5765_v16 = vadd.f32 %v7554_v49, %v5737_v5 }
 0x774   : > { %v13057_v17 = vadd.f32 %v5840_v52, %v5765_v16 }
 0x776   : > { %v5934_v10 = vsel %vm1063_vm2, %v13057_v17, 0.0 }
 0x777   : > { %v5935_v3 = vadd.f32 %v5934_v10, %v5933_v45  ;;  %v13124_v10 = vpop.permute.xlu0 %6069 }
 0x779   : > { %v5740_v30 = vpop.f32.mrf.mxu3 }
 0x77a   : > { %v5766_v60 = vadd.f32 %v7555_v18, %v5740_v30 }
 0x77c   : > { %v13061_v35 = vadd.f32 %v5845_v50, %v5766_v60  ;;  %v13083_v50 = vsel %vm5957_vm3, %v7539_v0, %v5956_v4 }
 0x77e   : > { %v5936_v25 = vsel %vm1063_vm2, %v13061_v35, 0.0 }
 0x77f   : > { %v5937_v30 = vadd.f32 %v5936_v25, %v5935_v3 }
 0x781   : > { %v5743_v46 = vpop.f32.mrf.mxu3 }
 0x782   : > { %v5767_v23 = vadd.f32 %v7556_v55, %v5743_v46 }
 0x784   : > { %v13065_v22 = vadd.f32 %v5850_v19, %v5767_v23  ;;  %v13101_v23 = vpop.permute.xlu1 %6059 }
 0x786   : > { %v5938_v24 = vsel %vm1063_vm2, %v13065_v22, 0.0 }
 0x787   : > { %v5939_v54 = vadd.f32 %v5938_v24, %v5937_v30  ;;  %v13140_v24 = vpop.permute.xlu2 %6079 }
 0x789   : > { %v5746_v42 = vpop.f32.mrf.mxu3 }
 0x78a   : > { %v5768_v9 = vadd.f32 %v7557_v48, %v5746_v42 }
 0x78c   : > { %v13069_v43 = vadd.f32 %v5855_v32, %v5768_v9  ;;  %v13132_v45 = vpop.permute.xlu1 %6074 }
 0x78e   : > { %v5940_v33 = vsel %vm1063_vm2, %v13069_v43, 0.0 }
 0x78f   : > { %v5941_v56 = vadd.f32 %v5940_v33, %v5939_v54 }
 0x791   : > { %v5749_v61 = vpop.f32.mrf.mxu3 }
 0x792   : > { %v5769_v36 = vadd.f32 %v7558_v14, %v5749_v61 }
 0x794   : > { %v13073_v5 = vadd.f32 %v5860_v26, %v5769_v36  ;;  %v13168_v1 = vpop.permute.xlu1 %6089 }
 0x796   : > { %v5942_v53 = vsel %vm1063_vm2, %v13073_v5, 0.0 }
 0x797   : > { %v5943_v29 = vadd.f32 %v5942_v53, %v5941_v56 }
 0x799   : > { %v5752_v8 = vpop.f32.mrf.mxu3 }
 0x79a   : > { %v5770_v46 = vadd.f32 %v7559_v2, %v5752_v8 }
 0x79c   : > { %v13079_v47 = vadd.f32 %v5865_v57, %v5770_v46  ;;  %v13160_v57 = vpop.permute.xlu0 %6084 }
 0x79e   : > { %v5944_v13 = vsel %vm1063_vm2, %v13079_v47, 0.0 }
 0x79f   : > { %v5945_v34 = vadd.f32 %v5944_v13, %v5943_v29 }
 0x7a1   : > { %v5946_v39 = vrot.slane %v5945_v34, 4 }
 0x7a3   : > { %v5947_v52 = vadd.f32 %v5946_v39, %v5945_v34 }
 0x7a5   : > { %v5948_v42 = vrot.slane %v5947_v52, 2 }
 0x7a7   : > { %v5949_v49 = vadd.f32 %v5948_v42, %v5947_v52  ;;  %v13174_v52 = vpop.permute.xlu2 %6094 }
 0x7a9   : > { %v5950_v16 = vrot.slane %v5949_v49, 1 }
 0x7ab   : > { %v5951_v31 = vadd.f32 %v5950_v16, %v5949_v49 }
 0x7ad   : > { %v5959_v44 = vmul.f32 %v13083_v50, %v5951_v31 }
 0x7af   : > { %v13087_v18 = vsub.f32 %v13019_v62, %v5959_v44  ;;  %v13090_v60 = vsub.f32 %v13021_v63, %v5959_v44  ;;  %v13093_v59 = vsub.f32 %v13027_v28, %v5959_v44  ;;  %v13096_v6 = vsub.f32 %v13031_v20, %v5959_v44 }
 0x7b0   : > { %v13099_v55 = vsub.f32 %v13035_v51, %v5959_v44  ;;  %v13112_v28 = vsub.f32 %v13039_v37, %v5959_v44  ;;  %v13119_v19 = vsub.f32 %v13041_v40, %v5959_v44  ;;  %v13127_v37 = vsub.f32 %v13045_v27, %v5959_v44 }
 0x7b1   : > { %v5976_v58 = vmul.f32 %v13087_v18, %v13087_v18  ;;  %v5977_v62 = vmul.f32 %v13090_v60, %v13090_v60  ;;  %v5978_v63 = vmul.f32 %v13093_v59, %v13093_v59  ;;  %v5979_v20 = vmul.f32 %v13096_v6, %v13096_v6 }
 0x7b2   : > { %v5980_v38 = vmul.f32 %v13099_v55, %v13099_v55  ;;  %v5981_v14 = vmul.f32 %v13112_v28, %v13112_v28  ;;  %v13135_v40 = vsub.f32 %v13049_v15, %v5959_v44  ;;  %v5982_v25 = vmul.f32 %v13119_v19, %v13119_v19 }
 0x7b3   : > { %v5992_v51 = vsel %vm1063_vm2, %v5976_v58, 0.0  ;;  %v5993_v48 = vsel %vm1063_vm2, %v5977_v62, 0.0  ;;  %v5995_v61 = vsel %vm1063_vm2, %v5978_v63, 0.0  ;;  %v5997_v36 = vsel %vm1063_vm2, %v5979_v20, 0.0 }
 0x7b4   : > { %v5994_v9 = vadd.f32 %v5993_v48, %v5992_v51  ;;  %v5999_v26 = vsel %vm1063_vm2, %v5980_v38, 0.0  ;;  %v13143_v27 = vsub.f32 %v13053_v11, %v5959_v44  ;;  %v5983_v0 = vmul.f32 %v13127_v37, %v13127_v37  ;;  %v13183_v51 = vpop.permute.xlu0 %6099  ;;  %v13186_v38 = vpop.permute.xlu1 %6104 }
 0x7b5   : > { %v6001_v30 = vsel %vm1063_vm2, %v5981_v14, 0.0  ;;  %v13149_v15 = vsub.f32 %v13057_v17, %v5959_v44  ;;  %v5984_v54 = vmul.f32 %v13135_v40, %v13135_v40  ;;  %v6003_v8 = vsel %vm1063_vm2, %v5982_v25, 0.0 }
 0x7b6   : > { %v5996_v12 = vadd.f32 %v5995_v61, %v5994_v9  ;;  %v13155_v2 = vsub.f32 %v13061_v35, %v5959_v44  ;;  %v5985_v11 = vmul.f32 %v13143_v27, %v13143_v27  ;;  %v6005_v46 = vsel %vm1063_vm2, %v5983_v0, 0.0 }
 0x7b7   : > { %v13163_v17 = vsub.f32 %v13065_v22, %v5959_v44  ;;  %v5986_v56 = vmul.f32 %v13149_v15, %v13149_v15  ;;  %v6007_v29 = vsel %vm1063_vm2, %v5984_v54, 0.0  ;;  %v5973_v35 = vsub.f32 %v13069_v43, %v5959_v44 }
 0x7b8   : > { %v5998_v32 = vadd.f32 %v5997_v36, %v5996_v12  ;;  %v5987_v34 = vmul.f32 %v13155_v2, %v13155_v2  ;;  %v6009_v39 = vsel %vm1063_vm2, %v5985_v11, 0.0  ;;  %v5974_v22 = vsub.f32 %v13073_v5, %v5959_v44 }
 0x7b9   : > { %v5988_v42 = vmul.f32 %v13163_v17, %v13163_v17  ;;  %v6011_v4 = vsel %vm1063_vm2, %v5986_v56, 0.0  ;;  %v5975_v16 = vsub.f32 %v13079_v47, %v5959_v44  ;;  %v5989_v31 = vmul.f32 %v5973_v35, %v5973_v35  ;;  %v6110_v47 = vpop.permute.xlu2 %6109 }
 0x7ba   : > { %v6000_v3 = vadd.f32 %v5999_v26, %v5998_v32  ;;  %v6013_v43 = vsel %vm1063_vm2, %v5987_v34, 0.0  ;;  %v5990_v62 = vmul.f32 %v5974_v22, %v5974_v22 }
 0x7bb   : > { %v6015_v63 = vsel %vm1063_vm2, %v5988_v42, 0.0  ;;  %v5991_v48 = vmul.f32 %v5975_v16, %v5975_v16  ;;  %v6017_v5 = vsel %vm1063_vm2, %v5989_v31, 0.0 }
 0x7bc   : > { %v6002_v33 = vadd.f32 %v6001_v30, %v6000_v3  ;;  %v6019_v61 = vsel %vm1063_vm2, %v5990_v62, 0.0  ;;  %v6135_v25 = vpop.permute.xlu0 %6134  ;;  %v6130_v3 = vpop.permute.xlu1 %6129 }
 0x7bd   : > { %v6021_v44 = vsel %vm1063_vm2, %v5991_v48, 0.0 }
 0x7be   : > { %v6004_v53 = vadd.f32 %v6003_v8, %v6002_v33 }
 0x7c0   : > { %v6006_v7 = vadd.f32 %v6005_v46, %v6004_v53 }
 0x7c1   : > { %v6231_v30 = vpop.permute.xlu2 %6230 }
 0x7c2   : > { %v6008_v13 = vadd.f32 %v6007_v29, %v6006_v7 }
 0x7c4   : > { %v6010_v21 = vadd.f32 %v6009_v39, %v6008_v13  ;;  %v6125_v53 = vpop.permute.xlu0 %6124  ;;  %v6226_v46 = vpop.permute.xlu1 %6225 }
 0x7c6   : > { %v6012_v49 = vadd.f32 %v6011_v4, %v6010_v21 }
 0x7c8   : > { %v6014_v58 = vadd.f32 %v6013_v43, %v6012_v49 }
 0x7c9   : > { %v6120_v7 = vpop.permute.xlu2 %6119 }
 0x7ca   : > { %v6016_v20 = vadd.f32 %v6015_v63, %v6014_v58 }
 0x7cc   : > { %v6018_v9 = vadd.f32 %v6017_v5, %v6016_v20  ;;  %v6221_v29 = vpop.permute.xlu0 %6220  ;;  %v6115_v34 = vpop.permute.xlu1 %6114 }
 0x7ce   : > { %v6020_v12 = vadd.f32 %v6019_v61, %v6018_v9 }
 0x7d0   : > { %v6022_v14 = vadd.f32 %v6021_v44, %v6020_v12 }
 0x7d1   : > { %v6216_v21 = vpop.permute.xlu2 %6215 }
 0x7d2   : > { %v6023_v36 = vrot.slane %v6022_v14, 4 }
 0x7d4   : > { %v6024_v32 = vadd.f32 %v6023_v36, %v6022_v14  ;;  %v6211_v31 = vpop.permute.xlu0 %6210  ;;  %v6206_v20 = vpop.permute.xlu1 %6205 }
 0x7d6   : > { %v6025_v26 = vrot.slane %v6024_v32, 2 }
 0x7d8   : > { %v6026_v0 = vadd.f32 %v6025_v26, %v6024_v32 }
 0x7d9   : > { %v6201_v12 = vpop.permute.xlu2 %6200 }
 0x7da   : > { %v6027_v33 = vrot.slane %v6026_v0, 1 }
 0x7dc   : > { %v6028_v54 = vadd.f32 %v6027_v33, %v6026_v0  ;;  %v6196_v26 = vpop.permute.xlu0 %6195 }
 0x7de   : > { %v6029_v8 = vmul.f32 %v6028_v54, %v13083_v50 }
 0x7e0   : > { %v6030_v11 = vadd.f32 1e-05, %v6029_v8 }
 0x7e1   : > { %v6186_v8 = vpop.permute.xlu2 %6185 }
 0x7e2   : > { %7540 = vrsqrt.f32 %v6030_v11  ;;  %vm6037_vm5 = vweird.f32 %v6030_v11 }
 0x7e8   : > { %v7541_v56 = vpop.eup %7540 }
 0x7e9   : > { %v6032_v13 = vmul.f32 %v7541_v56, %v6030_v11  ;;  %vm6038_vm4 = vweird.f32 %v7541_v56 }
 0x7ea   : > { %vm6039_vm6 = vmor %vm6037_vm5, %vm6038_vm4 }
 0x7eb   : > { %v6033_v39 = vmul.f32 %v7541_v56, %v6032_v13 }
 0x7ed   : > { %v6034_v42 = vmul.f32 0.5, %v6033_v39 }
 0x7ef   : > { %v6035_v4 = vsub.f32 1.5, %v6034_v42 }
 0x7f1   : > { %v6036_v49 = vmul.f32 %v7541_v56, %v6035_v4 }
 0x7f3   : > { %v6040_v43 = vsel %vm6039_vm6, %v7541_v56, %v6036_v49 }
 0x7f4   : > { %v6056_v58 = vmul.f32 %v6040_v43, %v5975_v16  ;;  %v6055_v62 = vmul.f32 %v6040_v43, %v5974_v22  ;;  %v6054_v63 = vmul.f32 %v6040_v43, %v5973_v35  ;;  %v6050_v48 = vmul.f32 %v6040_v43, %v13143_v27 }
 0x7f5   : > { %v6053_v61 = vmul.f32 %v6040_v43, %v13163_v17  ;;  %v6052_v36 = vmul.f32 %v6040_v43, %v13155_v2  ;;  %v6051_v35 = vmul.f32 %v6040_v43, %v13149_v15  ;;  %v6044_v22 = vmul.f32 %v6040_v43, %v13096_v6  ;;  %v6191_v6 = vpop.permute.xlu1 %6190 }
 0x7f6   : > { %v6152_v5 = vmul.f32 %v6135_v25, %v6056_v58  ;;  %v6151_v9 = vmul.f32 %v6130_v3, %v6055_v62  ;;  %v6150_v14 = vmul.f32 %v6125_v53, %v6054_v63  ;;  %v6043_v27 = vmul.f32 %v6040_v43, %v13093_v59  ;;  %v6253_v58 = vld [vmem:[%s7718_s16 + $0x20] sm:$0xff]  ;;  %v6254_v62 = vld [vmem:[%s7718_s16 + $0x28] sm:$0xff]  ;;  %v6255_v63 = vld [vmem:[%s7718_s16 + $0x30] sm:$0xff] }
 0x7f7   : > { %v6149_v16 = vmul.f32 %v6120_v7, %v6053_v61  ;;  %v6148_v25 = vmul.f32 %v6115_v34, %v6052_v36  ;;  %v6140_v3 = vmul.f32 %v13132_v45, %v6044_v22  ;;  %v6049_v15 = vmul.f32 %v6040_v43, %v13135_v40  ;;  %v6181_v7 = vpop.permute.xlu0 %6180  ;;  %v6260_v61 = vld [vmem:[%s7718_s16 + $0x58] sm:$0xff]  ;;  %v6263_v36 = vld [vmem:[%s7718_s16 + $0x70] sm:$0xff] }
 0x7f8   : > { %v13193_v44 = vadd.f32 %v6231_v30, %v6152_v5  ;;  %v13197_v32 = vadd.f32 %v6226_v46, %v6151_v9  ;;  %v13203_v17 = vadd.f32 %v6221_v29, %v6150_v14  ;;  %v6139_v2 = vmul.f32 %v13124_v10, %v6043_v27  ;;  %v6171_v29 = vpop.permute.xlu2 %6170  ;;  %v6258_v5 = vld [vmem:[%s7718_s16 + $0x48] sm:$0xff]  ;;  %v6259_v9 = vld [vmem:[%s7718_s16 + $0x50] sm:$0xff] }
 0x7f9   : > { %v13208_v0 = vadd.f32 %v6216_v21, %v6149_v16  ;;  %v6147_v30 = vmul.f32 %v6110_v47, %v6051_v35  ;;  %v13212_v59 = vadd.f32 %v6211_v31, %v6148_v25  ;;  %v6146_v33 = vmul.f32 %v13186_v38, %v6050_v48  ;;  %v6249_v31 = vld [vmem:[%s7718_s16] sm:$0xff]  ;;  %v6262_v14 = vld [vmem:[%s7718_s16 + $0x68] sm:$0xff]  ;;  %v6264_v16 = vld [vmem:[%s7718_s16 + $0x78] sm:$0xff] }
 0x7fa   : > { %6265 = vmatpush.msra.mxu1 %v13193_v44  ;;  %v6048_v54 = vmul.f32 %v6040_v43, %v13127_v37  ;;  %v6145_v45 = vmul.f32 %v13183_v51, %v6049_v15  ;;  %v6047_v47 = vmul.f32 %v6040_v43, %v13119_v19  ;;  %v6046_v11 = vmul.f32 %v6040_v43, %v13112_v28  ;;  %v6257_v48 = vld [vmem:[%s7718_s16 + $0x40] sm:$0xff] }
 0x7fb   : > { %v13217_v10 = vadd.f32 %v6206_v20, %v6147_v30  ;;  %v13222_v40 = vadd.f32 %v6201_v12, %v6146_v33  ;;  %v6045_v46 = vmul.f32 %v6040_v43, %v13099_v55  ;;  %v6042_v55 = vmul.f32 %v6040_v43, %v13090_v60  ;;  %v6256_v20 = vld [vmem:[%s7718_s16 + $0x38] sm:$0xff]  ;;  %v6261_v12 = vld [vmem:[%s7718_s16 + $0x60] sm:$0xff] }
 0x7fc   : > { %6266 = vmatpush.msra.mxu1 %v13197_v32  ;;  %v6144_v53 = vmul.f32 %v13174_v52, %v6048_v54  ;;  %v13227_v37 = vadd.f32 %v6196_v26, %v6145_v45  ;;  %v6143_v38 = vmul.f32 %v13168_v1, %v6047_v47  ;;  %v6142_v51 = vmul.f32 %v13160_v57, %v6046_v11 }
 0x7fd   : > { %v6176_v56 = vpop.permute.xlu1 %6175  ;;  %v6141_v28 = vmul.f32 %v13140_v24, %v6045_v46  ;;  %v6041_v57 = vmul.f32 %v6040_v43, %v13087_v18  ;;  %v13248_v34 = vadd.f32 %v6171_v29, %v6140_v3  ;;  %v6138_v24 = vmul.f32 %v13107_v41, %v6042_v55  ;;  %v6250_v41 = vld [vmem:[%s7718_s16 + $0x8] sm:$0xff]  ;;  %v6251_v43 = vld [vmem:[%s7718_s16 + $0x10] sm:$0xff] }
 0x7fe   : > { %6267 = vmatpush.msra.mxu1 %v13203_v17  ;;  %v13232_v19 = vadd.f32 %v6191_v6, %v6144_v53  ;;  %v13236_v52 = vadd.f32 %v6186_v8, %v6143_v38  ;;  %v13240_v1 = vadd.f32 %v6181_v7, %v6142_v51 }
 0x7ff   : > { %v13244_v13 = vadd.f32 %v6176_v56, %v6141_v28  ;;  %v6166_v39 = vpop.permute.xlu0 %6165  ;;  %v6137_v21 = vmul.f32 %v13101_v23, %v6041_v57  ;;  %v6252_v23 = vld [vmem:[%s7718_s16 + $0x18] sm:$0xff] }
 0x800   : > { %6268 = vmatpush.msra.mxu1 %v13208_v0  ;;  %v6235_v60 = vadd.f32 %v6166_v39, %v6139_v2  ;;  %v6156_v4 = vpop.permute.xlu2 %6155 }
 0x801   : > { %v6233_v49 = vadd.f32 %v6156_v4, %v6137_v21 }
 0x802   : > { %6269 = vmatpush.msra.mxu1 %v13212_v59 }
 0x804   : > { %6270 = vmatpush.msra.mxu1 %v13217_v10 }
 0x805   : > { %v6161_v42 = vpop.permute.xlu1 %6160 }
 0x806   : > { %6271 = vmatpush.msra.mxu1 %v13222_v40  ;;  %v6234_v18 = vadd.f32 %v6161_v42, %v6138_v24 }
 0x807   : > { %v6365_v27 = vpop.permute.xlu0 %6364 }
 0x808   : > { %6272 = vmatpush.msra.mxu1 %v13227_v37  ;;  %v6375_v45 = vpop.permute.xlu2 %6374 }
 0x80a   : > { %6273 = vmatpush.msra.mxu1 %v13232_v19 }
 0x80c   : > { %6274 = vmatpush.msra.mxu1 %v13236_v52 }
 0x80d   : > { %v6370_v2 = vpop.permute.xlu1 %6369 }
 0x80e   : > { %6275 = vmatpush.msra.mxu1 %v13240_v1 }
 0x80f   : > { %v6380_v7 = vpop.permute.xlu0 %6379 }
 0x810   : > { %6276 = vmatpush.msra.mxu1 %v13244_v13 }
 0x812   : > { %6277 = vmatpush.msra.mxu1 %v13248_v34 }
 0x814   : > { %6278 = vmatpush.msra.mxu1 %v6235_v60 }
 0x815   : > { %v6385_v57 = vpop.permute.xlu1 %6384 }
 0x816   : > { %6279 = vmatpush.msra.mxu1 %v6234_v18 }
 0x818   : > { %6280 = vmatpush.msra.mxu1 %v6233_v49 }
 0x819   : > { %6281 = vmatmul.f32.vlgmr.msra.gmra.mxu1 %v6249_v31  ;;  %v6390_v31 = vpop.permute.xlu2 %6389 }
 0x821   : > { %6284 = vmatmul.f32.gmra.mxu1 %v6250_v41 }
 0x829   : > { %6287 = vmatmul.f32.gmra.mxu1 %v6251_v43  ;;  %v6395_v43 = vpop.permute.xlu0 %6394 }
 0x831   : > { %6290 = vmatmul.f32.gmra.mxu1 %v6252_v23  ;;  %v6400_v23 = vpop.permute.xlu1 %6399 }
 0x839   : > { %6293 = vmatmul.f32.gmra.mxu1 %v6253_v58 }
 0x841   : > { %6296 = vmatmul.f32.gmra.mxu1 %v6254_v62 }
 0x849   : > { %6299 = vmatmul.f32.gmra.mxu1 %v6255_v63 }
 0x851   : > { %6302 = vmatmul.f32.gmra.mxu1 %v6256_v20 }
 0x859   : > { %6305 = vmatmul.f32.gmra.mxu1 %v6257_v48 }
 0x861   : > { %6308 = vmatmul.f32.gmra.mxu1 %v6258_v5 }
 0x869   : > { %6311 = vmatmul.f32.gmra.mxu1 %v6259_v9 }
 0x871   : > { %6314 = vmatmul.f32.gmra.mxu1 %v6260_v61  ;;  %v6410_v61 = vpop.permute.xlu0 %6409 }
 0x879   : > { %6317 = vmatmul.f32.gmra.mxu1 %v6261_v12 }
 0x881   : > { %6320 = vmatmul.f32.gmra.mxu1 %v6262_v14 }
 0x889   : > { %6323 = vmatmul.f32.gmra.mxu1 %v6263_v36  ;;  %v6415_v36 = vpop.permute.xlu1 %6414 }
 0x891   : > { %6326 = vmatmul.f32.gmra.mxu1 %v6264_v16 }
 0x896   : > { %v6282_v35 = vpop.f32.mrf.mxu1 }
 0x897   : > { %v6330_v22 = vadd.f32 %v6282_v35, %v6233_v49 }
 0x899   : > { %v13269_v26 = vadd.f32 %v6365_v27, %v6330_v22 }
 0x89b   : > { %v6490_v15 = vsel %vm1063_vm2, %v13269_v26, 0.0 }
 0x89e   : > { %v6285_v25 = vpop.f32.mrf.mxu1 }
 0x89f   : > { %v6331_v3 = vadd.f32 %v6285_v25, %v6234_v18 }
 0x8a1   : > { %v13271_v30 = vadd.f32 %v6370_v2, %v6331_v3 }
 0x8a3   : > { %v6491_v6 = vsel %vm1063_vm2, %v13271_v30, 0.0 }
 0x8a4   : > { %v6492_v33 = vadd.f32 %v6491_v6, %v6490_v15 }
 0x8a6   : > { %v6288_v54 = vpop.f32.mrf.mxu1 }
 0x8a7   : > { %v6332_v8 = vadd.f32 %v6288_v54, %v6235_v60 }
 0x8a9   : > { %v13277_v47 = vadd.f32 %v6375_v45, %v6332_v8  ;;  %v6425_v45 = vpop.permute.xlu0 %6424 }
 0x8ab   : > { %v6493_v53 = vsel %vm1063_vm2, %v13277_v47, 0.0 }
 0x8ac   : > { %v6494_v11 = vadd.f32 %v6493_v53, %v6492_v33 }
 0x8ae   : > { %v6291_v38 = vpop.f32.mrf.mxu1 }
 0x8af   : > { %v6333_v46 = vadd.f32 %v6291_v38, %v13248_v34 }
 0x8b1   : > { %v13282_v51 = vadd.f32 %v6380_v7, %v6333_v46  ;;  %v6430_v7 = vpop.permute.xlu1 %6429 }
 0x8b3   : > { %v6495_v56 = vsel %vm1063_vm2, %v13282_v51, 0.0 }
 0x8b4   : > { %v6496_v28 = vadd.f32 %v6495_v56, %v6494_v11 }
 0x8b6   : > { %v6294_v29 = vpop.f32.mrf.mxu1 }
 0x8b7   : > { %v6334_v55 = vadd.f32 %v6294_v29, %v13244_v13  ;;  %v6405_v13 = vpop.permute.xlu2 %6404 }
 0x8b9   : > { %v13287_v24 = vadd.f32 %v6385_v57, %v6334_v55 }
 0x8bb   : > { %v6497_v39 = vsel %vm1063_vm2, %v13287_v24, 0.0 }
 0x8bc   : > { %v6498_v60 = vadd.f32 %v6497_v39, %v6496_v28 }
 0x8be   : > { %v6297_v21 = vpop.f32.mrf.mxu1 }
 0x8bf   : > { %v6335_v58 = vadd.f32 %v6297_v21, %v13240_v1  ;;  %v6420_v22 = vpop.permute.xlu2 %6419 }
 0x8c1   : > { %v13293_v20 = vadd.f32 %v6390_v31, %v6335_v58 }
 0x8c3   : > { %v6499_v12 = vsel %vm1063_vm2, %v13293_v20, 0.0 }
 0x8c4   : > { %v6500_v27 = vadd.f32 %v6499_v12, %v6498_v60 }
 0x8c6   : > { %v6300_v42 = vpop.f32.mrf.mxu1 }
 0x8c7   : > { %v6336_v63 = vadd.f32 %v6300_v42, %v13236_v52  ;;  %v6435_v29 = vpop.permute.xlu2 %6434 }
 0x8c9   : > { %v13296_v5 = vadd.f32 %v6395_v43, %v6336_v63 }
 0x8cb   : > { %v6501_v52 = vsel %vm1063_vm2, %v13296_v5, 0.0 }
 0x8cc   : > { %v6502_v2 = vadd.f32 %v6501_v52, %v6500_v27 }
 0x8ce   : > { %v6303_v34 = vpop.f32.mrf.mxu1 }
 0x8cf   : > { %v6337_v48 = vadd.f32 %v6303_v34, %v13232_v19 }
 0x8d1   : > { %v13301_v14 = vadd.f32 %v6400_v23, %v6337_v48  ;;  %v13348_v48 = vpop.permute.xlu2 %6632 }
 0x8d6   : > { %v6306_v18 = vpop.f32.mrf.mxu1 }
 0x8d7   : > { %v6338_v9 = vadd.f32 %v6306_v18, %v13227_v37  ;;  %v6503_v37 = vsel %vm1063_vm2, %v13301_v14, 0.0  ;;  %v6440_v18 = vpop.permute.xlu0 %6439 }
 0x8d8   : > { %v6504_v33 = vadd.f32 %v6503_v37, %v6502_v2 }
 0x8d9   : > { %v13306_v35 = vadd.f32 %v6405_v13, %v6338_v9  ;;  %v13370_v27 = vpop.permute.xlu2 %6647 }
 0x8de   : > { %v6309_v4 = vpop.f32.mrf.mxu1 }
 0x8df   : > { %v6339_v1 = vadd.f32 %v6309_v4, %v13222_v40  ;;  %v6505_v40 = vsel %vm1063_vm2, %v13306_v35, 0.0  ;;  %v13363_v52 = vpop.permute.xlu0 %6637 }
 0x8e0   : > { %v6506_v53 = vadd.f32 %v6505_v40, %v6504_v33 }
 0x8e1   : > { %v13311_v25 = vadd.f32 %v6410_v61, %v6339_v1 }
 0x8e6   : > { %v6312_v49 = vpop.f32.mrf.mxu1 }
 0x8e7   : > { %v6340_v19 = vadd.f32 %v6312_v49, %v13217_v10  ;;  %v6507_v10 = vsel %vm1063_vm2, %v13311_v25, 0.0 }
 0x8e9   : > { %v13316_v15 = vadd.f32 %v6415_v36, %v6340_v19 }
 0x8ee   : > { %v6315_v41 = vpop.f32.mrf.mxu1 }
 0x8ef   : > { %v6341_v3 = vadd.f32 %v6315_v41, %v13212_v59  ;;  %v6509_v59 = vsel %vm1063_vm2, %v13316_v15, 0.0 }
 0x8f1   : > { %v13321_v54 = vadd.f32 %v6420_v22, %v6341_v3 }
 0x8f3   : > { %v6511_v56 = vsel %vm1063_vm2, %v13321_v54, 0.0 }
 0x8f6   : > { %v6318_v62 = vpop.f32.mrf.mxu1 }
 0x8f7   : > { %v6342_v6 = vadd.f32 %v6318_v62, %v13208_v0  ;;  %v6508_v0 = vadd.f32 %v6507_v10, %v6506_v53  ;;  %v13346_v62 = vpop.permute.xlu1 %6627  ;;  %v13391_v10 = vpop.permute.xlu0 %6652 }
 0x8f9   : > { %v13326_v38 = vadd.f32 %v6425_v45, %v6342_v6  ;;  %v6510_v55 = vadd.f32 %v6509_v59, %v6508_v0 }
 0x8fb   : > { %v6512_v39 = vadd.f32 %v6511_v56, %v6510_v55 }
 0x8fe   : > { %v6321_v16 = vpop.f32.mrf.mxu1 }
 0x8ff   : > { %v6343_v8 = vadd.f32 %v6321_v16, %v13203_v17  ;;  %v6513_v17 = vsel %vm1063_vm2, %v13326_v38, 0.0  ;;  %v13368_v22 = vpop.permute.xlu1 %6642 }
 0x900   : > { %v6514_v21 = vadd.f32 %v6513_v17, %v6512_v39 }
 0x901   : > { %v13331_v28 = vadd.f32 %v6430_v7, %v6343_v8 }
 0x903   : > { %v6515_v60 = vsel %vm1063_vm2, %v13331_v28, 0.0 }
 0x904   : > { %v6516_v4 = vadd.f32 %v6515_v60, %v6514_v21 }
 0x906   : > { %v6324_v11 = vpop.f32.mrf.mxu1 }
 0x907   : > { %v6344_v46 = vadd.f32 %v6324_v11, %v13197_v32  ;;  %v13393_v8 = vpop.permute.xlu1 %6657 }
 0x909   : > { %v13335_v57 = vadd.f32 %v6435_v29, %v6344_v46 }
 0x90b   : > { %v6517_v42 = vsel %vm1063_vm2, %v13335_v57, 0.0 }
 0x90c   : > { %v6518_v31 = vadd.f32 %v6517_v42, %v6516_v4 }
 0x90e   : > { %v6327_v32 = vpop.f32.mrf.mxu1 }
 0x90f   : > { %v6345_v34 = vadd.f32 %v6327_v32, %v13193_v44  ;;  %v13429_v4 = vpop.permute.xlu1 %6672 }
 0x911   : > { %v13342_v49 = vadd.f32 %v6440_v18, %v6345_v34  ;;  %v13427_v34 = vpop.permute.xlu0 %6667 }
 0x913   : > { %v6519_v41 = vsel %vm1063_vm2, %v13342_v49, 0.0 }
 0x914   : > { %v6520_v43 = vadd.f32 %v6519_v41, %v6518_v31 }
 0x916   : > { %v6521_v23 = vrot.slane %v6520_v43, 4 }
 0x918   : > { %v6522_v58 = vadd.f32 %v6521_v23, %v6520_v43 }
 0x91a   : > { %v6523_v13 = vrot.slane %v6522_v58, 2 }
 0x91c   : > { %v6524_v63 = vadd.f32 %v6523_v13, %v6522_v58 }
 0x91e   : > { %v6525_v9 = vrot.slane %v6524_v63, 1 }
 0x920   : > { %v6526_v61 = vadd.f32 %v6525_v9, %v6524_v63 }
 0x922   : > { %v6527_v44 = vmul.f32 %v6526_v61, %v13083_v50 }
 0x924   : > { %v13352_v12 = vsub.f32 %v13269_v26, %v6527_v44  ;;  %v13355_v1 = vsub.f32 %v13271_v30, %v6527_v44  ;;  %v13358_v36 = vsub.f32 %v13277_v47, %v6527_v44  ;;  %v13361_v16 = vsub.f32 %v13282_v51, %v6527_v44 }
 0x925   : > { %v13366_v19 = vsub.f32 %v13287_v24, %v6527_v44  ;;  %v13379_v51 = vsub.f32 %v13293_v20, %v6527_v44  ;;  %v13386_v40 = vsub.f32 %v13296_v5, %v6527_v44  ;;  %v13396_v45 = vsub.f32 %v13301_v14, %v6527_v44  ;;  %v13401_v5 = vpop.permute.xlu2 %6662 }
 0x926   : > { %v6544_v26 = vmul.f32 %v13352_v12, %v13352_v12  ;;  %v6545_v30 = vmul.f32 %v13355_v1, %v13355_v1  ;;  %v6546_v47 = vmul.f32 %v13358_v36, %v13358_v36  ;;  %v6547_v24 = vmul.f32 %v13361_v16, %v13361_v16 }
 0x927   : > { %v6548_v6 = vmul.f32 %v13366_v19, %v13366_v19  ;;  %v6549_v53 = vmul.f32 %v13379_v51, %v13379_v51  ;;  %v13404_v46 = vsub.f32 %v13306_v35, %v6527_v44  ;;  %v6550_v7 = vmul.f32 %v13386_v40, %v13386_v40 }
 0x928   : > { %v6560_v37 = vsel %vm1063_vm2, %v6544_v26, 0.0  ;;  %v6561_v3 = vsel %vm1063_vm2, %v6545_v30, 0.0  ;;  %v6563_v33 = vsel %vm1063_vm2, %v6546_v47, 0.0  ;;  %v6565_v11 = vsel %vm1063_vm2, %v6547_v24, 0.0 }
 0x929   : > { %v6562_v2 = vadd.f32 %v6561_v3, %v6560_v37  ;;  %v6567_v0 = vsel %vm1063_vm2, %v6548_v6, 0.0  ;;  %v13410_v14 = vsub.f32 %v13311_v25, %v6527_v44  ;;  %v6551_v29 = vmul.f32 %v13396_v45, %v13396_v45  ;;  %v13460_v3 = vpop.permute.xlu0 %6682  ;;  %v13462_v6 = vpop.permute.xlu1 %6687 }
 0x92a   : > { %v6569_v55 = vsel %vm1063_vm2, %v6549_v53, 0.0  ;;  %v13416_v39 = vsub.f32 %v13316_v15, %v6527_v44  ;;  %v6552_v35 = vmul.f32 %v13404_v46, %v13404_v46  ;;  %v6571_v60 = vsel %vm1063_vm2, %v6550_v7, 0.0 }
 0x92b   : > { %v6564_v20 = vadd.f32 %v6563_v33, %v6562_v2  ;;  %v13422_v32 = vsub.f32 %v13321_v54, %v6527_v44  ;;  %v6553_v25 = vmul.f32 %v13410_v14, %v13410_v14  ;;  %v6573_v42 = vsel %vm1063_vm2, %v6551_v29, 0.0 }
 0x92c   : > { %v13432_v15 = vsub.f32 %v13326_v38, %v6527_v44  ;;  %v6554_v31 = vmul.f32 %v13416_v39, %v13416_v39  ;;  %v6575_v41 = vsel %vm1063_vm2, %v6552_v35, 0.0  ;;  %v13440_v23 = vsub.f32 %v13331_v28, %v6527_v44 }
 0x92d   : > { %v6566_v59 = vadd.f32 %v6565_v11, %v6564_v20  ;;  %v13437_v54 = vpop.permute.xlu2 %6677  ;;  %v6555_v58 = vmul.f32 %v13422_v32, %v13422_v32  ;;  %v6577_v13 = vsel %vm1063_vm2, %v6553_v25, 0.0  ;;  %v13446_v38 = vsub.f32 %v13335_v57, %v6527_v44 }
 0x92e   : > { %v6556_v9 = vmul.f32 %v13432_v15, %v13432_v15  ;;  %v6579_v61 = vsel %vm1063_vm2, %v6554_v31, 0.0  ;;  %v13452_v30 = vsub.f32 %v13342_v49, %v6527_v44  ;;  %v6557_v28 = vmul.f32 %v13440_v23, %v13440_v23 }
 0x92f   : > { %v6568_v56 = vadd.f32 %v6567_v0, %v6566_v59  ;;  %v6581_v47 = vsel %vm1063_vm2, %v6555_v58, 0.0  ;;  %v6558_v37 = vmul.f32 %v13446_v38, %v13446_v38 }
 0x930   : > { %v6583_v57 = vsel %vm1063_vm2, %v6556_v9, 0.0  ;;  %v6559_v49 = vmul.f32 %v13452_v30, %v13452_v30  ;;  %v6585_v44 = vsel %vm1063_vm2, %v6557_v28, 0.0 }
 0x931   : > { %v6570_v17 = vadd.f32 %v6569_v55, %v6568_v56  ;;  %v6587_v53 = vsel %vm1063_vm2, %v6558_v37, 0.0  ;;  %v13471_v56 = vpop.permute.xlu0 %6697  ;;  %v13473_v55 = vpop.permute.xlu1 %6702 }
 0x932   : > { %v6589_v59 = vsel %vm1063_vm2, %v6559_v49, 0.0 }
 0x933   : > { %v6572_v21 = vadd.f32 %v6571_v60, %v6570_v17 }
 0x935   : > { %v6574_v18 = vadd.f32 %v6573_v42, %v6572_v21  ;;  %v13467_v33 = vpop.permute.xlu2 %6692 }
 0x937   : > { %v6576_v43 = vadd.f32 %v6575_v41, %v6574_v18 }
 0x939   : > { %v6578_v63 = vadd.f32 %v6577_v13, %v6576_v43  ;;  %v6729_v42 = vpop.permute.xlu0 %6728  ;;  %v6734_v31 = vpop.permute.xlu1 %6733 }
 0x93b   : > { %v6580_v26 = vadd.f32 %v6579_v61, %v6578_v63 }
 0x93d   : > { %v6582_v24 = vadd.f32 %v6581_v47, %v6580_v26  ;;  %v6724_v17 = vpop.permute.xlu2 %6723 }
 0x93f   : > { %v6584_v2 = vadd.f32 %v6583_v57, %v6582_v24 }
 0x941   : > { %v6586_v20 = vadd.f32 %v6585_v44, %v6584_v2  ;;  %v6744_v13 = vpop.permute.xlu0 %6743  ;;  %v6749_v63 = vpop.permute.xlu1 %6748 }
 0x943   : > { %v6588_v11 = vadd.f32 %v6587_v53, %v6586_v20 }
 0x945   : > { %v6590_v7 = vadd.f32 %v6589_v59, %v6588_v11  ;;  %v6739_v41 = vpop.permute.xlu2 %6738 }
 0x947   : > { %v6591_v0 = vrot.slane %v6590_v7, 4 }
 0x949   : > { %v6592_v29 = vadd.f32 %v6591_v0, %v6590_v7  ;;  %v6759_v37 = vpop.permute.xlu0 %6758  ;;  %v6764_v57 = vpop.permute.xlu1 %6763 }
 0x94b   : > { %v6593_v35 = vrot.slane %v6592_v29, 2 }
 0x94d   : > { %v6594_v60 = vadd.f32 %v6593_v35, %v6592_v29  ;;  %v6754_v61 = vpop.permute.xlu2 %6753 }
 0x94f   : > { %v6595_v21 = vrot.slane %v6594_v60, 1 }
 0x951   : > { %v6596_v25 = vadd.f32 %v6595_v21, %v6594_v60  ;;  %v6774_v60 = vpop.permute.xlu0 %6773 }
 0x953   : > { %v6597_v18 = vmul.f32 %v6596_v25, %v13083_v50  ;;  %v6779_v25 = vpop.permute.xlu1 %6778 }
 0x955   : > { %v6598_v43 = vadd.f32 1e-05, %v6597_v18  ;;  %v6769_v50 = vpop.permute.xlu2 %6768 }
 0x957   : > { %7542 = vrsqrt.f32 %v6598_v43  ;;  %vm6605_vm8 = vweird.f32 %v6598_v43 }
 0x95d   : > { %v7543_v58 = vpop.eup %7542  ;;  %v6784_v18 = vpop.permute.xlu2 %6783 }
 0x95e   : > { %v6600_v9 = vmul.f32 %v7543_v58, %v6598_v43  ;;  %vm6606_vm7 = vweird.f32 %v7543_v58 }
 0x95f   : > { %vm6607_vm9 = vmor %vm6605_vm8, %vm6606_vm7 }
 0x960   : > { %v6601_v26 = vmul.f32 %v7543_v58, %v6600_v9 }
 0x962   : > { %v6602_v28 = vmul.f32 0.5, %v6601_v26 }
 0x964   : > { %v6603_v47 = vsub.f32 1.5, %v6602_v28 }
 0x966   : > { %v6604_v24 = vmul.f32 %v7543_v58, %v6603_v47 }
 0x968   : > { %v6608_v2 = vsel %vm6607_vm9, %v7543_v58, %v6604_v24  ;;  %v6789_v58 = vpop.permute.xlu0 %6788 }
 0x969   : > { %v6609_v49 = vmul.f32 %v6608_v2, %v13352_v12  ;;  %v6610_v44 = vmul.f32 %v6608_v2, %v13355_v1  ;;  %v6611_v20 = vmul.f32 %v6608_v2, %v13358_v36  ;;  %v6612_v53 = vmul.f32 %v6608_v2, %v13361_v16 }
 0x96a   : > { %v6614_v11 = vmul.f32 %v6608_v2, %v13379_v51  ;;  %v6615_v59 = vmul.f32 %v6608_v2, %v13386_v40  ;;  %v6613_v7 = vmul.f32 %v6608_v2, %v13366_v19  ;;  %v6616_v12 = vmul.f32 %v6608_v2, %v13396_v45 }
 0x96b   : > { %v6705_v0 = vmul.f32 %v13346_v62, %v6609_v49  ;;  %v6706_v29 = vmul.f32 %v13348_v48, %v6610_v44  ;;  %v6707_v35 = vmul.f32 %v13363_v52, %v6611_v20  ;;  %v6708_v1 = vmul.f32 %v13368_v22, %v6612_v53 }
 0x96c   : > { %v6617_v36 = vmul.f32 %v6608_v2, %v13404_v46  ;;  %v6709_v16 = vmul.f32 %v13370_v27, %v6613_v7  ;;  %v6618_v51 = vmul.f32 %v6608_v2, %v13410_v14  ;;  %v6619_v40 = vmul.f32 %v6608_v2, %v13416_v39 }
 0x96d   : > { %v6710_v19 = vmul.f32 %v13391_v10, %v6614_v11  ;;  %v6711_v62 = vmul.f32 %v13393_v8, %v6615_v59  ;;  %v6801_v48 = vadd.f32 %v6724_v17, %v6705_v0  ;;  %v6802_v21 = vadd.f32 %v6729_v42, %v6706_v29 }
 0x96e   : > { %v6803_v52 = vadd.f32 %v6734_v31, %v6707_v35  ;;  %v6620_v45 = vmul.f32 %v6608_v2, %v13422_v32  ;;  %v6712_v22 = vmul.f32 %v13401_v5, %v6616_v12  ;;  %v6804_v46 = vadd.f32 %v6739_v41, %v6708_v1 }
 0x96f   : > { %v6621_v27 = vmul.f32 %v6608_v2, %v13432_v15  ;;  %v6713_v14 = vmul.f32 %v13427_v34, %v6617_v36  ;;  %v6805_v39 = vadd.f32 %v6744_v13, %v6709_v16  ;;  %6817 = vst.msk [vmem:[#allocation2] sm:$0xff] %vm1063_vm2, %v6801_v48  ;;  %v6622_v10 = vmul.f32 %v6608_v2, %v13440_v23  ;;  %v6794_v13 = vpop.permute.xlu1 %6793 }
 0x970   : > { %v6714_v8 = vmul.f32 %v13429_v4, %v6618_v51  ;;  %v6806_v17 = vadd.f32 %v6749_v63, %v6710_v19  ;;  %6818 = vst.msk [vmem:[#allocation2 + $0x8] sm:$0xff] %vm1063_vm2, %v6802_v21  ;;  %v6623_v32 = vmul.f32 %v6608_v2, %v13446_v38  ;;  %v6715_v5 = vmul.f32 %v13437_v54, %v6619_v40 }
 0x971   : > { %v6807_v42 = vadd.f32 %v6754_v61, %v6711_v62  ;;  %6819 = vst.msk [vmem:[#allocation2 + $0x10] sm:$0xff] %vm1063_vm2, %v6803_v52  ;;  %v6624_v15 = vmul.f32 %v6608_v2, %v13452_v30  ;;  %v6716_v34 = vmul.f32 %v13460_v3, %v6620_v45  ;;  %v6808_v31 = vadd.f32 %v6759_v37, %v6712_v22 }
 0x972   : > { %6820 = vst.msk [vmem:[#allocation2 + $0x18] sm:$0xff] %vm1063_vm2, %v6804_v46  ;;  %v6717_v23 = vmul.f32 %v13462_v6, %v6621_v27  ;;  %v6809_v4 = vadd.f32 %v6764_v57, %v6713_v14  ;;  %v6718_v41 = vmul.f32 %v13467_v33, %v6622_v10  ;;  %v6810_v38 = vadd.f32 %v6769_v50, %v6714_v8  ;;  %v6799_v33 = vpop.permute.xlu2 %6798 }
 0x973   : > { %6821 = vst.msk [vmem:[#allocation2 + $0x20] sm:$0xff] %vm1063_vm2, %v6805_v39  ;;  %v6719_v54 = vmul.f32 %v13471_v56, %v6623_v32  ;;  %v6811_v43 = vadd.f32 %v6774_v60, %v6715_v5  ;;  %v6720_v30 = vmul.f32 %v13473_v55, %v6624_v15  ;;  %v6812_v3 = vadd.f32 %v6779_v25, %v6716_v34 }
 0x974   : > { %6822 = vst.msk [vmem:[#allocation2 + $0x28] sm:$0xff] %vm1063_vm2, %v6806_v17  ;;  %v6813_v6 = vadd.f32 %v6784_v18, %v6717_v23  ;;  %v13517_v63 = vadd.f32 %v6789_v58, %v6718_v41 }
 0x975   : > { %6823 = vst.msk [vmem:[#allocation2 + $0x30] sm:$0xff] %vm1063_vm2, %v6807_v42  ;;  %v13520_v9 = vadd.f32 %v6794_v13, %v6719_v54  ;;  %v13523_v56 = vadd.f32 %v6799_v33, %v6720_v30 }
 0x976   : > { %6824 = vst.msk [vmem:[#allocation2 + $0x38] sm:$0xff] %vm1063_vm2, %v6808_v31 }
 0x977   : > { %6825 = vst.msk [vmem:[#allocation2 + $0x40] sm:$0xff] %vm1063_vm2, %v6809_v4 }
 0x978   : > { %6826 = vst.msk [vmem:[#allocation2 + $0x48] sm:$0xff] %vm1063_vm2, %v6810_v38 }
 0x979   : > { %6827 = vst.msk [vmem:[#allocation2 + $0x50] sm:$0xff] %vm1063_vm2, %v6811_v43 }
 0x97a   : > { %6828 = vst.msk [vmem:[#allocation2 + $0x58] sm:$0xff] %vm1063_vm2, %v6812_v3  ;;  %6836 = sbr.rel (%p7293_p5) target bundleno = 3043 (0xbe3), region = 92 }
 0x97b   : > { %6829 = vst.msk [vmem:[#allocation2 + $0x60] sm:$0xff] %vm1063_vm2, %v6813_v6 }
 0x97c   : > { %6830 = vst.msk [vmem:[#allocation2 + $0x68] sm:$0xff] %vm1063_vm2, %v13517_v63 }
 0x97d   : > { %6831 = vst.msk [vmem:[#allocation2 + $0x70] sm:$0xff] %vm1063_vm2, %v13520_v9 }
 0x97e   : > { %6832 = vst.msk [vmem:[#allocation2 + $0x78] sm:$0xff] %vm1063_vm2, %v13523_v56 }
 0x97f   : > { %6837 = vxpose.xlu0.b32.start [1/16] (narrow) %v6801_v48, 64  ;;  %v6884_v55 = vld [vmem:[%s13665_s14 + $0x78] sm:$0xff]  ;;  %v6883_v61 = vld [vmem:[%s13665_s14 + $0x70] sm:$0xff]  ;;  %v6882_v26 = vld [vmem:[%s13665_s14 + $0x68] sm:$0xff]  ;;  %vm6930_vm10 = vcmask 64512  }
 0x980   : > { %6889 = vmatpush.msra.mxu0 %v6884_v55  ;;  %7340 = vmatpush.msra.mxu1 %v6884_v55  ;;  %v6881_v28 = vld [vmem:[%s13665_s14 + $0x60] sm:$0xff]  ;;  %v6880_v47 = vld [vmem:[%s13665_s14 + $0x58] sm:$0xff]  ;;  %v6879_v24 = vld [vmem:[%s13665_s14 + $0x50] sm:$0xff] }
 0x981   : > { %7341 = vmatpush.msra.mxu2 %v6884_v55  ;;  %7342 = vmatpush.msra.mxu3 %v6884_v55  ;;  %v6878_v37 = vld [vmem:[%s13665_s14 + $0x48] sm:$0xff]  ;;  %v6877_v57 = vld [vmem:[%s13665_s14 + $0x40] sm:$0xff]  ;;  %v6876_v2 = vld [vmem:[%s13665_s14 + $0x38] sm:$0xff] }
 0x982   : > { %6890 = vmatpush.msra.mxu0 %v6883_v61  ;;  %7343 = vmatpush.msra.mxu1 %v6883_v61  ;;  %v6875_v50 = vld [vmem:[%s13665_s14 + $0x30] sm:$0xff]  ;;  %v6874_v49 = vld [vmem:[%s13665_s14 + $0x28] sm:$0xff]  ;;  %v6873_v44 = vld [vmem:[%s13665_s14 + $0x20] sm:$0xff] }
 0x983   : > { %7344 = vmatpush.msra.mxu2 %v6883_v61  ;;  %7345 = vmatpush.msra.mxu3 %v6883_v61  ;;  %v6872_v20 = vld [vmem:[%s13665_s14 + $0x18] sm:$0xff]  ;;  %v6871_v53 = vld [vmem:[%s13665_s14 + $0x10] sm:$0xff]  ;;  %v6870_v11 = vld [vmem:[%s13665_s14 + $0x8] sm:$0xff] }
 0x984   : > { %6891 = vmatpush.msra.mxu0 %v6882_v26  ;;  %7346 = vmatpush.msra.mxu1 %v6882_v26  ;;  %v6869_v59 = vld [vmem:[%s13665_s14] sm:$0xff] }
 0x985   : > { %7347 = vmatpush.msra.mxu2 %v6882_v26  ;;  %7348 = vmatpush.msra.mxu3 %v6882_v26  ;;  %v7560_v51 = vld [vmem:[%s15080_s17] ss:$0 sm:$0xff] }
 0x986   : > { %6892 = vmatpush.msra.mxu0 %v6881_v28  ;;  %7349 = vmatpush.msra.mxu1 %v6881_v28 }
 0x987   : > { %6838 = vxpose.xlu0.b32.cont [2/16] (narrow) %v6802_v21, 64  ;;  %7350 = vmatpush.msra.mxu2 %v6881_v28 }
 0x988   : > { %6893 = vmatpush.msra.mxu0 %v6880_v47  ;;  %7352 = vmatpush.msra.mxu1 %v6880_v47 }
 0x989   : > { %7353 = vmatpush.msra.mxu2 %v6880_v47  ;;  %7351 = vmatpush.msra.mxu3 %v6881_v28 }
 0x98a   : > { %6894 = vmatpush.msra.mxu0 %v6879_v24  ;;  %7355 = vmatpush.msra.mxu1 %v6879_v24 }
 0x98b   : > { %7356 = vmatpush.msra.mxu2 %v6879_v24  ;;  %7354 = vmatpush.msra.mxu3 %v6880_v47 }
 0x98c   : > { %6895 = vmatpush.msra.mxu0 %v6878_v37  ;;  %7358 = vmatpush.msra.mxu1 %v6878_v37 }
 0x98d   : > { %7359 = vmatpush.msra.mxu2 %v6878_v37  ;;  %7357 = vmatpush.msra.mxu3 %v6879_v24 }
 0x98e   : > { %6896 = vmatpush.msra.mxu0 %v6877_v57  ;;  %7361 = vmatpush.msra.mxu1 %v6877_v57 }
 0x98f   : > { %6839 = vxpose.xlu0.b32.cont [3/16] (narrow) %v6803_v52, 64  ;;  %7362 = vmatpush.msra.mxu2 %v6877_v57 }
 0x990   : > { %6897 = vmatpush.msra.mxu0 %v6876_v2  ;;  %7364 = vmatpush.msra.mxu1 %v6876_v2 }
 0x991   : > { %7365 = vmatpush.msra.mxu2 %v6876_v2  ;;  %7360 = vmatpush.msra.mxu3 %v6878_v37 }
 0x992   : > { %6898 = vmatpush.msra.mxu0 %v6875_v50  ;;  %7367 = vmatpush.msra.mxu1 %v6875_v50 }
 0x993   : > { %7368 = vmatpush.msra.mxu2 %v6875_v50  ;;  %7363 = vmatpush.msra.mxu3 %v6877_v57 }
 0x994   : > { %6899 = vmatpush.msra.mxu0 %v6874_v49  ;;  %7370 = vmatpush.msra.mxu1 %v6874_v49 }
 0x995   : > { %7371 = vmatpush.msra.mxu2 %v6874_v49  ;;  %7366 = vmatpush.msra.mxu3 %v6876_v2 }
 0x996   : > { %6900 = vmatpush.msra.mxu0 %v6873_v44  ;;  %7373 = vmatpush.msra.mxu1 %v6873_v44 }
 0x997   : > { %6840 = vxpose.xlu0.b32.cont [4/16] (narrow) %v6804_v46, 64  ;;  %7374 = vmatpush.msra.mxu2 %v6873_v44 }
 0x998   : > { %6901 = vmatpush.msra.mxu0 %v6872_v20  ;;  %7376 = vmatpush.msra.mxu1 %v6872_v20 }
 0x999   : > { %7377 = vmatpush.msra.mxu2 %v6872_v20  ;;  %7369 = vmatpush.msra.mxu3 %v6875_v50 }
 0x99a   : > { %6902 = vmatpush.msra.mxu0 %v6871_v53  ;;  %7379 = vmatpush.msra.mxu1 %v6871_v53 }
 0x99b   : > { %7380 = vmatpush.msra.mxu2 %v6871_v53  ;;  %7372 = vmatpush.msra.mxu3 %v6874_v49 }
 0x99c   : > { %6903 = vmatpush.msra.mxu0 %v6870_v11  ;;  %7382 = vmatpush.msra.mxu1 %v6870_v11 }
 0x99d   : > { %7383 = vmatpush.msra.mxu2 %v6870_v11  ;;  %7375 = vmatpush.msra.mxu3 %v6873_v44 }
 0x99e   : > { %6904 = vmatpush.msra.mxu0 %v6869_v59  ;;  %7385 = vmatpush.msra.mxu1 %v6869_v59 }
 0x99f   : > { %6841 = vxpose.xlu0.b32.cont [5/16] (narrow) %v6805_v39, 64  ;;  %7378 = vmatpush.msra.mxu3 %v6872_v20 }
 0x9a0   : > { %7386 = vmatpush.msra.mxu2 %v6869_v59 }
 0x9a1   : > { %7381 = vmatpush.msra.mxu3 %v6871_v53 }
 0x9a3   : > { %7384 = vmatpush.msra.mxu3 %v6870_v11 }
 0x9a5   : > { %7387 = vmatpush.msra.mxu3 %v6869_v59 }
 0x9a7   : > { %6842 = vxpose.xlu0.b32.cont [6/16] (narrow) %v6806_v17, 64 }
 0x9af   : > { %6843 = vxpose.xlu0.b32.cont [7/16] (narrow) %v6807_v42, 64 }
 0x9b7   : > { %6844 = vxpose.xlu0.b32.cont [8/16] (narrow) %v6808_v31, 64 }
 0x9bf   : > { %6845 = vxpose.xlu0.b32.cont [9/16] (narrow) %v6809_v4, 64 }
 0x9c7   : > { %6846 = vxpose.xlu0.b32.cont [10/16] (narrow) %v6810_v38, 64 }
 0x9cf   : > { %6847 = vxpose.xlu0.b32.cont [11/16] (narrow) %v6811_v43, 64 }
 0x9d7   : > { %6848 = vxpose.xlu0.b32.cont [12/16] (narrow) %v6812_v3, 64 }
 0x9df   : > { %6849 = vxpose.xlu0.b32.cont [13/16] (narrow) %v6813_v6, 64 }
 0x9e7   : > { %6850 = vxpose.xlu0.b32.cont [14/16] (narrow) %v13517_v63, 64 }
 0x9ef   : > { %6851 = vxpose.xlu0.b32.cont [15/16] (narrow) %v13520_v9, 64 }
 0x9f7   : > { %6852 = vxpose.xlu0.b32.end [16/16] (narrow) %v13523_v56, 64 }
 0xa23   : > { %v6853_v7 = vpop.trf.xlu0 }
 0xa24   : > { %6905 = vmatmul.f32.vlgmr.msra.gmra.mxu0 %v6853_v7 }
 0xa2b   : > { %v6854_v0 = vpop.trf.xlu0 }
 0xa2c   : > { %6908 = vmatmul.f32.gmra.mxu0 %v6854_v0 }
 0xa33   : > { %v6855_v29 = vpop.trf.xlu0 }
 0xa34   : > { %6911 = vmatmul.f32.vlgmr.msra.gmra.mxu1 %v6855_v29 }
 0xa3b   : > { %v6856_v35 = vpop.trf.xlu0 }
 0xa3c   : > { %6914 = vmatmul.f32.gmra.mxu1 %v6856_v35 }
 0xa43   : > { %v6857_v12 = vpop.trf.xlu0 }
 0xa44   : > { %6917 = vmatmul.f32.vlgmr.msra.gmra.mxu2 %v6857_v12 }
 0xa4b   : > { %v6858_v1 = vpop.trf.xlu0 }
 0xa4c   : > { %6920 = vmatmul.f32.gmra.mxu2 %v6858_v1 }
 0xa53   : > { %v6859_v36 = vpop.trf.xlu0 }
 0xa54   : > { %6923 = vmatmul.f32.vlgmr.msra.gmra.mxu3 %v6859_v36 }
 0xa5b   : > { %v6860_v16 = vpop.trf.xlu0 }
 0xa5c   : > { %6926 = vmatmul.f32.gmra.mxu3 %v6860_v16 }
 0xaa1   : > { %v6906_v40 = vpop.f32.mrf.mxu0 }
 0xaa2   : > { %v6907_v19 = vadd.f32 %v7560_v51, %v6906_v40 }
 0xaa4   : > { %v6931_v60 = vsel %vm6930_vm10, %v6907_v19, -inf }
 0xaa5   : > { %6932 = vmax.xlane.f32.xlu1 %v6931_v60 }
 0xaa9   : > { %v6909_v62 = vpop.f32.mrf.mxu0 }
 0xaaa   : > { %v6910_v48 = vadd.f32 %v7560_v51, %v6909_v62 }
 0xaac   : > { %v6934_v21 = vsel %vm6930_vm10, %v6910_v48, -inf }
 0xaad   : > { %6935 = vmax.xlane.f32.xlu1 %v6934_v21 }
 0xab1   : > { %v6912_v52 = vpop.f32.mrf.mxu1 }
 0xab2   : > { %v6913_v25 = vadd.f32 %v7560_v51, %v6912_v52 }
 0xab4   : > { %v6937_v45 = vsel %vm6930_vm10, %v6913_v25, -inf }
 0xab5   : > { %6938 = vmax.xlane.f32.xlu2 %v6937_v45 }
 0xab9   : > { %v6915_v22 = vpop.f32.mrf.mxu1 }
 0xaba   : > { %v6916_v46 = vadd.f32 %v7560_v51, %v6915_v22 }
 0xabc   : > { %v6940_v18 = vsel %vm6930_vm10, %v6916_v46, -inf }
 0xabd   : > { %6941 = vmax.xlane.f32.xlu2 %v6940_v18 }
 0xac7   : > { %v6918_v27 = vpop.f32.mrf.mxu2 }
 0xac8   : > { %v6919_v14 = vadd.f32 %v7560_v51, %v6918_v27 }
 0xaca   : > { %v6943_v39 = vsel %vm6930_vm10, %v6919_v14, -inf }
 0xacb   : > { %6944 = vmax.xlane.f32.xlu1 %v6943_v39 }
 0xacf   : > { %v6921_v10 = vpop.f32.mrf.mxu2 }
 0xad0   : > { %v6922_v8 = vadd.f32 %v7560_v51, %v6921_v10 }
 0xad2   : > { %v6946_v17 = vsel %vm6930_vm10, %v6922_v8, -inf }
 0xad3   : > { %6947 = vmax.xlane.f32.xlu2 %v6946_v17 }
 0xad7   : > { %v6924_v32 = vpop.f32.mrf.mxu3 }
 0xad8   : > { %v6925_v5 = vadd.f32 %v7560_v51, %v6924_v32 }
 0xada   : > { %v6949_v42 = vsel %vm6930_vm10, %v6925_v5, -inf }
 0xadb   : > { %6950 = vmax.xlane.f32.xlu1 %v6949_v42 }
 0xadf   : > { %v6927_v15 = vpop.f32.mrf.mxu3 }
 0xae0   : > { %v6928_v34 = vadd.f32 %v7560_v51, %v6927_v15 }
 0xae2   : > { %v6952_v31 = vsel %vm6930_vm10, %v6928_v34, -inf }
 0xae3   : > { %6953 = vmax.xlane.f32.xlu2 %v6952_v31 }
 0xb18   : > { %v6933_v23 = vpop.xlane.xlu1 %6932 }
 0xb19   : > { %v13596_v4 = vsub.f32 %v6907_v19, %v6933_v23 }
 0xb1b   : > { %v6963_v41 = vmul.f32 1.442695, %v13596_v4 }
 0xb1d   : > { %7561 = vpow2.f32 %v6963_v41 }
 0xb20   : > { %v6936_v38 = vpop.xlane.xlu1 %6935 }
 0xb21   : > { %v13599_v54 = vsub.f32 %v6910_v48, %v6936_v38 }
 0xb23   : > { %v7562_v43 = vpop.eup %7561  ;;  %v6965_v30 = vmul.f32 1.442695, %v13599_v54 }
 0xb24   : > { %v6979_v3 = vsel %vm6930_vm10, %v7562_v43, 0.0 }
 0xb25   : > { %7563 = vpow2.f32 %v6965_v30  ;;  %6980 = vadd.xlane.f32.xlu1 %v6979_v3 }
 0xb28   : > { %v6939_v58 = vpop.xlane.xlu2 %6938 }
 0xb29   : > { %v13603_v6 = vsub.f32 %v6913_v25, %v6939_v58 }
 0xb2b   : > { %v7564_v13 = vpop.eup %7563  ;;  %v6967_v63 = vmul.f32 1.442695, %v13603_v6 }
 0xb2c   : > { %v6982_v33 = vsel %vm6930_vm10, %v7564_v13, 0.0 }
 0xb2d   : > { %7565 = vpow2.f32 %v6967_v63  ;;  %6983 = vadd.xlane.f32.xlu2 %v6982_v33 }
 0xb30   : > { %v6942_v9 = vpop.xlane.xlu2 %6941 }
 0xb31   : > { %v6958_v56 = vsub.f32 %v6916_v46, %v6942_v9 }
 0xb33   : > { %v7566_v55 = vpop.eup %7565  ;;  %v6969_v61 = vmul.f32 1.442695, %v6958_v56 }
 0xb34   : > { %v6985_v26 = vsel %vm6930_vm10, %v7566_v55, 0.0 }
 0xb35   : > { %7567 = vpow2.f32 %v6969_v61  ;;  %6986 = vadd.xlane.f32.xlu1 %v6985_v26 }
 0xb3b   : > { %v7568_v28 = vpop.eup %7567 }
 0xb3c   : > { %v6988_v47 = vsel %vm6930_vm10, %v7568_v28, 0.0 }
 0xb3d   : > { %6989 = vadd.xlane.f32.xlu2 %v6988_v47 }
 0xb3e   : > { %v6945_v24 = vpop.xlane.xlu1 %6944 }
 0xb3f   : > { %v6959_v37 = vsub.f32 %v6919_v14, %v6945_v24 }
 0xb41   : > { %v6971_v57 = vmul.f32 1.442695, %v6959_v37 }
 0xb43   : > { %7569 = vpow2.f32 %v6971_v57 }
 0xb46   : > { %v6948_v2 = vpop.xlane.xlu2 %6947 }
 0xb47   : > { %v6960_v50 = vsub.f32 %v6922_v8, %v6948_v2 }
 0xb49   : > { %v7570_v49 = vpop.eup %7569  ;;  %v6973_v44 = vmul.f32 1.442695, %v6960_v50 }
 0xb4a   : > { %v6991_v20 = vsel %vm6930_vm10, %v7570_v49, 0.0 }
 0xb4b   : > { %7571 = vpow2.f32 %v6973_v44  ;;  %6992 = vadd.xlane.f32.xlu1 %v6991_v20 }
 0xb4e   : > { %v6951_v53 = vpop.xlane.xlu1 %6950 }
 0xb4f   : > { %v6961_v11 = vsub.f32 %v6925_v5, %v6951_v53 }
 0xb51   : > { %v7572_v59 = vpop.eup %7571  ;;  %v6975_v7 = vmul.f32 1.442695, %v6961_v11 }
 0xb52   : > { %v6994_v0 = vsel %vm6930_vm10, %v7572_v59, 0.0 }
 0xb53   : > { %7573 = vpow2.f32 %v6975_v7  ;;  %6995 = vadd.xlane.f32.xlu2 %v6994_v0 }
 0xb56   : > { %v6954_v29 = vpop.xlane.xlu2 %6953 }
 0xb57   : > { %v6962_v35 = vsub.f32 %v6928_v34, %v6954_v29 }
 0xb59   : > { %v7574_v12 = vpop.eup %7573  ;;  %v6977_v1 = vmul.f32 1.442695, %v6962_v35 }
 0xb5a   : > { %v6997_v36 = vsel %vm6930_vm10, %v7574_v12, 0.0 }
 0xb5b   : > { %7575 = vpow2.f32 %v6977_v1  ;;  %6998 = vadd.xlane.f32.xlu1 %v6997_v36 }
 0xb61   : > { %v7576_v16 = vpop.eup %7575 }
 0xb62   : > { %v7000_v51 = vsel %vm6930_vm10, %v7576_v16, 0.0 }
 0xb63   : > { %7001 = vadd.xlane.f32.xlu2 %v7000_v51 }
 0xb98   : > { %v6981_v40 = vpop.xlane.xlu1 %6980 }
 0xb99   : > { %7577 = vlog2.f32 %v6981_v40 }
 0xb9f   : > { %v7578_v19 = vpop.eup %7577 }
 0xba0   : > { %v7004_v60 = vmul.f32 0.6931472, %v7578_v19  ;;  %v6984_v62 = vpop.xlane.xlu2 %6983 }
 0xba1   : > { %7579 = vlog2.f32 %v6984_v62 }
 0xba2   : > { %v7019_v48 = vsub.f32 %v13596_v4, %v7004_v60 }
 0xba4   : > { %7027 = vst.msk [vmem:[%s15081_s5] sm:$0xff] %vm6930_vm10, %v7019_v48 }
 0xba7   : > { %v7580_v21 = vpop.eup %7579 }
 0xba8   : > { %v7006_v52 = vmul.f32 0.6931472, %v7580_v21  ;;  %v6987_v25 = vpop.xlane.xlu1 %6986 }
 0xba9   : > { %7581 = vlog2.f32 %v6987_v25 }
 0xbaa   : > { %v7020_v45 = vsub.f32 %v13599_v54, %v7006_v52 }
 0xbac   : > { %7028 = vst.msk [vmem:[%s15081_s5 + $0x8] sm:$0xff] %vm6930_vm10, %v7020_v45 }
 0xbaf   : > { %v7582_v22 = vpop.eup %7581 }
 0xbb0   : > { %v7008_v46 = vmul.f32 0.6931472, %v7582_v22  ;;  %v6990_v18 = vpop.xlane.xlu2 %6989 }
 0xbb1   : > { %7583 = vlog2.f32 %v6990_v18 }
 0xbb2   : > { %v7021_v27 = vsub.f32 %v13603_v6, %v7008_v46 }
 0xbb4   : > { %7029 = vst.msk [vmem:[%s15081_s5 + $0x10] sm:$0xff] %vm6930_vm10, %v7021_v27 }
 0xbb7   : > { %v7584_v14 = vpop.eup %7583 }
 0xbb8   : > { %v7010_v39 = vmul.f32 0.6931472, %v7584_v14 }
 0xbba   : > { %v7022_v10 = vsub.f32 %v6958_v56, %v7010_v39 }
 0xbbc   : > { %7030 = vst.msk [vmem:[%s15081_s5 + $0x18] sm:$0xff] %vm6930_vm10, %v7022_v10 }
 0xbbe   : > { %v6993_v8 = vpop.xlane.xlu1 %6992 }
 0xbbf   : > { %7585 = vlog2.f32 %v6993_v8 }
 0xbc5   : > { %v7586_v17 = vpop.eup %7585 }
 0xbc6   : > { %v7012_v32 = vmul.f32 0.6931472, %v7586_v17  ;;  %v6996_v5 = vpop.xlane.xlu2 %6995 }
 0xbc7   : > { %7587 = vlog2.f32 %v6996_v5 }
 0xbc8   : > { %v7023_v42 = vsub.f32 %v6959_v37, %v7012_v32 }
 0xbca   : > { %7031 = vst.msk [vmem:[%s15081_s5 + $0x20] sm:$0xff] %vm6930_vm10, %v7023_v42 }
 0xbcd   : > { %v7588_v15 = vpop.eup %7587 }
 0xbce   : > { %v7014_v34 = vmul.f32 0.6931472, %v7588_v15  ;;  %v6999_v31 = vpop.xlane.xlu1 %6998 }
 0xbcf   : > { %7589 = vlog2.f32 %v6999_v31 }
 0xbd0   : > { %v7024_v23 = vsub.f32 %v6960_v50, %v7014_v34 }
 0xbd2   : > { %7032 = vst.msk [vmem:[%s15081_s5 + $0x28] sm:$0xff] %vm6930_vm10, %v7024_v23 }
 0xbd5   : > { %v7590_v4 = vpop.eup %7589 }
 0xbd6   : > { %v7016_v41 = vmul.f32 0.6931472, %v7590_v4  ;;  %v7002_v38 = vpop.xlane.xlu2 %7001 }
 0xbd7   : > { %7591 = vlog2.f32 %v7002_v38 }
 0xbd8   : > { %v7025_v54 = vsub.f32 %v6961_v11, %v7016_v41 }
 0xbda   : > { %7033 = vst.msk [vmem:[%s15081_s5 + $0x30] sm:$0xff] %vm6930_vm10, %v7025_v54 }
 0xbdd   : > { %v7592_v43 = vpop.eup %7591 }
 0xbde   : > { %v7018_v30 = vmul.f32 0.6931472, %v7592_v43 }
 0xbe0   : > { %v7026_v3 = vsub.f32 %v6962_v35, %v7018_v30 }
 0xbe2   : > { %7034 = vst.msk [vmem:[%s15081_s5 + $0x38] sm:$0xff] %vm6930_vm10, %v7026_v3 }
 0xbe3 PF: > { %s15082_s7 = sld [smem:[#allocation4_spill]] }
 0xbe9   : > { %s26_s21 = sadd.s32 1, %s15082_s7  }
 0xbea   : > { %p23_p6 = scmp.ge.s32.totalorder %s26_s21, 9  }
 0xbec   :  { %25 = sbr.rel (!%p23_p6) target bundleno = 8 (0x8), region = 142 }

</bundles_post_ra>
